<compile_context>
chip_gen: v7x
topology: tpu7x:2x2x1
jax: 0.10.0
libtpu: 0.0.40
codegen_flags: <defaults>
</compile_context>

<pallas_src>
import functools

import jax
import jax.numpy as jnp
from jax.experimental import pallas as pl
from jax.experimental.pallas import tpu as pltpu

_VMEM_LIMIT = 64 * 1024 * 1024
_NEG = -1e30


# ---------------------------------------------------------------------------
# small helpers
# ---------------------------------------------------------------------------
def _softmax_lane(g):
    """Numerically-safe softmax over the last (lane) axis; EUP reciprocal."""
    g = g - jnp.max(g, axis=-1, keepdims=True)
    p = jnp.exp(g)
    return p * pl.reciprocal(jnp.sum(p, axis=-1, keepdims=True), approx=True)


def _largest_divisor(n, cap):
    best = 1
    for d_ in range(1, n + 1):
        if n % d_ == 0 and d_ <= cap:
            best = d_
    return best


def _pick_b_blk(batch, n_nodes):
    # dominant per-row VMEM term: ~3 live (b_blk, N, N) f32 softmax temporaries
    cap = max(1, (6 << 20) // max(3 * n_nodes * n_nodes * 4, 1))
    return _largest_divisor(batch, cap)


def _pick_n_blk(n_nodes, t_len):
    # n_blk is the second-minor dim of the s4/out blocks: multiple of 8 or == N
    cap = max(1, (6 << 20) // max(5 * t_len * t_len * 4, 1))
    if n_nodes <= cap:
        return n_nodes
    cands = [d_ for d_ in range(8, n_nodes, 8)
             if n_nodes % d_ == 0 and d_ <= cap]
    return max(cands) if cands else n_nodes


# ---------------------------------------------------------------------------
# Kernel 1: covariate attentions (spatial dim=2 softmax, temporal dim=1)
# ---------------------------------------------------------------------------
def _cov_kernel(cov_s_ref, cov_t_ref, attn_s_ref, attn_t_ref):
    cs = cov_s_ref[0]                                              # (N, F)
    gs = jnp.dot(cs, cs.T, preferred_element_type=jnp.float32)     # (N, N)
    attn_s_ref[0] = _softmax_lane(gs)                              # torch dim=2

    ct = cov_t_ref[0]                                              # (T, F)
    gt = jnp.dot(ct, ct.T, preferred_element_type=jnp.float32)     # (T, T)
    # torch softmax(dim=1) == axis 0 of each (T,T) slice.  gt is symmetric so a
    # lane softmax + transposed use would also work; kept on the sublane path
    # (proven lowering, T is tiny).
    gt = gt - jnp.max(gt, axis=0, keepdims=True)
    pt = jnp.exp(gt)
    attn_t_ref[0] = pt * pl.reciprocal(jnp.sum(pt, axis=0, keepdims=True),
                                       approx=True)


# ---------------------------------------------------------------------------
# Kernel 2: three spatial GATs, tiled over (time-step, batch-block)
# ---------------------------------------------------------------------------
def _spatial_kernel(x_ref, cov_ref, adj_ref, ws_ref, out_ref, *,
                    n_graphs, heads, d):
    # rows = b_blk batch elements of one time step t.  The BlockSpec grid
    # supplies the (batch,T,N,F) -> (t,b,N,F) relayout; the "+ covariate" add
    # happens here (no XLA transpose / add pass over x).
    xs = x_ref[:, 0] + cov_ref[:, 0]                               # (b_blk,N,F)
    xs16 = xs.astype(jnp.bfloat16)
    # wide projection: per graph/head columns are [z (d) ... | el (H) | er (H)]
    ps = jnp.einsum("bnf,fe->bne", xs16, ws_ref[...],
                    preferred_element_type=jnp.float32)
    ew = heads * d + 2 * heads
    inv_h = 1.0 / heads
    for g in range(n_graphs):                                      # static
        pg = ps[:, :, g * ew:(g + 1) * ew]
        z_all = pg[:, :, :heads * d]
        el_all = pg[:, :, heads * d:heads * d + heads]
        er_all = pg[:, :, heads * d + heads:]
        adj_g = adj_ref[g]                                         # (N, N)
        acc = None
        # TODO(synk): batch the H aggregation matmuls into one MXU pass
        #             (K-concat of alpha / row-stack of z) at production sizes.
        for h in range(heads):                                     # static
            el = jnp.sum(el_all[:, :, h:h + 1], axis=-1)           # (b_blk, N)
            er = jnp.sum(er_all[:, :, h:h + 1], axis=-1)           # (b_blk, N)
            e = el[:, :, None] + er[:, None, :]                    # (b_blk,N,N)
            e = jnp.maximum(e, 0.2 * e)                            # LeakyReLU
            e = jnp.where(adj_g[None, :, :] > 0, e, _NEG)          # mask 1st!
            e = e - jnp.max(e, axis=-1, keepdims=True)
            p = jnp.exp(e)                                         # 0 if masked
            alpha = p * pl.reciprocal(jnp.sum(p, axis=-1, keepdims=True),
                                      approx=True)
            z_h = z_all[:, :, h * d:(h + 1) * d]
            o_h = jnp.einsum("bij,bjd->bid", alpha.astype(jnp.bfloat16),
                             z_h.astype(jnp.bfloat16),
                             preferred_element_type=jnp.float32)
            acc = o_h if acc is None else acc + o_h
        # direct lane-slice store: no full-width concat temporary
        out_ref[0, :, :, g * d:(g + 1) * d] = acc * inv_h


# ---------------------------------------------------------------------------
# Kernel 3: temporal GAT + sigmoid gate + EncoderLayer gated fusion,
#           tiled over (batch, node-block)
# ---------------------------------------------------------------------------
def _temporal_fuse_kernel(xt_ref, s4_ref, attn_ref, wt_ref, wm_ref, bias_ref,
                          out_ref, g_scr, *, heads, d, n_nodes, batch):
    n_blk = xt_ref.shape[1]
    t_len = xt_ref.shape[2]
    xt = xt_ref[0]                                                 # (n_blk,T,F)
    xt16 = xt.astype(jnp.bfloat16)

    # ---- temporal GAT (synthetic dense, fully connected over T) ----
    pt = jnp.einsum("ntf,fe->nte", xt16, wt_ref[...],
                    preferred_element_type=jnp.float32)
    z_all = pt[:, :, :heads * d]
    el_all = pt[:, :, heads * d:heads * d + heads]
    er_all = pt[:, :, heads * d + heads:]
    acc = None
    for h in range(heads):                                         # static
        el = jnp.sum(el_all[:, :, h:h + 1], axis=-1)               # (n_blk, T)
        er = jnp.sum(er_all[:, :, h:h + 1], axis=-1)
        e = el[:, :, None] + er[:, None, :]                        # (n_blk,T,T)
        e = jnp.maximum(e, 0.2 * e)
        e = e - jnp.max(e, axis=-1, keepdims=True)
        p = jnp.exp(e)
        alpha = p * pl.reciprocal(jnp.sum(p, axis=-1, keepdims=True),
                                  approx=True)
        z_h = z_all[:, :, h * d:(h + 1) * d]
        o_h = jnp.einsum("nij,njd->nid", alpha.astype(jnp.bfloat16),
                         z_h.astype(jnp.bfloat16),
                         preferred_element_type=jnp.float32)
        acc = o_h if acc is None else acc + o_h
    gat = acc * (1.0 / heads)                                      # (n_blk,T,d)

    # ---- temporal covariate gate (torch quirk kept: row k uses attn[k%batch])
    bi = pl.program_id(0)
    nb = pl.program_id(1)
    row0 = bi * n_nodes + nb * n_blk
    res = (row0 + jax.lax.broadcasted_iota(jnp.int32, (n_blk, 1, 1), 0)) % batch
    attn_sel = jnp.zeros((n_blk, t_len, t_len), jnp.float32)
    # TODO(synk): static unroll over batch residues; fine for small batch.
    for c in range(batch):
        attn_sel = jnp.where(res == c, attn_ref[c][None, :, :], attn_sel)
    emb = jnp.einsum("nij,njf->nif", attn_sel.astype(jnp.bfloat16), xt16,
                     preferred_element_type=jnp.float32)           # (n_blk,T,F)
    g_scr[...] = gat * jax.nn.sigmoid(emb)                         # gated attn

    # ---- EncoderLayer fusion: z = sigmoid([s|t] @ Wm + b); z*s+(1-z)*t+x ----
    wm = wm_ref[...]                                               # (2D, D)
    bias = bias_ref[...]                                           # (1, D)
    for t in range(t_len):                                         # static
        x_t = xt_ref[0, :, t, :]                                   # residual
        s_t = x_t + s4_ref[0, t]                                   # spatial
        t_t = x_t + g_scr[:, t, :]                                 # temporal
        z = jax.nn.sigmoid(
            jnp.dot(jnp.concatenate([s_t, t_t], axis=-1), wm,
                    preferred_element_type=jnp.float32) + bias)
        out_ref[0, t] = z * s_t + (1.0 - z) * t_t + x_t


# ---------------------------------------------------------------------------
# Forward pass (wrapper: weight folding + minimal layout plumbing)
# ---------------------------------------------------------------------------
def _branch_weights(p):
    """Fold a_l/a_r into the projection; columns = [z_0..z_{H-1} | el_* | er_*]."""
    w, al, ar = p["w"], p["al"], p["ar"]                   # (H,F,d),(H,d),(H,d)
    heads, feat, d = w.shape
    z_cols = jnp.transpose(w, (1, 0, 2)).reshape(feat, heads * d)
    el_cols = jnp.einsum("hfd,hd->fh", w, al)              # (F, H)
    er_cols = jnp.einsum("hfd,hd->fh", w, ar)              # (F, H)
    return jnp.concatenate([z_cols, el_cols, er_cols], axis=1)


def encoder_layer_forward(params, x, spatial_emb, temporal_emb, graphs):
    batch, T, N, F = x.shape
    sp = params["spatial"]
    heads_s, _, d_s = sp["distance"]["w"].shape
    heads_t, _, d_t = params["temporal"]["w"].shape
    n_graphs = 3
    D = n_graphs * d_s                                     # output_dim
    assert d_t == D == F, "this instantiation needs input_dim == output_dim"

    ws_wide = jnp.concatenate(
        [_branch_weights(sp[g]) for g in ("distance", "mobility", "similarity")],
        axis=1).astype(jnp.bfloat16)                       # (F, G*(H*d+2H))
    wt_wide = _branch_weights(params["temporal"]).astype(jnp.bfloat16)
    adj = jnp.stack([graphs["distance"], graphs["mobility"], graphs["similarity"]])

    cov_s = spatial_emb[:, 0]                              # (batch, N, F)
    cov_t = temporal_emb[:, :, 0]                          # (batch, T, F)

    def cparams(sem):
        return pltpu.CompilerParams(dimension_semantics=sem,
                                    vmem_limit_bytes=_VMEM_LIMIT)

    # ---- K1: covariate attentions --------------------------------------
    attn_s, attn_t = pl.pallas_call(
        _cov_kernel,
        grid=(batch,),
        in_specs=[pl.BlockSpec((1, N, F), lambda b: (b, 0, 0)),
                  pl.BlockSpec((1, T, F), lambda b: (b, 0, 0))],
        out_specs=(pl.BlockSpec((1, N, N), lambda b: (b, 0, 0)),
                   pl.BlockSpec((1, T, T), lambda b: (b, 0, 0))),
        out_shape=(jax.ShapeDtypeStruct((batch, N, N), jnp.float32),
                   jax.ShapeDtypeStruct((batch, T, T), jnp.float32)),
        compiler_params=cparams(("parallel",)),
    )(cov_s, cov_t)

    # ---- K2: spatial GATs, tiled over (t, batch-block) ------------------
    b_blk = _pick_b_blk(batch, N)
    ew_s = heads_s * d_s + 2 * heads_s
    spatial = functools.partial(_spatial_kernel, n_graphs=n_graphs,
                                heads=heads_s, d=d_s)
    xattn_s = pl.pallas_call(
        spatial,
        grid=(T, batch // b_blk),
        in_specs=[pl.BlockSpec((b_blk, 1, N, F), lambda t, bb: (bb, t, 0, 0)),
                  pl.BlockSpec((b_blk, 1, N, F), lambda t, bb: (bb, t, 0, 0)),
                  pl.BlockSpec((n_graphs, N, N), lambda t, bb: (0, 0, 0)),
                  pl.BlockSpec((F, n_graphs * ew_s), lambda t, bb: (0, 0))],
        out_specs=pl.BlockSpec((1, b_blk, N, D), lambda t, bb: (t, bb, 0, 0)),
        out_shape=jax.ShapeDtypeStruct((T, batch, N, D), jnp.float32),
        compiler_params=cparams(("parallel", "parallel")),
    )(x, spatial_emb, adj, ws_wide)

    # torch quirk: the t-major (T*batch, N, D) GAT output is reinterpreted as
    # (batch, T, N, D) with a plain reshape (no data movement).
    s4 = xattn_s.reshape(batch, T, N, D)

    # ---- K3: temporal GAT + gate + gated fusion, tiled over (b, node-block)
    # TODO(synk): this (batch,T,N,F)->(batch,N,T,F) relayout of x is one XLA
    #             transpose pass; fold it in-kernel at production sizes.
    xt4 = jnp.transpose(x, (0, 2, 1, 3))                   # (batch, N, T, F)
    n_blk = _pick_n_blk(N, T)
    ew_t = heads_t * d_t + 2 * heads_t
    wm, bvec = params["W"]["w"], params["W"]["b"]          # (2D, D), (1, D)
    tfuse = functools.partial(_temporal_fuse_kernel, heads=heads_t, d=d_t,
                              n_nodes=N, batch=batch)
    out = pl.pallas_call(
        tfuse,
        grid=(batch, N // n_blk),
        in_specs=[pl.BlockSpec((1, n_blk, T, F), lambda b, nb: (b, nb, 0, 0)),
                  pl.BlockSpec((1, T, n_blk, D), lambda b, nb: (b, 0, nb, 0)),
                  pl.BlockSpec((batch, T, T), lambda b, nb: (0, 0, 0)),
                  pl.BlockSpec((F, ew_t), lambda b, nb: (0, 0)),
                  pl.BlockSpec((2 * D, D), lambda b, nb: (0, 0)),
                  pl.BlockSpec((1, D), lambda b, nb: (0, 0))],
        out_specs=pl.BlockSpec((1, T, n_blk, D), lambda b, nb: (b, 0, nb, 0)),
        out_shape=jax.ShapeDtypeStruct((batch, T, N, D), jnp.float32),
        scratch_shapes=[pltpu.VMEM((n_blk, T, d_t), jnp.float32)],
        compiler_params=cparams(("parallel", "parallel")),
    )(xt4, s4, attn_t, wt_wide, wm, bvec)

    # faithful to torch: SpatialBlock returns softmax(...).repeat(T, 1, 1).
    # TODO(synk): pure duplication; consumers needing only the per-batch
    #             attention can use attn_s directly (saves T*batch*N^2 writes).
    attn_S = jnp.tile(attn_s, (T, 1, 1))
    return out, attn_S


# ---------------------------------------------------------------------------
# Deterministic synthetic parameters / graphs
# ---------------------------------------------------------------------------
def init_params(key, input_dim, hidden, output_dim,
                spatial_heads=3, temporal_heads=4):
    assert 3 * hidden == output_dim, "head-mean GAT: need 3*hidden == output_dim"

    def gat_params(k, feat, d_head, heads, scale=0.3):
        k1, k2, k3 = jax.random.split(k, 3)
        return {"w": scale * jax.random.normal(k1, (heads, feat, d_head), jnp.float32),
                "al": scale * jax.random.normal(k2, (heads, d_head), jnp.float32),
                "ar": scale * jax.random.normal(k3, (heads, d_head), jnp.float32)}

    keys = jax.random.split(key, 6)
    return {
        "spatial": {
            "distance":   gat_params(keys[0], input_dim, hidden, spatial_heads),
            "mobility":   gat_params(keys[1], input_dim, hidden, spatial_heads),
            "similarity": gat_params(keys[2], input_dim, hidden, spatial_heads),
        },
        "temporal": gat_params(keys[3], input_dim, output_dim, temporal_heads),
        "W": {"w": 0.3 * jax.random.normal(keys[4], (2 * output_dim, output_dim),
                                           jnp.float32),
              "b": jnp.zeros((1, output_dim), jnp.float32)},
    }


def make_graphs(key, n_nodes):
    keys = jax.random.split(key, 3)
    graphs = {}
    for name, k in zip(("distance", "mobility", "similarity"), keys):
        a = (jax.random.uniform(k, (n_nodes, n_nodes)) > 0.5).astype(jnp.float32)
        a = jnp.maximum(a, jnp.eye(n_nodes, dtype=jnp.float32))   # self loops
        graphs[name] = a
    return graphs


# ---------------------------------------------------------------------------
if __name__ == "__main__":
    batch, T, N = 2, 4, 8
    input_dim = output_dim = 6
    hidden = 2          # 3 * hidden == output_dim

    key = jax.random.PRNGKey(0)
    k_in, k_se, k_te, k_p, k_g = jax.random.split(key, 5)
    x = jax.random.normal(k_in, (batch, T, N, input_dim), jnp.float32)
    s_emb = 0.5 * jax.random.normal(k_se, (batch, T, N, input_dim), jnp.float32)
    t_emb = 0.5 * jax.random.normal(k_te, (batch, T, N, input_dim), jnp.float32)

    params = init_params(k_p, input_dim, hidden, output_dim)
    graphs = make_graphs(k_g, N)

    fwd = jax.jit(encoder_layer_forward)
    out, attn_S = fwd(params, x, s_emb, t_emb, graphs)
    out = jax.block_until_ready(out)
    attn_S = jax.block_until_ready(attn_S)

    assert out.shape == (batch, T, N, output_dim), out.shape
    assert attn_S.shape == (batch * T, N, N), attn_S.shape
    assert bool(jnp.all(jnp.isfinite(out)))
    assert bool(jnp.all(jnp.isfinite(attn_S)))
    print("KERNEL_OK")
</pallas_src>

<mosaic_0001>
module attributes {stable_mosaic.version = 11 : i64} {
  func.func @_spatial_kernel(%arg0: i32, %arg1: i32, %arg2: memref<2x1x8x6xf32, #tpu.memory_space<vmem>>, %arg3: memref<2x1x8x6xf32, #tpu.memory_space<vmem>>, %arg4: memref<3x8x8xf32, #tpu.memory_space<vmem>>, %arg5: memref<6x36xbf16, #tpu.memory_space<vmem>>, %arg6: memref<1x2x8x6xf32, #tpu.memory_space<vmem>>) attributes {dimension_semantics = [#tpu.dimension_semantics<parallel>, #tpu.dimension_semantics<parallel>], iteration_bounds = array<i64: 4, 1>, scalar_prefetch = 0 : i64, scratch_operands = 0 : i64, tpu.core_type = #tpu.core_type<tc>, window_params = [{transform_indices = @transform_0, window_bounds = array<i64: 2, 1, 8, 6>}, {transform_indices = @transform_1, window_bounds = array<i64: 2, 1, 8, 6>}, {pipeline_mode = #tpu.pipeline_mode<synchronous>, transform_indices = @transform_2, window_bounds = array<i64: 3, 8, 8>}, {pipeline_mode = #tpu.pipeline_mode<synchronous>, transform_indices = @transform_3, window_bounds = array<i64: 6, 36>}, {transform_indices = @transform_4, window_bounds = array<i64: 1, 2, 8, 6>}]} {
    %c0 = arith.constant 0 : index
    %c0_0 = arith.constant 0 : index
    %c0_1 = arith.constant 0 : index
    %c0_2 = arith.constant 0 : index
    %0 = vector.load %arg2[%c0, %c0_0, %c0_1, %c0_2] : memref<2x1x8x6xf32, #tpu.memory_space<vmem>>, vector<2x1x8x6xf32>
    %1 = vector.shape_cast %0 : vector<2x1x8x6xf32> to vector<2x8x6xf32>
    %c0_3 = arith.constant 0 : index
    %c0_4 = arith.constant 0 : index
    %c0_5 = arith.constant 0 : index
    %c0_6 = arith.constant 0 : index
    %2 = vector.load %arg3[%c0_3, %c0_4, %c0_5, %c0_6] : memref<2x1x8x6xf32, #tpu.memory_space<vmem>>, vector<2x1x8x6xf32>
    %3 = vector.shape_cast %2 : vector<2x1x8x6xf32> to vector<2x8x6xf32>
    %4 = arith.addf %1, %3 : vector<2x8x6xf32>
    %5 = arith.truncf %4 : vector<2x8x6xf32> to vector<2x8x6xbf16>
    %c0_7 = arith.constant 0 : index
    %c0_8 = arith.constant 0 : index
    %6 = vector.load %arg5[%c0_7, %c0_8] : memref<6x36xbf16, #tpu.memory_space<vmem>>, vector<6x36xbf16>
    "tpu.trace_start"() <{level = 10 : i32, message = "bnf,fe->bne"}> : () -> ()
    %cst = arith.constant dense<0.000000e+00> : vector<2x8x36xf32>
    %7 = tpu.matmul %5, %6, %cst {dimension_numbers = #tpu.dot_dimension_numbers<[2], [0], [0, 1], [1], [0, 0, 0, 1, 1, 1], [], []>} : vector<2x8x6xbf16>, vector<6x36xbf16>, vector<2x8x36xf32> -> vector<2x8x36xf32>
    "tpu.trace_stop"() : () -> ()
    %8 = vector.extract_strided_slice %7 {offsets = [0, 0, 0], sizes = [2, 8, 12], strides = [1, 1, 1]} : vector<2x8x36xf32> to vector<2x8x12xf32>
    %9 = vector.extract_strided_slice %8 {offsets = [0, 0, 0], sizes = [2, 8, 6], strides = [1, 1, 1]} : vector<2x8x12xf32> to vector<2x8x6xf32>
    %10 = vector.extract_strided_slice %8 {offsets = [0, 0, 6], sizes = [2, 8, 3], strides = [1, 1, 1]} : vector<2x8x12xf32> to vector<2x8x3xf32>
    %11 = vector.extract_strided_slice %8 {offsets = [0, 0, 9], sizes = [2, 8, 3], strides = [1, 1, 1]} : vector<2x8x12xf32> to vector<2x8x3xf32>
    %c0_9 = arith.constant 0 : index
    %c0_10 = arith.constant 0 : index
    %c0_11 = arith.constant 0 : index
    %12 = vector.load %arg4[%c0_9, %c0_10, %c0_11] : memref<3x8x8xf32, #tpu.memory_space<vmem>>, vector<1x8x8xf32>
    %13 = vector.shape_cast %12 : vector<1x8x8xf32> to vector<8x8xf32>
    %14 = vector.extract_strided_slice %10 {offsets = [0, 0, 0], sizes = [2, 8, 1], strides = [1, 1, 1]} : vector<2x8x3xf32> to vector<2x8x1xf32>
    %cst_12 = arith.constant dense<0.000000e+00> : vector<2x8xf32>
    %15 = vector.multi_reduction <add>, %14, %cst_12 [2] : vector<2x8x1xf32> to vector<2x8xf32>
    %16 = vector.extract_strided_slice %11 {offsets = [0, 0, 0], sizes = [2, 8, 1], strides = [1, 1, 1]} : vector<2x8x3xf32> to vector<2x8x1xf32>
    %cst_13 = arith.constant dense<0.000000e+00> : vector<2x8xf32>
    %17 = vector.multi_reduction <add>, %16, %cst_13 [2] : vector<2x8x1xf32> to vector<2x8xf32>
    %18 = vector.shape_cast %15 : vector<2x8xf32> to vector<2x8x1xf32>
    %19 = vector.shape_cast %17 : vector<2x8xf32> to vector<2x1x8xf32>
    %20 = vector.broadcast %18 : vector<2x8x1xf32> to vector<2x8x8xf32>
    %21 = vector.broadcast %19 : vector<2x1x8xf32> to vector<2x8x8xf32>
    %22 = arith.addf %20, %21 : vector<2x8x8xf32>
    %cst_14 = arith.constant 2.000000e-01 : f32
    %23 = vector.broadcast %cst_14 : f32 to vector<2x8x8xf32>
    %24 = arith.mulf %23, %22 : vector<2x8x8xf32>
    %25 = arith.maximumf %22, %24 : vector<2x8x8xf32>
    %26 = vector.shape_cast %13 : vector<8x8xf32> to vector<1x8x8xf32>
    %cst_15 = arith.constant 0.000000e+00 : f32
    %27 = vector.broadcast %cst_15 : f32 to vector<1x8x8xf32>
    %28 = arith.cmpf ogt, %26, %27 : vector<1x8x8xf32>
    %cst_16 = arith.constant -1.000000e+30 : f32
    %29 = vector.shape_cast %28 : vector<1x8x8xi1> to vector<1x8x8xi1>
    %30 = vector.broadcast %29 : vector<1x8x8xi1> to vector<2x8x8xi1>
    %31 = vector.broadcast %cst_16 : f32 to vector<2x8x8xf32>
    %32 = arith.select %30, %25, %31 : vector<2x8x8xi1>, vector<2x8x8xf32>
    %cst_17 = arith.constant dense<0xFF800000> : vector<2x8xf32>
    %33 = vector.multi_reduction <maximumf>, %32, %cst_17 [2] : vector<2x8x8xf32> to vector<2x8xf32>
    %34 = vector.shape_cast %33 : vector<2x8xf32> to vector<2x8x1xf32>
    %35 = vector.broadcast %34 : vector<2x8x1xf32> to vector<2x8x8xf32>
    %36 = arith.subf %32, %35 : vector<2x8x8xf32>
    %37 = math.exp %36 : vector<2x8x8xf32>
    %cst_18 = arith.constant dense<0.000000e+00> : vector<2x8xf32>
    %38 = vector.multi_reduction <add>, %37, %cst_18 [2] : vector<2x8x8xf32> to vector<2x8xf32>
    %39 = vector.shape_cast %38 : vector<2x8xf32> to vector<2x8x1xf32>
    %40 = tpu.reciprocal %39 {approx = true} : vector<2x8x1xf32> -> vector<2x8x1xf32>
    %41 = vector.broadcast %40 : vector<2x8x1xf32> to vector<2x8x8xf32>
    %42 = arith.mulf %37, %41 : vector<2x8x8xf32>
    %43 = vector.extract_strided_slice %9 {offsets = [0, 0, 0], sizes = [2, 8, 2], strides = [1, 1, 1]} : vector<2x8x6xf32> to vector<2x8x2xf32>
    %44 = arith.truncf %42 : vector<2x8x8xf32> to vector<2x8x8xbf16>
    %45 = arith.truncf %43 : vector<2x8x2xf32> to vector<2x8x2xbf16>
    "tpu.trace_start"() <{level = 10 : i32, message = "bij,bjd->bid"}> : () -> ()
    %cst_19 = arith.constant dense<0.000000e+00> : vector<2x8x2xf32>
    %46 = tpu.matmul %44, %45, %cst_19 {dimension_numbers = #tpu.dot_dimension_numbers<[2], [1], [1], [2], [0, 0, 0, 1, 1, 2], [0], [0]>} : vector<2x8x8xbf16>, vector<2x8x2xbf16>, vector<2x8x2xf32> -> vector<2x8x2xf32>
    "tpu.trace_stop"() : () -> ()
    %47 = vector.extract_strided_slice %10 {offsets = [0, 0, 1], sizes = [2, 8, 1], strides = [1, 1, 1]} : vector<2x8x3xf32> to vector<2x8x1xf32>
    %cst_20 = arith.constant dense<0.000000e+00> : vector<2x8xf32>
    %48 = vector.multi_reduction <add>, %47, %cst_20 [2] : vector<2x8x1xf32> to vector<2x8xf32>
    %49 = vector.extract_strided_slice %11 {offsets = [0, 0, 1], sizes = [2, 8, 1], strides = [1, 1, 1]} : vector<2x8x3xf32> to vector<2x8x1xf32>
    %cst_21 = arith.constant dense<0.000000e+00> : vector<2x8xf32>
    %50 = vector.multi_reduction <add>, %49, %cst_21 [2] : vector<2x8x1xf32> to vector<2x8xf32>
    %51 = vector.shape_cast %48 : vector<2x8xf32> to vector<2x8x1xf32>
    %52 = vector.shape_cast %50 : vector<2x8xf32> to vector<2x1x8xf32>
    %53 = vector.broadcast %51 : vector<2x8x1xf32> to vector<2x8x8xf32>
    %54 = vector.broadcast %52 : vector<2x1x8xf32> to vector<2x8x8xf32>
    %55 = arith.addf %53, %54 : vector<2x8x8xf32>
    %cst_22 = arith.constant 2.000000e-01 : f32
    %56 = vector.broadcast %cst_22 : f32 to vector<2x8x8xf32>
    %57 = arith.mulf %56, %55 : vector<2x8x8xf32>
    %58 = arith.maximumf %55, %57 : vector<2x8x8xf32>
    %59 = vector.shape_cast %13 : vector<8x8xf32> to vector<1x8x8xf32>
    %cst_23 = arith.constant 0.000000e+00 : f32
    %60 = vector.broadcast %cst_23 : f32 to vector<1x8x8xf32>
    %61 = arith.cmpf ogt, %59, %60 : vector<1x8x8xf32>
    %cst_24 = arith.constant -1.000000e+30 : f32
    %62 = vector.shape_cast %61 : vector<1x8x8xi1> to vector<1x8x8xi1>
    %63 = vector.broadcast %62 : vector<1x8x8xi1> to vector<2x8x8xi1>
    %64 = vector.broadcast %cst_24 : f32 to vector<2x8x8xf32>
    %65 = arith.select %63, %58, %64 : vector<2x8x8xi1>, vector<2x8x8xf32>
    %cst_25 = arith.constant dense<0xFF800000> : vector<2x8xf32>
    %66 = vector.multi_reduction <maximumf>, %65, %cst_25 [2] : vector<2x8x8xf32> to vector<2x8xf32>
    %67 = vector.shape_cast %66 : vector<2x8xf32> to vector<2x8x1xf32>
    %68 = vector.broadcast %67 : vector<2x8x1xf32> to vector<2x8x8xf32>
    %69 = arith.subf %65, %68 : vector<2x8x8xf32>
    %70 = math.exp %69 : vector<2x8x8xf32>
    %cst_26 = arith.constant dense<0.000000e+00> : vector<2x8xf32>
    %71 = vector.multi_reduction <add>, %70, %cst_26 [2] : vector<2x8x8xf32> to vector<2x8xf32>
    %72 = vector.shape_cast %71 : vector<2x8xf32> to vector<2x8x1xf32>
    %73 = tpu.reciprocal %72 {approx = true} : vector<2x8x1xf32> -> vector<2x8x1xf32>
    %74 = vector.broadcast %73 : vector<2x8x1xf32> to vector<2x8x8xf32>
    %75 = arith.mulf %70, %74 : vector<2x8x8xf32>
    %76 = vector.extract_strided_slice %9 {offsets = [0, 0, 2], sizes = [2, 8, 2], strides = [1, 1, 1]} : vector<2x8x6xf32> to vector<2x8x2xf32>
    %77 = arith.truncf %75 : vector<2x8x8xf32> to vector<2x8x8xbf16>
    %78 = arith.truncf %76 : vector<2x8x2xf32> to vector<2x8x2xbf16>
    "tpu.trace_start"() <{level = 10 : i32, message = "bij,bjd->bid"}> : () -> ()
    %cst_27 = arith.constant dense<0.000000e+00> : vector<2x8x2xf32>
    %79 = tpu.matmul %77, %78, %cst_27 {dimension_numbers = #tpu.dot_dimension_numbers<[2], [1], [1], [2], [0, 0, 0, 1, 1, 2], [0], [0]>} : vector<2x8x8xbf16>, vector<2x8x2xbf16>, vector<2x8x2xf32> -> vector<2x8x2xf32>
    "tpu.trace_stop"() : () -> ()
    %80 = arith.addf %46, %79 : vector<2x8x2xf32>
    %81 = vector.extract_strided_slice %10 {offsets = [0, 0, 2], sizes = [2, 8, 1], strides = [1, 1, 1]} : vector<2x8x3xf32> to vector<2x8x1xf32>
    %cst_28 = arith.constant dense<0.000000e+00> : vector<2x8xf32>
    %82 = vector.multi_reduction <add>, %81, %cst_28 [2] : vector<2x8x1xf32> to vector<2x8xf32>
    %83 = vector.extract_strided_slice %11 {offsets = [0, 0, 2], sizes = [2, 8, 1], strides = [1, 1, 1]} : vector<2x8x3xf32> to vector<2x8x1xf32>
    %cst_29 = arith.constant dense<0.000000e+00> : vector<2x8xf32>
    %84 = vector.multi_reduction <add>, %83, %cst_29 [2] : vector<2x8x1xf32> to vector<2x8xf32>
    %85 = vector.shape_cast %82 : vector<2x8xf32> to vector<2x8x1xf32>
    %86 = vector.shape_cast %84 : vector<2x8xf32> to vector<2x1x8xf32>
    %87 = vector.broadcast %85 : vector<2x8x1xf32> to vector<2x8x8xf32>
    %88 = vector.broadcast %86 : vector<2x1x8xf32> to vector<2x8x8xf32>
    %89 = arith.addf %87, %88 : vector<2x8x8xf32>
    %cst_30 = arith.constant 2.000000e-01 : f32
    %90 = vector.broadcast %cst_30 : f32 to vector<2x8x8xf32>
    %91 = arith.mulf %90, %89 : vector<2x8x8xf32>
    %92 = arith.maximumf %89, %91 : vector<2x8x8xf32>
    %93 = vector.shape_cast %13 : vector<8x8xf32> to vector<1x8x8xf32>
    %cst_31 = arith.constant 0.000000e+00 : f32
    %94 = vector.broadcast %cst_31 : f32 to vector<1x8x8xf32>
    %95 = arith.cmpf ogt, %93, %94 : vector<1x8x8xf32>
    %cst_32 = arith.constant -1.000000e+30 : f32
    %96 = vector.shape_cast %95 : vector<1x8x8xi1> to vector<1x8x8xi1>
    %97 = vector.broadcast %96 : vector<1x8x8xi1> to vector<2x8x8xi1>
    %98 = vector.broadcast %cst_32 : f32 to vector<2x8x8xf32>
    %99 = arith.select %97, %92, %98 : vector<2x8x8xi1>, vector<2x8x8xf32>
    %cst_33 = arith.constant dense<0xFF800000> : vector<2x8xf32>
    %100 = vector.multi_reduction <maximumf>, %99, %cst_33 [2] : vector<2x8x8xf32> to vector<2x8xf32>
    %101 = vector.shape_cast %100 : vector<2x8xf32> to vector<2x8x1xf32>
    %102 = vector.broadcast %101 : vector<2x8x1xf32> to vector<2x8x8xf32>
    %103 = arith.subf %99, %102 : vector<2x8x8xf32>
    %104 = math.exp %103 : vector<2x8x8xf32>
    %cst_34 = arith.constant dense<0.000000e+00> : vector<2x8xf32>
    %105 = vector.multi_reduction <add>, %104, %cst_34 [2] : vector<2x8x8xf32> to vector<2x8xf32>
    %106 = vector.shape_cast %105 : vector<2x8xf32> to vector<2x8x1xf32>
    %107 = tpu.reciprocal %106 {approx = true} : vector<2x8x1xf32> -> vector<2x8x1xf32>
    %108 = vector.broadcast %107 : vector<2x8x1xf32> to vector<2x8x8xf32>
    %109 = arith.mulf %104, %108 : vector<2x8x8xf32>
    %110 = vector.extract_strided_slice %9 {offsets = [0, 0, 4], sizes = [2, 8, 2], strides = [1, 1, 1]} : vector<2x8x6xf32> to vector<2x8x2xf32>
    %111 = arith.truncf %109 : vector<2x8x8xf32> to vector<2x8x8xbf16>
    %112 = arith.truncf %110 : vector<2x8x2xf32> to vector<2x8x2xbf16>
    "tpu.trace_start"() <{level = 10 : i32, message = "bij,bjd->bid"}> : () -> ()
    %cst_35 = arith.constant dense<0.000000e+00> : vector<2x8x2xf32>
    %113 = tpu.matmul %111, %112, %cst_35 {dimension_numbers = #tpu.dot_dimension_numbers<[2], [1], [1], [2], [0, 0, 0, 1, 1, 2], [0], [0]>} : vector<2x8x8xbf16>, vector<2x8x2xbf16>, vector<2x8x2xf32> -> vector<2x8x2xf32>
    "tpu.trace_stop"() : () -> ()
    %114 = arith.addf %80, %113 : vector<2x8x2xf32>
    %cst_36 = arith.constant 0.333333343 : f32
    %115 = vector.broadcast %cst_36 : f32 to vector<2x8x2xf32>
    %116 = arith.mulf %114, %115 : vector<2x8x2xf32>
    %c0_37 = arith.constant 0 : index
    %c0_38 = arith.constant 0 : index
    %c0_39 = arith.constant 0 : index
    %c0_40 = arith.constant 0 : index
    %117 = vector.load %arg6[%c0_37, %c0_38, %c0_39, %c0_40] : memref<1x2x8x6xf32, #tpu.memory_space<vmem>>, vector<1x2x8x2xf32>
    %118 = vector.shape_cast %117 : vector<1x2x8x2xf32> to vector<2x8x2xf32>
    %119 = vector.shape_cast %116 : vector<2x8x2xf32> to vector<1x2x8x2xf32>
    tpu.vector_store %arg6[%c0_37, %c0_38, %c0_39, %c0_40], %119 {strides = array<i32>} : memref<1x2x8x6xf32, #tpu.memory_space<vmem>>, vector<1x2x8x2xf32>,
    %120 = vector.extract_strided_slice %7 {offsets = [0, 0, 12], sizes = [2, 8, 12], strides = [1, 1, 1]} : vector<2x8x36xf32> to vector<2x8x12xf32>
    %121 = vector.extract_strided_slice %120 {offsets = [0, 0, 0], sizes = [2, 8, 6], strides = [1, 1, 1]} : vector<2x8x12xf32> to vector<2x8x6xf32>
    %122 = vector.extract_strided_slice %120 {offsets = [0, 0, 6], sizes = [2, 8, 3], strides = [1, 1, 1]} : vector<2x8x12xf32> to vector<2x8x3xf32>
    %123 = vector.extract_strided_slice %120 {offsets = [0, 0, 9], sizes = [2, 8, 3], strides = [1, 1, 1]} : vector<2x8x12xf32> to vector<2x8x3xf32>
    %c1 = arith.constant 1 : index
    %c0_41 = arith.constant 0 : index
    %c0_42 = arith.constant 0 : index
    %124 = vector.load %arg4[%c1, %c0_41, %c0_42] : memref<3x8x8xf32, #tpu.memory_space<vmem>>, vector<1x8x8xf32>
    %125 = vector.shape_cast %124 : vector<1x8x8xf32> to vector<8x8xf32>
    %126 = vector.extract_strided_slice %122 {offsets = [0, 0, 0], sizes = [2, 8, 1], strides = [1, 1, 1]} : vector<2x8x3xf32> to vector<2x8x1xf32>
    %cst_43 = arith.constant dense<0.000000e+00> : vector<2x8xf32>
    %127 = vector.multi_reduction <add>, %126, %cst_43 [2] : vector<2x8x1xf32> to vector<2x8xf32>
    %128 = vector.extract_strided_slice %123 {offsets = [0, 0, 0], sizes = [2, 8, 1], strides = [1, 1, 1]} : vector<2x8x3xf32> to vector<2x8x1xf32>
    %cst_44 = arith.constant dense<0.000000e+00> : vector<2x8xf32>
    %129 = vector.multi_reduction <add>, %128, %cst_44 [2] : vector<2x8x1xf32> to vector<2x8xf32>
    %130 = vector.shape_cast %127 : vector<2x8xf32> to vector<2x8x1xf32>
    %131 = vector.shape_cast %129 : vector<2x8xf32> to vector<2x1x8xf32>
    %132 = vector.broadcast %130 : vector<2x8x1xf32> to vector<2x8x8xf32>
    %133 = vector.broadcast %131 : vector<2x1x8xf32> to vector<2x8x8xf32>
    %134 = arith.addf %132, %133 : vector<2x8x8xf32>
    %cst_45 = arith.constant 2.000000e-01 : f32
    %135 = vector.broadcast %cst_45 : f32 to vector<2x8x8xf32>
    %136 = arith.mulf %135, %134 : vector<2x8x8xf32>
    %137 = arith.maximumf %134, %136 : vector<2x8x8xf32>
    %138 = vector.shape_cast %125 : vector<8x8xf32> to vector<1x8x8xf32>
    %cst_46 = arith.constant 0.000000e+00 : f32
    %139 = vector.broadcast %cst_46 : f32 to vector<1x8x8xf32>
    %140 = arith.cmpf ogt, %138, %139 : vector<1x8x8xf32>
    %cst_47 = arith.constant -1.000000e+30 : f32
    %141 = vector.shape_cast %140 : vector<1x8x8xi1> to vector<1x8x8xi1>
    %142 = vector.broadcast %141 : vector<1x8x8xi1> to vector<2x8x8xi1>
    %143 = vector.broadcast %cst_47 : f32 to vector<2x8x8xf32>
    %144 = arith.select %142, %137, %143 : vector<2x8x8xi1>, vector<2x8x8xf32>
    %cst_48 = arith.constant dense<0xFF800000> : vector<2x8xf32>
    %145 = vector.multi_reduction <maximumf>, %144, %cst_48 [2] : vector<2x8x8xf32> to vector<2x8xf32>
    %146 = vector.shape_cast %145 : vector<2x8xf32> to vector<2x8x1xf32>
    %147 = vector.broadcast %146 : vector<2x8x1xf32> to vector<2x8x8xf32>
    %148 = arith.subf %144, %147 : vector<2x8x8xf32>
    %149 = math.exp %148 : vector<2x8x8xf32>
    %cst_49 = arith.constant dense<0.000000e+00> : vector<2x8xf32>
    %150 = vector.multi_reduction <add>, %149, %cst_49 [2] : vector<2x8x8xf32> to vector<2x8xf32>
    %151 = vector.shape_cast %150 : vector<2x8xf32> to vector<2x8x1xf32>
    %152 = tpu.reciprocal %151 {approx = true} : vector<2x8x1xf32> -> vector<2x8x1xf32>
    %153 = vector.broadcast %152 : vector<2x8x1xf32> to vector<2x8x8xf32>
    %154 = arith.mulf %149, %153 : vector<2x8x8xf32>
    %155 = vector.extract_strided_slice %121 {offsets = [0, 0, 0], sizes = [2, 8, 2], strides = [1, 1, 1]} : vector<2x8x6xf32> to vector<2x8x2xf32>
    %156 = arith.truncf %154 : vector<2x8x8xf32> to vector<2x8x8xbf16>
    %157 = arith.truncf %155 : vector<2x8x2xf32> to vector<2x8x2xbf16>
    "tpu.trace_start"() <{level = 10 : i32, message = "bij,bjd->bid"}> : () -> ()
    %cst_50 = arith.constant dense<0.000000e+00> : vector<2x8x2xf32>
    %158 = tpu.matmul %156, %157, %cst_50 {dimension_numbers = #tpu.dot_dimension_numbers<[2], [1], [1], [2], [0, 0, 0, 1, 1, 2], [0], [0]>} : vector<2x8x8xbf16>, vector<2x8x2xbf16>, vector<2x8x2xf32> -> vector<2x8x2xf32>
    "tpu.trace_stop"() : () -> ()
    %159 = vector.extract_strided_slice %122 {offsets = [0, 0, 1], sizes = [2, 8, 1], strides = [1, 1, 1]} : vector<2x8x3xf32> to vector<2x8x1xf32>
    %cst_51 = arith.constant dense<0.000000e+00> : vector<2x8xf32>
    %160 = vector.multi_reduction <add>, %159, %cst_51 [2] : vector<2x8x1xf32> to vector<2x8xf32>
    %161 = vector.extract_strided_slice %123 {offsets = [0, 0, 1], sizes = [2, 8, 1], strides = [1, 1, 1]} : vector<2x8x3xf32> to vector<2x8x1xf32>
    %cst_52 = arith.constant dense<0.000000e+00> : vector<2x8xf32>
    %162 = vector.multi_reduction <add>, %161, %cst_52 [2] : vector<2x8x1xf32> to vector<2x8xf32>
    %163 = vector.shape_cast %160 : vector<2x8xf32> to vector<2x8x1xf32>
    %164 = vector.shape_cast %162 : vector<2x8xf32> to vector<2x1x8xf32>
    %165 = vector.broadcast %163 : vector<2x8x1xf32> to vector<2x8x8xf32>
    %166 = vector.broadcast %164 : vector<2x1x8xf32> to vector<2x8x8xf32>
    %167 = arith.addf %165, %166 : vector<2x8x8xf32>
    %cst_53 = arith.constant 2.000000e-01 : f32
    %168 = vector.broadcast %cst_53 : f32 to vector<2x8x8xf32>
    %169 = arith.mulf %168, %167 : vector<2x8x8xf32>
    %170 = arith.maximumf %167, %169 : vector<2x8x8xf32>
    %171 = vector.shape_cast %125 : vector<8x8xf32> to vector<1x8x8xf32>
    %cst_54 = arith.constant 0.000000e+00 : f32
    %172 = vector.broadcast %cst_54 : f32 to vector<1x8x8xf32>
    %173 = arith.cmpf ogt, %171, %172 : vector<1x8x8xf32>
    %cst_55 = arith.constant -1.000000e+30 : f32
    %174 = vector.shape_cast %173 : vector<1x8x8xi1> to vector<1x8x8xi1>
    %175 = vector.broadcast %174 : vector<1x8x8xi1> to vector<2x8x8xi1>
    %176 = vector.broadcast %cst_55 : f32 to vector<2x8x8xf32>
    %177 = arith.select %175, %170, %176 : vector<2x8x8xi1>, vector<2x8x8xf32>
    %cst_56 = arith.constant dense<0xFF800000> : vector<2x8xf32>
    %178 = vector.multi_reduction <maximumf>, %177, %cst_56 [2] : vector<2x8x8xf32> to vector<2x8xf32>
    %179 = vector.shape_cast %178 : vector<2x8xf32> to vector<2x8x1xf32>
    %180 = vector.broadcast %179 : vector<2x8x1xf32> to vector<2x8x8xf32>
    %181 = arith.subf %177, %180 : vector<2x8x8xf32>
    %182 = math.exp %181 : vector<2x8x8xf32>
    %cst_57 = arith.constant dense<0.000000e+00> : vector<2x8xf32>
    %183 = vector.multi_reduction <add>, %182, %cst_57 [2] : vector<2x8x8xf32> to vector<2x8xf32>
    %184 = vector.shape_cast %183 : vector<2x8xf32> to vector<2x8x1xf32>
    %185 = tpu.reciprocal %184 {approx = true} : vector<2x8x1xf32> -> vector<2x8x1xf32>
    %186 = vector.broadcast %185 : vector<2x8x1xf32> to vector<2x8x8xf32>
    %187 = arith.mulf %182, %186 : vector<2x8x8xf32>
    %188 = vector.extract_strided_slice %121 {offsets = [0, 0, 2], sizes = [2, 8, 2], strides = [1, 1, 1]} : vector<2x8x6xf32> to vector<2x8x2xf32>
    %189 = arith.truncf %187 : vector<2x8x8xf32> to vector<2x8x8xbf16>
    %190 = arith.truncf %188 : vector<2x8x2xf32> to vector<2x8x2xbf16>
    "tpu.trace_start"() <{level = 10 : i32, message = "bij,bjd->bid"}> : () -> ()
    %cst_58 = arith.constant dense<0.000000e+00> : vector<2x8x2xf32>
    %191 = tpu.matmul %189, %190, %cst_58 {dimension_numbers = #tpu.dot_dimension_numbers<[2], [1], [1], [2], [0, 0, 0, 1, 1, 2], [0], [0]>} : vector<2x8x8xbf16>, vector<2x8x2xbf16>, vector<2x8x2xf32> -> vector<2x8x2xf32>
    "tpu.trace_stop"() : () -> ()
    %192 = arith.addf %158, %191 : vector<2x8x2xf32>
    %193 = vector.extract_strided_slice %122 {offsets = [0, 0, 2], sizes = [2, 8, 1], strides = [1, 1, 1]} : vector<2x8x3xf32> to vector<2x8x1xf32>
    %cst_59 = arith.constant dense<0.000000e+00> : vector<2x8xf32>
    %194 = vector.multi_reduction <add>, %193, %cst_59 [2] : vector<2x8x1xf32> to vector<2x8xf32>
    %195 = vector.extract_strided_slice %123 {offsets = [0, 0, 2], sizes = [2, 8, 1], strides = [1, 1, 1]} : vector<2x8x3xf32> to vector<2x8x1xf32>
    %cst_60 = arith.constant dense<0.000000e+00> : vector<2x8xf32>
    %196 = vector.multi_reduction <add>, %195, %cst_60 [2] : vector<2x8x1xf32> to vector<2x8xf32>
    %197 = vector.shape_cast %194 : vector<2x8xf32> to vector<2x8x1xf32>
    %198 = vector.shape_cast %196 : vector<2x8xf32> to vector<2x1x8xf32>
    %199 = vector.broadcast %197 : vector<2x8x1xf32> to vector<2x8x8xf32>
    %200 = vector.broadcast %198 : vector<2x1x8xf32> to vector<2x8x8xf32>
    %201 = arith.addf %199, %200 : vector<2x8x8xf32>
    %cst_61 = arith.constant 2.000000e-01 : f32
    %202 = vector.broadcast %cst_61 : f32 to vector<2x8x8xf32>
    %203 = arith.mulf %202, %201 : vector<2x8x8xf32>
    %204 = arith.maximumf %201, %203 : vector<2x8x8xf32>
    %205 = vector.shape_cast %125 : vector<8x8xf32> to vector<1x8x8xf32>
    %cst_62 = arith.constant 0.000000e+00 : f32
    %206 = vector.broadcast %cst_62 : f32 to vector<1x8x8xf32>
    %207 = arith.cmpf ogt, %205, %206 : vector<1x8x8xf32>
    %cst_63 = arith.constant -1.000000e+30 : f32
    %208 = vector.shape_cast %207 : vector<1x8x8xi1> to vector<1x8x8xi1>
    %209 = vector.broadcast %208 : vector<1x8x8xi1> to vector<2x8x8xi1>
    %210 = vector.broadcast %cst_63 : f32 to vector<2x8x8xf32>
    %211 = arith.select %209, %204, %210 : vector<2x8x8xi1>, vector<2x8x8xf32>
    %cst_64 = arith.constant dense<0xFF800000> : vector<2x8xf32>
    %212 = vector.multi_reduction <maximumf>, %211, %cst_64 [2] : vector<2x8x8xf32> to vector<2x8xf32>
    %213 = vector.shape_cast %212 : vector<2x8xf32> to vector<2x8x1xf32>
    %214 = vector.broadcast %213 : vector<2x8x1xf32> to vector<2x8x8xf32>
    %215 = arith.subf %211, %214 : vector<2x8x8xf32>
    %216 = math.exp %215 : vector<2x8x8xf32>
    %cst_65 = arith.constant dense<0.000000e+00> : vector<2x8xf32>
    %217 = vector.multi_reduction <add>, %216, %cst_65 [2] : vector<2x8x8xf32> to vector<2x8xf32>
    %218 = vector.shape_cast %217 : vector<2x8xf32> to vector<2x8x1xf32>
    %219 = tpu.reciprocal %218 {approx = true} : vector<2x8x1xf32> -> vector<2x8x1xf32>
    %220 = vector.broadcast %219 : vector<2x8x1xf32> to vector<2x8x8xf32>
    %221 = arith.mulf %216, %220 : vector<2x8x8xf32>
    %222 = vector.extract_strided_slice %121 {offsets = [0, 0, 4], sizes = [2, 8, 2], strides = [1, 1, 1]} : vector<2x8x6xf32> to vector<2x8x2xf32>
    %223 = arith.truncf %221 : vector<2x8x8xf32> to vector<2x8x8xbf16>
    %224 = arith.truncf %222 : vector<2x8x2xf32> to vector<2x8x2xbf16>
    "tpu.trace_start"() <{level = 10 : i32, message = "bij,bjd->bid"}> : () -> ()
    %cst_66 = arith.constant dense<0.000000e+00> : vector<2x8x2xf32>
    %225 = tpu.matmul %223, %224, %cst_66 {dimension_numbers = #tpu.dot_dimension_numbers<[2], [1], [1], [2], [0, 0, 0, 1, 1, 2], [0], [0]>} : vector<2x8x8xbf16>, vector<2x8x2xbf16>, vector<2x8x2xf32> -> vector<2x8x2xf32>
    "tpu.trace_stop"() : () -> ()
    %226 = arith.addf %192, %225 : vector<2x8x2xf32>
    %cst_67 = arith.constant 0.333333343 : f32
    %227 = vector.broadcast %cst_67 : f32 to vector<2x8x2xf32>
    %228 = arith.mulf %226, %227 : vector<2x8x2xf32>
    %c0_68 = arith.constant 0 : index
    %c0_69 = arith.constant 0 : index
    %c0_70 = arith.constant 0 : index
    %c2 = arith.constant 2 : index
    %229 = vector.load %arg6[%c0_68, %c0_69, %c0_70, %c2] : memref<1x2x8x6xf32, #tpu.memory_space<vmem>>, vector<1x2x8x2xf32>
    %230 = vector.shape_cast %229 : vector<1x2x8x2xf32> to vector<2x8x2xf32>
    %231 = vector.shape_cast %228 : vector<2x8x2xf32> to vector<1x2x8x2xf32>
    tpu.vector_store %arg6[%c0_68, %c0_69, %c0_70, %c2], %231 {strides = array<i32>} : memref<1x2x8x6xf32, #tpu.memory_space<vmem>>, vector<1x2x8x2xf32>,
    %232 = vector.extract_strided_slice %7 {offsets = [0, 0, 24], sizes = [2, 8, 12], strides = [1, 1, 1]} : vector<2x8x36xf32> to vector<2x8x12xf32>
    %233 = vector.extract_strided_slice %232 {offsets = [0, 0, 0], sizes = [2, 8, 6], strides = [1, 1, 1]} : vector<2x8x12xf32> to vector<2x8x6xf32>
    %234 = vector.extract_strided_slice %232 {offsets = [0, 0, 6], sizes = [2, 8, 3], strides = [1, 1, 1]} : vector<2x8x12xf32> to vector<2x8x3xf32>
    %235 = vector.extract_strided_slice %232 {offsets = [0, 0, 9], sizes = [2, 8, 3], strides = [1, 1, 1]} : vector<2x8x12xf32> to vector<2x8x3xf32>
    %c2_71 = arith.constant 2 : index
    %c0_72 = arith.constant 0 : index
    %c0_73 = arith.constant 0 : index
    %236 = vector.load %arg4[%c2_71, %c0_72, %c0_73] : memref<3x8x8xf32, #tpu.memory_space<vmem>>, vector<1x8x8xf32>
    %237 = vector.shape_cast %236 : vector<1x8x8xf32> to vector<8x8xf32>
    %238 = vector.extract_strided_slice %234 {offsets = [0, 0, 0], sizes = [2, 8, 1], strides = [1, 1, 1]} : vector<2x8x3xf32> to vector<2x8x1xf32>
    %cst_74 = arith.constant dense<0.000000e+00> : vector<2x8xf32>
    %239 = vector.multi_reduction <add>, %238, %cst_74 [2] : vector<2x8x1xf32> to vector<2x8xf32>
    %240 = vector.extract_strided_slice %235 {offsets = [0, 0, 0], sizes = [2, 8, 1], strides = [1, 1, 1]} : vector<2x8x3xf32> to vector<2x8x1xf32>
    %cst_75 = arith.constant dense<0.000000e+00> : vector<2x8xf32>
    %241 = vector.multi_reduction <add>, %240, %cst_75 [2] : vector<2x8x1xf32> to vector<2x8xf32>
    %242 = vector.shape_cast %239 : vector<2x8xf32> to vector<2x8x1xf32>
    %243 = vector.shape_cast %241 : vector<2x8xf32> to vector<2x1x8xf32>
    %244 = vector.broadcast %242 : vector<2x8x1xf32> to vector<2x8x8xf32>
    %245 = vector.broadcast %243 : vector<2x1x8xf32> to vector<2x8x8xf32>
    %246 = arith.addf %244, %245 : vector<2x8x8xf32>
    %cst_76 = arith.constant 2.000000e-01 : f32
    %247 = vector.broadcast %cst_76 : f32 to vector<2x8x8xf32>
    %248 = arith.mulf %247, %246 : vector<2x8x8xf32>
    %249 = arith.maximumf %246, %248 : vector<2x8x8xf32>
    %250 = vector.shape_cast %237 : vector<8x8xf32> to vector<1x8x8xf32>
    %cst_77 = arith.constant 0.000000e+00 : f32
    %251 = vector.broadcast %cst_77 : f32 to vector<1x8x8xf32>
    %252 = arith.cmpf ogt, %250, %251 : vector<1x8x8xf32>
    %cst_78 = arith.constant -1.000000e+30 : f32
    %253 = vector.shape_cast %252 : vector<1x8x8xi1> to vector<1x8x8xi1>
    %254 = vector.broadcast %253 : vector<1x8x8xi1> to vector<2x8x8xi1>
    %255 = vector.broadcast %cst_78 : f32 to vector<2x8x8xf32>
    %256 = arith.select %254, %249, %255 : vector<2x8x8xi1>, vector<2x8x8xf32>
    %cst_79 = arith.constant dense<0xFF800000> : vector<2x8xf32>
    %257 = vector.multi_reduction <maximumf>, %256, %cst_79 [2] : vector<2x8x8xf32> to vector<2x8xf32>
    %258 = vector.shape_cast %257 : vector<2x8xf32> to vector<2x8x1xf32>
    %259 = vector.broadcast %258 : vector<2x8x1xf32> to vector<2x8x8xf32>
    %260 = arith.subf %256, %259 : vector<2x8x8xf32>
    %261 = math.exp %260 : vector<2x8x8xf32>
    %cst_80 = arith.constant dense<0.000000e+00> : vector<2x8xf32>
    %262 = vector.multi_reduction <add>, %261, %cst_80 [2] : vector<2x8x8xf32> to vector<2x8xf32>
    %263 = vector.shape_cast %262 : vector<2x8xf32> to vector<2x8x1xf32>
    %264 = tpu.reciprocal %263 {approx = true} : vector<2x8x1xf32> -> vector<2x8x1xf32>
    %265 = vector.broadcast %264 : vector<2x8x1xf32> to vector<2x8x8xf32>
    %266 = arith.mulf %261, %265 : vector<2x8x8xf32>
    %267 = vector.extract_strided_slice %233 {offsets = [0, 0, 0], sizes = [2, 8, 2], strides = [1, 1, 1]} : vector<2x8x6xf32> to vector<2x8x2xf32>
    %268 = arith.truncf %266 : vector<2x8x8xf32> to vector<2x8x8xbf16>
    %269 = arith.truncf %267 : vector<2x8x2xf32> to vector<2x8x2xbf16>
    "tpu.trace_start"() <{level = 10 : i32, message = "bij,bjd->bid"}> : () -> ()
    %cst_81 = arith.constant dense<0.000000e+00> : vector<2x8x2xf32>
    %270 = tpu.matmul %268, %269, %cst_81 {dimension_numbers = #tpu.dot_dimension_numbers<[2], [1], [1], [2], [0, 0, 0, 1, 1, 2], [0], [0]>} : vector<2x8x8xbf16>, vector<2x8x2xbf16>, vector<2x8x2xf32> -> vector<2x8x2xf32>
    "tpu.trace_stop"() : () -> ()
    %271 = vector.extract_strided_slice %234 {offsets = [0, 0, 1], sizes = [2, 8, 1], strides = [1, 1, 1]} : vector<2x8x3xf32> to vector<2x8x1xf32>
    %cst_82 = arith.constant dense<0.000000e+00> : vector<2x8xf32>
    %272 = vector.multi_reduction <add>, %271, %cst_82 [2] : vector<2x8x1xf32> to vector<2x8xf32>
    %273 = vector.extract_strided_slice %235 {offsets = [0, 0, 1], sizes = [2, 8, 1], strides = [1, 1, 1]} : vector<2x8x3xf32> to vector<2x8x1xf32>
    %cst_83 = arith.constant dense<0.000000e+00> : vector<2x8xf32>
    %274 = vector.multi_reduction <add>, %273, %cst_83 [2] : vector<2x8x1xf32> to vector<2x8xf32>
    %275 = vector.shape_cast %272 : vector<2x8xf32> to vector<2x8x1xf32>
    %276 = vector.shape_cast %274 : vector<2x8xf32> to vector<2x1x8xf32>
    %277 = vector.broadcast %275 : vector<2x8x1xf32> to vector<2x8x8xf32>
    %278 = vector.broadcast %276 : vector<2x1x8xf32> to vector<2x8x8xf32>
    %279 = arith.addf %277, %278 : vector<2x8x8xf32>
    %cst_84 = arith.constant 2.000000e-01 : f32
    %280 = vector.broadcast %cst_84 : f32 to vector<2x8x8xf32>
    %281 = arith.mulf %280, %279 : vector<2x8x8xf32>
    %282 = arith.maximumf %279, %281 : vector<2x8x8xf32>
    %283 = vector.shape_cast %237 : vector<8x8xf32> to vector<1x8x8xf32>
    %cst_85 = arith.constant 0.000000e+00 : f32
    %284 = vector.broadcast %cst_85 : f32 to vector<1x8x8xf32>
    %285 = arith.cmpf ogt, %283, %284 : vector<1x8x8xf32>
    %cst_86 = arith.constant -1.000000e+30 : f32
    %286 = vector.shape_cast %285 : vector<1x8x8xi1> to vector<1x8x8xi1>
    %287 = vector.broadcast %286 : vector<1x8x8xi1> to vector<2x8x8xi1>
    %288 = vector.broadcast %cst_86 : f32 to vector<2x8x8xf32>
    %289 = arith.select %287, %282, %288 : vector<2x8x8xi1>, vector<2x8x8xf32>
    %cst_87 = arith.constant dense<0xFF800000> : vector<2x8xf32>
    %290 = vector.multi_reduction <maximumf>, %289, %cst_87 [2] : vector<2x8x8xf32> to vector<2x8xf32>
    %291 = vector.shape_cast %290 : vector<2x8xf32> to vector<2x8x1xf32>
    %292 = vector.broadcast %291 : vector<2x8x1xf32> to vector<2x8x8xf32>
    %293 = arith.subf %289, %292 : vector<2x8x8xf32>
    %294 = math.exp %293 : vector<2x8x8xf32>
    %cst_88 = arith.constant dense<0.000000e+00> : vector<2x8xf32>
    %295 = vector.multi_reduction <add>, %294, %cst_88 [2] : vector<2x8x8xf32> to vector<2x8xf32>
    %296 = vector.shape_cast %295 : vector<2x8xf32> to vector<2x8x1xf32>
    %297 = tpu.reciprocal %296 {approx = true} : vector<2x8x1xf32> -> vector<2x8x1xf32>
    %298 = vector.broadcast %297 : vector<2x8x1xf32> to vector<2x8x8xf32>
    %299 = arith.mulf %294, %298 : vector<2x8x8xf32>
    %300 = vector.extract_strided_slice %233 {offsets = [0, 0, 2], sizes = [2, 8, 2], strides = [1, 1, 1]} : vector<2x8x6xf32> to vector<2x8x2xf32>
    %301 = arith.truncf %299 : vector<2x8x8xf32> to vector<2x8x8xbf16>
    %302 = arith.truncf %300 : vector<2x8x2xf32> to vector<2x8x2xbf16>
    "tpu.trace_start"() <{level = 10 : i32, message = "bij,bjd->bid"}> : () -> ()
    %cst_89 = arith.constant dense<0.000000e+00> : vector<2x8x2xf32>
    %303 = tpu.matmul %301, %302, %cst_89 {dimension_numbers = #tpu.dot_dimension_numbers<[2], [1], [1], [2], [0, 0, 0, 1, 1, 2], [0], [0]>} : vector<2x8x8xbf16>, vector<2x8x2xbf16>, vector<2x8x2xf32> -> vector<2x8x2xf32>
    "tpu.trace_stop"() : () -> ()
    %304 = arith.addf %270, %303 : vector<2x8x2xf32>
    %305 = vector.extract_strided_slice %234 {offsets = [0, 0, 2], sizes = [2, 8, 1], strides = [1, 1, 1]} : vector<2x8x3xf32> to vector<2x8x1xf32>
    %cst_90 = arith.constant dense<0.000000e+00> : vector<2x8xf32>
    %306 = vector.multi_reduction <add>, %305, %cst_90 [2] : vector<2x8x1xf32> to vector<2x8xf32>
    %307 = vector.extract_strided_slice %235 {offsets = [0, 0, 2], sizes = [2, 8, 1], strides = [1, 1, 1]} : vector<2x8x3xf32> to vector<2x8x1xf32>
    %cst_91 = arith.constant dense<0.000000e+00> : vector<2x8xf32>
    %308 = vector.multi_reduction <add>, %307, %cst_91 [2] : vector<2x8x1xf32> to vector<2x8xf32>
    %309 = vector.shape_cast %306 : vector<2x8xf32> to vector<2x8x1xf32>
    %310 = vector.shape_cast %308 : vector<2x8xf32> to vector<2x1x8xf32>
    %311 = vector.broadcast %309 : vector<2x8x1xf32> to vector<2x8x8xf32>
    %312 = vector.broadcast %310 : vector<2x1x8xf32> to vector<2x8x8xf32>
    %313 = arith.addf %311, %312 : vector<2x8x8xf32>
    %cst_92 = arith.constant 2.000000e-01 : f32
    %314 = vector.broadcast %cst_92 : f32 to vector<2x8x8xf32>
    %315 = arith.mulf %314, %313 : vector<2x8x8xf32>
    %316 = arith.maximumf %313, %315 : vector<2x8x8xf32>
    %317 = vector.shape_cast %237 : vector<8x8xf32> to vector<1x8x8xf32>
    %cst_93 = arith.constant 0.000000e+00 : f32
    %318 = vector.broadcast %cst_93 : f32 to vector<1x8x8xf32>
    %319 = arith.cmpf ogt, %317, %318 : vector<1x8x8xf32>
    %cst_94 = arith.constant -1.000000e+30 : f32
    %320 = vector.shape_cast %319 : vector<1x8x8xi1> to vector<1x8x8xi1>
    %321 = vector.broadcast %320 : vector<1x8x8xi1> to vector<2x8x8xi1>
    %322 = vector.broadcast %cst_94 : f32 to vector<2x8x8xf32>
    %323 = arith.select %321, %316, %322 : vector<2x8x8xi1>, vector<2x8x8xf32>
    %cst_95 = arith.constant dense<0xFF800000> : vector<2x8xf32>
    %324 = vector.multi_reduction <maximumf>, %323, %cst_95 [2] : vector<2x8x8xf32> to vector<2x8xf32>
    %325 = vector.shape_cast %324 : vector<2x8xf32> to vector<2x8x1xf32>
    %326 = vector.broadcast %325 : vector<2x8x1xf32> to vector<2x8x8xf32>
    %327 = arith.subf %323, %326 : vector<2x8x8xf32>
    %328 = math.exp %327 : vector<2x8x8xf32>
    %cst_96 = arith.constant dense<0.000000e+00> : vector<2x8xf32>
    %329 = vector.multi_reduction <add>, %328, %cst_96 [2] : vector<2x8x8xf32> to vector<2x8xf32>
    %330 = vector.shape_cast %329 : vector<2x8xf32> to vector<2x8x1xf32>
    %331 = tpu.reciprocal %330 {approx = true} : vector<2x8x1xf32> -> vector<2x8x1xf32>
    %332 = vector.broadcast %331 : vector<2x8x1xf32> to vector<2x8x8xf32>
    %333 = arith.mulf %328, %332 : vector<2x8x8xf32>
    %334 = vector.extract_strided_slice %233 {offsets = [0, 0, 4], sizes = [2, 8, 2], strides = [1, 1, 1]} : vector<2x8x6xf32> to vector<2x8x2xf32>
    %335 = arith.truncf %333 : vector<2x8x8xf32> to vector<2x8x8xbf16>
    %336 = arith.truncf %334 : vector<2x8x2xf32> to vector<2x8x2xbf16>
    "tpu.trace_start"() <{level = 10 : i32, message = "bij,bjd->bid"}> : () -> ()
    %cst_97 = arith.constant dense<0.000000e+00> : vector<2x8x2xf32>
    %337 = tpu.matmul %335, %336, %cst_97 {dimension_numbers = #tpu.dot_dimension_numbers<[2], [1], [1], [2], [0, 0, 0, 1, 1, 2], [0], [0]>} : vector<2x8x8xbf16>, vector<2x8x2xbf16>, vector<2x8x2xf32> -> vector<2x8x2xf32>
    "tpu.trace_stop"() : () -> ()
    %338 = arith.addf %304, %337 : vector<2x8x2xf32>
    %cst_98 = arith.constant 0.333333343 : f32
    %339 = vector.broadcast %cst_98 : f32 to vector<2x8x2xf32>
    %340 = arith.mulf %338, %339 : vector<2x8x2xf32>
    %c0_99 = arith.constant 0 : index
    %c0_100 = arith.constant 0 : index
    %c0_101 = arith.constant 0 : index
    %c4 = arith.constant 4 : index
    %341 = vector.load %arg6[%c0_99, %c0_100, %c0_101, %c4] : memref<1x2x8x6xf32, #tpu.memory_space<vmem>>, vector<1x2x8x2xf32>
    %342 = vector.shape_cast %341 : vector<1x2x8x2xf32> to vector<2x8x2xf32>
    %343 = vector.shape_cast %340 : vector<2x8x2xf32> to vector<1x2x8x2xf32>
    tpu.vector_store %arg6[%c0_99, %c0_100, %c0_101, %c4], %343 {strides = array<i32>} : memref<1x2x8x6xf32, #tpu.memory_space<vmem>>, vector<1x2x8x2xf32>,
    return
  }
  func.func @transform_0(%arg0: i32, %arg1: i32) -> (i32, i32, i32, i32) {
    %c0_i32 = arith.constant 0 : i32
    %c0_i32_0 = arith.constant 0 : i32
    %c0_i32_1 = arith.constant 0 : i32
    return %arg1, %arg0, %c0_i32, %c0_i32_0 : i32, i32, i32, i32
  }
  func.func @transform_1(%arg0: i32, %arg1: i32) -> (i32, i32, i32, i32) {
    %c0_i32 = arith.constant 0 : i32
    %c0_i32_0 = arith.constant 0 : i32
    %c0_i32_1 = arith.constant 0 : i32
    return %arg1, %arg0, %c0_i32, %c0_i32_0 : i32, i32, i32, i32
  }
  func.func @transform_2(%arg0: i32, %arg1: i32) -> (i32, i32, i32) {
    %c0_i32 = arith.constant 0 : i32
    %c0_i32_0 = arith.constant 0 : i32
    %c0_i32_1 = arith.constant 0 : i32
    %c0_i32_2 = arith.constant 0 : i32
    return %c0_i32, %c0_i32_0, %c0_i32_1 : i32, i32, i32
  }
  func.func @transform_3(%arg0: i32, %arg1: i32) -> (i32, i32) {
    %c0_i32 = arith.constant 0 : i32
    %c0_i32_0 = arith.constant 0 : i32
    %c0_i32_1 = arith.constant 0 : i32
    return %c0_i32, %c0_i32_0 : i32, i32
  }
  func.func @transform_4(%arg0: i32, %arg1: i32) -> (i32, i32, i32, i32) {
    %c0_i32 = arith.constant 0 : i32
    %c0_i32_0 = arith.constant 0 : i32
    %c0_i32_1 = arith.constant 0 : i32
    return %arg0, %arg1, %c0_i32, %c0_i32_0 : i32, i32, i32, i32
  }
}

module attributes {stable_mosaic.version = 11 : i64} {
  func.func @_cov_kernel(%arg0: i32, %arg1: memref<1x8x6xf32, #tpu.memory_space<vmem>>, %arg2: memref<1x4x6xf32, #tpu.memory_space<vmem>>, %arg3: memref<1x8x8xf32, #tpu.memory_space<vmem>>, %arg4: memref<1x4x4xf32, #tpu.memory_space<vmem>>) attributes {dimension_semantics = [#tpu.dimension_semantics<parallel>], iteration_bounds = array<i64: 2>, scalar_prefetch = 0 : i64, scratch_operands = 0 : i64, tpu.core_type = #tpu.core_type<tc>, window_params = [{transform_indices = @transform_0, window_bounds = array<i64: 1, 8, 6>}, {transform_indices = @transform_1, window_bounds = array<i64: 1, 4, 6>}, {transform_indices = @transform_2, window_bounds = array<i64: 1, 8, 8>}, {transform_indices = @transform_3, window_bounds = array<i64: 1, 4, 4>}]} {
    %c0 = arith.constant 0 : index
    %c0_0 = arith.constant 0 : index
    %c0_1 = arith.constant 0 : index
    %0 = vector.load %arg1[%c0, %c0_0, %c0_1] : memref<1x8x6xf32, #tpu.memory_space<vmem>>, vector<1x8x6xf32>
    %1 = vector.shape_cast %0 : vector<1x8x6xf32> to vector<8x6xf32>
    %2 = tpu.transpose %1, [1, 0] : vector<8x6xf32> -> vector<6x8xf32>
    %cst = arith.constant dense<0.000000e+00> : vector<8x8xf32>
    %3 = tpu.matmul %1, %2, %cst {dimension_numbers = #tpu.dot_dimension_numbers<[1], [0], [0], [1], [0, 0, 1, 1], [], []>} : vector<8x6xf32>, vector<6x8xf32>, vector<8x8xf32> -> vector<8x8xf32>
    %cst_2 = arith.constant dense<0xFF800000> : vector<8xf32>
    %4 = vector.multi_reduction <maximumf>, %3, %cst_2 [1] : vector<8x8xf32> to vector<8xf32>
    %5 = vector.shape_cast %4 : vector<8xf32> to vector<8x1xf32>
    %6 = vector.broadcast %5 : vector<8x1xf32> to vector<8x8xf32>
    %7 = arith.subf %3, %6 : vector<8x8xf32>
    %8 = math.exp %7 : vector<8x8xf32>
    %cst_3 = arith.constant dense<0.000000e+00> : vector<8xf32>
    %9 = vector.multi_reduction <add>, %8, %cst_3 [1] : vector<8x8xf32> to vector<8xf32>
    %10 = vector.shape_cast %9 : vector<8xf32> to vector<8x1xf32>
    %11 = tpu.reciprocal %10 {approx = true} : vector<8x1xf32> -> vector<8x1xf32>
    %12 = vector.broadcast %11 : vector<8x1xf32> to vector<8x8xf32>
    %13 = arith.mulf %8, %12 : vector<8x8xf32>
    %c0_4 = arith.constant 0 : index
    %c0_5 = arith.constant 0 : index
    %c0_6 = arith.constant 0 : index
    %14 = vector.load %arg3[%c0_4, %c0_5, %c0_6] : memref<1x8x8xf32, #tpu.memory_space<vmem>>, vector<1x8x8xf32>
    %15 = vector.shape_cast %14 : vector<1x8x8xf32> to vector<8x8xf32>
    %16 = vector.shape_cast %13 : vector<8x8xf32> to vector<1x8x8xf32>
    tpu.vector_store %arg3[%c0_4, %c0_5, %c0_6], %16 {strides = array<i32>} : memref<1x8x8xf32, #tpu.memory_space<vmem>>, vector<1x8x8xf32>,
    %c0_7 = arith.constant 0 : index
    %c0_8 = arith.constant 0 : index
    %c0_9 = arith.constant 0 : index
    %17 = vector.load %arg2[%c0_7, %c0_8, %c0_9] : memref<1x4x6xf32, #tpu.memory_space<vmem>>, vector<1x4x6xf32>
    %18 = vector.shape_cast %17 : vector<1x4x6xf32> to vector<4x6xf32>
    %19 = tpu.transpose %18, [1, 0] : vector<4x6xf32> -> vector<6x4xf32>
    %cst_10 = arith.constant dense<0.000000e+00> : vector<4x4xf32>
    %20 = tpu.matmul %18, %19, %cst_10 {dimension_numbers = #tpu.dot_dimension_numbers<[1], [0], [0], [1], [0, 0, 1, 1], [], []>} : vector<4x6xf32>, vector<6x4xf32>, vector<4x4xf32> -> vector<4x4xf32>
    %cst_11 = arith.constant dense<0xFF800000> : vector<4xf32>
    %21 = vector.multi_reduction <maximumf>, %20, %cst_11 [0] : vector<4x4xf32> to vector<4xf32>
    %22 = vector.shape_cast %21 : vector<4xf32> to vector<1x4xf32>
    %23 = vector.broadcast %22 : vector<1x4xf32> to vector<4x4xf32>
    %24 = arith.subf %20, %23 : vector<4x4xf32>
    %25 = math.exp %24 : vector<4x4xf32>
    %cst_12 = arith.constant dense<0.000000e+00> : vector<4xf32>
    %26 = vector.multi_reduction <add>, %25, %cst_12 [0] : vector<4x4xf32> to vector<4xf32>
    %27 = vector.shape_cast %26 : vector<4xf32> to vector<1x4xf32>
    %28 = tpu.reciprocal %27 {approx = true} : vector<1x4xf32> -> vector<1x4xf32>
    %29 = vector.broadcast %28 : vector<1x4xf32> to vector<4x4xf32>
    %30 = arith.mulf %25, %29 : vector<4x4xf32>
    %c0_13 = arith.constant 0 : index
    %c0_14 = arith.constant 0 : index
    %c0_15 = arith.constant 0 : index
    %31 = vector.load %arg4[%c0_13, %c0_14, %c0_15] : memref<1x4x4xf32, #tpu.memory_space<vmem>>, vector<1x4x4xf32>
    %32 = vector.shape_cast %31 : vector<1x4x4xf32> to vector<4x4xf32>
    %33 = vector.shape_cast %30 : vector<4x4xf32> to vector<1x4x4xf32>
    tpu.vector_store %arg4[%c0_13, %c0_14, %c0_15], %33 {strides = array<i32>} : memref<1x4x4xf32, #tpu.memory_space<vmem>>, vector<1x4x4xf32>,
    return
  }
  func.func @transform_0(%arg0: i32) -> (i32, i32, i32) {
    %c0_i32 = arith.constant 0 : i32
    %c0_i32_0 = arith.constant 0 : i32
    %c0_i32_1 = arith.constant 0 : i32
    return %arg0, %c0_i32, %c0_i32_0 : i32, i32, i32
  }
  func.func @transform_1(%arg0: i32) -> (i32, i32, i32) {
    %c0_i32 = arith.constant 0 : i32
    %c0_i32_0 = arith.constant 0 : i32
    %c0_i32_1 = arith.constant 0 : i32
    return %arg0, %c0_i32, %c0_i32_0 : i32, i32, i32
  }
  func.func @transform_2(%arg0: i32) -> (i32, i32, i32) {
    %c0_i32 = arith.constant 0 : i32
    %c0_i32_0 = arith.constant 0 : i32
    %c0_i32_1 = arith.constant 0 : i32
    return %arg0, %c0_i32, %c0_i32_0 : i32, i32, i32
  }
  func.func @transform_3(%arg0: i32) -> (i32, i32, i32) {
    %c0_i32 = arith.constant 0 : i32
    %c0_i32_0 = arith.constant 0 : i32
    %c0_i32_1 = arith.constant 0 : i32
    return %arg0, %c0_i32, %c0_i32_0 : i32, i32, i32
  }
}

module attributes {stable_mosaic.version = 11 : i64} {
  func.func @_temporal_fuse_kernel(%arg0: i32, %arg1: i32, %arg2: memref<1x8x4x6xf32, #tpu.memory_space<vmem>>, %arg3: memref<1x4x8x6xf32, #tpu.memory_space<vmem>>, %arg4: memref<2x4x4xf32, #tpu.memory_space<vmem>>, %arg5: memref<6x32xbf16, #tpu.memory_space<vmem>>, %arg6: memref<12x6xf32, #tpu.memory_space<vmem>>, %arg7: memref<1x6xf32, #tpu.memory_space<vmem>>, %arg8: memref<1x4x8x6xf32, #tpu.memory_space<vmem>>, %arg9: memref<8x4x6xf32, #tpu.memory_space<vmem>>) attributes {dimension_semantics = [#tpu.dimension_semantics<parallel>, #tpu.dimension_semantics<parallel>], iteration_bounds = array<i64: 2, 1>, scalar_prefetch = 0 : i64, scratch_operands = 1 : i64, tpu.core_type = #tpu.core_type<tc>, window_params = [{transform_indices = @transform_0, window_bounds = array<i64: 1, 8, 4, 6>}, {transform_indices = @transform_1, window_bounds = array<i64: 1, 4, 8, 6>}, {pipeline_mode = #tpu.pipeline_mode<synchronous>, transform_indices = @transform_2, window_bounds = array<i64: 2, 4, 4>}, {pipeline_mode = #tpu.pipeline_mode<synchronous>, transform_indices = @transform_3, window_bounds = array<i64: 6, 32>}, {pipeline_mode = #tpu.pipeline_mode<synchronous>, transform_indices = @transform_4, window_bounds = array<i64: 12, 6>}, {pipeline_mode = #tpu.pipeline_mode<synchronous>, transform_indices = @transform_5, window_bounds = array<i64: 1, 6>}, {transform_indices = @transform_6, window_bounds = array<i64: 1, 4, 8, 6>}]} {
    %c0 = arith.constant 0 : index
    %c0_0 = arith.constant 0 : index
    %c0_1 = arith.constant 0 : index
    %c0_2 = arith.constant 0 : index
    %0 = vector.load %arg2[%c0, %c0_0, %c0_1, %c0_2] : memref<1x8x4x6xf32, #tpu.memory_space<vmem>>, vector<1x8x4x6xf32>
    %1 = vector.shape_cast %0 : vector<1x8x4x6xf32> to vector<8x4x6xf32>
    %2 = arith.truncf %1 : vector<8x4x6xf32> to vector<8x4x6xbf16>
    %c0_3 = arith.constant 0 : index
    %c0_4 = arith.constant 0 : index
    %3 = vector.load %arg5[%c0_3, %c0_4] : memref<6x32xbf16, #tpu.memory_space<vmem>>, vector<6x32xbf16>
    "tpu.trace_start"() <{level = 10 : i32, message = "ntf,fe->nte"}> : () -> ()
    %cst = arith.constant dense<0.000000e+00> : vector<8x4x32xf32>
    %4 = tpu.matmul %2, %3, %cst {dimension_numbers = #tpu.dot_dimension_numbers<[2], [0], [0, 1], [1], [0, 0, 0, 1, 1, 1], [], []>} : vector<8x4x6xbf16>, vector<6x32xbf16>, vector<8x4x32xf32> -> vector<8x4x32xf32>
    "tpu.trace_stop"() : () -> ()
    %5 = vector.extract_strided_slice %4 {offsets = [0, 0, 0], sizes = [8, 4, 24], strides = [1, 1, 1]} : vector<8x4x32xf32> to vector<8x4x24xf32>
    %6 = vector.extract_strided_slice %4 {offsets = [0, 0, 24], sizes = [8, 4, 4], strides = [1, 1, 1]} : vector<8x4x32xf32> to vector<8x4x4xf32>
    %7 = vector.extract_strided_slice %4 {offsets = [0, 0, 28], sizes = [8, 4, 4], strides = [1, 1, 1]} : vector<8x4x32xf32> to vector<8x4x4xf32>
    %8 = vector.extract_strided_slice %6 {offsets = [0, 0, 0], sizes = [8, 4, 1], strides = [1, 1, 1]} : vector<8x4x4xf32> to vector<8x4x1xf32>
    %cst_5 = arith.constant dense<0.000000e+00> : vector<8x4xf32>
    %9 = vector.multi_reduction <add>, %8, %cst_5 [2] : vector<8x4x1xf32> to vector<8x4xf32>
    %10 = vector.extract_strided_slice %7 {offsets = [0, 0, 0], sizes = [8, 4, 1], strides = [1, 1, 1]} : vector<8x4x4xf32> to vector<8x4x1xf32>
    %cst_6 = arith.constant dense<0.000000e+00> : vector<8x4xf32>
    %11 = vector.multi_reduction <add>, %10, %cst_6 [2] : vector<8x4x1xf32> to vector<8x4xf32>
    %12 = vector.shape_cast %9 : vector<8x4xf32> to vector<8x4x1xf32>
    %13 = vector.shape_cast %11 : vector<8x4xf32> to vector<8x1x4xf32>
    %14 = vector.broadcast %12 : vector<8x4x1xf32> to vector<8x4x4xf32>
    %15 = vector.broadcast %13 : vector<8x1x4xf32> to vector<8x4x4xf32>
    %16 = arith.addf %14, %15 : vector<8x4x4xf32>
    %cst_7 = arith.constant 2.000000e-01 : f32
    %17 = vector.broadcast %cst_7 : f32 to vector<8x4x4xf32>
    %18 = arith.mulf %17, %16 : vector<8x4x4xf32>
    %19 = arith.maximumf %16, %18 : vector<8x4x4xf32>
    %cst_8 = arith.constant dense<0xFF800000> : vector<8x4xf32>
    %20 = vector.multi_reduction <maximumf>, %19, %cst_8 [2] : vector<8x4x4xf32> to vector<8x4xf32>
    %21 = vector.shape_cast %20 : vector<8x4xf32> to vector<8x4x1xf32>
    %22 = vector.broadcast %21 : vector<8x4x1xf32> to vector<8x4x4xf32>
    %23 = arith.subf %19, %22 : vector<8x4x4xf32>
    %24 = math.exp %23 : vector<8x4x4xf32>
    %cst_9 = arith.constant dense<0.000000e+00> : vector<8x4xf32>
    %25 = vector.multi_reduction <add>, %24, %cst_9 [2] : vector<8x4x4xf32> to vector<8x4xf32>
    %26 = vector.shape_cast %25 : vector<8x4xf32> to vector<8x4x1xf32>
    %27 = tpu.reciprocal %26 {approx = true} : vector<8x4x1xf32> -> vector<8x4x1xf32>
    %28 = vector.broadcast %27 : vector<8x4x1xf32> to vector<8x4x4xf32>
    %29 = arith.mulf %24, %28 : vector<8x4x4xf32>
    %30 = vector.extract_strided_slice %5 {offsets = [0, 0, 0], sizes = [8, 4, 6], strides = [1, 1, 1]} : vector<8x4x24xf32> to vector<8x4x6xf32>
    %31 = arith.truncf %29 : vector<8x4x4xf32> to vector<8x4x4xbf16>
    %32 = arith.truncf %30 : vector<8x4x6xf32> to vector<8x4x6xbf16>
    "tpu.trace_start"() <{level = 10 : i32, message = "nij,njd->nid"}> : () -> ()
    %cst_10 = arith.constant dense<0.000000e+00> : vector<8x4x6xf32>
    %33 = tpu.matmul %31, %32, %cst_10 {dimension_numbers = #tpu.dot_dimension_numbers<[2], [1], [1], [2], [0, 0, 0, 1, 1, 2], [0], [0]>} : vector<8x4x4xbf16>, vector<8x4x6xbf16>, vector<8x4x6xf32> -> vector<8x4x6xf32>
    "tpu.trace_stop"() : () -> ()
    %34 = vector.extract_strided_slice %6 {offsets = [0, 0, 1], sizes = [8, 4, 1], strides = [1, 1, 1]} : vector<8x4x4xf32> to vector<8x4x1xf32>
    %cst_11 = arith.constant dense<0.000000e+00> : vector<8x4xf32>
    %35 = vector.multi_reduction <add>, %34, %cst_11 [2] : vector<8x4x1xf32> to vector<8x4xf32>
    %36 = vector.extract_strided_slice %7 {offsets = [0, 0, 1], sizes = [8, 4, 1], strides = [1, 1, 1]} : vector<8x4x4xf32> to vector<8x4x1xf32>
    %cst_12 = arith.constant dense<0.000000e+00> : vector<8x4xf32>
    %37 = vector.multi_reduction <add>, %36, %cst_12 [2] : vector<8x4x1xf32> to vector<8x4xf32>
    %38 = vector.shape_cast %35 : vector<8x4xf32> to vector<8x4x1xf32>
    %39 = vector.shape_cast %37 : vector<8x4xf32> to vector<8x1x4xf32>
    %40 = vector.broadcast %38 : vector<8x4x1xf32> to vector<8x4x4xf32>
    %41 = vector.broadcast %39 : vector<8x1x4xf32> to vector<8x4x4xf32>
    %42 = arith.addf %40, %41 : vector<8x4x4xf32>
    %cst_13 = arith.constant 2.000000e-01 : f32
    %43 = vector.broadcast %cst_13 : f32 to vector<8x4x4xf32>
    %44 = arith.mulf %43, %42 : vector<8x4x4xf32>
    %45 = arith.maximumf %42, %44 : vector<8x4x4xf32>
    %cst_14 = arith.constant dense<0xFF800000> : vector<8x4xf32>
    %46 = vector.multi_reduction <maximumf>, %45, %cst_14 [2] : vector<8x4x4xf32> to vector<8x4xf32>
    %47 = vector.shape_cast %46 : vector<8x4xf32> to vector<8x4x1xf32>
    %48 = vector.broadcast %47 : vector<8x4x1xf32> to vector<8x4x4xf32>
    %49 = arith.subf %45, %48 : vector<8x4x4xf32>
    %50 = math.exp %49 : vector<8x4x4xf32>
    %cst_15 = arith.constant dense<0.000000e+00> : vector<8x4xf32>
    %51 = vector.multi_reduction <add>, %50, %cst_15 [2] : vector<8x4x4xf32> to vector<8x4xf32>
    %52 = vector.shape_cast %51 : vector<8x4xf32> to vector<8x4x1xf32>
    %53 = tpu.reciprocal %52 {approx = true} : vector<8x4x1xf32> -> vector<8x4x1xf32>
    %54 = vector.broadcast %53 : vector<8x4x1xf32> to vector<8x4x4xf32>
    %55 = arith.mulf %50, %54 : vector<8x4x4xf32>
    %56 = vector.extract_strided_slice %5 {offsets = [0, 0, 6], sizes = [8, 4, 6], strides = [1, 1, 1]} : vector<8x4x24xf32> to vector<8x4x6xf32>
    %57 = arith.truncf %55 : vector<8x4x4xf32> to vector<8x4x4xbf16>
    %58 = arith.truncf %56 : vector<8x4x6xf32> to vector<8x4x6xbf16>
    "tpu.trace_start"() <{level = 10 : i32, message = "nij,njd->nid"}> : () -> ()
    %cst_16 = arith.constant dense<0.000000e+00> : vector<8x4x6xf32>
    %59 = tpu.matmul %57, %58, %cst_16 {dimension_numbers = #tpu.dot_dimension_numbers<[2], [1], [1], [2], [0, 0, 0, 1, 1, 2], [0], [0]>} : vector<8x4x4xbf16>, vector<8x4x6xbf16>, vector<8x4x6xf32> -> vector<8x4x6xf32>
    "tpu.trace_stop"() : () -> ()
    %60 = arith.addf %33, %59 : vector<8x4x6xf32>
    %61 = vector.extract_strided_slice %6 {offsets = [0, 0, 2], sizes = [8, 4, 1], strides = [1, 1, 1]} : vector<8x4x4xf32> to vector<8x4x1xf32>
    %cst_17 = arith.constant dense<0.000000e+00> : vector<8x4xf32>
    %62 = vector.multi_reduction <add>, %61, %cst_17 [2] : vector<8x4x1xf32> to vector<8x4xf32>
    %63 = vector.extract_strided_slice %7 {offsets = [0, 0, 2], sizes = [8, 4, 1], strides = [1, 1, 1]} : vector<8x4x4xf32> to vector<8x4x1xf32>
    %cst_18 = arith.constant dense<0.000000e+00> : vector<8x4xf32>
    %64 = vector.multi_reduction <add>, %63, %cst_18 [2] : vector<8x4x1xf32> to vector<8x4xf32>
    %65 = vector.shape_cast %62 : vector<8x4xf32> to vector<8x4x1xf32>
    %66 = vector.shape_cast %64 : vector<8x4xf32> to vector<8x1x4xf32>
    %67 = vector.broadcast %65 : vector<8x4x1xf32> to vector<8x4x4xf32>
    %68 = vector.broadcast %66 : vector<8x1x4xf32> to vector<8x4x4xf32>
    %69 = arith.addf %67, %68 : vector<8x4x4xf32>
    %cst_19 = arith.constant 2.000000e-01 : f32
    %70 = vector.broadcast %cst_19 : f32 to vector<8x4x4xf32>
    %71 = arith.mulf %70, %69 : vector<8x4x4xf32>
    %72 = arith.maximumf %69, %71 : vector<8x4x4xf32>
    %cst_20 = arith.constant dense<0xFF800000> : vector<8x4xf32>
    %73 = vector.multi_reduction <maximumf>, %72, %cst_20 [2] : vector<8x4x4xf32> to vector<8x4xf32>
    %74 = vector.shape_cast %73 : vector<8x4xf32> to vector<8x4x1xf32>
    %75 = vector.broadcast %74 : vector<8x4x1xf32> to vector<8x4x4xf32>
    %76 = arith.subf %72, %75 : vector<8x4x4xf32>
    %77 = math.exp %76 : vector<8x4x4xf32>
    %cst_21 = arith.constant dense<0.000000e+00> : vector<8x4xf32>
    %78 = vector.multi_reduction <add>, %77, %cst_21 [2] : vector<8x4x4xf32> to vector<8x4xf32>
    %79 = vector.shape_cast %78 : vector<8x4xf32> to vector<8x4x1xf32>
    %80 = tpu.reciprocal %79 {approx = true} : vector<8x4x1xf32> -> vector<8x4x1xf32>
    %81 = vector.broadcast %80 : vector<8x4x1xf32> to vector<8x4x4xf32>
    %82 = arith.mulf %77, %81 : vector<8x4x4xf32>
    %83 = vector.extract_strided_slice %5 {offsets = [0, 0, 12], sizes = [8, 4, 6], strides = [1, 1, 1]} : vector<8x4x24xf32> to vector<8x4x6xf32>
    %84 = arith.truncf %82 : vector<8x4x4xf32> to vector<8x4x4xbf16>
    %85 = arith.truncf %83 : vector<8x4x6xf32> to vector<8x4x6xbf16>
    "tpu.trace_start"() <{level = 10 : i32, message = "nij,njd->nid"}> : () -> ()
    %cst_22 = arith.constant dense<0.000000e+00> : vector<8x4x6xf32>
    %86 = tpu.matmul %84, %85, %cst_22 {dimension_numbers = #tpu.dot_dimension_numbers<[2], [1], [1], [2], [0, 0, 0, 1, 1, 2], [0], [0]>} : vector<8x4x4xbf16>, vector<8x4x6xbf16>, vector<8x4x6xf32> -> vector<8x4x6xf32>
    "tpu.trace_stop"() : () -> ()
    %87 = arith.addf %60, %86 : vector<8x4x6xf32>
    %88 = vector.extract_strided_slice %6 {offsets = [0, 0, 3], sizes = [8, 4, 1], strides = [1, 1, 1]} : vector<8x4x4xf32> to vector<8x4x1xf32>
    %cst_23 = arith.constant dense<0.000000e+00> : vector<8x4xf32>
    %89 = vector.multi_reduction <add>, %88, %cst_23 [2] : vector<8x4x1xf32> to vector<8x4xf32>
    %90 = vector.extract_strided_slice %7 {offsets = [0, 0, 3], sizes = [8, 4, 1], strides = [1, 1, 1]} : vector<8x4x4xf32> to vector<8x4x1xf32>
    %cst_24 = arith.constant dense<0.000000e+00> : vector<8x4xf32>
    %91 = vector.multi_reduction <add>, %90, %cst_24 [2] : vector<8x4x1xf32> to vector<8x4xf32>
    %92 = vector.shape_cast %89 : vector<8x4xf32> to vector<8x4x1xf32>
    %93 = vector.shape_cast %91 : vector<8x4xf32> to vector<8x1x4xf32>
    %94 = vector.broadcast %92 : vector<8x4x1xf32> to vector<8x4x4xf32>
    %95 = vector.broadcast %93 : vector<8x1x4xf32> to vector<8x4x4xf32>
    %96 = arith.addf %94, %95 : vector<8x4x4xf32>
    %cst_25 = arith.constant 2.000000e-01 : f32
    %97 = vector.broadcast %cst_25 : f32 to vector<8x4x4xf32>
    %98 = arith.mulf %97, %96 : vector<8x4x4xf32>
    %99 = arith.maximumf %96, %98 : vector<8x4x4xf32>
    %cst_26 = arith.constant dense<0xFF800000> : vector<8x4xf32>
    %100 = vector.multi_reduction <maximumf>, %99, %cst_26 [2] : vector<8x4x4xf32> to vector<8x4xf32>
    %101 = vector.shape_cast %100 : vector<8x4xf32> to vector<8x4x1xf32>
    %102 = vector.broadcast %101 : vector<8x4x1xf32> to vector<8x4x4xf32>
    %103 = arith.subf %99, %102 : vector<8x4x4xf32>
    %104 = math.exp %103 : vector<8x4x4xf32>
    %cst_27 = arith.constant dense<0.000000e+00> : vector<8x4xf32>
    %105 = vector.multi_reduction <add>, %104, %cst_27 [2] : vector<8x4x4xf32> to vector<8x4xf32>
    %106 = vector.shape_cast %105 : vector<8x4xf32> to vector<8x4x1xf32>
    %107 = tpu.reciprocal %106 {approx = true} : vector<8x4x1xf32> -> vector<8x4x1xf32>
    %108 = vector.broadcast %107 : vector<8x4x1xf32> to vector<8x4x4xf32>
    %109 = arith.mulf %104, %108 : vector<8x4x4xf32>
    %110 = vector.extract_strided_slice %5 {offsets = [0, 0, 18], sizes = [8, 4, 6], strides = [1, 1, 1]} : vector<8x4x24xf32> to vector<8x4x6xf32>
    %111 = arith.truncf %109 : vector<8x4x4xf32> to vector<8x4x4xbf16>
    %112 = arith.truncf %110 : vector<8x4x6xf32> to vector<8x4x6xbf16>
    "tpu.trace_start"() <{level = 10 : i32, message = "nij,njd->nid"}> : () -> ()
    %cst_28 = arith.constant dense<0.000000e+00> : vector<8x4x6xf32>
    %113 = tpu.matmul %111, %112, %cst_28 {dimension_numbers = #tpu.dot_dimension_numbers<[2], [1], [1], [2], [0, 0, 0, 1, 1, 2], [0], [0]>} : vector<8x4x4xbf16>, vector<8x4x6xbf16>, vector<8x4x6xf32> -> vector<8x4x6xf32>
    "tpu.trace_stop"() : () -> ()
    %114 = arith.addf %87, %113 : vector<8x4x6xf32>
    %cst_29 = arith.constant 2.500000e-01 : f32
    %115 = vector.broadcast %cst_29 : f32 to vector<8x4x6xf32>
    %116 = arith.mulf %114, %115 : vector<8x4x6xf32>
    %c8_i32 = arith.constant 8 : i32
    %117 = arith.muli %arg0, %c8_i32 : i32
    %c8_i32_30 = arith.constant 8 : i32
    %118 = arith.muli %arg1, %c8_i32_30 : i32
    %119 = arith.addi %117, %118 : i32
    %120 = tpu.iota {dimensions = array<i32: 0>} : vector<8x1x1xi32>
    %121 = vector.broadcast %119 : i32 to vector<8x1x1xi32>
    %122 = arith.addi %121, %120 : vector<8x1x1xi32>
    %c2_i32 = arith.constant 2 : i32
    %c0_i32 = arith.constant 0 : i32
    %123 = arith.cmpi eq, %c2_i32, %c0_i32 : i32
    %c1_i32 = arith.constant 1 : i32
    %124 = arith.select %123, %c1_i32, %c2_i32 : i32
    %125 = vector.broadcast %124 : i32 to vector<8x1x1xi32>
    %126 = arith.remsi %122, %125 : vector<8x1x1xi32>
    %c0_i32_31 = arith.constant 0 : i32
    %127 = vector.broadcast %c0_i32_31 : i32 to vector<8x1x1xi32>
    %128 = arith.cmpi ne, %126, %127 : vector<8x1x1xi32>
    %c0_i32_32 = arith.constant 0 : i32
    %129 = vector.broadcast %c0_i32_32 : i32 to vector<8x1x1xi32>
    %130 = arith.cmpi slt, %126, %129 : vector<8x1x1xi32>
    %c0_i32_33 = arith.constant 0 : i32
    %131 = arith.cmpi slt, %124, %c0_i32_33 : i32
    %132 = vector.broadcast %131 : i1 to vector<8x1x1xi1>
    %133 = vector.broadcast %132 : vector<8x1x1xi1> to vector<8x1x1xi1>
    %134 = arith.xori %130, %133 : vector<8x1x1xi1>
    %135 = arith.andi %134, %128 : vector<8x1x1xi1>
    %136 = vector.broadcast %124 : i32 to vector<8x1x1xi32>
    %137 = arith.addi %126, %136 : vector<8x1x1xi32>
    %138 = arith.select %135, %137, %126 : vector<8x1x1xi1>, vector<8x1x1xi32>
    %cst_34 = arith.constant 0.000000e+00 : f32
    %139 = vector.broadcast %cst_34 : f32 to vector<8x4x4xf32>
    %c0_i32_35 = arith.constant 0 : i32
    %140 = vector.broadcast %c0_i32_35 : i32 to vector<8x1x1xi32>
    %141 = arith.cmpi eq, %138, %140 : vector<8x1x1xi32>
    %c0_36 = arith.constant 0 : index
    %c0_37 = arith.constant 0 : index
    %c0_38 = arith.constant 0 : index
    %142 = vector.load %arg4[%c0_36, %c0_37, %c0_38] : memref<2x4x4xf32, #tpu.memory_space<vmem>>, vector<1x4x4xf32>
    %143 = vector.shape_cast %142 : vector<1x4x4xf32> to vector<4x4xf32>
    %144 = vector.shape_cast %143 : vector<4x4xf32> to vector<1x4x4xf32>
    %145 = vector.shape_cast %141 : vector<8x1x1xi1> to vector<8x1x1xi1>
    %146 = vector.broadcast %145 : vector<8x1x1xi1> to vector<8x4x4xi1>
    %147 = vector.shape_cast %144 : vector<1x4x4xf32> to vector<1x4x4xf32>
    %148 = vector.broadcast %147 : vector<1x4x4xf32> to vector<8x4x4xf32>
    %149 = arith.select %146, %148, %139 : vector<8x4x4xi1>, vector<8x4x4xf32>
    %c1_i32_39 = arith.constant 1 : i32
    %150 = vector.broadcast %c1_i32_39 : i32 to vector<8x1x1xi32>
    %151 = arith.cmpi eq, %138, %150 : vector<8x1x1xi32>
    %c1 = arith.constant 1 : index
    %c0_40 = arith.constant 0 : index
    %c0_41 = arith.constant 0 : index
    %152 = vector.load %arg4[%c1, %c0_40, %c0_41] : memref<2x4x4xf32, #tpu.memory_space<vmem>>, vector<1x4x4xf32>
    %153 = vector.shape_cast %152 : vector<1x4x4xf32> to vector<4x4xf32>
    %154 = vector.shape_cast %153 : vector<4x4xf32> to vector<1x4x4xf32>
    %155 = vector.shape_cast %151 : vector<8x1x1xi1> to vector<8x1x1xi1>
    %156 = vector.broadcast %155 : vector<8x1x1xi1> to vector<8x4x4xi1>
    %157 = vector.shape_cast %154 : vector<1x4x4xf32> to vector<1x4x4xf32>
    %158 = vector.broadcast %157 : vector<1x4x4xf32> to vector<8x4x4xf32>
    %159 = arith.select %156, %158, %149 : vector<8x4x4xi1>, vector<8x4x4xf32>
    %160 = arith.truncf %159 : vector<8x4x4xf32> to vector<8x4x4xbf16>
    "tpu.trace_start"() <{level = 10 : i32, message = "nij,njf->nif"}> : () -> ()
    %cst_42 = arith.constant dense<0.000000e+00> : vector<8x4x6xf32>
    %161 = tpu.matmul %160, %2, %cst_42 {dimension_numbers = #tpu.dot_dimension_numbers<[2], [1], [1], [2], [0, 0, 0, 1, 1, 2], [0], [0]>} : vector<8x4x4xbf16>, vector<8x4x6xbf16>, vector<8x4x6xf32> -> vector<8x4x6xf32>
    "tpu.trace_stop"() : () -> ()
    %162 = arith.negf %161 : vector<8x4x6xf32>
    %163 = math.exp %162 : vector<8x4x6xf32>
    %cst_43 = arith.constant 1.000000e+00 : f32
    %164 = vector.broadcast %cst_43 : f32 to vector<8x4x6xf32>
    %165 = arith.addf %164, %163 : vector<8x4x6xf32>
    %166 = arith.divf %164, %165 : vector<8x4x6xf32>
    %167 = arith.mulf %116, %166 : vector<8x4x6xf32>
    %c0_44 = arith.constant 0 : index
    %c0_45 = arith.constant 0 : index
    %c0_46 = arith.constant 0 : index
    %168 = vector.load %arg9[%c0_44, %c0_45, %c0_46] : memref<8x4x6xf32, #tpu.memory_space<vmem>>, vector<8x4x6xf32>
    tpu.vector_store %arg9[%c0_44, %c0_45, %c0_46], %167 {strides = array<i32>} : memref<8x4x6xf32, #tpu.memory_space<vmem>>, vector<8x4x6xf32>,
    %c0_47 = arith.constant 0 : index
    %c0_48 = arith.constant 0 : index
    %169 = vector.load %arg6[%c0_47, %c0_48] : memref<12x6xf32, #tpu.memory_space<vmem>>, vector<12x6xf32>
    %c0_49 = arith.constant 0 : index
    %c0_50 = arith.constant 0 : index
    %170 = vector.load %arg7[%c0_49, %c0_50] : memref<1x6xf32, #tpu.memory_space<vmem>>, vector<1x6xf32>
    %c0_51 = arith.constant 0 : index
    %c0_52 = arith.constant 0 : index
    %c0_53 = arith.constant 0 : index
    %c0_54 = arith.constant 0 : index
    %171 = vector.load %arg2[%c0_51, %c0_52, %c0_53, %c0_54] : memref<1x8x4x6xf32, #tpu.memory_space<vmem>>, vector<1x8x1x6xf32>
    %172 = vector.shape_cast %171 : vector<1x8x1x6xf32> to vector<8x6xf32>
    %c0_55 = arith.constant 0 : index
    %c0_56 = arith.constant 0 : index
    %c0_57 = arith.constant 0 : index
    %c0_58 = arith.constant 0 : index
    %173 = vector.load %arg3[%c0_55, %c0_56, %c0_57, %c0_58] : memref<1x4x8x6xf32, #tpu.memory_space<vmem>>, vector<1x1x8x6xf32>
    %174 = vector.shape_cast %173 : vector<1x1x8x6xf32> to vector<8x6xf32>
    %175 = arith.addf %172, %174 : vector<8x6xf32>
    %c0_59 = arith.constant 0 : index
    %c0_60 = arith.constant 0 : index
    %c0_61 = arith.constant 0 : index
    %176 = vector.load %arg9[%c0_59, %c0_60, %c0_61] : memref<8x4x6xf32, #tpu.memory_space<vmem>>, vector<8x1x6xf32>
    %177 = vector.shape_cast %176 : vector<8x1x6xf32> to vector<8x6xf32>
    %178 = arith.addf %172, %177 : vector<8x6xf32>
    %179 = tpu.concatenate %175, %178 in 1 : vector<8x6xf32>, vector<8x6xf32> -> vector<8x12xf32>
    %cst_62 = arith.constant dense<0.000000e+00> : vector<8x6xf32>
    %180 = tpu.matmul %179, %169, %cst_62 {dimension_numbers = #tpu.dot_dimension_numbers<[1], [0], [0], [1], [0, 0, 1, 1], [], []>} : vector<8x12xf32>, vector<12x6xf32>, vector<8x6xf32> -> vector<8x6xf32>
    %181 = vector.broadcast %170 : vector<1x6xf32> to vector<8x6xf32>
    %182 = arith.addf %180, %181 : vector<8x6xf32>
    %183 = arith.negf %182 : vector<8x6xf32>
    %184 = math.exp %183 : vector<8x6xf32>
    %cst_63 = arith.constant 1.000000e+00 : f32
    %185 = vector.broadcast %cst_63 : f32 to vector<8x6xf32>
    %186 = arith.addf %185, %184 : vector<8x6xf32>
    %187 = arith.divf %185, %186 : vector<8x6xf32>
    %188 = arith.mulf %187, %175 : vector<8x6xf32>
    %cst_64 = arith.constant 1.000000e+00 : f32
    %189 = vector.broadcast %cst_64 : f32 to vector<8x6xf32>
    %190 = arith.subf %189, %187 : vector<8x6xf32>
    %191 = arith.mulf %190, %178 : vector<8x6xf32>
    %192 = arith.addf %188, %191 : vector<8x6xf32>
    %193 = arith.addf %192, %172 : vector<8x6xf32>
    %c0_65 = arith.constant 0 : index
    %c0_66 = arith.constant 0 : index
    %c0_67 = arith.constant 0 : index
    %c0_68 = arith.constant 0 : index
    %194 = vector.load %arg8[%c0_65, %c0_66, %c0_67, %c0_68] : memref<1x4x8x6xf32, #tpu.memory_space<vmem>>, vector<1x1x8x6xf32>
    %195 = vector.shape_cast %194 : vector<1x1x8x6xf32> to vector<8x6xf32>
    %196 = vector.shape_cast %193 : vector<8x6xf32> to vector<1x1x8x6xf32>
    tpu.vector_store %arg8[%c0_65, %c0_66, %c0_67, %c0_68], %196 {strides = array<i32>} : memref<1x4x8x6xf32, #tpu.memory_space<vmem>>, vector<1x1x8x6xf32>,
    %c0_69 = arith.constant 0 : index
    %c0_70 = arith.constant 0 : index
    %c1_71 = arith.constant 1 : index
    %c0_72 = arith.constant 0 : index
    %197 = vector.load %arg2[%c0_69, %c0_70, %c1_71, %c0_72] : memref<1x8x4x6xf32, #tpu.memory_space<vmem>>, vector<1x8x1x6xf32>
    %198 = vector.shape_cast %197 : vector<1x8x1x6xf32> to vector<8x6xf32>
    %c0_73 = arith.constant 0 : index
    %c1_74 = arith.constant 1 : index
    %c0_75 = arith.constant 0 : index
    %c0_76 = arith.constant 0 : index
    %199 = vector.load %arg3[%c0_73, %c1_74, %c0_75, %c0_76] : memref<1x4x8x6xf32, #tpu.memory_space<vmem>>, vector<1x1x8x6xf32>
    %200 = vector.shape_cast %199 : vector<1x1x8x6xf32> to vector<8x6xf32>
    %201 = arith.addf %198, %200 : vector<8x6xf32>
    %c0_77 = arith.constant 0 : index
    %c1_78 = arith.constant 1 : index
    %c0_79 = arith.constant 0 : index
    %202 = vector.load %arg9[%c0_77, %c1_78, %c0_79] : memref<8x4x6xf32, #tpu.memory_space<vmem>>, vector<8x1x6xf32>
    %203 = vector.shape_cast %202 : vector<8x1x6xf32> to vector<8x6xf32>
    %204 = arith.addf %198, %203 : vector<8x6xf32>
    %205 = tpu.concatenate %201, %204 in 1 : vector<8x6xf32>, vector<8x6xf32> -> vector<8x12xf32>
    %cst_80 = arith.constant dense<0.000000e+00> : vector<8x6xf32>
    %206 = tpu.matmul %205, %169, %cst_80 {dimension_numbers = #tpu.dot_dimension_numbers<[1], [0], [0], [1], [0, 0, 1, 1], [], []>} : vector<8x12xf32>, vector<12x6xf32>, vector<8x6xf32> -> vector<8x6xf32>
    %207 = vector.broadcast %170 : vector<1x6xf32> to vector<8x6xf32>
    %208 = arith.addf %206, %207 : vector<8x6xf32>
    %209 = arith.negf %208 : vector<8x6xf32>
    %210 = math.exp %209 : vector<8x6xf32>
    %cst_81 = arith.constant 1.000000e+00 : f32
    %211 = vector.broadcast %cst_81 : f32 to vector<8x6xf32>
    %212 = arith.addf %211, %210 : vector<8x6xf32>
    %213 = arith.divf %211, %212 : vector<8x6xf32>
    %214 = arith.mulf %213, %201 : vector<8x6xf32>
    %cst_82 = arith.constant 1.000000e+00 : f32
    %215 = vector.broadcast %cst_82 : f32 to vector<8x6xf32>
    %216 = arith.subf %215, %213 : vector<8x6xf32>
    %217 = arith.mulf %216, %204 : vector<8x6xf32>
    %218 = arith.addf %214, %217 : vector<8x6xf32>
    %219 = arith.addf %218, %198 : vector<8x6xf32>
    %c0_83 = arith.constant 0 : index
    %c1_84 = arith.constant 1 : index
    %c0_85 = arith.constant 0 : index
    %c0_86 = arith.constant 0 : index
    %220 = vector.load %arg8[%c0_83, %c1_84, %c0_85, %c0_86] : memref<1x4x8x6xf32, #tpu.memory_space<vmem>>, vector<1x1x8x6xf32>
    %221 = vector.shape_cast %220 : vector<1x1x8x6xf32> to vector<8x6xf32>
    %222 = vector.shape_cast %219 : vector<8x6xf32> to vector<1x1x8x6xf32>
    tpu.vector_store %arg8[%c0_83, %c1_84, %c0_85, %c0_86], %222 {strides = array<i32>} : memref<1x4x8x6xf32, #tpu.memory_space<vmem>>, vector<1x1x8x6xf32>,
    %c0_87 = arith.constant 0 : index
    %c0_88 = arith.constant 0 : index
    %c2 = arith.constant 2 : index
    %c0_89 = arith.constant 0 : index
    %223 = vector.load %arg2[%c0_87, %c0_88, %c2, %c0_89] : memref<1x8x4x6xf32, #tpu.memory_space<vmem>>, vector<1x8x1x6xf32>
    %224 = vector.shape_cast %223 : vector<1x8x1x6xf32> to vector<8x6xf32>
    %c0_90 = arith.constant 0 : index
    %c2_91 = arith.constant 2 : index
    %c0_92 = arith.constant 0 : index
    %c0_93 = arith.constant 0 : index
    %225 = vector.load %arg3[%c0_90, %c2_91, %c0_92, %c0_93] : memref<1x4x8x6xf32, #tpu.memory_space<vmem>>, vector<1x1x8x6xf32>
    %226 = vector.shape_cast %225 : vector<1x1x8x6xf32> to vector<8x6xf32>
    %227 = arith.addf %224, %226 : vector<8x6xf32>
    %c0_94 = arith.constant 0 : index
    %c2_95 = arith.constant 2 : index
    %c0_96 = arith.constant 0 : index
    %228 = vector.load %arg9[%c0_94, %c2_95, %c0_96] : memref<8x4x6xf32, #tpu.memory_space<vmem>>, vector<8x1x6xf32>
    %229 = vector.shape_cast %228 : vector<8x1x6xf32> to vector<8x6xf32>
    %230 = arith.addf %224, %229 : vector<8x6xf32>
    %231 = tpu.concatenate %227, %230 in 1 : vector<8x6xf32>, vector<8x6xf32> -> vector<8x12xf32>
    %cst_97 = arith.constant dense<0.000000e+00> : vector<8x6xf32>
    %232 = tpu.matmul %231, %169, %cst_97 {dimension_numbers = #tpu.dot_dimension_numbers<[1], [0], [0], [1], [0, 0, 1, 1], [], []>} : vector<8x12xf32>, vector<12x6xf32>, vector<8x6xf32> -> vector<8x6xf32>
    %233 = vector.broadcast %170 : vector<1x6xf32> to vector<8x6xf32>
    %234 = arith.addf %232, %233 : vector<8x6xf32>
    %235 = arith.negf %234 : vector<8x6xf32>
    %236 = math.exp %235 : vector<8x6xf32>
    %cst_98 = arith.constant 1.000000e+00 : f32
    %237 = vector.broadcast %cst_98 : f32 to vector<8x6xf32>
    %238 = arith.addf %237, %236 : vector<8x6xf32>
    %239 = arith.divf %237, %238 : vector<8x6xf32>
    %240 = arith.mulf %239, %227 : vector<8x6xf32>
    %cst_99 = arith.constant 1.000000e+00 : f32
    %241 = vector.broadcast %cst_99 : f32 to vector<8x6xf32>
    %242 = arith.subf %241, %239 : vector<8x6xf32>
    %243 = arith.mulf %242, %230 : vector<8x6xf32>
    %244 = arith.addf %240, %243 : vector<8x6xf32>
    %245 = arith.addf %244, %224 : vector<8x6xf32>
    %c0_100 = arith.constant 0 : index
    %c2_101 = arith.constant 2 : index
    %c0_102 = arith.constant 0 : index
    %c0_103 = arith.constant 0 : index
    %246 = vector.load %arg8[%c0_100, %c2_101, %c0_102, %c0_103] : memref<1x4x8x6xf32, #tpu.memory_space<vmem>>, vector<1x1x8x6xf32>
    %247 = vector.shape_cast %246 : vector<1x1x8x6xf32> to vector<8x6xf32>
    %248 = vector.shape_cast %245 : vector<8x6xf32> to vector<1x1x8x6xf32>
    tpu.vector_store %arg8[%c0_100, %c2_101, %c0_102, %c0_103], %248 {strides = array<i32>} : memref<1x4x8x6xf32, #tpu.memory_space<vmem>>, vector<1x1x8x6xf32>,
    %c0_104 = arith.constant 0 : index
    %c0_105 = arith.constant 0 : index
    %c3 = arith.constant 3 : index
    %c0_106 = arith.constant 0 : index
    %249 = vector.load %arg2[%c0_104, %c0_105, %c3, %c0_106] : memref<1x8x4x6xf32, #tpu.memory_space<vmem>>, vector<1x8x1x6xf32>
    %250 = vector.shape_cast %249 : vector<1x8x1x6xf32> to vector<8x6xf32>
    %c0_107 = arith.constant 0 : index
    %c3_108 = arith.constant 3 : index
    %c0_109 = arith.constant 0 : index
    %c0_110 = arith.constant 0 : index
    %251 = vector.load %arg3[%c0_107, %c3_108, %c0_109, %c0_110] : memref<1x4x8x6xf32, #tpu.memory_space<vmem>>, vector<1x1x8x6xf32>
    %252 = vector.shape_cast %251 : vector<1x1x8x6xf32> to vector<8x6xf32>
    %253 = arith.addf %250, %252 : vector<8x6xf32>
    %c0_111 = arith.constant 0 : index
    %c3_112 = arith.constant 3 : index
    %c0_113 = arith.constant 0 : index
    %254 = vector.load %arg9[%c0_111, %c3_112, %c0_113] : memref<8x4x6xf32, #tpu.memory_space<vmem>>, vector<8x1x6xf32>
    %255 = vector.shape_cast %254 : vector<8x1x6xf32> to vector<8x6xf32>
    %256 = arith.addf %250, %255 : vector<8x6xf32>
    %257 = tpu.concatenate %253, %256 in 1 : vector<8x6xf32>, vector<8x6xf32> -> vector<8x12xf32>
    %cst_114 = arith.constant dense<0.000000e+00> : vector<8x6xf32>
    %258 = tpu.matmul %257, %169, %cst_114 {dimension_numbers = #tpu.dot_dimension_numbers<[1], [0], [0], [1], [0, 0, 1, 1], [], []>} : vector<8x12xf32>, vector<12x6xf32>, vector<8x6xf32> -> vector<8x6xf32>
    %259 = vector.broadcast %170 : vector<1x6xf32> to vector<8x6xf32>
    %260 = arith.addf %258, %259 : vector<8x6xf32>
    %261 = arith.negf %260 : vector<8x6xf32>
    %262 = math.exp %261 : vector<8x6xf32>
    %cst_115 = arith.constant 1.000000e+00 : f32
    %263 = vector.broadcast %cst_115 : f32 to vector<8x6xf32>
    %264 = arith.addf %263, %262 : vector<8x6xf32>
    %265 = arith.divf %263, %264 : vector<8x6xf32>
    %266 = arith.mulf %265, %253 : vector<8x6xf32>
    %cst_116 = arith.constant 1.000000e+00 : f32
    %267 = vector.broadcast %cst_116 : f32 to vector<8x6xf32>
    %268 = arith.subf %267, %265 : vector<8x6xf32>
    %269 = arith.mulf %268, %256 : vector<8x6xf32>
    %270 = arith.addf %266, %269 : vector<8x6xf32>
    %271 = arith.addf %270, %250 : vector<8x6xf32>
    %c0_117 = arith.constant 0 : index
    %c3_118 = arith.constant 3 : index
    %c0_119 = arith.constant 0 : index
    %c0_120 = arith.constant 0 : index
    %272 = vector.load %arg8[%c0_117, %c3_118, %c0_119, %c0_120] : memref<1x4x8x6xf32, #tpu.memory_space<vmem>>, vector<1x1x8x6xf32>
    %273 = vector.shape_cast %272 : vector<1x1x8x6xf32> to vector<8x6xf32>
    %274 = vector.shape_cast %271 : vector<8x6xf32> to vector<1x1x8x6xf32>
    tpu.vector_store %arg8[%c0_117, %c3_118, %c0_119, %c0_120], %274 {strides = array<i32>} : memref<1x4x8x6xf32, #tpu.memory_space<vmem>>, vector<1x1x8x6xf32>,
    return
  }
  func.func @transform_0(%arg0: i32, %arg1: i32) -> (i32, i32, i32, i32) {
    %c0_i32 = arith.constant 0 : i32
    %c0_i32_0 = arith.constant 0 : i32
    %c0_i32_1 = arith.constant 0 : i32
    return %arg0, %arg1, %c0_i32, %c0_i32_0 : i32, i32, i32, i32
  }
  func.func @transform_1(%arg0: i32, %arg1: i32) -> (i32, i32, i32, i32) {
    %c0_i32 = arith.constant 0 : i32
    %c0_i32_0 = arith.constant 0 : i32
    %c0_i32_1 = arith.constant 0 : i32
    return %arg0, %c0_i32, %arg1, %c0_i32_0 : i32, i32, i32, i32
  }
  func.func @transform_2(%arg0: i32, %arg1: i32) -> (i32, i32, i32) {
    %c0_i32 = arith.constant 0 : i32
    %c0_i32_0 = arith.constant 0 : i32
    %c0_i32_1 = arith.constant 0 : i32
    %c0_i32_2 = arith.constant 0 : i32
    return %c0_i32, %c0_i32_0, %c0_i32_1 : i32, i32, i32
  }
  func.func @transform_3(%arg0: i32, %arg1: i32) -> (i32, i32) {
    %c0_i32 = arith.constant 0 : i32
    %c0_i32_0 = arith.constant 0 : i32
    %c0_i32_1 = arith.constant 0 : i32
    return %c0_i32, %c0_i32_0 : i32, i32
  }
  func.func @transform_4(%arg0: i32, %arg1: i32) -> (i32, i32) {
    %c0_i32 = arith.constant 0 : i32
    %c0_i32_0 = arith.constant 0 : i32
    %c0_i32_1 = arith.constant 0 : i32
    return %c0_i32, %c0_i32_0 : i32, i32
  }
  func.func @transform_5(%arg0: i32, %arg1: i32) -> (i32, i32) {
    %c0_i32 = arith.constant 0 : i32
    %c0_i32_0 = arith.constant 0 : i32
    %c0_i32_1 = arith.constant 0 : i32
    return %c0_i32, %c0_i32_0 : i32, i32
  }
  func.func @transform_6(%arg0: i32, %arg1: i32) -> (i32, i32, i32, i32) {
    %c0_i32 = arith.constant 0 : i32
    %c0_i32_0 = arith.constant 0 : i32
    %c0_i32_1 = arith.constant 0 : i32
    return %arg0, %c0_i32, %arg1, %c0_i32_0 : i32, i32, i32, i32
  }
}

</mosaic_0001>

<bundles_post_ra>
// kernel: encoder_layer_forward.3
= control target key start
LH: loop header
LB: loop body
LE: loop exit
PB: predicated region body
PF: predicated region fallthrough
CT: control target
= control target key end

     0   :  { %9 = vsyncpa [#allocation3], 0  ;;  %s1108_s0 = inlined_call_operand.hbm [shape: f32[2,8,6], index: 0, kind: input, shape index: {}]   ;;  %s1109_s1 = inlined_call_operand.hbm [shape: f32[2,4,6], index: 1, kind: input, shape index: {}]   ;;  %s1110_s2 = inlined_call_operand.hbm [shape: f32[2,8,8], index: 2, kind: output, shape index: {0}]   ;;  %s1111_s3 = inlined_call_operand.hbm [shape: f32[2,4,4], index: 3, kind: output, shape index: {1}]  }
   0x1   :  { %11 = vsyncpa [#allocation3 + $0x1], 0 }
   0x2   :  { %12 = vsyncpa [#allocation6], 0 }
   0x3   :  { %14 = vsyncpa [#allocation6 + $0x1], 0 }
   0x4   :  { %15 = vsyncpa [#allocation4], 0 }
   0x5   :  { %17 = vsyncpa [#allocation4 + $0x1], 0 }
   0x6   :  { %18 = vsyncpa [#allocation9], 0 }
   0x7   :  { %20 = vsyncpa [#allocation9 + $0x1], 0  ;;  %s866_s12 = smov 0   ;;  %s868_s13 = smov 0  }
   0x8   :  { %s870_s14 = smov 0   ;;  %s872_s15 = smov 0  }
   0x9 LB: > { %s887_s16 = sadd.s32 4294967295, %s838_s15   ;;  %s574_s17 = sadd.s32 4294967294, %s838_s15   ;;  %s838_s15 = sphi %s872_s15, %s1130_s15   ;;  %s834_s14 = sphi %s870_s14, %s1129_s14   ;;  %s830_s13 = sphi %s868_s13, %s1128_s13   ;;  %s826_s12 = sphi %s866_s12, %s1127_s12  }
   0xa   : > { %s891_s18 = sadd.s32 1, %s838_s15   ;;  %s33_s19 = sadd.s32 1, %s834_s14 }
   0xb   : > { %s30_s20 = ssub.s32 %s838_s15, %s891_s18  ;;  %p40_p0 = scmp.ne.s32.totalorder %s834_s14, %s830_s13 }
   0xc   : > { %p31_p1 = scmp.eq.s32.totalorder %s30_s20, 0  ;;  %p41_p2 = scmp.eq.s32.totalorder %s838_s15, 0 }
   0xd   : > { %p46_p3 = scmp.ne.s32.totalorder %s830_s13, %s826_s12  ;;  %p47_p4 = scmp.eq.s32.totalorder %s887_s16, 0 }
   0xe   : > { %s903_s21 = scalar_select %p31_p1, %s834_s14, %s33_s19  }
   0xf   : > { %p905_p5 = por %p41_p2, %p40_p0  ;;  %p909_p6 = por %p47_p4, %p46_p3 }
  0x10   : > { %p96_p7 = scmp.eq.s32.totalorder %s887_s16, 1  ;;  %p102_p8 = scmp.eq.s32.totalorder %s574_s17, 1 }
  0x11   : > { %s1115_s23 = scalar_select %p909_p6, 1, 0 }
  0x12   : > { %p632_p10 = scmp.lt.s32.totalorder %s838_s15, 2  ;;  %p916_p11 = por %p96_p7, %p40_p0 }
  0x13   : > { %p920_p12 = por %p102_p8, %p46_p3  ;;  %s925_s26 = sand.u32 1, %s834_s14  }
  0x14   : > { %s1116_s24 = scalar_select %p916_p11, 1, 0 }
  0x15   : > { %s1117_s25 = scalar_select %p920_p12, 1, 0 }
  0x16   : > { %s578_s27 = sshll.u32 %s838_s15, 7  ;;  %s577_s28 = sshll.u32 %s925_s26, 3 }
  0x17   : > { %s932_s4 = scalar_lea.hbm %s1108_s0, %s578_s27  ;;  %s152_s5 = scalar_lea.vmem [#allocation2], %s577_s28 }
  0x18   : > { %s159_s6 = sshll.u32 %s152_s5, 4  ;;  %p936_p13 = pnand %p632_p10, %p905_p5  ;;  %s940_s6 = int_to_ptr.vmem [resolvable:$true] %s159_s6 }
  0x19   : > { %s149_s8 = scalar_lea.sflag [#allocation3], %s925_s26  ;;  %s676_s9 = scalar_lea.hbm %s932_s4, 128 }
  0x1a   : > { %p677_p2 = scmp.ne.s32.totalorder %s932_s4, %s676_s9  ;;  %p678_p3 = pneg %p936_p13 }
  0x1b   : > { %s681_s17 = scalar_lea.hbm %s1108_s0, 256  ;;  %p682_p5 = scmp.lt.u32.totalorder %s932_s4, %s1108_s0 }
  0x1c   : > { %p679_p4 = pnand %p678_p3, %p677_p2  ;;  %p683_p8 = scmp.lt.u32.totalorder %s681_s17, %s676_s9 }
  0x1d   : > { %p685_p9 = scmp.lt.u32.totalorder %s676_s9, %s932_s4 }
  0x1e   : > { %p680_p7 = pneg %p679_p4  ;;  %p684_p10 = por %p683_p8, %p682_p5 }
  0x20   : > { %p686_p0 = por %p685_p9, %p684_p10 }
  0x22   : > { %p687_p1 = pnand %p686_p0, %p680_p7 }
  0x24   : > { %690 = shalt.err (!%p687_p1)
}
  0x25   : > { %s691_s22 = scalar_lea.vmem %s940_s6, 128  ;;  %s840_s27 = smov [#allocation2]  }
  0x26   : > { %p692_p2 = scmp.ne.s32.totalorder %s940_s6, %s691_s22  ;;  %s696_s28 = sshll.u32 %s840_s27, 4  ;;  %s697_s28 = int_to_ptr.vmem [resolvable:$false] %s696_s28 }
  0x27   : > { %s698_s29 = scalar_lea.vmem %s697_s28, 256  ;;  %p699_p11 = scmp.lt.s32.totalorder %s940_s6, %s697_s28 }
  0x28   : > { %p694_p4 = pnand %p692_p2, %p678_p3  ;;  %p700_p5 = scmp.lt.s32.totalorder %s698_s29, %s691_s22 }
  0x2a   : > { %p695_p12 = pneg %p694_p4  ;;  %p701_p8 = por %p700_p5, %p699_p11 }
  0x2c   : > { %p702_p9 = pnand %p701_p8, %p695_p12 }
  0x2e   : > { %705 = shalt.err (!%p702_p9)
}
  0x2f   : > { %621 = dma.hbm_to_vmem [thread:$0]  (!%p936_p13), %s932_s4, 128, %s940_s6, %s149_s8  }
  0x30   : > { %p1119_p0 = scmp.lt.s32.totalorder %s838_s15, 3  ;;  %p1120_p1 = scmp.ge.s32.totalorder %s838_s15, 1 }
  0x31   : > { %s579_s5 = sshll.u32 %s925_s26, 2  ;;  %s580_s9 = sshll.u32 %s838_s15, 6 }
  0x32   : > { %p974_p7 = pnand %p1120_p1, %p1119_p0  ;;  %s983_s17 = scalar_lea.hbm %s1109_s1, %s580_s9 }
  0x33   : > { %s170_s19 = scalar_lea.vmem [#allocation5], %s579_s5  ;;  %s167_s4 = scalar_lea.sflag [#allocation6], %s925_s26 }
  0x34   : > { %s1121_s30 = scalar_select %p974_p7, 1, 0 }
  0x35   : > { %s177_s20 = sshll.u32 %s170_s19, 4  ;;  %s706_s6 = scalar_lea.hbm %s983_s17, 64  ;;  %s178_s20 = int_to_ptr.vmem [resolvable:$true] %s177_s20 }
  0x36   : > { %p707_p11 = scmp.ne.s32.totalorder %s983_s17, %s706_s6  ;;  %s711_s27 = scalar_lea.hbm %s1109_s1, 128 }
  0x37   : > { %p712_p2 = scmp.lt.u32.totalorder %s983_s17, %s1109_s1  ;;  %p713_p4 = scmp.lt.u32.totalorder %s711_s27, %s706_s6 }
  0x38   : > { %p709_p12 = pnand %p707_p11, %p678_p3  ;;  %p715_p8 = scmp.lt.u32.totalorder %s706_s6, %s983_s17 }
  0x39   : > { %p714_p5 = por %p713_p4, %p712_p2 }
  0x3a   : > { %p710_p10 = pneg %p709_p12 }
  0x3b   : > { %p716_p9 = por %p715_p8, %p714_p5 }
  0x3d   : > { %p717_p0 = pnand %p716_p9, %p710_p10 }
  0x3f   : > { %720 = shalt.err (!%p717_p0)
}
  0x40   : > { %s721_s26 = scalar_lea.vmem %s178_s20, 64  ;;  %s841_s5 = smov [#allocation5]  }
  0x41   : > { %p722_p1 = scmp.ne.s32.totalorder %s178_s20, %s721_s26  ;;  %s726_s9 = sshll.u32 %s841_s5, 4  ;;  %s727_s9 = int_to_ptr.vmem [resolvable:$false] %s726_s9 }
  0x42   : > { %s728_s10 = scalar_lea.vmem %s727_s9, 128  ;;  %p729_p6 = scmp.lt.s32.totalorder %s178_s20, %s727_s9 }
  0x43   : > { %p724_p11 = pnand %p722_p1, %p678_p3  ;;  %p730_p7 = scmp.lt.s32.totalorder %s728_s10, %s721_s26 }
  0x45   : > { %p725_p12 = pneg %p724_p11  ;;  %p731_p2 = por %p730_p7, %p729_p6 }
  0x47   : > { %p732_p4 = pnand %p731_p2, %p725_p12 }
  0x49   : > { %735 = shalt.err (!%p732_p4)
}
  0x4a   : > { %624 = dma.hbm_to_vmem [thread:$0]  (!%p936_p13), %s983_s17, 64, %s178_s20, %s167_s4  }
  0x4b   : > { %p1122_p10 = scmp.ne.s32.totalorder %s1121_s30, 0 }
  0x4c   : > { %s1008_s11 = sand.u32 (!%p1122_p10), 1, %s830_s13   ;;  %p1123_p6 = scmp.ne.s32.totalorder (!%p1122_p10), %s1115_s23, 0 }
  0x4d   : > { %186 = sbr.rel (%p1122_p10) target bundleno = 634 (0x27a), region = 28  ;;  %s582_s19 = sshll.u32 (!%p1122_p10), %s1008_s11, 3 }
  0x4e   : > { %s189_s6 = scalar_lea.sflag (!%p1122_p10), [#allocation3], %s1008_s11  ;;  %s192_s8 = scalar_lea.vmem (!%p1122_p10), [#allocation2], %s582_s19 }
  0x54   : > { %809 = dma.done.wait (%p1123_p6), %s189_s6, 128  }
  0x55   : > { %811 = vsyncadd (%p1123_p6), %s189_s6, 4294967168  ;;  %s583_s7 = sshll.u32 %s1008_s11, 2  ;;  %s198_s30 = scalar_lea.sflag [#allocation6], %s1008_s11 }
  0x56   : > { %s201_s17 = scalar_lea.vmem [#allocation5], %s583_s7 }
  0x57   : > { %813 = dma.done.wait (%p1123_p6), %s198_s30, 64  }
  0x58   : > { %815 = vsyncadd (%p1123_p6), %s198_s30, 4294967232  ;;  %v842_v0 = vmov 0.0   ;;  %vm843_vm0 = vmmov 0   ;;  %vm235_vm1 = vcmask 48128   ;;  %v234_v1 = vld [vmem:[%s192_s8] sm:$0xff]  ;;  %vm309_vm2 = vcmask 64512  }
  0x59   : > { %600 = vmatprep.subr.mxu0 %v842_v0  ;;  %602 = vmatprep.mubr.msk.f32.mxu0 %vm843_vm0, %v842_v0  ;;  %v322_v2 = vld [vmem:[%s201_s17] sm:$0xf]  ;;  %vm396_vm3 = vcmask 27648   ;;  %s233_s23 = scalar_lea.vmem [#allocation8], %s583_s7  ;;  %s593_s20 = sshll.u32 %s887_s16, 6 }
  0x5a   : > { %605 = vmatprep.subr.mxu1 %v842_v0  ;;  %607 = vmatprep.mubr.msk.f32.mxu1 %vm843_vm0, %v842_v0  ;;  %s449_s4 = sshll.u32 %s233_s23, 4  ;;  %s1037_s28 = scalar_lea.hbm %s1111_s3, %s593_s20  ;;  %s450_s4 = int_to_ptr.vmem [resolvable:$true] %s449_s4 }
  0x5b   : > { %601 = vmatpush3.xpose.msk.msra.mxu0 %vm235_vm1, %v234_v1  ;;  %606 = vmatpush3.xpose.msk.msra.mxu1 %vm235_vm1, %v322_v2  ;;  %s423_s29 = scalar_lea.sflag [#allocation9], %s1008_s11  ;;  %s736_s26 = scalar_lea.vmem %s450_s4, 64 }
  0x5c   : > { %p737_p13 = scmp.ne.s32.totalorder %s450_s4, %s736_s26  ;;  %p1124_p3 = scmp.ne.s32.totalorder %s1116_s24, 0 }
  0x5d   : > { %s844_s5 = smov [#allocation8]  }
  0x5e   : > { %603 = vmatmul.mubr.msk.f32.vlgmr.msra.gmra.mrb[0].mxu0 %vm235_vm1, %v234_v1  ;;  %608 = vmatmul.mubr.msk.f32.vlgmr.msra.gmra.mrb[0].mxu1 %vm235_vm1, %v322_v2  ;;  %p738_p7 = pnand %p737_p13, %p1124_p3  ;;  %s740_s9 = sshll.u32 %s844_s5, 4  ;;  %s741_s9 = int_to_ptr.vmem [resolvable:$false] %s740_s9 }
  0x5f   : > { %s742_s10 = scalar_lea.vmem %s741_s9, 128  ;;  %p743_p8 = scmp.lt.s32.totalorder %s450_s4, %s741_s9 }
  0x60   : > { %p739_p5 = pneg %p738_p7  ;;  %p744_p9 = scmp.lt.s32.totalorder %s742_s10, %s736_s26 }
  0x62   : > { %p745_p0 = por %p744_p9, %p743_p8 }
  0x64   : > { %p746_p1 = pnand %p745_p0, %p739_p5 }
 0x131   : > { %v305_v3 = vpop.f32.mrb[0].mxu0  ;;  %v392_v6 = vpop.f32.mrb[0].mxu1 }
 0x132   : > { %v604_v4 = vpop.f32.mrb[1].mxu0  ;;  %v310_v5 = vsel %vm309_vm2, %v305_v3, -inf  ;;  %v397_v7 = vsel %vm396_vm3, %v392_v6, -inf  ;;  %v609_v8 = vpop.f32.mrb[1].mxu1 }
 0x133   : > { %311 = vmax.xlane.f32.xlu0 %v310_v5  ;;  %v398_v9 = vrot.slane %v397_v7, 4 }
 0x135   : > { %v399_v10 = vmax.f32 %v397_v7, %v398_v9 }
 0x137   : > { %v400_v11 = vrot.slane %v399_v10, 2 }
 0x139   : > { %v401_v12 = vmax.f32 %v399_v10, %v400_v11 }
 0x13b   : > { %v402_v13 = vrot.slane %v401_v12, 1 }
 0x13d   : > { %v403_v14 = vmax.f32 %v401_v12, %v402_v13 }
 0x13f   : > { %v404_v15 = vsub.f32 %v392_v6, %v403_v14 }
 0x141   : > { %v405_v16 = vmul.f32 1.442695, %v404_v15 }
 0x143   : > { %668 = vpow2.f32 %v405_v16 }
 0x14d   : > { %v669_v17 = vpop.eup %668 }
 0x14e   : > { %v407_v18 = vsel %vm396_vm3, %v669_v17, 0.0 }
 0x14f   : > { %v408_v19 = vrot.slane %v407_v18, 4 }
 0x151   : > { %v409_v20 = vadd.f32 %v408_v19, %v407_v18 }
 0x153   : > { %v410_v21 = vrot.slane %v409_v20, 2 }
 0x155   : > { %v411_v22 = vadd.f32 %v410_v21, %v409_v20 }
 0x157   : > { %v412_v23 = vrot.slane %v411_v22, 1 }
 0x159   : > { %v413_v24 = vadd.f32 %v412_v23, %v411_v22 }
 0x15b   : > { %670 = vrcp.f32 %v413_v24 }
 0x165   : > { %v671_v27 = vpop.eup %670 }
 0x166   : > { %v415_v29 = vmul.f32 %v671_v27, %v669_v17 }
 0x168   : > { %416 = vst.msk [vmem:[%s233_s23] sm:$0xf] %vm396_vm3, %v415_v29 }
 0x1c0   : > { %v312_v25 = vpop.xlane.xlu0 %311 }
 0x1c1   : > { %v313_v26 = vsub.f32 %v305_v3, %v312_v25 }
 0x1c3   : > { %v314_v28 = vmul.f32 1.442695, %v313_v26 }
 0x1c5   : > { %672 = vpow2.f32 %v314_v28 }
 0x1cf   : > { %v673_v30 = vpop.eup %672 }
 0x1d0   : > { %v316_v31 = vsel %vm309_vm2, %v673_v30, 0.0 }
 0x1d1   : > { %317 = vadd.xlane.f32.xlu0 %v316_v31 }
 0x1d2   : > { %749 = shalt.err (!%p746_p1)
}
 0x1d3   : > { %s750_s6 = scalar_lea.hbm %s1037_s28, 64  ;;  %s754_s30 = scalar_lea.hbm %s1111_s3, 128 }
 0x1d4   : > { %p751_p11 = scmp.ne.s32.totalorder %s1037_s28, %s750_s6  ;;  %p755_p4 = scmp.lt.u32.totalorder %s1037_s28, %s1111_s3 }
 0x1d5   : > { %p756_p10 = scmp.lt.u32.totalorder %s754_s30, %s750_s6  ;;  %p758_p13 = scmp.lt.u32.totalorder %s750_s6, %s1037_s28 }
 0x1d6   : > { %p752_p12 = pnand %p751_p11, %p1124_p3 }
 0x1d7   : > { %p757_p6 = por %p756_p10, %p755_p4 }
 0x1d8   : > { %p753_p2 = pneg %p752_p12 }
 0x1d9   : > { %p759_p7 = por %p758_p13, %p757_p6 }
 0x1db   : > { %p760_p5 = pnand %p759_p7, %p753_p2 }
 0x1dd   : > { %763 = shalt.err (!%p760_p5)
}
 0x1de   : > { %615 = dma.vmem_to_hbm [thread:$0]  (%p1124_p3), %s450_s4, 64, %s1037_s28, %s423_s29  }
 0x1df   : > { %s592_s20 = sshll.u32 %s887_s16, 7  ;;  %s226_s22 = scalar_lea.vmem [#allocation7], %s582_s19 }
 0x1e0   : > { %s436_s27 = sshll.u32 %s226_s22, 4  ;;  %s1063_s9 = scalar_lea.hbm %s1110_s2, %s592_s20  ;;  %s1065_s27 = int_to_ptr.vmem [resolvable:$true] %s436_s27 }
 0x1e1   : > { %s418_s4 = scalar_lea.sflag [#allocation4], %s1008_s11  ;;  %s764_s28 = scalar_lea.vmem %s1065_s27, 128 }
 0x1e2   : > { %p765_p8 = scmp.ne.s32.totalorder %s1065_s27, %s764_s28  ;;  %s845_s16 = smov [#allocation7]  }
 0x1e3   : > { %s768_s19 = sshll.u32 %s845_s16, 4  ;;  %s769_s19 = int_to_ptr.vmem [resolvable:$false] %s768_s19 }
 0x1e4   : > { %p766_p9 = pnand %p765_p8, %p1124_p3  ;;  %s770_s29 = scalar_lea.vmem %s769_s19, 256 }
 0x1e5   : > { %p771_p1 = scmp.lt.s32.totalorder %s1065_s27, %s769_s19  ;;  %p772_p11 = scmp.lt.s32.totalorder %s770_s29, %s764_s28 }
 0x1e6   : > { %p767_p0 = pneg %p766_p9 }
 0x1e7   : > { %p773_p12 = por %p772_p11, %p771_p1 }
 0x1e9   : > { %p774_p2 = pnand %p773_p12, %p767_p0 }
 0x25e   : > { %v318_v32 = vpop.xlane.xlu0 %317 }
 0x25f   : > { %674 = vrcp.f32 %v318_v32 }
 0x269   : > { %v675_v33 = vpop.eup %674 }
 0x26a   : > { %v320_v34 = vmul.f32 %v675_v33, %v673_v30 }
 0x26c   : > { %321 = vst.msk [vmem:[%s226_s22] sm:$0xff] %vm309_vm2, %v320_v34 }
 0x26d   : > { %777 = shalt.err (!%p774_p2)
}
 0x26e   : > { %s778_s11 = scalar_lea.hbm %s1063_s9, 128  ;;  %s782_s8 = scalar_lea.hbm %s1110_s2, 256 }
 0x26f   : > { %p779_p4 = scmp.ne.s32.totalorder %s1063_s9, %s778_s11  ;;  %p783_p13 = scmp.lt.u32.totalorder %s1063_s9, %s1110_s2 }
 0x270   : > { %p784_p7 = scmp.lt.u32.totalorder %s782_s8, %s778_s11  ;;  %p786_p8 = scmp.lt.u32.totalorder %s778_s11, %s1063_s9 }
 0x271   : > { %p780_p10 = pnand %p779_p4, %p1124_p3 }
 0x272   : > { %p785_p5 = por %p784_p7, %p783_p13 }
 0x273   : > { %p781_p6 = pneg %p780_p10 }
 0x274   : > { %p787_p9 = por %p786_p8, %p785_p5 }
 0x276   : > { %p788_p0 = pnand %p787_p9, %p781_p6 }
 0x278   : > { %791 = shalt.err (!%p788_p0)
}
 0x279   : > { %614 = dma.vmem_to_hbm [thread:$0]  (%p1124_p3), %s1065_s27, 128, %s1063_s9, %s418_s4  }
 0x27a PF: > { %s461_s17 = sand.u32 1, %s826_s12   ;;  %p1125_p1 = scmp.ne.s32.totalorder %s1117_s25, 0 }
 0x27b   : > { %p1126_p11 = scmp.ge.s32.totalorder %s838_s15, 2  ;;  %s462_s23 = scalar_lea.sflag [#allocation4], %s461_s17 }
 0x27d   : > { %p626_p12 = pnand %p1126_p11, %p1125_p1 }
 0x27f   : > { %817 = dma.done.wait (!%p626_p12), %s462_s23, 128  }
 0x280   : > { %819 = vsyncadd (!%p626_p12), %s462_s23, 4294967168  ;;  %s471_s20 = scalar_lea.sflag [#allocation9], %s461_s17 }
 0x281   : > { %821 = dma.done.wait (!%p626_p12), %s471_s20, 64  }
 0x282   : > { %823 = vsyncadd (!%p626_p12), %s471_s20, 4294967232  ;;  %p23_p3 = scmp.ge.s32.totalorder %s891_s18, 4   ;;  %s1127_s12 = smov %s830_s13 }
 0x283   : > { %s1128_s13 = smov %s834_s14  ;;  %s1129_s14 = smov %s903_s21 }
 0x284   : > { %s1130_s15 = smov %s891_s18  ;;  %25 = sbr.rel (!%p23_p3) target bundleno = 9 (0x9), region = 103 }
 0x28b   :  { %476 = vsyncpa [#allocation3], 1 }
 0x28c   :  { %478 = vsyncpa [#allocation3 + $0x1], 1 }
 0x28d   :  { %479 = vsyncpa [#allocation6], 1 }
 0x28e   :  { %481 = vsyncpa [#allocation6 + $0x1], 1 }
 0x28f   :  { %482 = vsyncpa [#allocation4], 1 }
 0x290   :  { %484 = vsyncpa [#allocation4 + $0x1], 1 }
 0x291   :  { %485 = vsyncpa [#allocation9], 1 }
 0x292   :  { %487 = vsyncpa [#allocation9 + $0x1], 1 }

// kernel: encoder_layer_forward.4
= control target key start
LH: loop header
LB: loop body
LE: loop exit
PB: predicated region body
PF: predicated region fallthrough
CT: control target
= control target key end

     0   :  { %s3612_s0 = inlined_call_operand.hbm [shape: f32[2,4,8,6], index: 0, kind: input, shape index: {}]   ;;  %s3613_s1 = inlined_call_operand.hbm [shape: f32[2,4,8,6], index: 1, kind: input, shape index: {}]   ;;  %s3614_s2 = inlined_call_operand.hbm [shape: f32[3,8,8], index: 2, kind: input, shape index: {}]   ;;  %s3615_s3 = inlined_call_operand.hbm [shape: bf16[6,36], index: 3, kind: input, shape index: {}]   ;;  %s3616_s4 = inlined_call_operand.hbm [shape: f32[4,2,8,6], index: 4, kind: output, shape index: {}]  }
   0x1   :  { %3626 = sst [smem:[#allocation17_spill]] %s3612_s0 }
   0x2   :  { %3627 = sst [smem:[#allocation18_spill]] %s3614_s2 }
   0x3   :  { %3628 = sst [smem:[#allocation19_spill]] %s3615_s3 }
   0x4   :  { %9 = vsyncpa [#allocation3], 0 }
   0x5   :  { %11 = vsyncpa [#allocation3 + $0x1], 0 }
   0x6   :  { %12 = vsyncpa [#allocation6], 0 }
   0x7   :  { %14 = vsyncpa [#allocation6 + $0x1], 0 }
   0x8   :  { %15 = vsyncpa [#allocation9], 0 }
   0x9   :  { %16 = vsyncpa [#allocation4], 0 }
   0xa   :  { %18 = vsyncpa [#allocation4 + $0x1], 0  ;;  %s2810_s15 = smov 0   ;;  %s2812_s16 = smov 0  }
   0xb   :  { %s2814_s17 = smov 0   ;;  %s2816_s18 = smov 0  }
   0xc   :  { %s2818_s19 = smov 0   ;;  %s2820_s20 = smov 0  }
   0xd LB: > { %s2841_s21 = sadd.s32 4294967295, %s2743_s20   ;;  %s2060_s22 = sadd.s32 4294967294, %s2743_s20   ;;  %s2743_s20 = sphi %s2820_s20, %s24_s20   ;;  %s2739_s19 = sphi %s2818_s19, %s3656_s19   ;;  %s2735_s18 = sphi %s2816_s18, %s3655_s18   ;;  %s2731_s17 = sphi %s2814_s17, %s3654_s17   ;;  %s2727_s16 = sphi %s2812_s16, %s3653_s16   ;;  %s2723_s15 = sphi %s2810_s15, %s3652_s15  }
   0xe   : > { %p52_p0 = scmp.ne.s32.totalorder %s2731_s17, %s2727_s16  ;;  %p53_p1 = scmp.eq.s32.totalorder %s2743_s20, 0 }
   0xf   : > { %p58_p2 = scmp.ne.s32.totalorder %s2727_s16, %s2723_s15  ;;  %p3617_p3 = scmp.eq.s32.totalorder %s2841_s21, 0 }
  0x10   : > { %p154_p4 = scmp.eq.s32.totalorder %s2841_s21, 3  ;;  %p2852_p5 = por %p53_p1, %p52_p0 }
  0x11   : > { %p160_p6 = scmp.eq.s32.totalorder %s2060_s22, 3  ;;  %p2858_p7 = por %p3617_p3, %p58_p2 }
  0x12   : > { %p2862_p8 = por %p154_p4, %p52_p0  ;;  %p2061_p10 = scmp.ge.s32.totalorder %s2743_s20, 1 }
  0x13   : > { %s3630_s25 = scalar_select %p2858_p7, 1, 0 }
  0x14   : > { %s3631_s26 = scalar_select %p2862_p8, 1, 0 }
  0x15   : > { %p2866_p9 = por %p160_p6, %p58_p2  ;;  %p167_p11 = scmp.lt.s32.totalorder %s2743_s20, 5 }
  0x16   : > { %s2745_s29 = smov [#allocation7]   ;;  %p2336_p0 = scmp.lt.s32.totalorder %s2743_s20, 4 }
  0x17   : > { %s3632_s27 = scalar_select %p2866_p9, 1, 0 }
  0x18   : > { %p2872_p12 = pnand %p2061_p10, %p167_p11  ;;  %s179_s30 = sshll.u32 %s2745_s29, 4  ;;  %s2876_s30 = int_to_ptr.vmem [resolvable:$true] %s179_s30 }
  0x19   : > { %s2746_s6 = smov [#allocation8]   ;;  %p2889_p2 = pnand %p2336_p0, %p2852_p5 }
  0x1a   : > { %p2316_p13 = pneg %p2872_p12  ;;  %s193_s7 = sshll.u32 %s2746_s6, 4  ;;  %s2893_s7 = int_to_ptr.vmem [resolvable:$true] %s193_s7 }
  0x1b   : > { %s3636_s2 = sld [smem:[#allocation18_spill]] }
  0x1c   : > { %p2883_p1 = pnand %p2316_p13, %p3617_p3 }
  0x1e   : > { %p2535_p6 = pneg %p2883_p1 }
  0x21   : > { %s2533_s11 = scalar_lea.hbm %s3636_s2, 384 }
  0x22   : > { %p2534_p4 = scmp.ne.s32.totalorder %s3636_s2, %s2533_s11  ;;  %p2540_p5 = scmp.lt.u32.totalorder %s2533_s11, %s3636_s2 }
  0x24   : > { %p2536_p10 = pnand %p2535_p6, %p2534_p4 }
  0x26   : > { %p2537_p11 = pneg %p2536_p10 }
  0x28   : > { %p2542_p13 = pnand %p2540_p5, %p2537_p11 }
  0x2a   : > { %2545 = shalt.err (!%p2542_p13)
}
  0x2b   : > { %s2546_s24 = scalar_lea.vmem %s2876_s30, 384  ;;  %p2554_p8 = scmp.lt.s32.totalorder %s2876_s30, %s2876_s30 }
  0x2c   : > { %p2547_p0 = scmp.ne.s32.totalorder %s2876_s30, %s2546_s24  ;;  %p2555_p4 = scmp.lt.s32.totalorder %s2546_s24, %s2546_s24 }
  0x2e   : > { %p2549_p3 = pnand %p2547_p0, %p2535_p6  ;;  %p2556_p10 = por %p2555_p4, %p2554_p8 }
  0x30   : > { %p2550_p9 = pneg %p2549_p3 }
  0x32   : > { %p2557_p7 = pnand %p2556_p10, %p2550_p9 }
  0x34   : > { %2560 = shalt.err (!%p2557_p7)
}
  0x35   : > { %s3620_s29 = smov 128   ;;  %s3622_s6 = smov 8  }
  0x36   : > { %2319 = dma.hbm_to_vmem [thread:$0]  (!%p2883_p1), %s3636_s2, 384, %s2876_s30, [#allocation6], %s3620_s29, %s3620_s29, %s3622_s6  }
  0x37   : > { %s3637_s3 = sld [smem:[#allocation19_spill]] }
  0x3d   : > { %s2561_s13 = scalar_lea.hbm %s3637_s3, 64 }
  0x3e   : > { %p2562_p3 = scmp.ne.s32.totalorder %s3637_s3, %s2561_s13  ;;  %p2568_p9 = scmp.lt.u32.totalorder %s2561_s13, %s3637_s3 }
  0x40   : > { %p2564_p7 = pnand %p2562_p3, %p2535_p6 }
  0x42   : > { %p2565_p8 = pneg %p2564_p7 }
  0x44   : > { %p2570_p11 = pnand %p2568_p9, %p2565_p8 }
  0x46   : > { %2573 = shalt.err (!%p2570_p11)
}
  0x47   : > { %s2574_s30 = scalar_lea.vmem %s2893_s7, 64  ;;  %p2582_p4 = scmp.lt.s32.totalorder %s2893_s7, %s2893_s7 }
  0x48   : > { %p2575_p5 = scmp.ne.s32.totalorder %s2893_s7, %s2574_s30  ;;  %p2583_p10 = scmp.lt.s32.totalorder %s2574_s30, %s2574_s30 }
  0x4a   : > { %p2577_p13 = pnand %p2575_p5, %p2535_p6  ;;  %p2584_p3 = por %p2583_p10, %p2582_p4 }
  0x4c   : > { %p2578_p0 = pneg %p2577_p13 }
  0x4e   : > { %p2585_p7 = pnand %p2584_p3, %p2578_p0 }
  0x50   : > { %2588 = shalt.err (!%p2585_p7)
}
  0x51   : > { %2322 = dma.hbm_to_vmem [thread:$0]  (!%p2883_p1), %s3637_s3, 64, %s2893_s7, [#allocation9]  }
  0x52   : > { %s36_s10 = sadd.s32 1, %s2739_s19  ;;  %s204_s11 = sand.u32 1, %s2731_s17  }
  0x53   : > { %p38_p6 = scmp.ge.s32.totalorder %s36_s10, 4  ;;  %s2952_s12 = sshll.u32 %s204_s11, 4 }
  0x54   : > { %s3624_s5 = sshll.u32 %s2739_s19, 7  ;;  %s3639_s0 = sld [smem:[#allocation17_spill]] }
  0x55   : > { %s3658_s10 = smov (%p38_p6, %s36_s10), 0  ;;  %s208_s24 = scalar_lea.vmem [#allocation2], %s2952_s12 }
  0x56   : > { %3638 = sst [smem:[#allocation16_spill]] %s3658_s10  ;;  %s41_s7 = ssub.s32 %s2739_s19, %s3658_s10 }
  0x57   : > { %s217_s30 = sshll.u32 %s208_s24, 4  ;;  %p43_p1 = scmp.eq.s32.totalorder %s41_s7, 0  ;;  %s2967_s30 = int_to_ptr.vmem [resolvable:$true] %s217_s30 }
  0x58   : > { %s3640_s23 = sadd.s32 1, %s2731_s17  ;;  %s2974_s29 = scalar_lea.sflag [#allocation3], %s204_s11 }
  0x59   : > { %s2972_s9 = scalar_select %p43_p1, %s2731_s17, %s3640_s23  }
  0x5a   : > { %s2962_s22 = scalar_lea.hbm %s3639_s0, %s3624_s5  ;;  %p2591_p9 = pneg %p2889_p2 }
  0x5b   : > { %s2589_s6 = scalar_lea.hbm %s2962_s22, 256  ;;  %s2594_s24 = scalar_lea.hbm %s3639_s0, 1024 }
  0x5c   : > { %p2590_p8 = scmp.ne.s32.totalorder %s2962_s22, %s2589_s6  ;;  %p2595_p13 = scmp.lt.u32.totalorder %s2962_s22, %s3639_s0 }
  0x5d   : > { %p2596_p0 = scmp.lt.u32.totalorder %s2594_s24, %s2589_s6  ;;  %p2598_p10 = scmp.lt.u32.totalorder %s2589_s6, %s2962_s22 }
  0x5e   : > { %p2592_p11 = pnand %p2591_p9, %p2590_p8 }
  0x5f   : > { %p2597_p4 = por %p2596_p0, %p2595_p13 }
  0x60   : > { %p2593_p5 = pneg %p2592_p11 }
  0x61   : > { %p2599_p3 = por %p2598_p10, %p2597_p4 }
  0x63   : > { %p2600_p7 = pnand %p2599_p3, %p2593_p5 }
  0x65   : > { %2603 = shalt.err (!%p2600_p7)
}
  0x66   : > { %s2604_s11 = scalar_lea.vmem %s2967_s30, 256  ;;  %s2749_s23 = smov [#allocation2]  }
  0x67   : > { %p2605_p6 = scmp.ne.s32.totalorder %s2967_s30, %s2604_s11  ;;  %s2609_s13 = sshll.u32 %s2749_s23, 4  ;;  %s2610_s13 = int_to_ptr.vmem [resolvable:$false] %s2609_s13 }
  0x68   : > { %s2611_s5 = scalar_lea.vmem %s2610_s13, 512  ;;  %p2612_p11 = scmp.lt.s32.totalorder %s2967_s30, %s2610_s13 }
  0x69   : > { %p2607_p1 = pnand %p2605_p6, %p2591_p9  ;;  %p2613_p13 = scmp.lt.s32.totalorder %s2611_s5, %s2604_s11 }
  0x6b   : > { %p2608_p8 = pneg %p2607_p1  ;;  %p2614_p0 = por %p2613_p13, %p2612_p11 }
  0x6d   : > { %p2615_p4 = pnand %p2614_p0, %p2608_p8 }
  0x6f   : > { %2618 = shalt.err (!%p2615_p4)
}
  0x70   : > { %s2750_s6 = smov 512   ;;  %s3641_s14 = smov 8  }
  0x71   : > { %s3642_s24 = smov 128   ;;  %s3643_s7 = sshll.u32 %s2739_s19, 7 }
  0x72   : > { %2326 = dma.hbm_to_vmem [thread:$0]  (!%p2889_p2), %s2962_s22, 256, %s2967_s30, %s2974_s29, %s2750_s6, %s3642_s24, %s3641_s14  }
  0x73   : > { %s3010_s13 = scalar_lea.hbm %s3613_s1, %s3643_s7  ;;  %s231_s5 = scalar_lea.vmem [#allocation5], %s2952_s12 }
  0x74   : > { %s240_s0 = sshll.u32 %s231_s5, 4  ;;  %s227_s2 = sand.u32 1, %s2743_s20   ;;  %s3013_s0 = int_to_ptr.vmem [resolvable:$true] %s240_s0 }
  0x75   : > { %s3016_s3 = scalar_lea.sflag [#allocation6], %s227_s2  ;;  %s2619_s10 = scalar_lea.hbm %s3010_s13, 256 }
  0x76   : > { %p2620_p5 = scmp.ne.s32.totalorder %s3010_s13, %s2619_s10  ;;  %s2624_s30 = scalar_lea.hbm %s3613_s1, 1024 }
  0x77   : > { %p2625_p7 = scmp.lt.u32.totalorder %s3010_s13, %s3613_s1  ;;  %p2626_p6 = scmp.lt.u32.totalorder %s2624_s30, %s2619_s10 }
  0x78   : > { %p2622_p10 = pnand %p2620_p5, %p2591_p9  ;;  %p2628_p8 = scmp.lt.u32.totalorder %s2619_s10, %s3010_s13 }
  0x79   : > { %p2627_p1 = por %p2626_p6, %p2625_p7 }
  0x7a   : > { %p2623_p3 = pneg %p2622_p10 }
  0x7b   : > { %p2629_p11 = por %p2628_p8, %p2627_p1 }
  0x7d   : > { %p2630_p13 = pnand %p2629_p11, %p2623_p3 }
  0x7f   : > { %2633 = shalt.err (!%p2630_p13)
}
  0x80   : > { %s2634_s2 = scalar_lea.vmem %s3013_s0, 256  ;;  %s2751_s12 = smov [#allocation5]  }
  0x81   : > { %p2635_p0 = scmp.ne.s32.totalorder %s3013_s0, %s2634_s2  ;;  %s2639_s11 = sshll.u32 %s2751_s12, 4  ;;  %s2640_s11 = int_to_ptr.vmem [resolvable:$false] %s2639_s11 }
  0x82   : > { %s2641_s5 = scalar_lea.vmem %s2640_s11, 512  ;;  %p2642_p10 = scmp.lt.s32.totalorder %s3013_s0, %s2640_s11 }
  0x83   : > { %p2637_p4 = pnand %p2635_p0, %p2591_p9  ;;  %p2643_p7 = scmp.lt.s32.totalorder %s2641_s5, %s2634_s2 }
  0x85   : > { %p2638_p5 = pneg %p2637_p4  ;;  %p2644_p6 = por %p2643_p7, %p2642_p10 }
  0x87   : > { %p2645_p1 = pnand %p2644_p6, %p2638_p5 }
  0x89   : > { %2648 = shalt.err (!%p2645_p1)
}
  0x8a   : > { %2329 = dma.hbm_to_vmem [thread:$0]  (!%p2889_p2), %s3010_s13, 256, %s3013_s0, %s3016_s3, %s2750_s6, %s3642_s24, %s3641_s14  }
  0x8b   : > { %252 = sbr.rel (%p2872_p12) target bundleno = 1375 (0x55f), region = 36  ;;  %s3048_s10 = sand.u32 (!%p2872_p12), 1, %s2727_s16  }
  0x8c   : > { %s3051_s29 = sshll.u32 (!%p2872_p12), %s3048_s10, 4  ;;  %s255_s8 = scalar_lea.sflag (!%p2872_p12), [#allocation3], %s3048_s10 }
  0x8d   : > { %s258_s22 = scalar_lea.vmem (!%p2872_p12), [#allocation2], %s3051_s29  ;;  %p3644_p9 = scmp.ne.s32.totalorder (!%p2872_p12), %s3630_s25, 0 }
  0x92   : > { %2702 = dma.done.wait (%p3644_p9), %s255_s8, 256  }
  0x93   : > { %2704 = vsyncadd (%p3644_p9), %s255_s8, 4294967040  ;;  %s263_s0 = sand.u32 1, %s2841_s21   ;;  %s267_s28 = scalar_lea.vmem [#allocation5], %s3051_s29 }
  0x94   : > { %s264_s3 = scalar_lea.sflag [#allocation6], %s263_s0 }
  0x95   : > { %2706 = dma.done.wait (%p3644_p9), %s264_s3, 256  }
  0x96   : > { %2708 = vsyncadd (%p3644_p9), %s264_s3, 4294967040  ;;  %p3645_p12 = scmp.eq.s32.totalorder %s2841_s21, 0 }
  0x98   : > { %2710 = dma.done.wait (%p3645_p12), [#allocation6], 384   ;;  %p3646_p2 = pmov %p3645_p12 }
  0x9a   : > { %2712 = vsyncadd (%p3646_p2), [#allocation6], 4294966912  ;;  %p3647_p3 = pmov %p3646_p2 }
  0x9b   : > { %p3648_p8 = pmov %p3646_p2 }
  0x9c   : > { %2714 = dma.done.wait (%p3647_p3), [#allocation9], 64  }
  0x9d   : > { %2716 = vsyncadd (%p3648_p8), [#allocation9], 4294967232  ;;  %v2752_v0 = vmov 0.0   ;;  %vm2753_vm0 = vmmov 0   ;;  %v2754_v1 = vmov 10   ;;  %v2755_v2 = vmov 7  }
  0x9e   : > { %2140 = vmatprep.subr.bf16.mxu0 %v2752_v0  ;;  %2142 = vmatprep.mubr.msk.bf16.mxu0 %vm2753_vm0, %v2752_v0  ;;  %vm327_vm1 = vcmask 1042432   ;;  %v317_v3 = vld [vmem:[#allocation8] sm:$0x7]  ;;  %v309_v4 = vld [vmem:[%s258_s22] sm:$0xff]  ;;  %vm323_vm2 = vcmask 48128   ;;  %v2756_v16 = vmov 6   ;;  %v391_v33 = vlaneseq }
  0x9f   : > { %2425 = vset.pattern.permute.xlu0 %v2754_v1  ;;  %2426 = vset.pattern.permute.xlu1 %v2755_v2  ;;  %v310_v5 = vld [vmem:[%s258_s22 + $0x8] sm:$0xff]  ;;  %v329_v6 = vsel %vm327_vm1, %v317_v3, 0  ;;  %v311_v7 = vld [vmem:[%s267_s28] sm:$0xff]  ;;  %v2757_v17 = vmov 9   ;;  %v2758_v18 = vmov 11   ;;  %v2759_v19 = vmov 8  }
  0xa0   : > { %2146 = vmatprep.subr.bf16.mxu1 %v2752_v0  ;;  %2148 = vmatprep.mubr.msk.bf16.mxu1 %vm2753_vm0, %v2752_v0  ;;  %v312_v8 = vld [vmem:[%s267_s28 + $0x8] sm:$0xff]  ;;  %v313_v9 = vadd.f32 %v311_v7, %v309_v4  ;;  %v2760_v20 = vmov 22   ;;  %v2761_v21 = vmov 21   ;;  %v2762_v22 = vmov 19   ;;  %s2772_s21 = smov 126   ;;  %s2773_s25 = smov 124  }
  0xa1   : > { %2141 = vmatpush3.bf16.msra.mxu0 %v329_v6  ;;  %v314_v10 = vadd.f32 %v312_v8, %v310_v5  ;;  %v2763_v23 = vmov 20   ;;  %v2764_v24 = vmov 18   ;;  %v2765_v25 = vmov 33   ;;  %s2774_s6 = smov 114   ;;  %v3153_v42 = vld [vmem:[#allocation7] sm:$0xff]  ;;  %s2775_s14 = smov 116  }
  0xa2   : > { %2152 = vmatprep.subr.bf16.mxu0 %v2752_v0  ;;  %v2766_v26 = vmov 23   ;;  %v2767_v27 = vmov 34   ;;  %v2768_v28 = vmov 31   ;;  %v2769_v29 = vmov 30   ;;  %s2776_s24 = smov 112   ;;  %s2777_s13 = smov 102  }
  0xa3   : > { %v2100_v11 = vpack.c.bf16 %v314_v10, %v313_v9  ;;  %v2770_v30 = vmov 35   ;;  %v2771_v31 = vmov 32   ;;  %v392_v35 = vand.u32 127, %v391_v33  ;;  %s2778_s30 = smov 104   ;;  %s2779_s7 = smov 100  }
  0xa4   : > { %v394_v36 = vshrl.u32 %v391_v33, 7  ;;  %vm427_vm3 = vcmp.gt.f32.partialorder %v3153_v42, 0.0  ;;  %vm432_vm4 = vcmask 64512   ;;  %vm533_vm7 = vcmask 1043456   ;;  %s3545_s23 = scalar_lea.vmem [#allocation10], %s3051_s29  ;;  %s2780_s2 = smov 2  }
  0xa5   : > { %2143 = vmatmul.mubr.msk.bf16.vlgmr.msra.gmra.mrb[0].mxu0 %vm323_vm2, %v2100_v11  ;;  %v3173_v11 = vld [vmem:[#allocation7 + $0x8] sm:$0xff]  ;;  %vm886_vm8 = vcmask 15360   ;;  %vm1398_vm9 = vcmask 31760   ;;  %s2781_s12 = smov 4   ;;  %vm1910_vm10 = vcmask 48160   ;;  %s2101_s11 = sshll.u32 %s2735_s18, 8 }
  0xa6   : > { %2154 = vmatprep.mubr.msk.bf16.mxu0 %vm2753_vm0, %v2752_v0  ;;  %v3148_v37 = vsub.s32 %v392_v35, %v394_v36  ;;  %vm933_vm5 = vcmp.gt.f32.partialorder %v3173_v11, 0.0  ;;  %s1929_s5 = sshll.u32 %s3545_s23, 4  ;;  %s3561_s22 = scalar_lea.hbm %s3616_s4, %s2101_s11  ;;  %s3563_s5 = int_to_ptr.vmem [resolvable:$true] %s1929_s5 }
  0xa7   : > { %s1914_s0 = scalar_lea.sflag [#allocation4], %s3048_s10  ;;  %s2649_s3 = scalar_lea.vmem %s3563_s5, 256 }
  0xa8   : > { %p2650_p11 = scmp.ne.s32.totalorder %s3563_s5, %s2649_s3  ;;  %p3649_p13 = scmp.ne.s32.totalorder %s3631_s26, 0 }
  0xa9   : > { %s2782_s18 = smov [#allocation10]  }
  0xaa   : > { %p2651_p0 = pnand %p2650_p11, %p3649_p13  ;;  %s2653_s28 = sshll.u32 %s2782_s18, 4  ;;  %s2654_s28 = int_to_ptr.vmem [resolvable:$false] %s2653_s28 }
  0xab   : > { %p2656_p5 = scmp.lt.s32.totalorder %s3563_s5, %s2654_s28 }
  0xac   : > { %p2652_p4 = pneg %p2651_p0 }
 0x178   : > { %v3083_v12 = vpop.f32.mrb[0].mxu0 }
 0x179   : > { %460 = vperm.xlu1 %2426, %v3083_v12   ;;  %468 = vperm.xlu0 %2425, %v3083_v12   ;;  %v2144_v13 = vpop.f32.mrb[1].mxu0  ;;  %v3116_v32 = vpack.c.bf16 %v3083_v12, %v3083_v12 }
 0x17a   : > { %v3087_v14 = vpop.f32.mrb[2].mxu0 }
 0x17b   : > { %v2145_v15 = vpop.f32.mrb[3].mxu0  ;;  %v3142_v34 = vpack.c.bf16 %v3087_v14, %v3087_v14 }
 0x17d   : > { %2428 = vset.pattern.permute.xlu1 %v2756_v16  ;;  %2427 = vset.pattern.permute.xlu0 %v2757_v17 }
 0x17e   : > { %377 = vperm.xlu1 %2428, %v3083_v12   ;;  %386 = vperm.xlu0 %2427, %v3083_v12  }
 0x182   : > { %2429 = vset.pattern.permute.xlu1 %v2758_v18  ;;  %2430 = vset.pattern.permute.xlu0 %v2759_v19 }
 0x183   : > { %727 = vperm.xlu1 %2429, %v3083_v12   ;;  %719 = vperm.xlu0 %2430, %v3083_v12  }
 0x187   : > { %2431 = vset.pattern.permute.xlu1 %v2760_v20  ;;  %2433 = vset.pattern.permute.xlu0 %v2761_v21 }
 0x188   : > { %971 = vperm.xlu1 %2431, %v3083_v12   ;;  %900 = vperm.xlu0 %2433, %v3083_v12  }
 0x18c   : > { %2432 = vset.pattern.permute.xlu1 %v2762_v22  ;;  %2436 = vset.pattern.permute.xlu0 %v2763_v23 }
 0x18d   : > { %963 = vperm.xlu1 %2432, %v3083_v12   ;;  %1223 = vperm.xlu0 %2436, %v3083_v12  }
 0x191   : > { %2434 = vset.pattern.permute.xlu1 %v2764_v24  ;;  %2439 = vset.pattern.permute.xlu0 %v2765_v25 }
 0x192   : > { %892 = vperm.xlu1 %2434, %v3083_v12   ;;  %1412 = vperm.xlu0 %2439, %v3083_v12  }
 0x196   : > { %2435 = vset.pattern.permute.xlu1 %v2766_v26  ;;  %2443 = vset.pattern.permute.xlu0 %v2754_v1 }
 0x197   : > { %1231 = vperm.xlu1 %2435, %v3083_v12   ;;  %471 = vperm.xlu0 %2443, %v3087_v14  }
 0x19b   : > { %2437 = vset.pattern.permute.xlu1 %v2767_v27  ;;  %2446 = vset.pattern.permute.xlu0 %v2756_v16 }
 0x19c   : > { %1483 = vperm.xlu1 %2437, %v3083_v12   ;;  %382 = vperm.xlu0 %2446, %v3087_v14  }
 0x1a0   : > { %2438 = vset.pattern.permute.xlu1 %v2768_v28  ;;  %2449 = vset.pattern.permute.xlu0 %v2760_v20 }
 0x1a1   : > { %1475 = vperm.xlu1 %2438, %v3083_v12   ;;  %974 = vperm.xlu0 %2449, %v3087_v14  }
 0x1a5   : > { %2440 = vset.pattern.permute.xlu1 %v2769_v29  ;;  %2452 = vset.pattern.permute.xlu0 %v2764_v24 }
 0x1a6   : > { %1404 = vperm.xlu1 %2440, %v3083_v12   ;;  %896 = vperm.xlu0 %2452, %v3087_v14  }
 0x1aa   : > { %2441 = vset.pattern.permute.xlu1 %v2770_v30  ;;  %2455 = vset.pattern.permute.xlu0 %v2767_v27  ;;  %v3193_v27 = vld [vmem:[#allocation7 + $0x10] sm:$0xff] }
 0x1ab   : > { %1743 = vperm.xlu1 %2441, %v3083_v12   ;;  %1486 = vperm.xlu0 %2455, %v3087_v14   ;;  %vm1445_vm6 = vcmp.gt.f32.partialorder %v3193_v27, 0.0 }
 0x1af   : > { %2442 = vset.pattern.permute.xlu1 %v2771_v31  ;;  %2459 = vset.pattern.permute.xlu0 %v2770_v30 }
 0x1b0   : > { %1735 = vperm.xlu1 %2442, %v3083_v12   ;;  %1746 = vperm.xlu0 %2459, %v3087_v14  }
 0x1b4   : > { %2444 = vset.pattern.permute.xlu1 %v2755_v2  ;;  %528 = vrot.lane.b32.xlu0 %v3116_v32, %s2772_s21 }
 0x1b5   : > { %464 = vperm.xlu1 %2444, %v3087_v14  }
 0x1b8   : > { %786 = vrot.lane.b32.xlu0 %v3116_v32, %s2773_s25 }
 0x1b9   : > { %2445 = vset.pattern.permute.xlu1 %v2757_v17 }
 0x1ba   : > { %389 = vperm.xlu1 %2445, %v3087_v14  }
 0x1bc   : > { %1030 = vrot.lane.b32.xlu0 %v3116_v32, %s2774_s6 }
 0x1be   : > { %2447 = vset.pattern.permute.xlu1 %v2758_v18 }
 0x1bf   : > { %730 = vperm.xlu1 %2447, %v3087_v14  }
 0x1c3   : > { %2448 = vset.pattern.permute.xlu1 %v2759_v19 }
 0x1c4   : > { %723 = vperm.xlu1 %2448, %v3087_v14  }
 0x1c8   : > { %2450 = vset.pattern.permute.xlu1 %v2762_v22 }
 0x1c9   : > { %967 = vperm.xlu1 %2450, %v3087_v14  }
 0x1cd   : > { %2451 = vset.pattern.permute.xlu1 %v2761_v21 }
 0x1ce   : > { %903 = vperm.xlu1 %2451, %v3087_v14  }
 0x1d2   : > { %2453 = vset.pattern.permute.xlu1 %v2766_v26 }
 0x1d3   : > { %1234 = vperm.xlu1 %2453, %v3087_v14  }
 0x1d7   : > { %2454 = vset.pattern.permute.xlu1 %v2763_v23 }
 0x1d8   : > { %1227 = vperm.xlu1 %2454, %v3087_v14  }
 0x1dc   : > { %2456 = vset.pattern.permute.xlu1 %v2768_v28 }
 0x1dd   : > { %1479 = vperm.xlu1 %2456, %v3087_v14  }
 0x1e1   : > { %2457 = vset.pattern.permute.xlu1 %v2765_v25 }
 0x1e2   : > { %1415 = vperm.xlu1 %2457, %v3087_v14  }
 0x1e6   : > { %2458 = vset.pattern.permute.xlu1 %v2769_v29 }
 0x1e7   : > { %1408 = vperm.xlu1 %2458, %v3087_v14  }
 0x1eb   : > { %2460 = vset.pattern.permute.xlu1 %v2771_v31 }
 0x1ec   : > { %1739 = vperm.xlu1 %2460, %v3087_v14  }
 0x1f0   : > { %578 = vrot.lane.b32.xlu1 %v3142_v34, %s2772_s21  ;;  %s2655_s21 = scalar_lea.vmem %s2654_s28, 512 }
 0x1f1   : > { %p2657_p10 = scmp.lt.s32.totalorder %s2655_s21, %s2649_s3 }
 0x1f3   : > { %p2658_p7 = por %p2657_p10, %p2656_p5 }
 0x1f4   : > { %834 = vrot.lane.b32.xlu1 %v3142_v34, %s2773_s25 }
 0x1f5   : > { %p2659_p6 = pnand %p2658_p7, %p2652_p4 }
 0x1f8   : > { %v461_v38 = vpop.permute.xlu1 %460  ;;  %v469_v39 = vpop.permute.xlu0 %468  ;;  %1078 = vrot.lane.b32.xlu1 %v3142_v34, %s2774_s6 }
 0x1f9   : > { %v476_v40 = vrot.slane %v469_v39, %v3148_v37 }
 0x1fb   : > { %v495_v41 = vadd.f32 %v476_v40, %v461_v38 }
 0x1fd   : > { %v497_v43 = vmul.f32 0.2, %v495_v41  ;;  %v378_v44 = vpop.permute.xlu1 %377  ;;  %v387_v45 = vpop.permute.xlu0 %386 }
 0x1fe   : > { %v396_v51 = vrot.slane %v387_v45, %v3148_v37 }
 0x1ff   : > { %v499_v46 = vmax.f32 %v495_v41, %v497_v43 }
 0x200   : > { %v421_v54 = vadd.f32 %v396_v51, %v378_v44 }
 0x201   : > { %v3158_v47 = vsel %vm427_vm3, %v499_v46, -1e+30 }
 0x202   : > { %v728_v48 = vpop.permute.xlu1 %727  ;;  %v720_v49 = vpop.permute.xlu0 %719  ;;  %v503_v50 = vsel %vm432_vm4, %v3158_v47, -inf  ;;  %v423_v58 = vmul.f32 0.2, %v421_v54 }
 0x203   : > { %504 = vmax.xlane.f32.xlu0 %v503_v50  ;;  %v735_v55 = vrot.slane %v728_v48, %v3148_v37 }
 0x204   : > { %v425_v63 = vmax.f32 %v421_v54, %v423_v58 }
 0x205   : > { %v754_v59 = vadd.f32 %v735_v55, %v720_v49 }
 0x206   : > { %v3170_v6 = vsel %vm427_vm3, %v425_v63, -1e+30 }
 0x207   : > { %v972_v52 = vpop.permute.xlu1 %971  ;;  %v901_v53 = vpop.permute.xlu0 %900  ;;  %v756_v1 = vmul.f32 0.2, %v754_v59  ;;  %v433_v14 = vsel %vm432_vm4, %v3170_v6, -inf }
 0x208   : > { %v979_v62 = vrot.slane %v972_v52, %v3148_v37  ;;  %v908_v3 = vrot.slane %v901_v53, %v3148_v37 }
 0x209   : > { %v758_v7 = vmax.f32 %v754_v59, %v756_v1 }
 0x20b   : > { %v3181_v17 = vsel %vm427_vm3, %v758_v7, -1e+30 }
 0x20c   : > { %v964_v56 = vpop.permute.xlu1 %963  ;;  %v1224_v57 = vpop.permute.xlu0 %1223  ;;  %v762_v20 = vsel %vm432_vm4, %v3181_v17, -inf }
 0x20d   : > { %v998_v2 = vadd.f32 %v979_v62, %v964_v56 }
 0x20f   : > { %v1000_v8 = vmul.f32 0.2, %v998_v2 }
 0x211   : > { %v893_v60 = vpop.permute.xlu1 %892  ;;  %v1413_v61 = vpop.permute.xlu0 %1412  ;;  %v1002_v18 = vmax.f32 %v998_v2, %v1000_v8 }
 0x212   : > { %v927_v9 = vadd.f32 %v908_v3, %v893_v60  ;;  %v1420_v30 = vrot.slane %v1413_v61, %v3148_v37 }
 0x213   : > { %v3191_v24 = vsel %vm933_vm5, %v1002_v18, -1e+30 }
 0x214   : > { %v929_v15 = vmul.f32 0.2, %v927_v9  ;;  %v1006_v29 = vsel %vm432_vm4, %v3191_v24, -inf }
 0x216   : > { %v1232_v4 = vpop.permute.xlu1 %1231  ;;  %v3166_v5 = vpop.permute.xlu0 %471  ;;  %v931_v25 = vmax.f32 %v927_v9, %v929_v15 }
 0x217   : > { %v1239_v10 = vrot.slane %v1232_v4, %v3148_v37  ;;  %v480_v58 = vrot.slane %v3166_v5, %v3148_v37 }
 0x218   : > { %v3200_v31 = vsel %vm933_vm5, %v931_v25, -1e+30 }
 0x219   : > { %v1258_v16 = vadd.f32 %v1239_v10, %v1224_v57  ;;  %v938_v40 = vsel %vm432_vm4, %v3200_v31, -inf }
 0x21b   : > { %v1484_v12 = vpop.permute.xlu1 %1483  ;;  %v3175_v13 = vpop.permute.xlu0 %382  ;;  %v1260_v21 = vmul.f32 0.2, %v1258_v16 }
 0x21c   : > { %434 = vmax.xlane.f32.xlu1 %v433_v14  ;;  %v1491_v19 = vrot.slane %v1484_v12, %v3148_v37 }
 0x21d   : > { %v1262_v33 = vmax.f32 %v1258_v16, %v1260_v21 }
 0x21f   : > { %v3215_v45 = vsel %vm933_vm5, %v1262_v33, -1e+30 }
 0x220   : > { %v1476_v22 = vpop.permute.xlu1 %1475  ;;  %v3187_v23 = vpop.permute.xlu0 %974  ;;  %763 = vmax.xlane.f32.xlu1 %v762_v20  ;;  %v1266_v50 = vsel %vm432_vm4, %v3215_v45, -inf }
 0x221   : > { %v1510_v26 = vadd.f32 %v1491_v19, %v1476_v22  ;;  %v983_v22 = vrot.slane %v3187_v23, %v3148_v37 }
 0x223   : > { %v1512_v28 = vmul.f32 0.2, %v1510_v26 }
 0x224   : > { %1007 = vmax.xlane.f32.xlu1 %v1006_v29 }
 0x225   : > { %v1514_v35 = vmax.f32 %v1510_v26, %v1512_v28  ;;  %v1405_v36 = vpop.permute.xlu1 %1404  ;;  %v3203_v38 = vpop.permute.xlu0 %896 }
 0x226   : > { %v1439_v39 = vadd.f32 %v1420_v30, %v1405_v36 }
 0x227   : > { %v3209_v41 = vsel %vm1445_vm6, %v1514_v35, -1e+30 }
 0x228   : > { %v1441_v43 = vmul.f32 0.2, %v1439_v39  ;;  %939 = vmax.xlane.f32.xlu1 %v938_v40  ;;  %v1518_v44 = vsel %vm432_vm4, %v3209_v41, -inf }
 0x229   : > { %1519 = vmax.xlane.f32.xlu0 %v1518_v44 }
 0x22a   : > { %v1443_v46 = vmax.f32 %v1439_v39, %v1441_v43  ;;  %v1744_v48 = vpop.permute.xlu1 %1743  ;;  %v3217_v49 = vpop.permute.xlu0 %1486 }
 0x22b   : > { %v1751_v53 = vrot.slane %v1744_v48, %v3148_v37 }
 0x22c   : > { %1267 = vmax.xlane.f32.xlu1 %v1266_v50  ;;  %v3223_v51 = vsel %vm1445_vm6, %v1443_v46, -1e+30 }
 0x22d   : > { %v1450_v52 = vsel %vm432_vm4, %v3223_v51, -inf }
 0x22e   : > { %1451 = vmax.xlane.f32.xlu0 %v1450_v52 }
 0x22f   : > { %v1736_v54 = vpop.permute.xlu1 %1735  ;;  %v3228_v55 = vpop.permute.xlu0 %1746 }
 0x230   : > { %v1770_v56 = vadd.f32 %v1751_v53, %v1736_v54 }
 0x232   : > { %v1772_v57 = vmul.f32 0.2, %v1770_v56 }
 0x233   : > { %v529_v59 = vpop.permute.xlu0 %528 }
 0x234   : > { %v1774_v60 = vmax.f32 %v1770_v56, %v1772_v57  ;;  %v465_v61 = vpop.permute.xlu1 %464  ;;  %v535_v62 = vsel %vm533_vm7, %v529_v59, 0  ;;  %v1495_v59 = vrot.slane %v3217_v49, %v3148_v37 }
 0x235   : > { %v496_v63 = vadd.f32 %v480_v58, %v465_v61  ;;  %2147 = vmatpush3.bf16.msra.mxu1 %v535_v62 }
 0x236   : > { %v3235_v1 = vsel %vm1445_vm6, %v1774_v60, -1e+30  ;;  %2158 = vmatprep.subr.bf16.mxu1 %v2752_v0 }
 0x237   : > { %v498_v2 = vmul.f32 0.2, %v496_v63  ;;  %v1778_v3 = vsel %vm432_vm4, %v3235_v1, -inf }
 0x238   : > { %1779 = vmax.xlane.f32.xlu0 %v1778_v3 }
 0x239   : > { %v500_v4 = vmax.f32 %v496_v63, %v498_v2  ;;  %v390_v5 = vpop.permute.xlu1 %389 }
 0x23a   : > { %v400_v7 = vrot.slane %v390_v5, %v3148_v37 }
 0x23b   : > { %v3243_v8 = vsel %vm427_vm3, %v500_v4, -1e+30 }
 0x23c   : > { %v422_v9 = vadd.f32 %v400_v7, %v3175_v13  ;;  %v506_v10 = vsel %vm432_vm4, %v3243_v8, -inf }
 0x23d   : > { %507 = vmax.xlane.f32.xlu1 %v506_v10 }
 0x23e   : > { %v424_v12 = vmul.f32 0.2, %v422_v9  ;;  %v731_v14 = vpop.permute.xlu1 %730 }
 0x23f   : > { %v739_v16 = vrot.slane %v731_v14, %v3148_v37 }
 0x240   : > { %v426_v15 = vmax.f32 %v422_v9, %v424_v12  ;;  %v3287_v9 = vpop.permute.xlu0 %786 }
 0x242   : > { %v3251_v18 = vsel %vm427_vm3, %v426_v15, -1e+30 }
 0x243   : > { %v724_v19 = vpop.permute.xlu1 %723  ;;  %v436_v20 = vsel %vm432_vm4, %v3251_v18, -inf }
 0x244   : > { %v755_v21 = vadd.f32 %v739_v16, %v724_v19  ;;  %437 = vmax.xlane.f32.xlu0 %v436_v20 }
 0x246   : > { %v757_v13 = vmul.f32 0.2, %v755_v21 }
 0x248   : > { %v759_v25 = vmax.f32 %v755_v21, %v757_v13  ;;  %v968_v26 = vpop.permute.xlu1 %967 }
 0x249   : > { %v999_v28 = vadd.f32 %v983_v22, %v968_v26 }
 0x24a   : > { %v3259_v29 = vsel %vm427_vm3, %v759_v25, -1e+30 }
 0x24b   : > { %v1001_v30 = vmul.f32 0.2, %v999_v28  ;;  %v765_v33 = vsel %vm432_vm4, %v3259_v29, -inf }
 0x24c   : > { %766 = vmax.xlane.f32.xlu0 %v765_v33 }
 0x24d   : > { %v1003_v35 = vmax.f32 %v999_v28, %v1001_v30  ;;  %v904_v36 = vpop.permute.xlu1 %903 }
 0x24e   : > { %v912_v53 = vrot.slane %v904_v36, %v3148_v37 }
 0x24f   : > { %v3265_v39 = vsel %vm933_vm5, %v1003_v35, -1e+30 }
 0x250   : > { %v1009_v23 = vsel %vm432_vm4, %v3265_v39, -inf  ;;  %v928_v54 = vadd.f32 %v912_v53, %v3203_v38  ;;  %v1755_v38 = vrot.slane %v3228_v55, %v3148_v37  ;;  %v3299_v55 = vpop.permute.xlu0 %1030 }
 0x251   : > { %1010 = vmax.xlane.f32.xlu1 %v1009_v23 }
 0x252   : > { %v1235_v40 = vpop.permute.xlu1 %1234  ;;  %v930_v57 = vmul.f32 0.2, %v928_v54 }
 0x253   : > { %v1243_v56 = vrot.slane %v1235_v40, %v3148_v37 }
 0x254   : > { %v932_v62 = vmax.f32 %v928_v54, %v930_v57 }
 0x256   : > { %v3281_v5 = vsel %vm933_vm5, %v932_v62, -1e+30 }
 0x257   : > { %v1228_v43 = vpop.permute.xlu1 %1227  ;;  %v941_v7 = vsel %vm432_vm4, %v3281_v5, -inf }
 0x258   : > { %v1259_v58 = vadd.f32 %v1243_v56, %v1228_v43 }
 0x25a   : > { %v1261_v60 = vmul.f32 0.2, %v1259_v58 }
 0x25c   : > { %v1480_v42 = vpop.permute.xlu1 %1479  ;;  %v1263_v2 = vmax.f32 %v1259_v58, %v1261_v60 }
 0x25d   : > { %v1511_v61 = vadd.f32 %v1495_v59, %v1480_v42 }
 0x25e   : > { %v3291_v14 = vsel %vm933_vm5, %v1263_v2, -1e+30 }
 0x25f   : > { %v1513_v3 = vmul.f32 0.2, %v1511_v61  ;;  %v1269_v15 = vsel %vm432_vm4, %v3291_v14, -inf }
 0x261   : > { %v1416_v44 = vpop.permute.xlu1 %1415  ;;  %v1515_v49 = vmax.f32 %v1511_v61, %v1513_v3 }
 0x262   : > { %1126 = vrot.lane.b32.xlu0 %v3116_v32, %s2775_s14  ;;  %1174 = vrot.lane.b32.xlu1 %v3142_v34, %s2775_s14  ;;  %v1424_v63 = vrot.slane %v1416_v44, %v3148_v37 }
 0x263   : > { %v3297_v37 = vsel %vm1445_vm6, %v1515_v49, -1e+30 }
 0x264   : > { %v1521_v20 = vsel %vm432_vm4, %v3297_v37, -inf }
 0x266   : > { %v1409_v46 = vpop.permute.xlu1 %1408 }
 0x267   : > { %v1440_v4 = vadd.f32 %v1424_v63, %v1409_v46 }
 0x269   : > { %v1442_v10 = vmul.f32 0.2, %v1440_v4 }
 0x26b   : > { %v1740_v48 = vpop.permute.xlu1 %1739  ;;  %v1444_v16 = vmax.f32 %v1440_v4, %v1442_v10 }
 0x26c   : > { %v1771_v12 = vadd.f32 %v1755_v38, %v1740_v48 }
 0x26d   : > { %v3305_v11 = vsel %vm1445_vm6, %v1444_v16, -1e+30 }
 0x26e   : > { %v1773_v19 = vmul.f32 0.2, %v1771_v12  ;;  %v1453_v25 = vsel %vm432_vm4, %v3305_v11, -inf }
 0x26f   : > { %v579_v50 = vpop.permute.xlu1 %578 }
 0x270   : > { %v584_v52 = vsel %vm533_vm7, %v579_v50, 0  ;;  %v1775_v21 = vmax.f32 %v1771_v12, %v1773_v19 }
 0x271   : > { %2153 = vmatpush3.bf16.msra.mxu0 %v584_v52 }
 0x272   : > { %2164 = vmatprep.subr.bf16.mxu0 %v2752_v0  ;;  %v3312_v26 = vsel %vm1445_vm6, %v1775_v21, -1e+30 }
 0x273   : > { %v1781_v30 = vsel %vm432_vm4, %v3312_v26, -inf  ;;  %v3318_v35 = vpop.permute.xlu1 %834 }
 0x277   : > { %v3322_v36 = vpop.permute.xlu1 %1078 }
 0x286   : > { %942 = vmax.xlane.f32.xlu1 %v941_v7 }
 0x28a   : > { %1270 = vmax.xlane.f32.xlu1 %v1269_v15 }
 0x28e   : > { %1522 = vmax.xlane.f32.xlu1 %v1521_v20 }
 0x290   : > { %v505_v13 = vpop.xlane.xlu0 %504 }
 0x291   : > { %v509_v22 = vsub.f32 %v3158_v47, %v505_v13 }
 0x292   : > { %1454 = vmax.xlane.f32.xlu1 %v1453_v25 }
 0x293   : > { %v511_v28 = vmul.f32 1.442695, %v509_v22 }
 0x295   : > { %2461 = vpow2.f32 %v511_v28 }
 0x296   : > { %1782 = vmax.xlane.f32.xlu1 %v1781_v30 }
 0x29f   : > { %v3316_v33 = vpop.eup %2461 }
 0x2a0   : > { %v515_v47 = vsel %vm432_vm4, %v3316_v33, 0.0 }
 0x2a1   : > { %516 = vadd.xlane.f32.xlu0 %v515_v47 }
 0x2a9   : > { %v435_v23 = vpop.xlane.xlu1 %434 }
 0x2aa   : > { %v439_v27 = vsub.f32 %v3170_v6, %v435_v23 }
 0x2ac   : > { %v441_v40 = vmul.f32 1.442695, %v439_v27 }
 0x2ad   : > { %v764_v43 = vpop.xlane.xlu1 %763 }
 0x2ae   : > { %2463 = vpow2.f32 %v441_v40  ;;  %v768_v42 = vsub.f32 %v3181_v17, %v764_v43 }
 0x2b0   : > { %v770_v44 = vmul.f32 1.442695, %v768_v42 }
 0x2b1   : > { %v1008_v46 = vpop.xlane.xlu1 %1007 }
 0x2b2   : > { %2465 = vpow2.f32 %v770_v44  ;;  %v1012_v48 = vsub.f32 %v3191_v24, %v1008_v46 }
 0x2b4   : > { %v1014_v50 = vmul.f32 1.442695, %v1012_v48 }
 0x2b5   : > { %v940_v52 = vpop.xlane.xlu1 %939 }
 0x2b6   : > { %2467 = vpow2.f32 %v1014_v50  ;;  %v944_v53 = vsub.f32 %v3200_v31, %v940_v52  ;;  %v1520_v54 = vpop.xlane.xlu0 %1519 }
 0x2b7   : > { %v1524_v6 = vsub.f32 %v3209_v41, %v1520_v54 }
 0x2b8   : > { %v3328_v56 = vpop.eup %2463  ;;  %v946_v57 = vmul.f32 1.442695, %v944_v53 }
 0x2b9   : > { %v1268_v58 = vpop.xlane.xlu1 %1267  ;;  %v445_v17 = vsel %vm432_vm4, %v3328_v56, 0.0  ;;  %v1526_v61 = vmul.f32 1.442695, %v1524_v6 }
 0x2ba   : > { %2469 = vpow2.f32 %v946_v57  ;;  %v1272_v59 = vsub.f32 %v3215_v45, %v1268_v58  ;;  %446 = vadd.xlane.f32.xlu0 %v445_v17 }
 0x2bb   : > { %v1452_v24 = vpop.xlane.xlu0 %1451 }
 0x2bc   : > { %v3334_v60 = vpop.eup %2465  ;;  %v1274_v62 = vmul.f32 1.442695, %v1272_v59  ;;  %v1456_v31 = vsub.f32 %v3223_v51, %v1452_v24 }
 0x2bd   : > { %v774_v63 = vsel %vm432_vm4, %v3334_v60, 0.0 }
 0x2be   : > { %2471 = vpow2.f32 %v1274_v62  ;;  %775 = vadd.xlane.f32.xlu0 %v774_v63  ;;  %v1458_v2 = vmul.f32 1.442695, %v1456_v31 }
 0x2bf   : > { %2473 = vpow2.f32 %v1526_v61 }
 0x2c0   : > { %v3339_v41 = vpop.eup %2467  ;;  %2475 = vpow2.f32 %v1458_v2 }
 0x2c1   : > { %v1018_v45 = vsel %vm432_vm4, %v3339_v41, 0.0 }
 0x2c2   : > { %1019 = vadd.xlane.f32.xlu1 %v1018_v45 }
 0x2c4   : > { %v3343_v3 = vpop.eup %2469 }
 0x2c5   : > { %v950_v4 = vsel %vm432_vm4, %v3343_v3, 0.0  ;;  %v3354_v12 = vpop.xlane.xlu0 %1779 }
 0x2c6   : > { %951 = vadd.xlane.f32.xlu0 %v950_v4 }
 0x2c8   : > { %v3347_v51 = vpop.eup %2471 }
 0x2c9   : > { %v1278_v38 = vsel %vm432_vm4, %v3347_v51, 0.0  ;;  %v3351_v7 = vpop.eup %2473 }
 0x2ca   : > { %1279 = vadd.xlane.f32.xlu1 %v1278_v38  ;;  %v508_v49 = vpop.xlane.xlu1 %507  ;;  %v1530_v16 = vsel %vm432_vm4, %v3351_v7, 0.0  ;;  %v3358_v19 = vpop.eup %2475 }
 0x2cb   : > { %v510_v10 = vsub.f32 %v3243_v8, %v508_v49  ;;  %v1462_v21 = vsel %vm432_vm4, %v3358_v19, 0.0 }
 0x2cd   : > { %v513_v15 = vmul.f32 1.442695, %v510_v10 }
 0x2ce   : > { %1531 = vadd.xlane.f32.xlu1 %v1530_v16 }
 0x2cf   : > { %2477 = vpow2.f32 %v513_v15 }
 0x2d1   : > { %v438_v20 = vpop.xlane.xlu0 %437 }
 0x2d2   : > { %v440_v13 = vsub.f32 %v3251_v18, %v438_v20  ;;  %1463 = vadd.xlane.f32.xlu1 %v1462_v21 }
 0x2d4   : > { %v443_v22 = vmul.f32 1.442695, %v440_v13  ;;  %v630_v13 = vsel %vm533_vm7, %v3116_v32, 0 }
 0x2d6   : > { %2479 = vpow2.f32 %v443_v22  ;;  %v1784_v22 = vsub.f32 %v3235_v1, %v3354_v12 }
 0x2d9   : > { %v3363_v8 = vpop.eup %2477  ;;  %v767_v25 = vpop.xlane.xlu0 %766 }
 0x2da   : > { %v769_v28 = vsub.f32 %v3259_v29, %v767_v25  ;;  %v518_v30 = vsel %vm432_vm4, %v3363_v8, 0.0  ;;  %v1786_v25 = vmul.f32 1.442695, %v1784_v22 }
 0x2db   : > { %519 = vadd.xlane.f32.xlu1 %v518_v30 }
 0x2dc   : > { %v772_v47 = vmul.f32 1.442695, %v769_v28 }
 0x2dd   : > { %v3400_v45 = vpop.permute.xlu0 %1126 }
 0x2de   : > { %2481 = vpow2.f32 %v772_v47  ;;  %v1011_v23 = vpop.xlane.xlu1 %1010 }
 0x2df   : > { %v1013_v27 = vsub.f32 %v3265_v39, %v1011_v23 }
 0x2e0   : > { %v3369_v40 = vpop.eup %2479 }
 0x2e1   : > { %v1016_v18 = vmul.f32 1.442695, %v1013_v27  ;;  %v448_v43 = vsel %vm432_vm4, %v3369_v40, 0.0  ;;  %v792_v27 = vsel %vm533_vm7, %v3287_v9, 0 }
 0x2e2   : > { %449 = vadd.xlane.f32.xlu1 %v448_v43  ;;  %v3383_v39 = vpop.permute.xlu1 %1174 }
 0x2e3   : > { %2483 = vpow2.f32 %v1016_v18 }
 0x2e8   : > { %v3373_v42 = vpop.eup %2481 }
 0x2e9   : > { %v777_v29 = vsel %vm432_vm4, %v3373_v42, 0.0 }
 0x2ea   : > { %778 = vadd.xlane.f32.xlu1 %v777_v29 }
 0x2ed   : > { %v3377_v44 = vpop.eup %2483 }
 0x2ee   : > { %v1021_v46 = vsel %vm432_vm4, %v3377_v44, 0.0 }
 0x2ef   : > { %1022 = vadd.xlane.f32.xlu0 %v1021_v46 }
 0x305   : > { %1290 = vrot.lane.b32.xlu0 %v3116_v32, %s2776_s24 }
 0x313   : > { %v943_v48 = vpop.xlane.xlu1 %942 }
 0x314   : > { %v945_v50 = vsub.f32 %v3281_v5, %v943_v48 }
 0x316   : > { %v948_v52 = vmul.f32 1.442695, %v945_v50 }
 0x317   : > { %v1271_v53 = vpop.xlane.xlu1 %1270 }
 0x318   : > { %2485 = vpow2.f32 %v948_v52  ;;  %v1273_v54 = vsub.f32 %v3291_v14, %v1271_v53  ;;  %v1036_v52 = vsel %vm533_vm7, %v3299_v55, 0  ;;  %v1132_v55 = vsel %vm533_vm7, %v3400_v45, 0 }
 0x31a   : > { %v1276_v57 = vmul.f32 1.442695, %v1273_v54 }
 0x31b   : > { %v1523_v6 = vpop.xlane.xlu1 %1522 }
 0x31c   : > { %2487 = vpow2.f32 %v1276_v57  ;;  %v1525_v58 = vsub.f32 %v3297_v37, %v1523_v6 }
 0x31e   : > { %v1528_v17 = vmul.f32 1.442695, %v1525_v58 }
 0x31f   : > { %v1455_v59 = vpop.xlane.xlu1 %1454 }
 0x320   : > { %2489 = vpow2.f32 %v1528_v17  ;;  %v1457_v24 = vsub.f32 %v3305_v11, %v1455_v59 }
 0x322   : > { %v3389_v61 = vpop.eup %2485  ;;  %v1460_v62 = vmul.f32 1.442695, %v1457_v24 }
 0x323   : > { %v1783_v31 = vpop.xlane.xlu1 %1782  ;;  %v953_v5 = vsel %vm432_vm4, %v3389_v61, 0.0 }
 0x324   : > { %2491 = vpow2.f32 %v1460_v62  ;;  %v1785_v14 = vsub.f32 %v3312_v26, %v1783_v31  ;;  %954 = vadd.xlane.f32.xlu1 %v953_v5  ;;  %v676_v31 = vsel %vm533_vm7, %v3142_v34, 0 }
 0x326   : > { %v3394_v63 = vpop.eup %2487  ;;  %v1788_v2 = vmul.f32 1.442695, %v1785_v14 }
 0x327   : > { %v1281_v37 = vsel %vm432_vm4, %v3394_v63, 0.0 }
 0x328   : > { %2493 = vpow2.f32 %v1788_v2  ;;  %1282 = vadd.xlane.f32.xlu0 %v1281_v37 }
 0x32a   : > { %v3398_v11 = vpop.eup %2489 }
 0x32b   : > { %v1533_v4 = vsel %vm432_vm4, %v3398_v11, 0.0 }
 0x32c   : > { %1534 = vadd.xlane.f32.xlu0 %v1533_v4 }
 0x32e   : > { %v3404_v38 = vpop.eup %2491  ;;  %v517_v26 = vpop.xlane.xlu0 %516 }
 0x32f   : > { %2495 = vrcp.f32 %v517_v26  ;;  %v1465_v49 = vsel %vm432_vm4, %v3404_v38, 0.0  ;;  %v840_v26 = vsel %vm533_vm7, %v3318_v35, 0  ;;  %v1084_v35 = vsel %vm533_vm7, %v3322_v36, 0 }
 0x330   : > { %1466 = vadd.xlane.f32.xlu0 %v1465_v49 }
 0x332   : > { %v3408_v10 = vpop.eup %2493 }
 0x333   : > { %v1793_v15 = vsel %vm432_vm4, %v3408_v10, 0.0 }
 0x334   : > { %1794 = vadd.xlane.f32.xlu0 %v1793_v15 }
 0x335   : > { %1338 = vrot.lane.b32.xlu1 %v3142_v34, %s2776_s24 }
 0x339   : > { %v2496_v16 = vpop.eup %2495 }
 0x33a   : > { %v523_v20 = vmul.f32 %v2496_v16, %v3316_v33 }
 0x33c   : > { %v525_v21 = vpack.c.bf16 %v523_v20, %v523_v20 }
 0x33e   : > { %2149 = vmatmul.mubr.msk.bf16.vlgmr.msra.gmra.mrb[0].mxu1 %vm432_vm4, %v525_v21  ;;  %v1180_v21 = vsel %vm533_vm7, %v3383_v39, 0 }
 0x33f   : > { %2159 = vmatpush3.bf16.msra.mxu1 %v630_v13  ;;  %2160 = vmatprep.mubr.msk.bf16.mxu1 %vm2753_vm0, %v2752_v0 }
 0x340   : > { %2170 = vmatprep.subr.bf16.mxu1 %v2752_v0 }
 0x347   : > { %v447_v28 = vpop.xlane.xlu0 %446 }
 0x348   : > { %2497 = vrcp.f32 %v447_v28 }
 0x349   : > { %2499 = vpow2.f32 %v1786_v25 }
 0x34a   : > { %1542 = vrot.lane.b32.xlu0 %v3116_v32, %s2777_s13 }
 0x34b   : > { %v776_v33 = vpop.xlane.xlu0 %775 }
 0x34c   : > { %2501 = vrcp.f32 %v776_v33 }
 0x34e   : > { %1686 = vrot.lane.b32.xlu0 %v3142_v34, %s2778_s30 }
 0x34f   : > { %v1020_v12 = vpop.xlane.xlu1 %1019 }
 0x350   : > { %2503 = vrcp.f32 %v1020_v12 }
 0x352   : > { %v2498_v30 = vpop.eup %2497  ;;  %1850 = vrot.lane.b32.xlu0 %v3142_v34, %s2779_s7 }
 0x353   : > { %v453_v1 = vmul.f32 %v2498_v30, %v3328_v56  ;;  %v3430_v47 = vpop.eup %2499  ;;  %v952_v9 = vpop.xlane.xlu0 %951 }
 0x354   : > { %v1790_v43 = vsel %vm432_vm4, %v3430_v47, 0.0  ;;  %2505 = vrcp.f32 %v952_v9 }
 0x355   : > { %v455_v23 = vpack.c.bf16 %v453_v1, %v453_v1 }
 0x356   : > { %v2502_v56 = vpop.eup %2501 }
 0x357   : > { %2161 = vmatmul.mubr.msk.bf16.vlgmr.msra.gmra.mrb[0].mxu1 %vm432_vm4, %v455_v23  ;;  %v1280_v18 = vpop.xlane.xlu1 %1279  ;;  %v782_v29 = vmul.f32 %v2502_v56, %v3334_v60 }
 0x358   : > { %2171 = vmatpush3.bf16.msra.mxu1 %v792_v27  ;;  %2172 = vmatprep.mubr.msk.bf16.mxu1 %vm2753_vm0, %v2752_v0 }
 0x359   : > { %1791 = vadd.xlane.f32.xlu1 %v1790_v43  ;;  %2182 = vmatprep.subr.bf16.mxu1 %v2752_v0  ;;  %v784_v48 = vpack.c.bf16 %v782_v29, %v782_v29 }
 0x35a   : > { %v2504_v50 = vpop.eup %2503 }
 0x35b   : > { %v3441_v46 = vpop.xlane.xlu1 %1531  ;;  %v1026_v54 = vmul.f32 %v2504_v50, %v3339_v41 }
 0x35d   : > { %v1028_v57 = vpack.c.bf16 %v1026_v54, %v1026_v54 }
 0x35e   : > { %v2506_v41 = vpop.eup %2505 }
 0x35f   : > { %v3446_v53 = vpop.xlane.xlu1 %1463  ;;  %v958_v58 = vmul.f32 %v2506_v41, %v3343_v3 }
 0x361   : > { %v960_v24 = vpack.c.bf16 %v958_v58, %v958_v58 }
 0x363   : > { %2173 = vmatmul.mubr.msk.bf16.vlgmr.msra.gmra.mrb[0].mxu1 %vm432_vm4, %v784_v48 }
 0x364   : > { %2183 = vmatpush3.bf16.msra.mxu1 %v1036_v52  ;;  %2184 = vmatprep.mubr.msk.bf16.mxu1 %vm2753_vm0, %v2752_v0 }
 0x365   : > { %2194 = vmatprep.subr.bf16.mxu1 %v2752_v0 }
 0x368   : > { %v520_v60 = vpop.xlane.xlu1 %519 }
 0x369   : > { %2507 = vrcp.f32 %v520_v60 }
 0x36a   : > { %1590 = vrot.lane.b32.xlu1 %v3142_v34, %s2777_s13 }
 0x36b   : > { %2185 = vmatmul.mubr.msk.bf16.vlgmr.msra.gmra.mrb[4].mxu1 %vm432_vm4, %v1028_v57 }
 0x36c   : > { %2195 = vmatpush3.bf16.msra.mxu1 %v1132_v55  ;;  %2196 = vmatprep.mubr.msk.bf16.mxu1 %vm2753_vm0, %v2752_v0 }
 0x36d   : > { %2206 = vmatprep.subr.bf16.mxu1 %v2752_v0 }
 0x36e   : > { %1638 = vrot.lane.b32.xlu1 %v3116_v32, %s2778_s30 }
 0x36f   : > { %v450_v6 = vpop.xlane.xlu1 %449 }
 0x370   : > { %2509 = vrcp.f32 %v450_v6 }
 0x371   : > { %2511 = vrcp.f32 %v1280_v18 }
 0x372   : > { %1802 = vrot.lane.b32.xlu1 %v3116_v32, %s2779_s7 }
 0x373   : > { %v2508_v17 = vpop.eup %2507 }
 0x374   : > { %v524_v59 = vmul.f32 %v2508_v17, %v3363_v8 }
 0x376   : > { %v526_v62 = vpack.c.bf16 %v524_v59, %v524_v59 }
 0x377   : > { %2197 = vmatmul.mubr.msk.bf16.vlgmr.msra.gmra.mrb[4].mxu1 %vm432_vm4, %v960_v24  ;;  %v779_v32 = vpop.xlane.xlu1 %778 }
 0x378   : > { %2155 = vmatmul.mubr.msk.bf16.vlgmr.msra.gmra.mrb[4].mxu0 %vm432_vm4, %v526_v62  ;;  %2208 = vmatprep.mubr.msk.bf16.mxu1 %vm2753_vm0, %v2752_v0  ;;  %2513 = vrcp.f32 %v779_v32 }
 0x379   : > { %2165 = vmatpush3.bf16.msra.mxu0 %v676_v31  ;;  %2166 = vmatprep.mubr.msk.bf16.mxu0 %vm2753_vm0, %v2752_v0 }
 0x37a   : > { %2176 = vmatprep.subr.bf16.mxu0 %v2752_v0  ;;  %v2510_v3 = vpop.eup %2509 }
 0x37b   : > { %v2512_v8 = vpop.eup %2511  ;;  %v454_v14 = vmul.f32 %v2510_v3, %v3369_v40 }
 0x37c   : > { %v1023_v5 = vpop.xlane.xlu0 %1022  ;;  %v1286_v2 = vmul.f32 %v2512_v8, %v3347_v51 }
 0x37d   : > { %v456_v45 = vpack.c.bf16 %v454_v14, %v454_v14  ;;  %2515 = vrcp.f32 %v1023_v5 }
 0x37e   : > { %v1288_v4 = vpack.c.bf16 %v1286_v2, %v1286_v2 }
 0x380   : > { %v1291_v37 = vpop.permute.xlu0 %1290 }
 0x381   : > { %v1296_v34 = vsel %vm533_vm7, %v1291_v37, 0 }
 0x382   : > { %2207 = vmatpush3.bf16.msra.mxu1 %v1296_v34  ;;  %v2514_v51 = vpop.eup %2513 }
 0x383   : > { %2218 = vmatprep.subr.bf16.mxu1 %v2752_v0  ;;  %v783_v40 = vmul.f32 %v2514_v51, %v3373_v42 }
 0x384   : > { %2167 = vmatmul.mubr.msk.bf16.vlgmr.msra.gmra.mrb[4].mxu0 %vm432_vm4, %v456_v45 }
 0x385   : > { %2177 = vmatpush3.bf16.msra.mxu0 %v840_v26  ;;  %2209 = vmatmul.mubr.msk.bf16.vlgmr.msra.gmra.mrb[4].mxu1 %vm432_vm4, %v1288_v4  ;;  %v785_v49 = vpack.c.bf16 %v783_v40, %v783_v40 }
 0x386   : > { %2178 = vmatprep.mubr.msk.bf16.mxu0 %vm2753_vm0, %v2752_v0  ;;  %2188 = vmatprep.subr.bf16.mxu0 %v2752_v0 }
 0x387   : > { %2220 = vmatprep.mubr.msk.bf16.mxu1 %vm2753_vm0, %v2752_v0  ;;  %v2516_v15 = vpop.eup %2515 }
 0x388   : > { %v1027_v16 = vmul.f32 %v2516_v15, %v3377_v44 }
 0x38a   : > { %v1029_v20 = vpack.c.bf16 %v1027_v16, %v1027_v16 }
 0x390   : > { %2179 = vmatmul.mubr.msk.bf16.vlgmr.msra.gmra.mrb[4].mxu0 %vm432_vm4, %v785_v49 }
 0x391   : > { %2189 = vmatpush3.bf16.msra.mxu0 %v1084_v35  ;;  %2190 = vmatprep.mubr.msk.bf16.mxu0 %vm2753_vm0, %v2752_v0 }
 0x392   : > { %2200 = vmatprep.subr.bf16.mxu0 %v2752_v0 }
 0x398   : > { %2191 = vmatmul.mubr.msk.bf16.vlgmr.msra.gmra.mrb[8].mxu0 %vm432_vm4, %v1029_v20 }
 0x399   : > { %2201 = vmatpush3.bf16.msra.mxu0 %v1180_v21  ;;  %2202 = vmatprep.mubr.msk.bf16.mxu0 %vm2753_vm0, %v2752_v0 }
 0x39a   : > { %2212 = vmatprep.subr.bf16.mxu0 %v2752_v0 }
 0x3b1   : > { %v955_v36 = vpop.xlane.xlu1 %954 }
 0x3b2   : > { %2517 = vrcp.f32 %v955_v36 }
 0x3b3   : > { %2519 = vrcp.f32 %v3441_v46 }
 0x3b5   : > { %v1283_v42 = vpop.xlane.xlu0 %1282  ;;  %v1339_v39 = vpop.permute.xlu1 %1338 }
 0x3b6   : > { %2521 = vrcp.f32 %v1283_v42  ;;  %v1344_v30 = vsel %vm533_vm7, %v1339_v39, 0 }
 0x3b9   : > { %v1535_v44 = vpop.xlane.xlu0 %1534 }
 0x3ba   : > { %2523 = vrcp.f32 %v1535_v44 }
 0x3bb   : > { %2525 = vrcp.f32 %v3446_v53 }
 0x3bc   : > { %v2518_v13 = vpop.eup %2517 }
 0x3bd   : > { %v959_v22 = vmul.f32 %v2518_v13, %v3389_v61  ;;  %v1467_v25 = vpop.xlane.xlu0 %1466  ;;  %v2520_v33 = vpop.eup %2519 }
 0x3be   : > { %v1538_v23 = vmul.f32 %v2520_v33, %v3351_v7  ;;  %2527 = vrcp.f32 %v1467_v25 }
 0x3bf   : > { %v961_v28 = vpack.c.bf16 %v959_v22, %v959_v22 }
 0x3c0   : > { %v2522_v12 = vpop.eup %2521  ;;  %v1540_v43 = vpack.c.bf16 %v1538_v23, %v1538_v23 }
 0x3c1   : > { %v1795_v1 = vpop.xlane.xlu0 %1794  ;;  %2203 = vmatmul.mubr.msk.bf16.vlgmr.msra.gmra.mrb[8].mxu0 %vm432_vm4, %v961_v28  ;;  %v1287_v18 = vmul.f32 %v2522_v12, %v3394_v63 }
 0x3c2   : > { %2213 = vmatpush3.bf16.msra.mxu0 %v1344_v30  ;;  %2214 = vmatprep.mubr.msk.bf16.mxu0 %vm2753_vm0, %v2752_v0 }
 0x3c3   : > { %2224 = vmatprep.subr.bf16.mxu0 %v2752_v0  ;;  %v1289_v56 = vpack.c.bf16 %v1287_v18, %v1287_v18 }
 0x3c4   : > { %v2524_v7 = vpop.eup %2523 }
 0x3c5   : > { %v1543_v27 = vpop.permute.xlu0 %1542  ;;  %v1539_v29 = vmul.f32 %v2524_v7, %v3398_v11  ;;  %v2526_v46 = vpop.eup %2525 }
 0x3c6   : > { %v1548_v61 = vsel %vm533_vm7, %v1543_v27, 0  ;;  %v1470_v52 = vmul.f32 %v2526_v46, %v3358_v19 }
 0x3c7   : > { %2219 = vmatpush3.bf16.msra.mxu1 %v1548_v61  ;;  %v1541_v54 = vpack.c.bf16 %v1539_v29, %v1539_v29 }
 0x3c8   : > { %2230 = vmatprep.subr.bf16.mxu1 %v2752_v0  ;;  %v1472_v11 = vpack.c.bf16 %v1470_v52, %v1470_v52  ;;  %v2528_v55 = vpop.eup %2527 }
 0x3c9   : > { %v1687_v50 = vpop.permute.xlu0 %1686  ;;  %v1471_v6 = vmul.f32 %v2528_v55, %v3404_v38 }
 0x3ca   : > { %2221 = vmatmul.mubr.msk.bf16.vlgmr.msra.gmra.mrb[8].mxu1 %vm432_vm4, %v1540_v43  ;;  %v1692_v53 = vsel %vm533_vm7, %v1687_v50, 0 }
 0x3cb   : > { %2232 = vmatprep.mubr.msk.bf16.mxu1 %vm2753_vm0, %v2752_v0  ;;  %v1473_v24 = vpack.c.bf16 %v1471_v6, %v1471_v6 }
 0x3cd   : > { %2215 = vmatmul.mubr.msk.bf16.vlgmr.msra.gmra.mrb[8].mxu0 %vm432_vm4, %v1289_v56  ;;  %v1851_v17 = vpop.permute.xlu0 %1850 }
 0x3ce   : > { %2226 = vmatprep.mubr.msk.bf16.mxu0 %vm2753_vm0, %v2752_v0  ;;  %v1856_v62 = vsel %vm533_vm7, %v1851_v17, 0 }
 0x3e6   : > { %v1792_v63 = vpop.xlane.xlu1 %1791 }
 0x3e7   : > { %2529 = vrcp.f32 %v1792_v63 }
 0x3e8   : > { %2531 = vrcp.f32 %v1795_v1 }
 0x3ea   : > { %v1591_v9 = vpop.permute.xlu1 %1590 }
 0x3eb   : > { %v1596_v48 = vsel %vm533_vm7, %v1591_v9, 0 }
 0x3ec   : > { %2225 = vmatpush3.bf16.msra.mxu0 %v1596_v48 }
 0x3ed   : > { %2236 = vmatprep.subr.bf16.mxu0 %v2752_v0 }
 0x3ee   : > { %v1639_v60 = vpop.permute.xlu1 %1638 }
 0x3ef   : > { %v1644_v57 = vsel %vm533_vm7, %v1639_v60, 0  ;;  %2227 = vmatmul.mubr.msk.bf16.vlgmr.msra.gmra.mrb[12].mxu0 %vm432_vm4, %v1541_v54 }
 0x3f0   : > { %2231 = vmatpush3.bf16.msra.mxu1 %v1644_v57  ;;  %2237 = vmatpush3.bf16.msra.mxu0 %v1692_v53 }
 0x3f1   : > { %2242 = vmatprep.subr.bf16.mxu1 %v2752_v0  ;;  %2238 = vmatprep.mubr.msk.bf16.mxu0 %vm2753_vm0, %v2752_v0  ;;  %v2530_v58 = vpop.eup %2529 }
 0x3f2   : > { %v1803_v19 = vpop.permute.xlu1 %1802  ;;  %2248 = vmatprep.subr.bf16.mxu0 %v2752_v0  ;;  %v1798_v59 = vmul.f32 %v2530_v58, %v3430_v47  ;;  %v2532_v32 = vpop.eup %2531 }
 0x3f3   : > { %v1808_v41 = vsel %vm533_vm7, %v1803_v19, 0  ;;  %2233 = vmatmul.mubr.msk.bf16.vlgmr.msra.gmra.mrb[8].mxu1 %vm432_vm4, %v1472_v11  ;;  %v1799_v38 = vmul.f32 %v2532_v32, %v3408_v10 }
 0x3f4   : > { %2243 = vmatpush3.bf16.msra.mxu1 %v1808_v41  ;;  %2244 = vmatprep.mubr.msk.bf16.mxu1 %vm2753_vm0, %v2752_v0  ;;  %v1800_v31 = vpack.c.bf16 %v1798_v59, %v1798_v59 }
 0x3f5   : > { %v1801_v3 = vpack.c.bf16 %v1799_v38, %v1799_v38 }
 0x3fb   : > { %2239 = vmatmul.mubr.msk.bf16.vlgmr.msra.gmra.mrb[12].mxu0 %vm432_vm4, %v1473_v24 }
 0x3fc   : > { %2249 = vmatpush3.bf16.msra.mxu0 %v1856_v62  ;;  %2250 = vmatprep.mubr.msk.bf16.mxu0 %vm2753_vm0, %v2752_v0 }
 0x3ff   : > { %2245 = vmatmul.mubr.msk.bf16.vlgmr.msra.gmra.mrb[8].mxu1 %vm432_vm4, %v1800_v31 }
 0x407   : > { %2251 = vmatmul.mubr.msk.bf16.vlgmr.msra.gmra.mrb[12].mxu0 %vm432_vm4, %v1801_v3 }
 0x436   : > { %v828_v47 = vpop.f32.mrb[0].mxu1 }
 0x437   : > { %v884_v8 = vmul.f32 0.33333334, %v828_v47  ;;  %v2174_v5 = vpop.f32.mrb[1].mxu1 }
 0x438   : > { %v831_v14 = vpop.f32.mrb[2].mxu1 }
 0x439   : > { %887 = vst.msk [vmem:[%s3545_s23] sm:$0xff] %vm886_vm8, %v884_v8  ;;  %v2175_v0 = vpop.f32.mrb[3].mxu1 }
 0x458   : > { %v1332_v2 = vpop.f32.mrb[4].mxu1 }
 0x459   : > { %v1388_v37 = vmul.f32 0.33333334, %v1332_v2  ;;  %v2210_v34 = vpop.f32.mrb[5].mxu1 }
 0x45a   : > { %v1335_v45 = vpop.f32.mrb[6].mxu1 }
 0x45b   : > { %1392 = vrot.lane.b32.xlu1 %v1388_v37, %s2780_s2  ;;  %v2211_v10 = vpop.f32.mrb[7].mxu1 }
 0x463   : > { %v876_v4 = vpop.f32.mrb[4].mxu0 }
 0x464   : > { %v885_v26 = vmul.f32 0.33333334, %v876_v4  ;;  %v2180_v51 = vpop.f32.mrb[5].mxu0 }
 0x465   : > { %v879_v40 = vpop.f32.mrb[6].mxu0 }
 0x466   : > { %888 = vst.msk [vmem:[%s3545_s23 + $0x8] sm:$0xff] %vm886_vm8, %v885_v26  ;;  %v2181_v49 = vpop.f32.mrb[7].mxu0 }
 0x4a0   : > { %v1380_v15 = vpop.f32.mrb[8].mxu0 }
 0x4a1   : > { %v1389_v35 = vmul.f32 0.33333334, %v1380_v15  ;;  %v2216_v16 = vpop.f32.mrb[9].mxu0 }
 0x4a2   : > { %v1383_v20 = vpop.f32.mrb[10].mxu0 }
 0x4a3   : > { %1394 = vrot.lane.b32.xlu0 %v1389_v35, %s2780_s2  ;;  %v2217_v21 = vpop.f32.mrb[11].mxu0 }
 0x4cd   : > { %v1393_v36 = vpop.permute.xlu1 %1392 }
 0x4ce   : > { %1399 = vst.msk [vmem:[%s3545_s23] sm:$0xff] %vm1398_vm9, %v1393_v36 }
 0x4d2   : > { %v1844_v42 = vpop.f32.mrb[8].mxu1 }
 0x4d3   : > { %v1900_v44 = vmul.f32 0.33333334, %v1844_v42  ;;  %v2246_v13 = vpop.f32.mrb[9].mxu1 }
 0x4d4   : > { %v1847_v22 = vpop.f32.mrb[10].mxu1 }
 0x4d5   : > { %1904 = vrot.lane.b32.xlu1 %v1900_v44, %s2781_s12  ;;  %v2247_v25 = vpop.f32.mrb[11].mxu1 }
 0x4da   : > { %v1892_v39 = vpop.f32.mrb[12].mxu0 }
 0x4db   : > { %v1901_v28 = vmul.f32 0.33333334, %v1892_v39  ;;  %v2252_v33 = vpop.f32.mrb[13].mxu0 }
 0x4dc   : > { %v1895_v30 = vpop.f32.mrb[14].mxu0 }
 0x4dd   : > { %1906 = vrot.lane.b32.xlu0 %v1901_v28, %s2781_s12  ;;  %v2253_v1 = vpop.f32.mrb[15].mxu0 }
 0x515   : > { %v1395_v12 = vpop.permute.xlu0 %1394 }
 0x516   : > { %1400 = vst.msk [vmem:[%s3545_s23 + $0x8] sm:$0xff] %vm1398_vm9, %v1395_v12 }
 0x547   : > { %v1905_v23 = vpop.permute.xlu1 %1904 }
 0x548   : > { %1911 = vst.msk [vmem:[%s3545_s23] sm:$0xff] %vm1910_vm10, %v1905_v23 }
 0x54f   : > { %v1907_v27 = vpop.permute.xlu0 %1906 }
 0x550   : > { %1912 = vst.msk [vmem:[%s3545_s23 + $0x8] sm:$0xff] %vm1910_vm10, %v1907_v27 }
 0x551   : > { %2662 = shalt.err (!%p2659_p6)
}
 0x552   : > { %s2663_s25 = scalar_lea.hbm %s3561_s22, 256  ;;  %s2667_s24 = scalar_lea.hbm %s3616_s4, 1024 }
 0x553   : > { %p2664_p1 = scmp.ne.s32.totalorder %s3561_s22, %s2663_s25  ;;  %p2668_p2 = scmp.lt.u32.totalorder %s3561_s22, %s3616_s4 }
 0x554   : > { %p2669_p3 = scmp.lt.u32.totalorder %s2667_s24, %s2663_s25  ;;  %p2671_p11 = scmp.lt.u32.totalorder %s2663_s25, %s3561_s22 }
 0x555   : > { %p2665_p9 = pnand %p2664_p1, %p3649_p13 }
 0x556   : > { %p2670_p8 = por %p2669_p3, %p2668_p2 }
 0x557   : > { %p2666_p12 = pneg %p2665_p9 }
 0x558   : > { %p2672_p0 = por %p2671_p11, %p2670_p8 }
 0x55a   : > { %p2673_p4 = pnand %p2672_p0, %p2666_p12 }
 0x55c   : > { %2676 = shalt.err (!%p2673_p4)
}
 0x55d   : > { %s2783_s7 = smov 128   ;;  %s2784_s23 = smov 8  }
 0x55e   : > { %2314 = dma.vmem_to_hbm [thread:$0]  (%p3649_p13), %s3563_s5, 256, %s3561_s22, %s1914_s0, %s2783_s7, %s2783_s7, %s2784_s23  }
 0x55f PF: > { %p2339_p5 = scmp.ge.s32.totalorder %s2743_s20, 2  ;;  %s1944_s2 = sand.u32 1, %s2723_s15  }
 0x560   : > { %p3650_p10 = scmp.ne.s32.totalorder %s3632_s27, 0  ;;  %s1945_s12 = scalar_lea.sflag [#allocation4], %s1944_s2 }
 0x562   : > { %p2331_p7 = pnand %p2339_p5, %p3650_p10 }
 0x564   : > { %2718 = dma.done.wait (!%p2331_p7), %s1945_s12, 256  }
 0x565   : > { %2720 = vsyncadd (!%p2331_p7), %s1945_s12, 4294967040  ;;  %s24_s20 = sadd.s32 1, %s2743_s20   ;;  %s3651_s26 = sld [smem:[#allocation16_spill]] }
 0x566   : > { %p21_p6 = scmp.ge.s32.totalorder %s24_s20, 6   ;;  %s3652_s15 = smov %s2727_s16 }
 0x567   : > { %s3653_s16 = smov %s2731_s17  ;;  %s3654_s17 = smov %s2972_s9 }
 0x568   : > { %s3655_s18 = smov %s2739_s19  ;;  %23 = sbr.rel (!%p21_p6) target bundleno = 13 (0xd), region = 104 }
 0x56b   : > { %s3656_s19 = smov %s3651_s26 }
 0x56f   :  { %1950 = vsyncpa [#allocation3], 1 }
 0x570   :  { %1952 = vsyncpa [#allocation3 + $0x1], 1 }
 0x571   :  { %1953 = vsyncpa [#allocation6], 1 }
 0x572   :  { %1955 = vsyncpa [#allocation6 + $0x1], 1 }
 0x573   :  { %1956 = vsyncpa [#allocation9], 1 }
 0x574   :  { %1957 = vsyncpa [#allocation4], 1 }
 0x575   :  { %1959 = vsyncpa [#allocation4 + $0x1], 1 }

// kernel: encoder_layer_forward.5
= control target key start
LH: loop header
LB: loop body
LE: loop exit
PB: predicated region body
PF: predicated region fallthrough
CT: control target
= control target key end

     0   :  { %s8080_s0 = inlined_call_operand.hbm [shape: f32[2,8,4,6], index: 0, kind: input, shape index: {}]   ;;  %s8081_s1 = inlined_call_operand.hbm [shape: f32[2,4,8,6], index: 1, kind: input, shape index: {}]   ;;  %s8082_s2 = inlined_call_operand.hbm [shape: f32[2,4,4], index: 2, kind: input, shape index: {}]   ;;  %s8083_s3 = inlined_call_operand.hbm [shape: bf16[6,32], index: 3, kind: input, shape index: {}]   ;;  %s8084_s4 = inlined_call_operand.hbm [shape: f32[12,6], index: 4, kind: input, shape index: {}]   ;;  %s8085_s5 = inlined_call_operand.hbm [shape: f32[1,6], index: 5, kind: input, shape index: {}]   ;;  %s8086_s6 = inlined_call_operand.hbm [shape: f32[2,4,8,6], index: 6, kind: output, shape index: {}]  }
   0x1   :  { %8122 = sst [smem:[#allocation34_spill]] %s8080_s0 }
   0x2   :  { %8123 = sst [smem:[#allocation35_spill]] %s8082_s2 }
   0x3   :  { %8124 = sst [smem:[#allocation36_spill]] %s8083_s3 }
   0x4   :  { %8125 = sst [smem:[#allocation37_spill]] %s8084_s4 }
   0x5   :  { %8126 = sst [smem:[#allocation38_spill]] %s8085_s5 }
   0x6   :  { %11 = vsyncpa [#allocation4], 0 }
   0x7   :  { %13 = vsyncpa [#allocation4 + $0x1], 0 }
   0x8   :  { %14 = vsyncpa [#allocation7], 0 }
   0x9   :  { %16 = vsyncpa [#allocation7 + $0x1], 0 }
   0xa   :  { %17 = vsyncpa [#allocation10], 0 }
   0xb   :  { %18 = vsyncpa [#allocation13], 0 }
   0xc   :  { %19 = vsyncpa [#allocation5], 0 }
   0xd   :  { %21 = vsyncpa [#allocation5 + $0x1], 0  ;;  %s6182_s21 = smov 0   ;;  %s6184_s22 = smov 0  }
   0xe   :  { %s6186_s23 = smov 0   ;;  %s6188_s24 = smov 0  }
   0xf   :  { %s6190_s25 = smov 0   ;;  %s6192_s26 = smov 0  }
  0x10 LB: > { %8127 = sst [smem:[#allocation21_spill]] %s6094_s21  ;;  %s6213_s27 = sadd.s32 4294967295, %s6114_s26   ;;  %s6114_s26 = sphi %s6192_s26, %s27_s26   ;;  %s6110_s25 = sphi %s6190_s25, %s8210_s25   ;;  %s6106_s24 = sphi %s6188_s24, %s8209_s24   ;;  %s6102_s23 = sphi %s6186_s23, %s8208_s23   ;;  %s6098_s22 = sphi %s6184_s22, %s8207_s22   ;;  %s6094_s21 = sphi %s6182_s21, %s8206_s21  }
  0x11   : > { %s4886_s28 = sadd.s32 4294967294, %s6114_s26   ;;  %p61_p0 = scmp.ne.s32.totalorder %s6098_s22, %s6094_s21 }
  0x12   : > { %p8087_p1 = scmp.eq.s32.totalorder %s6213_s27, 0  ;;  %p205_p3 = scmp.eq.s32.totalorder %s4886_s28, 1 }
  0x13   : > { %p4887_p5 = scmp.ge.s32.totalorder %s6114_s26, 1  ;;  %p212_p7 = scmp.lt.s32.totalorder %s6114_s26, 3 }
  0x14   : > { %p6222_p4 = por %p8087_p1, %p61_p0  ;;  %p6227_p6 = por %p205_p3, %p61_p0 }
  0x15   : > { %p6232_p8 = pnand %p4887_p5, %p212_p7  ;;  %s6116_s8 = smov [#allocation8]  }
  0x16   : > { %s8128_s29 = scalar_select %p6222_p4, 1, 0 }
  0x17   : > { %s8129_s30 = scalar_select %p6227_p6, 1, 0 }
  0x18   : > { %s8131_s7 = scalar_select %p6232_p8, 1, 0 }
  0x19   : > { %8130 = sst [smem:[#allocation22_spill]] %s8129_s30  ;;  %s224_s9 = sshll.u32 %s6116_s8, 4  ;;  %s6236_s9 = int_to_ptr.vmem [resolvable:$true] %s224_s9 }
  0x1a   : > { %p5501_p9 = pneg %p6232_p8  ;;  %s6117_s11 = smov [#allocation9]  }
  0x1b   : > { %s238_s12 = sshll.u32 %s6117_s11, 4  ;;  %s6118_s13 = smov [#allocation11]   ;;  %s6247_s12 = int_to_ptr.vmem [resolvable:$true] %s238_s12 }
  0x1c   : > { %p6243_p11 = pnand %p5501_p9, %p8087_p1  ;;  %s6249_s14 = sshll.u32 %s6118_s13, 4  ;;  %s249_s14 = int_to_ptr.vmem [resolvable:$true] %s6249_s14 }
  0x1d   : > { %s8133_s2 = sld [smem:[#allocation35_spill]] }
  0x1e   : > { %p6259_p13 = pneg %p6243_p11 }
  0x23   : > { %s5844_s17 = scalar_lea.hbm %s8133_s2, 128 }
  0x24   : > { %p5845_p12 = scmp.ne.s32.totalorder %s8133_s2, %s5844_s17  ;;  %p5851_p5 = scmp.lt.u32.totalorder %s5844_s17, %s8133_s2 }
  0x26   : > { %p5847_p0 = pnand %p6259_p13, %p5845_p12 }
  0x28   : > { %p5848_p3 = pneg %p5847_p0 }
  0x2a   : > { %p5853_p7 = pnand %p5851_p5, %p5848_p3 }
  0x2c   : > { %5856 = shalt.err (!%p5853_p7)
}
  0x2d   : > { %s5857_s11 = scalar_lea.vmem %s6236_s9, 128  ;;  %p5865_p2 = scmp.lt.s32.totalorder %s6236_s9, %s6236_s9 }
  0x2e   : > { %p5858_p9 = scmp.ne.s32.totalorder %s6236_s9, %s5857_s11  ;;  %p5866_p6 = scmp.lt.s32.totalorder %s5857_s11, %s5857_s11 }
  0x30   : > { %p5860_p10 = pnand %p5858_p9, %p6259_p13  ;;  %p5867_p12 = por %p5866_p6, %p5865_p2 }
  0x32   : > { %p5861_p1 = pneg %p5860_p10 }
  0x34   : > { %p5868_p0 = pnand %p5867_p12, %p5861_p1 }
  0x36   : > { %5871 = shalt.err (!%p5868_p0)
}
  0x37   : > { %s8092_s13 = smov 64   ;;  %s8093_s15 = smov 4  }
  0x38   : > { %5504 = dma.hbm_to_vmem [thread:$0]  (!%p6243_p11), %s8133_s2, 128, %s6236_s9, [#allocation7], %s8092_s13, %s8092_s13, %s8093_s15  }
  0x39   : > { %s8135_s3 = sld [smem:[#allocation36_spill]] }
  0x3f   : > { %s5872_s28 = scalar_lea.hbm %s8135_s3, 64 }
  0x40   : > { %p5873_p1 = scmp.ne.s32.totalorder %s8135_s3, %s5872_s28  ;;  %p5879_p10 = scmp.lt.u32.totalorder %s5872_s28, %s8135_s3 }
  0x42   : > { %p5875_p2 = pnand %p5873_p1, %p6259_p13 }
  0x44   : > { %p5876_p6 = pneg %p5875_p2 }
  0x46   : > { %p5881_p3 = pnand %p5879_p10, %p5876_p6 }
  0x48   : > { %5884 = shalt.err (!%p5881_p3)
}
  0x49   : > { %s5885_s9 = scalar_lea.vmem %s6247_s12, 64  ;;  %p5893_p12 = scmp.lt.s32.totalorder %s6247_s12, %s6247_s12 }
  0x4a   : > { %p5886_p5 = scmp.ne.s32.totalorder %s6247_s12, %s5885_s9  ;;  %p5894_p0 = scmp.lt.s32.totalorder %s5885_s9, %s5885_s9 }
  0x4c   : > { %p5888_p7 = pnand %p5886_p5, %p6259_p13  ;;  %p5895_p1 = por %p5894_p0, %p5893_p12 }
  0x4e   : > { %p5889_p9 = pneg %p5888_p7 }
  0x50   : > { %p5896_p2 = pnand %p5895_p1, %p5889_p9 }
  0x52   : > { %5899 = shalt.err (!%p5896_p2)
}
  0x53   : > { %5507 = dma.hbm_to_vmem [thread:$0]  (!%p6243_p11), %s8135_s3, 64, %s6247_s12, [#allocation10]  }
  0x54   : > { %s8136_s4 = sld [smem:[#allocation37_spill]] }
  0x5a   : > { %s5900_s18 = scalar_lea.hbm %s8136_s4, 256 }
  0x5b   : > { %p5901_p6 = scmp.ne.s32.totalorder %s8136_s4, %s5900_s18  ;;  %p5907_p5 = scmp.lt.u32.totalorder %s5900_s18, %s8136_s4 }
  0x5d   : > { %p5903_p10 = pnand %p5901_p6, %p6259_p13 }
  0x5f   : > { %p5904_p3 = pneg %p5903_p10 }
  0x61   : > { %p5909_p7 = pnand %p5907_p5, %p5904_p3 }
  0x63   : > { %5912 = shalt.err (!%p5909_p7)
}
  0x64   : > { %s5913_s9 = scalar_lea.vmem %s249_s14, 256  ;;  %p5921_p1 = scmp.lt.s32.totalorder %s249_s14, %s249_s14 }
  0x65   : > { %p5914_p9 = scmp.ne.s32.totalorder %s249_s14, %s5913_s9  ;;  %p5922_p2 = scmp.lt.s32.totalorder %s5913_s9, %s5913_s9 }
  0x67   : > { %p5916_p12 = pnand %p5914_p9, %p6259_p13  ;;  %p5923_p4 = por %p5922_p2, %p5921_p1 }
  0x69   : > { %p5917_p0 = pneg %p5916_p12 }
  0x6b   : > { %p5924_p8 = pnand %p5923_p4, %p5917_p0 }
  0x6d   : > { %5927 = shalt.err (!%p5924_p8)
}
  0x6e   : > { %s8094_s12 = smov 128   ;;  %s8095_s21 = smov 8  }
  0x6f   : > { %5510 = dma.hbm_to_vmem [thread:$0]  (!%p6243_p11), %s8136_s4, 256, %s249_s14, [#allocation10], %s8094_s12, %s8094_s12, %s8095_s21  }
  0x70   : > { %s6123_s17 = smov [#allocation12]   ;;  %s8137_s5 = sld [smem:[#allocation38_spill]] }
  0x71   : > { %s262_s18 = sshll.u32 %s6123_s17, 4  ;;  %s263_s18 = int_to_ptr.vmem [resolvable:$true] %s262_s18 }
  0x76   : > { %s5928_s8 = scalar_lea.hbm %s8137_s5, 16 }
  0x77   : > { %p5929_p4 = scmp.ne.s32.totalorder %s8137_s5, %s5928_s8  ;;  %p5935_p10 = scmp.lt.u32.totalorder %s5928_s8, %s8137_s5 }
  0x79   : > { %p5931_p8 = pnand %p5929_p4, %p6259_p13 }
  0x7b   : > { %p5932_p6 = pneg %p5931_p8 }
  0x7d   : > { %p5937_p3 = pnand %p5935_p10, %p5932_p6 }
  0x7f   : > { %5940 = shalt.err (!%p5937_p3)
}
  0x80   : > { %s5941_s14 = scalar_lea.vmem %s263_s18, 16  ;;  %s5948_s30 = scalar_lea.vmem %s263_s18, 32 }
  0x81   : > { %p5942_p5 = scmp.ne.s32.totalorder %s263_s18, %s5941_s14  ;;  %p5949_p12 = scmp.lt.s32.totalorder %s263_s18, %s263_s18 }
  0x82   : > { %p5950_p0 = scmp.lt.s32.totalorder %s5948_s30, %s5941_s14 }
  0x83   : > { %p5944_p7 = pnand %p5942_p5, %p6259_p13 }
  0x84   : > { %p5951_p1 = por %p5950_p0, %p5949_p12 }
  0x85   : > { %p5945_p9 = pneg %p5944_p7 }
  0x87   : > { %p5952_p2 = pnand %p5951_p1, %p5945_p9 }
  0x89   : > { %5955 = shalt.err (!%p5952_p2)
}
  0x8a   : > { %5513 = dma.hbm_to_vmem [thread:$0]  (!%p6243_p11), %s8137_s5, 16, %s263_s18, [#allocation13]  }
  0x8b   : > { %s39_s20 = sadd.s32 1, %s6110_s25  ;;  %s48_s13 = sadd.s32 1, %s6102_s23 }
  0x8c   : > { %p41_p13 = scmp.ge.s32.totalorder %s39_s20, 2  ;;  %p55_p4 = scmp.ne.s32.totalorder %s6102_s23, %s6098_s22 }
  0x8d   : > { %p56_p8 = scmp.eq.s32.totalorder %s6114_s26, 0  ;;  %p5529_p6 = scmp.lt.s32.totalorder %s6114_s26, 2 }
  0x8e   : > { %s8212_s20 = smov (%p41_p13, %s39_s20), 0  ;;  %p8138_p3 = scmp.eq.s32.totalorder %s6213_s27, 1 }
  0x8f   : > { %p57_p10 = por %p56_p8, %p55_p4  ;;  %s43_s15 = ssub.s32 %s6110_s25, %s8212_s20 }
  0x90   : > { %p6356_p5 = por %p8138_p3, %p55_p4  ;;  %s273_s19 = sand.u32 1, %s6102_s23  }
  0x91   : > { %p46_p7 = scmp.eq.s32.totalorder %s43_s15, 0  ;;  %s6363_s18 = sshll.u32 %s273_s19, 5 }
  0x92   : > { %s4994_s28 = sshll.u32 %s6110_s25, 9  ;;  %s8140_s0 = sld [smem:[#allocation34_spill]] }
  0x93   : > { %s6367_s8 = scalar_select %p46_p7, %s6102_s23, %s48_s13  }
  0x94   : > { %s277_s30 = scalar_lea.vmem [#allocation3], %s6363_s18  ;;  %p6377_p11 = pnand %p5529_p6, %p57_p10 }
  0x95   : > { %s286_s16 = sshll.u32 %s277_s30, 4  ;;  %s6386_s11 = scalar_lea.hbm %s8081_s1, %s4994_s28  ;;  %s6381_s16 = int_to_ptr.vmem [resolvable:$true] %s286_s16 }
  0x96   : > { %s6388_s9 = scalar_lea.sflag [#allocation4], %s273_s19  ;;  %p5958_p12 = pneg %p6377_p11 }
  0x98   : > { %s6372_s14 = scalar_lea.hbm %s8140_s0, %s4994_s28  ;;  %s5961_s2 = scalar_lea.hbm %s8140_s0, 1024 }
  0x99   : > { %s5956_s12 = scalar_lea.hbm %s6372_s14, 512  ;;  %p5962_p2 = scmp.lt.u32.totalorder %s6372_s14, %s8140_s0 }
  0x9a   : > { %p5957_p9 = scmp.ne.s32.totalorder %s6372_s14, %s5956_s12  ;;  %p5963_p13 = scmp.lt.u32.totalorder %s5961_s2, %s5956_s12 }
  0x9b   : > { %p5965_p8 = scmp.lt.u32.totalorder %s5956_s12, %s6372_s14 }
  0x9c   : > { %p5959_p0 = pnand %p5958_p12, %p5957_p9  ;;  %p5964_p4 = por %p5963_p13, %p5962_p2 }
  0x9e   : > { %p5960_p1 = pneg %p5959_p0  ;;  %p5966_p6 = por %p5965_p8, %p5964_p4 }
  0xa0   : > { %p5967_p10 = pnand %p5966_p6, %p5960_p1 }
  0xa2   : > { %5970 = shalt.err (!%p5967_p10)
}
  0xa3   : > { %s5971_s19 = scalar_lea.vmem %s6381_s16, 512  ;;  %s6124_s21 = smov [#allocation3]  }
  0xa4   : > { %p5972_p3 = scmp.ne.s32.totalorder %s6381_s16, %s5971_s19  ;;  %s5976_s28 = sshll.u32 %s6124_s21, 4  ;;  %s5977_s28 = int_to_ptr.vmem [resolvable:$false] %s5976_s28 }
  0xa5   : > { %s5978_s3 = scalar_lea.vmem %s5977_s28, 1024  ;;  %p5979_p0 = scmp.lt.s32.totalorder %s6381_s16, %s5977_s28 }
  0xa6   : > { %p5974_p7 = pnand %p5972_p3, %p5958_p12  ;;  %p5980_p2 = scmp.lt.s32.totalorder %s5978_s3, %s5971_s19 }
  0xa8   : > { %p5975_p9 = pneg %p5974_p7  ;;  %p5981_p13 = por %p5980_p2, %p5979_p0 }
  0xaa   : > { %p5982_p4 = pnand %p5981_p13, %p5975_p9 }
  0xac   : > { %5985 = shalt.err (!%p5982_p4)
}
  0xad   : > { %s8142_s2 = smov 4   ;;  %s8143_s4 = smov 64  }
  0xae   : > { %5517 = dma.hbm_to_vmem [thread:$0]  (!%p6377_p11), %s6372_s14, 512, %s6381_s16, %s6388_s9, %s8143_s4, %s8143_s4, %s8142_s2  }
  0xaf   : > { %s300_s12 = scalar_lea.vmem [#allocation6], %s6363_s18  ;;  %s296_s15 = sand.u32 1, %s6114_s26  }
  0xb0   : > { %s308_s13 = sshll.u32 %s300_s12, 4  ;;  %s6423_s30 = scalar_lea.sflag [#allocation7], %s296_s15  ;;  %s6421_s13 = int_to_ptr.vmem [resolvable:$true] %s308_s13 }
  0xb1   : > { %s5986_s19 = scalar_lea.hbm %s6386_s11, 512  ;;  %s5991_s3 = scalar_lea.hbm %s8081_s1, 1024 }
  0xb2   : > { %p5987_p1 = scmp.ne.s32.totalorder %s6386_s11, %s5986_s19  ;;  %p5992_p10 = scmp.lt.u32.totalorder %s6386_s11, %s8081_s1 }
  0xb3   : > { %p5993_p3 = scmp.lt.u32.totalorder %s5991_s3, %s5986_s19  ;;  %p5995_p9 = scmp.lt.u32.totalorder %s5986_s19, %s6386_s11 }
  0xb4   : > { %p5989_p8 = pnand %p5987_p1, %p5958_p12 }
  0xb5   : > { %p5994_p7 = por %p5993_p3, %p5992_p10 }
  0xb6   : > { %p5990_p6 = pneg %p5989_p8 }
  0xb7   : > { %p5996_p0 = por %p5995_p9, %p5994_p7 }
  0xb9   : > { %p5997_p2 = pnand %p5996_p0, %p5990_p6 }
  0xbb   : > { %6000 = shalt.err (!%p5997_p2)
}
  0xbc   : > { %s6001_s18 = scalar_lea.vmem %s6421_s13, 512  ;;  %s6125_s14 = smov [#allocation6]  }
  0xbd   : > { %p6002_p13 = scmp.ne.s32.totalorder %s6421_s13, %s6001_s18  ;;  %s6006_s16 = sshll.u32 %s6125_s14, 4  ;;  %s6007_s16 = int_to_ptr.vmem [resolvable:$false] %s6006_s16 }
  0xbe   : > { %s6008_s0 = scalar_lea.vmem %s6007_s16, 1024  ;;  %p6009_p8 = scmp.lt.s32.totalorder %s6421_s13, %s6007_s16 }
  0xbf   : > { %p6004_p4 = pnand %p6002_p13, %p5958_p12  ;;  %p6010_p10 = scmp.lt.s32.totalorder %s6008_s0, %s6001_s18 }
  0xc1   : > { %p6005_p1 = pneg %p6004_p4  ;;  %p6011_p3 = por %p6010_p10, %p6009_p8 }
  0xc3   : > { %p6012_p7 = pnand %p6011_p3, %p6005_p1 }
  0xc5   : > { %6015 = shalt.err (!%p6012_p7)
}
  0xc6   : > { %s8144_s5 = smov 8   ;;  %s8145_s9 = smov 128  }
  0xc7   : > { %5520 = dma.hbm_to_vmem [thread:$0]  (!%p6377_p11), %s6386_s11, 512, %s6421_s13, %s6423_s30, %s8145_s9, %s8145_s9, %s8144_s5  }
  0xc8   : > { %p8146_p12 = scmp.ne.s32.totalorder %s8131_s7, 0 }
  0xca   : > { %320 = sbr.rel (%p8146_p12) target bundleno = 2155 (0x86b), region = 44 }
  0xd1   : > { %s6455_s2 = sand.u32 1, %s6098_s22   ;;  %p8147_p6 = scmp.ne.s32.totalorder %s8128_s29, 0 }
  0xd2   : > { %s6458_s4 = sshll.u32 %s6455_s2, 5  ;;  %s323_s17 = scalar_lea.sflag [#allocation4], %s6455_s2 }
  0xd3   : > { %s6462_s12 = scalar_lea.vmem [#allocation3], %s6458_s4 }
  0xd4   : > { %6069 = dma.done.wait (%p8147_p6), %s323_s17, 512  }
  0xd5   : > { %6071 = vsyncadd (%p8147_p6), %s323_s17, 4294966784  ;;  %s331_s7 = sand.u32 1, %s6213_s27   ;;  %s6470_s13 = scalar_lea.vmem [#allocation6], %s6458_s4 }
  0xd6   : > { %s332_s11 = scalar_lea.sflag [#allocation7], %s331_s7 }
  0xd7   : > { %6073 = dma.done.wait (%p8147_p6), %s332_s11, 512  }
  0xd8   : > { %6075 = vsyncadd (%p8147_p6), %s332_s11, 4294966784  ;;  %p8148_p11 = scmp.eq.s32.totalorder %s6213_s27, 0 }
  0xda   : > { %6077 = dma.done.wait (%p8148_p11), [#allocation7], 128   ;;  %p8149_p9 = pmov %p8148_p11 }
  0xdc   : > { %6079 = vsyncadd (%p8149_p9), [#allocation7], 4294967168  ;;  %p8150_p0 = pmov %p8149_p9 }
  0xde   : > { %6081 = dma.done.wait (%p8150_p0), [#allocation10], 320   ;;  %p8151_p2 = pmov %p8150_p0 }
  0xdf   : > { %p8152_p13 = pmov %p8150_p0 }
  0xe0   : > { %6083 = vsyncadd (%p8151_p2), [#allocation10], 4294966976 }
  0xe1   : > { %6085 = dma.done.wait (%p8152_p13), [#allocation13], 16   ;;  %p8153_p4 = pmov %p8150_p0 }
  0xe2   : > { %v417_v0 = vlaneseq  ;;  %v6126_v1 = vmov 1983009808   ;;  %v6127_v5 = vmov 29   ;;  %v6128_v6 = vmov 25   ;;  %v403_v10 = vld [vmem:[#allocation9] sm:$0x7] }
  0xe3   : > { %6087 = vsyncadd (%p8153_p4), [#allocation13], 4294967280  ;;  %v415_v2 = vunpack.c.l.s4 %v6126_v1  ;;  %5612 = vset.pattern.permute.xlu0 %v6127_v5  ;;  %5611 = vset.pattern.permute.xlu1 %v6128_v6  ;;  %vm453_vm0 = vcmask 1042432   ;;  %v387_v11 = vld [vmem:[%s6462_s12] sm:$0xf]  ;;  %vm446_vm1 = vcmask 48128  }
  0xe4   : > { %v6488_v3 = vshrl.u32 %v417_v0, 7  ;;  %v647_v4 = vand.u32 127, %v417_v0  ;;  %v388_v12 = vld [vmem:[%s6462_s12 + $0x4] sm:$0xf]  ;;  %5478 = vmatprep.subr.msk.bf16.mxu0 %vm453_vm0, %v403_v10  ;;  %v455_v13 = vsel %vm453_vm0, %v403_v10, 0  ;;  %v6129_v34 = vmov 26  }
  0xe5   : > { %v416_v7 = vunpack.c.0.s8 %v415_v2  ;;  %v389_v14 = vld [vmem:[%s6462_s12 + $0x8] sm:$0xf]  ;;  %v390_v15 = vld [vmem:[%s6462_s12 + $0xc] sm:$0xf]  ;;  %v4907_v16 = vpack.c.bf16 %v388_v12, %v387_v11  ;;  %5093 = vmatpush3.bf16.msra.mxu0 %v455_v13  ;;  %v391_v18 = vld [vmem:[%s6462_s12 + $0x10] sm:$0xf] }
  0xe6   : > { %v6493_v8 = vsub.s32 %v647_v4, %v6488_v3  ;;  %v4908_v17 = vpack.c.bf16 %v390_v15, %v389_v14  ;;  %v392_v19 = vld [vmem:[%s6462_s12 + $0x14] sm:$0xf]  ;;  %v393_v20 = vld [vmem:[%s6462_s12 + $0x18] sm:$0xf]  ;;  %v394_v22 = vld [vmem:[%s6462_s12 + $0x1c] sm:$0xf] }
  0xe7   : > { %v419_v9 = vsub.s32 %v416_v7, %v6488_v3  ;;  %v4909_v23 = vpack.c.bf16 %v392_v19, %v391_v18  ;;  %v4910_v25 = vpack.c.bf16 %v394_v22, %v393_v20  ;;  %v6130_v35 = vmov 24   ;;  %s6136_s27 = smov 122   ;;  %s6139_s29 = smov 116  }
  0xe8   : > { %v6131_v36 = vmov 28   ;;  %v6132_v37 = vmov 30   ;;  %v6133_v38 = vmov 31   ;;  %v6134_v39 = vmov 27   ;;  %s6140_s15 = smov 110   ;;  %s4945_s30 = sshll.u32 %s6106_s24, 3 }
  0xe9   : > { %v420_v21 = vrot.slane %v4907_v16, %v419_v9  ;;  %v427_v24 = vrot.slane %v4908_v17, %v419_v9  ;;  %v437_v26 = vrot.slane %v4909_v23, %v419_v9  ;;  %v444_v28 = vrot.slane %v4910_v25, %v419_v9  ;;  %s6143_s19 = smov 6   ;;  %s384_s21 = scalar_lea.vmem [#allocation14], %s6458_s4 }
  0xea   : > { %v6135_v44 = vmov 839922192   ;;  %vm731_vm2 = vcmask 27648   ;;  %vm6138_vm3 = vmmov 0   ;;  %vm1131_vm4 = vcmask 1041408   ;;  %s4996_s28 = sshll.u32 %s6106_s24, 9 }
  0xeb   : > { %v428_v27 = vcombine.low %v420_v21, %v427_v24  ;;  %v445_v29 = vcombine.low %v437_v26, %v444_v28  ;;  %v532_v45 = vunpack.c.l.s4 %v6135_v44  ;;  %vm1127_vm5 = vcmask 31744   ;;  %s4736_s3 = sshll.u32 %s384_s21, 4  ;;  %s8028_s16 = scalar_lea.hbm %s8086_s6, %s4996_s28  ;;  %s8030_s3 = int_to_ptr.vmem [resolvable:$true] %s4736_s3 }
  0xec   : > { %s4722_s24 = scalar_lea.sflag [#allocation5], %s6455_s2  ;;  %s6016_s0 = scalar_lea.vmem %s8030_s3, 512 }
  0xed   : > { %5094 = vmatprep.mubr.msk.bf16.mxu0 %vm446_vm1, %v428_v27  ;;  %v533_v46 = vunpack.c.0.s8 %v532_v45  ;;  %p6017_p1 = scmp.ne.s32.totalorder %s8030_s3, %s6016_s0  ;;  %s6144_s5 = smov [#allocation14]  }
  0xee   : > { %5095 = vmatmul.mubr.msk.bf16.vlgmr.msra.gmra.mrb[0].mxu0 %vm446_vm1, %v445_v29  ;;  %s6020_s9 = sshll.u32 %s6144_s5, 4  ;;  %s6021_s9 = int_to_ptr.vmem [resolvable:$false] %s6020_s9 }
  0xef   : > { %v6615_v47 = vsub.s32 %v533_v46, %v6488_v3  ;;  %p6018_p8 = pnand %p6017_p1, %p6356_p5  ;;  %s6022_s4 = scalar_lea.vmem %s6021_s9, 1024 }
  0xf0   : > { %p6023_p3 = scmp.lt.s32.totalorder %s8030_s3, %s6021_s9  ;;  %p6024_p7 = scmp.lt.s32.totalorder %s6022_s4, %s6016_s0 }
  0xf1   : > { %p6019_p10 = pneg %p6018_p8 }
  0xf2   : > { %p6025_p12 = por %p6024_p7, %p6023_p3 }
  0xf4   : > { %p6026_p6 = pnand %p6025_p12, %p6019_p10 }
 0x1c1   : > { %v6506_v30 = vpop.f32.mrb[0].mxu0 }
 0x1c2   : > { %937 = vperm.xlu0 %5612, %v6506_v30   ;;  %881 = vperm.xlu1 %5611, %v6506_v30   ;;  %v6510_v31 = vpop.f32.mrb[1].mxu0  ;;  %v6542_v40 = vcombine.high %v6506_v30, %v6506_v30 }
 0x1c3   : > { %v6512_v32 = vpop.f32.mrb[2].mxu0  ;;  %v6570_v41 = vcombine.high %v6510_v31, %v6510_v31 }
 0x1c4   : > { %v6514_v33 = vpop.f32.mrb[3].mxu0  ;;  %v6582_v42 = vcombine.high %v6512_v32, %v6512_v32 }
 0x1c5   : > { %v6590_v43 = vcombine.high %v6514_v33, %v6514_v33 }
 0x1c6   : > { %5615 = vset.pattern.permute.xlu0 %v6129_v34  ;;  %5613 = vset.pattern.permute.xlu1 %v6130_v35 }
 0x1c7   : > { %1931 = vperm.xlu0 %5615, %v6506_v30   ;;  %576 = vperm.xlu1 %5613, %v6506_v30  }
 0x1cb   : > { %5618 = vset.pattern.permute.xlu0 %v6128_v6  ;;  %5614 = vset.pattern.permute.xlu1 %v6131_v36 }
 0x1cc   : > { %635 = vperm.xlu1 %5614, %v6506_v30   ;;  %837 = vperm.xlu0 %5618, %v6510_v31  }
 0x1d0   : > { %5616 = vset.pattern.permute.xlu1 %v6132_v37  ;;  %5619 = vset.pattern.permute.xlu0 %v6127_v5 }
 0x1d1   : > { %1987 = vperm.xlu1 %5616, %v6506_v30   ;;  %925 = vperm.xlu0 %5619, %v6510_v31  }
 0x1d5   : > { %5617 = vset.pattern.permute.xlu1 %v6133_v38  ;;  %5621 = vset.pattern.permute.xlu0 %v6131_v36 }
 0x1d6   : > { %2667 = vperm.xlu1 %5617, %v6506_v30   ;;  %623 = vperm.xlu0 %5621, %v6510_v31  }
 0x1da   : > { %5620 = vset.pattern.permute.xlu1 %v6130_v35  ;;  %5622 = vset.pattern.permute.xlu0 %v6129_v34 }
 0x1db   : > { %528 = vperm.xlu1 %5620, %v6510_v31   ;;  %1887 = vperm.xlu0 %5622, %v6510_v31  }
 0x1df   : > { %5623 = vset.pattern.permute.xlu1 %v6132_v37  ;;  %5624 = vset.pattern.permute.xlu0 %v6134_v39 }
 0x1e0   : > { %1975 = vperm.xlu1 %5623, %v6510_v31   ;;  %2567 = vperm.xlu0 %5624, %v6510_v31  }
 0x1e4   : > { %5625 = vset.pattern.permute.xlu1 %v6133_v38  ;;  %5627 = vset.pattern.permute.xlu0 %v6127_v5 }
 0x1e5   : > { %2655 = vperm.xlu1 %5625, %v6510_v31   ;;  %940 = vperm.xlu0 %5627, %v6542_v40  }
 0x1e9   : > { %5626 = vset.pattern.permute.xlu1 %v6128_v6  ;;  %943 = vperm.xlu0 %5627, %v6512_v32  }
 0x1ea   : > { %892 = vperm.xlu1 %5626, %v6542_v40  }
 0x1ed   : > { %5628 = vset.pattern.permute.xlu0 %v6130_v35 }
 0x1ee   : > { %588 = vperm.xlu0 %5628, %v6542_v40   ;;  %903 = vperm.xlu1 %5626, %v6512_v32  }
 0x1f2   : > { %5631 = vset.pattern.permute.xlu0 %v6131_v36  ;;  %5629 = vset.pattern.permute.xlu1 %v6131_v36 }
 0x1f3   : > { %641 = vperm.xlu0 %5631, %v6512_v32   ;;  %638 = vperm.xlu1 %5629, %v6542_v40  }
 0x1f7   : > { %5633 = vset.pattern.permute.xlu0 %v6132_v37  ;;  %5630 = vset.pattern.permute.xlu1 %v6130_v35 }
 0x1f8   : > { %1990 = vperm.xlu0 %5633, %v6542_v40   ;;  %600 = vperm.xlu1 %5630, %v6512_v32  }
 0x1fc   : > { %1993 = vperm.xlu0 %5633, %v6512_v32   ;;  %5632 = vset.pattern.permute.xlu1 %v6129_v34 }
 0x1fd   : > { %1942 = vperm.xlu1 %5632, %v6542_v40  }
 0x200   : > { %5637 = vset.pattern.permute.xlu0 %v6127_v5 }
 0x201   : > { %1953 = vperm.xlu1 %5632, %v6512_v32   ;;  %931 = vperm.xlu0 %5637, %v6514_v33  }
 0x205   : > { %5634 = vset.pattern.permute.xlu1 %v6128_v6  ;;  %5640 = vset.pattern.permute.xlu0 %v6130_v35 }
 0x206   : > { %848 = vperm.xlu1 %5634, %v6570_v41   ;;  %552 = vperm.xlu0 %5640, %v6514_v33  }
 0x20a   : > { %5635 = vset.pattern.permute.xlu1 %v6127_v5  ;;  %5642 = vset.pattern.permute.xlu0 %v6132_v37 }
 0x20b   : > { %928 = vperm.xlu1 %5635, %v6570_v41   ;;  %1978 = vperm.xlu0 %5642, %v6570_v41  }
 0x20f   : > { %5636 = vset.pattern.permute.xlu1 %v6128_v6  ;;  %5646 = vset.pattern.permute.xlu0 %v6127_v5 }
 0x210   : > { %946 = vperm.xlu0 %5646, %v6582_v42   ;;  %859 = vperm.xlu1 %5636, %v6514_v33  }
 0x214   : > { %5638 = vset.pattern.permute.xlu1 %v6130_v35  ;;  %934 = vperm.xlu0 %5646, %v6590_v43  }
 0x215   : > { %540 = vperm.xlu1 %5638, %v6570_v41  }
 0x218   : > { %5653 = vset.pattern.permute.xlu0 %v6131_v36 }
 0x219   : > { %5639 = vset.pattern.permute.xlu1 %v6131_v36  ;;  %632 = vperm.xlu0 %5653, %v6590_v43  }
 0x21a   : > { %626 = vperm.xlu1 %5639, %v6570_v41  }
 0x21d   : > { %5654 = vset.pattern.permute.xlu0 %v6129_v34 }
 0x21e   : > { %629 = vperm.xlu1 %5639, %v6514_v33   ;;  %1920 = vperm.xlu0 %5654, %v6590_v43  }
 0x222   : > { %5641 = vset.pattern.permute.xlu1 %v6129_v34  ;;  %5658 = vset.pattern.permute.xlu0 %v6133_v38 }
 0x223   : > { %1898 = vperm.xlu1 %5641, %v6570_v41  }
 0x227   : > { %1909 = vperm.xlu1 %5641, %v6514_v33  }
 0x22b   : > { %5643 = vset.pattern.permute.xlu1 %v6132_v37 }
 0x22c   : > { %1981 = vperm.xlu1 %5643, %v6514_v33  }
 0x230   : > { %5644 = vset.pattern.permute.xlu1 %v6133_v38 }
 0x231   : > { %2658 = vperm.xlu1 %5644, %v6570_v41  }
 0x235   : > { %5645 = vset.pattern.permute.xlu1 %v6128_v6 }
 0x236   : > { %914 = vperm.xlu1 %5645, %v6582_v42  }
 0x23a   : > { %5647 = vset.pattern.permute.xlu1 %v6130_v35 }
 0x23b   : > { %612 = vperm.xlu1 %5647, %v6582_v42  }
 0x23f   : > { %5648 = vset.pattern.permute.xlu1 %v6131_v36 }
 0x240   : > { %644 = vperm.xlu1 %5648, %v6582_v42  }
 0x241   : > { %v938_v48 = vpop.permute.xlu0 %937  ;;  %v882_v49 = vpop.permute.xlu1 %881 }
 0x242   : > { %v967_v50 = vrot.slane %v938_v48, %v6493_v8  ;;  %v890_v51 = vrot.slane %v882_v49, %v6615_v47 }
 0x244   : > { %v1008_v52 = vadd.f32 %v967_v50, %v890_v51  ;;  %5649 = vset.pattern.permute.xlu1 %v6129_v34 }
 0x245   : > { %1964 = vperm.xlu1 %5649, %v6582_v42  }
 0x246   : > { %v6623_v53 = vpop.permute.xlu0 %1931  ;;  %v6625_v54 = vpop.permute.xlu1 %576  ;;  %v1016_v55 = vmul.f32 0.2, %v1008_v52 }
 0x248   : > { %v6627_v56 = vmax.f32 %v1008_v52, %v1016_v55 }
 0x249   : > { %5650 = vset.pattern.permute.xlu1 %v6132_v37 }
 0x24a   : > { %1996 = vperm.xlu1 %5650, %v6582_v42   ;;  %v1040_v57 = vsel %vm731_vm2, %v6627_v56, -inf }
 0x24b   : > { %v6633_v58 = vpop.permute.xlu1 %635  ;;  %v838_v59 = vpop.permute.xlu0 %837  ;;  %1041 = vmax.xlane.f32.xlu0 %v1040_v57 }
 0x24c   : > { %v846_v12 = vrot.slane %v838_v59, %v6615_v47 }
 0x24e   : > { %5651 = vset.pattern.permute.xlu1 %v6128_v6 }
 0x24f   : > { %870 = vperm.xlu1 %5651, %v6590_v43  }
 0x250   : > { %v6637_v60 = vpop.permute.xlu1 %1987  ;;  %v926_v61 = vpop.permute.xlu0 %925 }
 0x251   : > { %v951_v10 = vrot.slane %v926_v61, %v6493_v8 }
 0x253   : > { %5652 = vset.pattern.permute.xlu1 %v6130_v35  ;;  %v1004_v13 = vadd.f32 %v951_v10, %v846_v12 }
 0x254   : > { %564 = vperm.xlu1 %5652, %v6590_v43  }
 0x255   : > { %v6641_v62 = vpop.permute.xlu1 %2667  ;;  %v624_v63 = vpop.permute.xlu0 %623  ;;  %v1012_v20 = vmul.f32 0.2, %v1004_v13 }
 0x256   : > { %v651_v16 = vrot.slane %v624_v63, %v6493_v8 }
 0x257   : > { %v6673_v26 = vmax.f32 %v1004_v13, %v1012_v20 }
 0x258   : > { %5655 = vset.pattern.permute.xlu1 %v6132_v37 }
 0x259   : > { %1984 = vperm.xlu1 %5655, %v6590_v43   ;;  %v1028_v36 = vsel %vm731_vm2, %v6673_v26, -inf }
 0x25a   : > { %v529_v0 = vpop.permute.xlu1 %528  ;;  %v6645_v1 = vpop.permute.xlu0 %1887 }
 0x25b   : > { %v537_v14 = vrot.slane %v529_v0, %v6615_v47 }
 0x25d   : > { %5656 = vset.pattern.permute.xlu1 %v6133_v38  ;;  %v707_v18 = vadd.f32 %v651_v16, %v537_v14 }
 0x25e   : > { %2664 = vperm.xlu1 %5656, %v6590_v43  }
 0x25f   : > { %v6649_v2 = vpop.permute.xlu1 %1975  ;;  %v6652_v3 = vpop.permute.xlu0 %2567  ;;  %v715_v27 = vmul.f32 0.2, %v707_v18 }
 0x261   : > { %v6682_v37 = vmax.f32 %v707_v18, %v715_v27 }
 0x262   : > { %5657 = vset.pattern.permute.xlu1 %v6134_v39 }
 0x263   : > { %v732_v45 = vsel %vm731_vm2, %v6682_v37, -inf }
 0x264   : > { %v6654_v4 = vpop.permute.xlu1 %2655  ;;  %v941_v5 = vpop.permute.xlu0 %940 }
 0x265   : > { %v971_v21 = vrot.slane %v941_v5, %v6493_v8 }
 0x268   : > { %v944_v9 = vpop.permute.xlu0 %943 }
 0x269   : > { %v893_v6 = vpop.permute.xlu1 %892  ;;  %v975_v28 = vrot.slane %v944_v9, %v6493_v8 }
 0x26a   : > { %v901_v19 = vrot.slane %v893_v6, %v6615_v47 }
 0x26c   : > { %v1009_v24 = vadd.f32 %v971_v21, %v901_v19 }
 0x26d   : > { %v904_v7 = vpop.permute.xlu1 %903  ;;  %v6661_v15 = vpop.permute.xlu0 %588 }
 0x26e   : > { %v912_v25 = vrot.slane %v904_v7, %v6615_v47  ;;  %v1017_v39 = vmul.f32 0.2, %v1009_v24 }
 0x270   : > { %v1010_v34 = vadd.f32 %v975_v28, %v912_v25  ;;  %v6686_v46 = vmax.f32 %v1009_v24, %v1017_v39 }
 0x272   : > { %v6657_v11 = vpop.permute.xlu1 %638  ;;  %v6668_v22 = vpop.permute.xlu0 %641  ;;  %v1018_v48 = vmul.f32 0.2, %v1010_v34  ;;  %v1043_v50 = vsel %vm731_vm2, %v6686_v46, -inf }
 0x274   : > { %v6692_v51 = vmax.f32 %v1010_v34, %v1018_v48 }
 0x276   : > { %v1046_v63 = vsel %vm731_vm2, %v6692_v51, -inf }
 0x277   : > { %v6664_v17 = vpop.permute.xlu1 %600  ;;  %v6678_v35 = vpop.permute.xlu0 %1990 }
 0x27b   : > { %v6688_v49 = vpop.permute.xlu0 %1993 }
 0x27c   : > { %v6670_v23 = vpop.permute.xlu1 %1942 }
 0x280   : > { %v6676_v29 = vpop.permute.xlu1 %1953  ;;  %v932_v59 = vpop.permute.xlu0 %931 }
 0x281   : > { %v959_v6 = vrot.slane %v932_v59, %v6493_v8 }
 0x282   : > { %1029 = vmax.xlane.f32.xlu1 %v1028_v36 }
 0x285   : > { %v849_v44 = vpop.permute.xlu1 %848  ;;  %v553_v24 = vpop.permute.xlu0 %552 }
 0x286   : > { %733 = vmax.xlane.f32.xlu1 %v732_v45  ;;  %v857_v55 = vrot.slane %v849_v44, %v6615_v47  ;;  %v561_v28 = vrot.slane %v553_v24, %v6615_v47 }
 0x28a   : > { %v929_v52 = vpop.permute.xlu1 %928  ;;  %1044 = vmax.xlane.f32.xlu1 %v1043_v50 }
 0x28b   : > { %v955_v57 = vrot.slane %v929_v52, %v6493_v8 }
 0x28d   : > { %v1005_v61 = vadd.f32 %v955_v57, %v857_v55 }
 0x28e   : > { %1047 = vmax.xlane.f32.xlu1 %v1046_v63 }
 0x28f   : > { %v860_v0 = vpop.permute.xlu1 %859  ;;  %v1013_v5 = vmul.f32 0.2, %v1005_v61 }
 0x290   : > { %v868_v7 = vrot.slane %v860_v0, %v6615_v47 }
 0x291   : > { %v6700_v9 = vmax.f32 %v1005_v61, %v1013_v5  ;;  %v1979_v61 = vpop.permute.xlu0 %1978 }
 0x292   : > { %v1006_v10 = vadd.f32 %v959_v6, %v868_v7 }
 0x293   : > { %v1031_v12 = vsel %vm731_vm2, %v6700_v9, -inf }
 0x294   : > { %v541_v13 = vpop.permute.xlu1 %540  ;;  %1032 = vmax.xlane.f32.xlu0 %v1031_v12  ;;  %v1014_v14 = vmul.f32 0.2, %v1006_v10 }
 0x295   : > { %v549_v20 = vrot.slane %v541_v13, %v6615_v47  ;;  %v947_v0 = vpop.permute.xlu0 %946 }
 0x296   : > { %v6704_v16 = vmax.f32 %v1006_v10, %v1014_v14  ;;  %v979_v6 = vrot.slane %v947_v0, %v6493_v8 }
 0x298   : > { %v1034_v18 = vsel %vm731_vm2, %v6704_v16, -inf }
 0x299   : > { %v627_v19 = vpop.permute.xlu1 %626  ;;  %1035 = vmax.xlane.f32.xlu1 %v1034_v18  ;;  %v935_v24 = vpop.permute.xlu0 %934 }
 0x29a   : > { %v655_v21 = vrot.slane %v627_v19, %v6493_v8 }
 0x29c   : > { %v708_v25 = vadd.f32 %v655_v21, %v549_v20 }
 0x29d   : > { %v630_v27 = vpop.permute.xlu1 %629 }
 0x29e   : > { %v659_v34 = vrot.slane %v630_v27, %v6493_v8  ;;  %v716_v36 = vmul.f32 0.2, %v708_v25  ;;  %v963_v27 = vrot.slane %v935_v24, %v6493_v8 }
 0x2a0   : > { %v709_v39 = vadd.f32 %v659_v34, %v561_v28  ;;  %v6712_v44 = vmax.f32 %v708_v25, %v716_v36  ;;  %v633_v34 = vpop.permute.xlu0 %632 }
 0x2a2   : > { %v6714_v45 = vpop.permute.xlu1 %1898  ;;  %v735_v48 = vsel %vm731_vm2, %v6712_v44, -inf  ;;  %v717_v50 = vmul.f32 0.2, %v709_v39 }
 0x2a3   : > { %736 = vmax.xlane.f32.xlu0 %v735_v48 }
 0x2a4   : > { %v6718_v52 = vmax.f32 %v709_v39, %v717_v50  ;;  %v663_v50 = vrot.slane %v633_v34, %v6493_v8 }
 0x2a6   : > { %v6720_v55 = vpop.permute.xlu1 %1909  ;;  %v738_v57 = vsel %vm731_vm2, %v6718_v52, -inf }
 0x2a7   : > { %739 = vmax.xlane.f32.xlu1 %v738_v57 }
 0x2ab   : > { %v6724_v59 = vpop.permute.xlu1 %1981 }
 0x2b0   : > { %v6726_v63 = vpop.permute.xlu1 %2658 }
 0x2b5   : > { %v915_v5 = vpop.permute.xlu1 %914 }
 0x2b6   : > { %v923_v7 = vrot.slane %v915_v5, %v6615_v47 }
 0x2b8   : > { %v1011_v10 = vadd.f32 %v979_v6, %v923_v7  ;;  %2578 = vperm.xlu1 %5657, %v6570_v41  }
 0x2ba   : > { %v613_v12 = vpop.permute.xlu1 %612  ;;  %v1019_v13 = vmul.f32 0.2, %v1011_v10 }
 0x2bc   : > { %2589 = vperm.xlu1 %5657, %v6514_v33   ;;  %v6732_v14 = vmax.f32 %v1011_v10, %v1019_v13 }
 0x2be   : > { %v1049_v18 = vsel %vm731_vm2, %v6732_v14, -inf }
 0x2bf   : > { %v645_v19 = vpop.permute.xlu1 %644  ;;  %1050 = vmax.xlane.f32.xlu0 %v1049_v18  ;;  %v667_v18 = vrot.slane %v6633_v58, %v6493_v8 }
 0x2c0   : > { %2600 = vperm.xlu1 %5657, %v6590_v43  }
 0x2c4   : > { %v6737_v20 = vpop.permute.xlu1 %1964  ;;  %2611 = vperm.xlu1 %5657, %v6506_v30  }
 0x2c8   : > { %2622 = vperm.xlu1 %5657, %v6542_v40  }
 0x2c9   : > { %v6741_v21 = vpop.permute.xlu1 %1996 }
 0x2cc   : > { %2633 = vperm.xlu1 %5657, %v6512_v32  }
 0x2ce   : > { %v871_v25 = vpop.permute.xlu1 %870 }
 0x2cf   : > { %v879_v28 = vrot.slane %v871_v25, %v6615_v47  ;;  %v609_v25 = vrot.slane %v6664_v17, %v6615_v47  ;;  %v2005_v17 = vrot.slane %v1979_v61, %v6493_v8 }
 0x2d0   : > { %2644 = vperm.xlu1 %5657, %v6582_v42  }
 0x2d1   : > { %v1007_v36 = vadd.f32 %v963_v27, %v879_v28  ;;  %v675_v27 = vrot.slane %v6668_v22, %v6493_v8 }
 0x2d3   : > { %v565_v39 = vpop.permute.xlu1 %564  ;;  %v1015_v48 = vmul.f32 0.2, %v1007_v36  ;;  %v713_v34 = vadd.f32 %v675_v27, %v609_v25  ;;  %v2021_v25 = vrot.slane %v6678_v35, %v6493_v8  ;;  %v2029_v35 = vrot.slane %v6741_v21, %v6493_v8 }
 0x2d4   : > { %v573_v57 = vrot.slane %v565_v39, %v6615_v47  ;;  %5659 = vset.pattern.permute.xlu1 %v6133_v38  ;;  %v585_v38 = vrot.slane %v6625_v54, %v6615_v47  ;;  %v621_v39 = vrot.slane %v613_v12, %v6615_v47  ;;  %v1907_v54 = vrot.slane %v6714_v45, %v6615_v47 }
 0x2d5   : > { %2676 = vperm.xlu1 %5659, %v6582_v42   ;;  %v6751_v0 = vmax.f32 %v1007_v36, %v1015_v48  ;;  %v679_v36 = vrot.slane %v645_v19, %v6493_v8  ;;  %v671_v21 = vrot.slane %v6657_v11, %v6493_v8 }
 0x2d6   : > { %v710_v5 = vadd.f32 %v663_v50, %v573_v57  ;;  %v711_v24 = vadd.f32 %v667_v18, %v585_v38  ;;  %v721_v50 = vmul.f32 0.2, %v713_v34  ;;  %v2055_v19 = vadd.f32 %v2005_v17, %v1907_v54 }
 0x2d7   : > { %v1037_v6 = vsel %vm731_vm2, %v6751_v0, -inf  ;;  %v714_v58 = vadd.f32 %v679_v36, %v621_v39  ;;  %v2025_v39 = vrot.slane %v6688_v49, %v6493_v8  ;;  %v2681_v17 = vrot.slane %v6654_v4, %v6493_v8 }
 0x2d8   : > { %1038 = vmax.xlane.f32.xlu0 %v1037_v6  ;;  %v718_v7 = vmul.f32 0.2, %v710_v5  ;;  %v719_v28 = vmul.f32 0.2, %v711_v24  ;;  %v1985_v57 = vpop.permute.xlu1 %1984  ;;  %v6779_v6 = vmax.f32 %v713_v34, %v721_v50 }
 0x2d9   : > { %v2013_v12 = vrot.slane %v1985_v57, %v6493_v8 }
 0x2da   : > { %v6755_v10 = vmax.f32 %v710_v5, %v718_v7  ;;  %v6770_v48 = vmax.f32 %v711_v24, %v719_v28  ;;  %v1921_v5 = vpop.permute.xlu0 %1920  ;;  %v722_v7 = vmul.f32 0.2, %v714_v58  ;;  %v750_v18 = vsel %vm731_vm2, %v6779_v6, -inf }
 0x2db   : > { %v1929_v45 = vrot.slane %v1921_v5, %v6615_v47  ;;  %v2063_v24 = vmul.f32 0.2, %v2055_v19  ;;  %v1962_v28 = vrot.slane %v6676_v29, %v6615_v47  ;;  %v1973_v29 = vrot.slane %v6737_v20, %v6615_v47 }
 0x2dc   : > { %v741_v13 = vsel %vm731_vm2, %v6755_v10, -inf  ;;  %v744_v22 = vsel %vm731_vm2, %v6770_v48, -inf  ;;  %v6787_v38 = vmax.f32 %v714_v58, %v722_v7  ;;  %v597_v20 = vrot.slane %v6661_v15, %v6615_v47 }
 0x2dd   : > { %742 = vmax.xlane.f32.xlu0 %v741_v13  ;;  %v1951_v13 = vrot.slane %v6670_v23, %v6615_v47  ;;  %v2057_v61 = vadd.f32 %v2013_v12, %v1929_v45  ;;  %v6795_v34 = vmax.f32 %v2055_v19, %v2063_v24  ;;  %v2060_v58 = vadd.f32 %v2025_v39, %v1962_v28  ;;  %v6819_v45 = vpop.permute.xlu1 %2664 }
 0x2de   : > { %v753_v23 = vsel %vm731_vm2, %v6787_v38, -inf  ;;  %v2061_v5 = vadd.f32 %v2029_v35, %v1973_v29  ;;  %v2576_v12 = vrot.slane %v6652_v3, %v6615_v47  ;;  %v712_v11 = vadd.f32 %v671_v21, %v597_v20 }
 0x2df   : > { %v2059_v27 = vadd.f32 %v2021_v25, %v1951_v13  ;;  %v2065_v36 = vmul.f32 0.2, %v2057_v61  ;;  %v2081_v50 = vsel %vm731_vm2, %v6795_v34, -inf  ;;  %v2068_v19 = vmul.f32 0.2, %v2060_v58 }
 0x2e0   : > { %v2734_v7 = vadd.f32 %v2681_v17, %v2576_v12  ;;  %v1896_v3 = vrot.slane %v6645_v1, %v6615_v47  ;;  %v1042_v12 = vpop.xlane.xlu0 %1041 }
 0x2e1   : > { %v2067_v54 = vmul.f32 0.2, %v2059_v27  ;;  %v6803_v57 = vmax.f32 %v2057_v61, %v2065_v36  ;;  %v6823_v13 = vmax.f32 %v2060_v58, %v2068_v19  ;;  %v2069_v61 = vmul.f32 0.2, %v2061_v5 }
 0x2e2   : > { %v720_v36 = vmul.f32 0.2, %v712_v11  ;;  %v2017_v58 = vrot.slane %v6637_v60, %v6493_v8 }
 0x2e3   : > { %v2087_v49 = vsel %vm731_vm2, %v6803_v57, -inf  ;;  %v2096_v15 = vsel %vm731_vm2, %v6823_v13, -inf  ;;  %v6831_v25 = vmax.f32 %v2061_v5, %v2069_v61 }
 0x2e5   : > { %v2099_v1 = vsel %vm731_vm2, %v6831_v25, -inf }
 0x2f3   : > { %2661 = vperm.xlu0 %5658, %v6514_v33  }
 0x2f7   : > { %2670 = vperm.xlu0 %5658, %v6542_v40  }
 0x2f9   : > { %745 = vmax.xlane.f32.xlu1 %v744_v22  ;;  %v6811_v22 = vmax.f32 %v2059_v27, %v2067_v54  ;;  %v2742_v27 = vmul.f32 0.2, %v2734_v7 }
 0x2fb   : > { %2673 = vperm.xlu0 %5658, %v6512_v32   ;;  %v2093_v4 = vsel %vm731_vm2, %v6811_v22, -inf  ;;  %v6840_v54 = vmax.f32 %v2734_v7, %v2742_v27 }
 0x2fd   : > { %751 = vmax.xlane.f32.xlu1 %v750_v18  ;;  %v2001_v18 = vrot.slane %v6649_v2, %v6493_v8  ;;  %v1918_v2 = vrot.slane %v6720_v55, %v6615_v47  ;;  %v1940_v55 = vrot.slane %v6623_v53, %v6615_v47 }
 0x2ff   : > { %v2054_v28 = vadd.f32 %v2001_v18, %v1896_v3  ;;  %v2058_v5 = vadd.f32 %v2017_v58, %v1940_v55 }
 0x301   : > { %754 = vmax.xlane.f32.xlu1 %v753_v23  ;;  %v2009_v23 = vrot.slane %v6724_v59, %v6493_v8  ;;  %v2062_v59 = vmul.f32 0.2, %v2054_v28  ;;  %v2066_v7 = vmul.f32 0.2, %v2058_v5 }
 0x303   : > { %v2056_v35 = vadd.f32 %v2009_v23, %v1918_v2  ;;  %v6854_v60 = vmax.f32 %v2054_v28, %v2062_v59  ;;  %v6862_v18 = vmax.f32 %v2058_v5, %v2066_v7  ;;  %v2685_v59 = vrot.slane %v6726_v63, %v6493_v8 }
 0x304   : > { %v1056_v7 = vsub.f32 %v6627_v56, %v1042_v12 }
 0x305   : > { %2082 = vmax.xlane.f32.xlu1 %v2081_v50  ;;  %v6844_v50 = vmax.f32 %v712_v11, %v720_v36  ;;  %v2064_v19 = vmul.f32 0.2, %v2056_v35  ;;  %v2078_v20 = vsel %vm731_vm2, %v6854_v60, -inf }
 0x306   : > { %v1068_v63 = vmul.f32 1.442695, %v1056_v7 }
 0x307   : > { %v6858_v53 = vmax.f32 %v2056_v35, %v2064_v19 }
 0x309   : > { %2088 = vmax.xlane.f32.xlu1 %v2087_v49  ;;  %v747_v49 = vsel %vm731_vm2, %v6844_v50, -inf  ;;  %v2084_v61 = vsel %vm731_vm2, %v6858_v53, -inf }
 0x30d   : > { %2094 = vmax.xlane.f32.xlu1 %v2093_v4 }
 0x30f   : > { %v1030_v24 = vpop.xlane.xlu1 %1029 }
 0x310   : > { %v1052_v39 = vsub.f32 %v6673_v26, %v1030_v24  ;;  %v2758_v26 = vsel %vm731_vm2, %v6840_v54, -inf }
 0x311   : > { %2097 = vmax.xlane.f32.xlu1 %v2096_v15  ;;  %v2090_v15 = vsel %vm731_vm2, %v6862_v18, -inf }
 0x312   : > { %v1060_v17 = vmul.f32 1.442695, %v1052_v39 }
 0x313   : > { %v6846_v29 = vpop.xlane.xlu1 %733 }
 0x314   : > { %5660 = vpow2.f32 %v1060_v17 }
 0x315   : > { %2100 = vmax.xlane.f32.xlu1 %v2099_v1 }
 0x317   : > { %v1045_v21 = vpop.xlane.xlu1 %1044 }
 0x319   : > { %2759 = vmax.xlane.f32.xlu1 %v2758_v26 }
 0x31a   : > { %748 = vmax.xlane.f32.xlu0 %v747_v49 }
 0x31b   : > { %v1048_v11 = vpop.xlane.xlu1 %1047 }
 0x31e   : > { %2079 = vmax.xlane.f32.xlu0 %v2078_v20  ;;  %v6867_v27 = vpop.eup %5660 }
 0x31f   : > { %v1076_v2 = vsel %vm731_vm2, %v6867_v27, 0.0 }
 0x321   : > { %v1033_v4 = vpop.xlane.xlu0 %1032 }
 0x322   : > { %v1053_v3 = vsub.f32 %v6700_v9, %v1033_v4  ;;  %2085 = vmax.xlane.f32.xlu0 %v2084_v61 }
 0x324   : > { %v1062_v24 = vmul.f32 1.442695, %v1053_v3 }
 0x326   : > { %5662 = vpow2.f32 %v1062_v24  ;;  %2091 = vmax.xlane.f32.xlu0 %v2090_v15  ;;  %v1036_v28 = vpop.xlane.xlu1 %1035  ;;  %v1057_v24 = vsub.f32 %v6686_v46, %v1045_v21 }
 0x327   : > { %v1054_v23 = vsub.f32 %v6704_v16, %v1036_v28 }
 0x329   : > { %v1064_v36 = vmul.f32 1.442695, %v1054_v23  ;;  %v1070_v23 = vmul.f32 1.442695, %v1057_v24 }
 0x32a   : > { %1077 = vadd.xlane.f32.xlu0 %v1076_v2 }
 0x32b   : > { %5664 = vpow2.f32 %v1064_v36  ;;  %v1058_v36 = vsub.f32 %v6692_v51, %v1048_v11 }
 0x32d   : > { %v1072_v56 = vmul.f32 1.442695, %v1058_v36 }
 0x330   : > { %v6872_v39 = vpop.eup %5662  ;;  %v6889_v19 = vpop.xlane.xlu0 %736 }
 0x331   : > { %v1079_v9 = vsel %vm731_vm2, %v6872_v39, 0.0 }
 0x332   : > { %1080 = vadd.xlane.f32.xlu0 %v1079_v9 }
 0x334   : > { %v6876_v1 = vpop.xlane.xlu1 %739 }
 0x335   : > { %v6878_v58 = vpop.eup %5664 }
 0x336   : > { %v1082_v35 = vsel %vm731_vm2, %v6878_v58, 0.0 }
 0x337   : > { %1083 = vadd.xlane.f32.xlu0 %v1082_v35 }
 0x338   : > { %v2579_v16 = vpop.permute.xlu1 %2578 }
 0x339   : > { %v2587_v55 = vrot.slane %v2579_v16, %v6615_v47 }
 0x33b   : > { %v2735_v17 = vadd.f32 %v2685_v59, %v2587_v55 }
 0x33c   : > { %v2590_v4 = vpop.permute.xlu1 %2589 }
 0x33d   : > { %v2743_v26 = vmul.f32 0.2, %v2735_v17  ;;  %v2598_v21 = vrot.slane %v2590_v4, %v6615_v47 }
 0x33f   : > { %v6885_v5 = vmax.f32 %v2735_v17, %v2743_v26  ;;  %v2697_v17 = vrot.slane %v6641_v62, %v6493_v8 }
 0x340   : > { %v2601_v28 = vpop.permute.xlu1 %2600 }
 0x341   : > { %v2761_v49 = vsel %vm731_vm2, %v6885_v5, -inf  ;;  %v2609_v9 = vrot.slane %v2601_v28, %v6615_v47 }
 0x342   : > { %2762 = vmax.xlane.f32.xlu1 %v2761_v49 }
 0x344   : > { %v2612_v12 = vpop.permute.xlu1 %2611 }
 0x345   : > { %v2620_v59 = vrot.slane %v2612_v12, %v6615_v47 }
 0x347   : > { %v2738_v7 = vadd.f32 %v2697_v17, %v2620_v59 }
 0x34c   : > { %v1051_v20 = vpop.xlane.xlu0 %1050 }
 0x34d   : > { %v1059_v35 = vsub.f32 %v6732_v14, %v1051_v20 }
 0x34f   : > { %v1074_v55 = vmul.f32 1.442695, %v1059_v35 }
 0x365   : > { %v1039_v61 = vpop.xlane.xlu0 %1038 }
 0x366   : > { %v1055_v3 = vsub.f32 %v6751_v0, %v1039_v61  ;;  %v2693_v0 = vrot.slane %v6819_v45, %v6493_v8  ;;  %v2623_v61 = vpop.permute.xlu1 %2622 }
 0x367   : > { %v2631_v28 = vrot.slane %v2623_v61, %v6615_v47 }
 0x368   : > { %v1066_v15 = vmul.f32 1.442695, %v1055_v3  ;;  %v2737_v16 = vadd.f32 %v2693_v0, %v2609_v9 }
 0x36a   : > { %5666 = vpow2.f32 %v1066_v15  ;;  %v6895_v2 = vpop.xlane.xlu0 %742  ;;  %v2745_v20 = vmul.f32 0.2, %v2737_v16  ;;  %v2746_v15 = vmul.f32 0.2, %v2738_v7 }
 0x36b   : > { %5668 = vpow2.f32 %v1068_v63 }
 0x36c   : > { %5670 = vpow2.f32 %v1070_v23  ;;  %v6922_v36 = vmax.f32 %v2737_v16, %v2745_v20  ;;  %v6930_v0 = vmax.f32 %v2738_v7, %v2746_v15  ;;  %v2634_v20 = vpop.permute.xlu1 %2633 }
 0x36d   : > { %5672 = vpow2.f32 %v1072_v56 }
 0x36e   : > { %5674 = vpow2.f32 %v1074_v55  ;;  %8154 = vst [vmem:[#allocation23_spill] sm:$0xff] %v6922_v36  ;;  %v2767_v35 = vsel %vm731_vm2, %v6922_v36, -inf  ;;  %8155 = vst [vmem:[#allocation24_spill] sm:$0xff] %v6930_v0  ;;  %v2770_v59 = vsel %vm731_vm2, %v6930_v0, -inf }
 0x370   : > { %v2645_v61 = vpop.permute.xlu1 %2644 }
 0x372   : > { %v2662_v46 = vpop.permute.xlu0 %2661 }
 0x373   : > { %v2689_v51 = vrot.slane %v2662_v46, %v6493_v8 }
 0x374   : > { %v6904_v11 = vpop.eup %5666 }
 0x375   : > { %v2736_v26 = vadd.f32 %v2689_v51, %v2598_v21  ;;  %v1085_v14 = vsel %vm731_vm2, %v6904_v11, 0.0  ;;  %v6910_v45 = vpop.eup %5668 }
 0x376   : > { %v2671_v49 = vpop.permute.xlu0 %2670  ;;  %1086 = vadd.xlane.f32.xlu0 %v1085_v14  ;;  %v1088_v63 = vsel %vm731_vm2, %v6910_v45, 0.0  ;;  %v6917_v62 = vpop.eup %5670  ;;  %v8096_v14 = vmov 0.0  }
 0x377   : > { %v2744_v4 = vmul.f32 0.2, %v2736_v26  ;;  %v2701_v3 = vrot.slane %v2671_v49, %v6493_v8  ;;  %v1091_v56 = vsel %vm731_vm2, %v6917_v62, 0.0  ;;  %v6926_v12 = vpop.eup %5672  ;;  %5098 = vmatprep.subr.bf16.mxu1 %v8096_v14  ;;  %5104 = vmatprep.subr.bf16.mxu0 %v8096_v14  ;;  %v756_v49 = vsub.f32 %v6682_v37, %v6846_v29 }
 0x378   : > { %v1094_v46 = vsel %vm731_vm2, %v6926_v12, 0.0  ;;  %v6934_v16 = vpop.eup %5674  ;;  %5100 = vmatprep.mubr.msk.bf16.mxu1 %vm6138_vm3, %v8096_v14  ;;  %5106 = vmatprep.mubr.msk.bf16.mxu0 %vm6138_vm3, %v8096_v14  ;;  %v2653_v37 = vrot.slane %v2645_v61, %v6615_v47 }
 0x379   : > { %v6915_v24 = vmax.f32 %v2736_v26, %v2744_v4  ;;  %v2739_v9 = vadd.f32 %v2701_v3, %v2631_v28  ;;  %v1097_v51 = vsel %vm731_vm2, %v6934_v16, 0.0  ;;  %v6946_v26 = vpack.c.bf16 %v6510_v31, %v6510_v31 }
 0x37a   : > { %1089 = vadd.xlane.f32.xlu0 %v1088_v63  ;;  %v6958_v31 = vpack.c.bf16 %v6570_v41, %v6570_v41  ;;  %v764_v7 = vmul.f32 1.442695, %v756_v49  ;;  %v757_v4 = vsub.f32 %v6712_v44, %v6889_v19  ;;  %v2674_v63 = vpop.permute.xlu0 %2673  ;;  %v2677_v41 = vpop.permute.xlu1 %2676  ;;  %v2642_v28 = vrot.slane %v2634_v20, %v6615_v47 }
 0x37b   : > { %v2764_v23 = vsel %vm731_vm2, %v6915_v24, -inf  ;;  %v2747_v21 = vmul.f32 0.2, %v2739_v9  ;;  %v2705_v15 = vrot.slane %v2674_v63, %v6493_v8  ;;  %v759_v63 = vsub.f32 %v6755_v10, %v6895_v2 }
 0x37c   : > { %2765 = vmax.xlane.f32.xlu1 %v2764_v23  ;;  %5676 = vpow2.f32 %v764_v7  ;;  %v766_v3 = vmul.f32 1.442695, %v757_v4  ;;  %v2709_v23 = vrot.slane %v2677_v41, %v6493_v8  ;;  %v6996_v7 = vpack.c.bf16 %v6590_v43, %v6590_v43 }
 0x37d   : > { %v6940_v55 = vmax.f32 %v2739_v9, %v2747_v21  ;;  %v2740_v9 = vadd.f32 %v2705_v15, %v2642_v28  ;;  %v758_v4 = vsub.f32 %v6718_v52, %v6876_v1  ;;  %v770_v43 = vmul.f32 1.442695, %v759_v63 }
 0x37e   : > { %1092 = vadd.xlane.f32.xlu0 %v1091_v56  ;;  %5678 = vpow2.f32 %v766_v3  ;;  %v2741_v56 = vadd.f32 %v2709_v23, %v2653_v37 }
 0x37f   : > { %8156 = vst [vmem:[#allocation25_spill] sm:$0xff] %v6940_v55  ;;  %v2773_v17 = vsel %vm731_vm2, %v6940_v55, -inf  ;;  %v768_v3 = vmul.f32 1.442695, %v758_v4 }
 0x380   : > { %2768 = vmax.xlane.f32.xlu1 %v2767_v35  ;;  %v2748_v35 = vmul.f32 0.2, %v2740_v9  ;;  %v2749_v21 = vmul.f32 0.2, %v2741_v56 }
 0x381   : > { %5680 = vpow2.f32 %v768_v3 }
 0x382   : > { %1095 = vadd.xlane.f32.xlu0 %v1094_v46  ;;  %v6976_v46 = vmax.f32 %v2740_v9, %v2748_v35  ;;  %v6982_v47 = vmax.f32 %v2741_v56, %v2749_v21  ;;  %5682 = vpow2.f32 %v770_v43 }
 0x384   : > { %2771 = vmax.xlane.f32.xlu1 %v2770_v59  ;;  %8158 = vst [vmem:[#allocation27_spill] sm:$0xff] %v6976_v46  ;;  %v2776_v8 = vsel %vm731_vm2, %v6976_v46, -inf  ;;  %8159 = vst [vmem:[#allocation28_spill] sm:$0xff] %v6982_v47 }
 0x386   : > { %1098 = vadd.xlane.f32.xlu0 %v1097_v51  ;;  %v6970_v29 = vpop.eup %5676  ;;  %v2779_v51 = vsel %vm731_vm2, %v6982_v47, -inf  ;;  %v746_v49 = vpop.xlane.xlu1 %745 }
 0x387   : > { %v780_v44 = vsel %vm731_vm2, %v6970_v29, 0.0 }
 0x388   : > { %v6974_v19 = vpop.eup %5678 }
 0x389   : > { %8157 = vst [vmem:[#allocation26_spill] sm:$0xff] %v6974_v19  ;;  %v783_v59 = vsel %vm731_vm2, %v6974_v19, 0.0 }
 0x38a   : > { %2774 = vmax.xlane.f32.xlu0 %v2773_v17  ;;  %v6988_v17 = vpack.c.bf16 %v6514_v33, %v6514_v33  ;;  %v6992_v20 = vpop.xlane.xlu1 %751 }
 0x38b   : > { %v7014_v9 = vpop.eup %5680 }
 0x38c   : > { %8160 = vst [vmem:[#allocation29_spill] sm:$0xff] %v7014_v9  ;;  %v786_v10 = vsel %vm731_vm2, %v7014_v9, 0.0  ;;  %v7022_v2 = vpop.eup %5682 }
 0x38d   : > { %8161 = vst [vmem:[#allocation30_spill] sm:$0xff] %v7022_v2  ;;  %v789_v35 = vsel %vm731_vm2, %v7022_v2, 0.0 }
 0x38e   : > { %v7002_v61 = vpop.xlane.xlu1 %754 }
 0x392   : > { %v7006_v15 = vpop.xlane.xlu1 %2082 }
 0x395   : > { %1125 = vrot.lane.b32.xlu1 %v6946_v26, %s6136_s27 }
 0x396   : > { %v7010_v28 = vpop.xlane.xlu1 %2088 }
 0x39a   : > { %v7016_v52 = vpop.xlane.xlu1 %2094 }
 0x39e   : > { %v7024_v37 = vpop.xlane.xlu1 %2097 }
 0x3a0   : > { %1176 = vrot.lane.b32.xlu0 %v6958_v31, %s6136_s27 }
 0x3a2   : > { %v7028_v21 = vpop.xlane.xlu1 %2100 }
 0x3a7   : > { %v749_v33 = vpop.xlane.xlu0 %748 }
 0x3a8   : > { %v761_v19 = vsub.f32 %v6844_v50, %v749_v33  ;;  %v7086_v33 = vpack.c.bf16 %v6512_v32, %v6512_v32 }
 0x3ab   : > { %v7008_v41 = vpop.xlane.xlu0 %2079 }
 0x3af   : > { %v7012_v23 = vpop.xlane.xlu0 %2085 }
 0x3b3   : > { %v7018_v1 = vpop.xlane.xlu0 %2091 }
 0x3b7   : > { %v1078_v56 = vpop.xlane.xlu0 %1077 }
 0x3b8   : > { %5684 = vrcp.f32 %v1078_v56  ;;  %v760_v56 = vsub.f32 %v6770_v48, %v746_v49  ;;  %v8163_v48 = vmov 0.0  }
 0x3b9   : > { %781 = vadd.xlane.f32.xlu1 %v780_v44 }
 0x3ba   : > { %v772_v2 = vmul.f32 1.442695, %v760_v56 }
 0x3bd   : > { %784 = vadd.xlane.f32.xlu1 %v783_v59 }
 0x3bf   : > { %2777 = vmax.xlane.f32.xlu0 %v2776_v8  ;;  %v1081_v44 = vpop.xlane.xlu0 %1080  ;;  %v7030_v8 = vpop.xlane.xlu1 %2759 }
 0x3c0   : > { %5686 = vrcp.f32 %v1081_v44 }
 0x3c1   : > { %5688 = vpow2.f32 %v772_v2  ;;  %v762_v2 = vsub.f32 %v6779_v6, %v6992_v20  ;;  %v2103_v6 = vsub.f32 %v6795_v34, %v7006_v15 }
 0x3c2   : > { %v5685_v47 = vpop.eup %5684 }
 0x3c3   : > { %2780 = vmax.xlane.f32.xlu0 %v2779_v51  ;;  %v7034_v51 = vpack.c.bf16 %v6506_v30, %v6506_v30  ;;  %v1108_v0 = vmul.f32 %v5685_v47, %v6867_v27  ;;  %v774_v27 = vmul.f32 1.442695, %v761_v19  ;;  %v776_v32 = vmul.f32 1.442695, %v762_v2 }
 0x3c4   : > { %v1084_v59 = vpop.xlane.xlu0 %1083 }
 0x3c5   : > { %v1116_v36 = vpack.c.bf16 %v1108_v0, %v1108_v0  ;;  %5690 = vpow2.f32 %v774_v27 }
 0x3c6   : > { %5692 = vrcp.f32 %v1084_v59 }
 0x3ca   : > { %v5687_v9 = vpop.eup %5686 }
 0x3cb   : > { %v1109_v49 = vmul.f32 %v5687_v9, %v6872_v39  ;;  %v7076_v39 = vpop.eup %5688  ;;  %v7092_v9 = vpack.c.bf16 %v6582_v42, %v6582_v42  ;;  %v763_v42 = vsub.f32 %v6787_v38, %v7002_v61  ;;  %v2105_v61 = vsub.f32 %v6803_v57, %v7010_v28 }
 0x3cc   : > { %v2107_v57 = vsub.f32 %v6811_v22, %v7016_v52 }
 0x3cd   : > { %v1117_v50 = vpack.c.bf16 %v1109_v49, %v1109_v49  ;;  %v2102_v49 = vsub.f32 %v6854_v60, %v7008_v41  ;;  %v2104_v60 = vsub.f32 %v6858_v53, %v7012_v23  ;;  %v2106_v53 = vsub.f32 %v6862_v18, %v7018_v1 }
 0x3ce   : > { %1225 = vrot.lane.b32.xlu1 %v6988_v17, %s6136_s27  ;;  %v2116_v2 = vmul.f32 1.442695, %v2105_v61  ;;  %v2108_v18 = vsub.f32 %v6823_v13, %v7024_v37 }
 0x3cf   : > { %v7038_v3 = vpop.xlane.xlu1 %2762  ;;  %v7080_v0 = vpop.eup %5690  ;;  %v2110_v20 = vmul.f32 1.442695, %v2102_v49  ;;  %v2114_v15 = vmul.f32 1.442695, %v2104_v60  ;;  %v2118_v1 = vmul.f32 1.442695, %v2106_v53 }
 0x3d0   : > { %v795_v19 = vsel %vm731_vm2, %v7080_v0, 0.0  ;;  %v2122_v49 = vmul.f32 1.442695, %v2108_v18 }
 0x3d9   : > { %1274 = vrot.lane.b32.xlu0 %v6996_v7, %s6136_s27 }
 0x3f2   : > { %787 = vadd.xlane.f32.xlu1 %v786_v10 }
 0x3f8   : > { %790 = vadd.xlane.f32.xlu0 %v789_v35  ;;  %v7048_v35 = vpack.c.bf16 %v6542_v40, %v6542_v40 }
 0x3fa   : > { %8162 = vst [vmem:[#allocation31_spill] sm:$0xff] %v7048_v35 }
 0x403   : > { %v1087_v4 = vpop.xlane.xlu0 %1086  ;;  %1323 = vrot.lane.b32.xlu1 %v7034_v51, %s6136_s27 }
 0x404   : > { %5694 = vrcp.f32 %v1087_v4 }
 0x405   : > { %5696 = vpow2.f32 %v776_v32  ;;  %v2109_v32 = vsub.f32 %v6831_v25, %v7028_v21 }
 0x406   : > { %5698 = vpow2.f32 %v2110_v20 }
 0x407   : > { %v7040_v63 = vpop.xlane.xlu0 %1089  ;;  %v2124_v37 = vmul.f32 1.442695, %v2109_v32  ;;  %v2783_v32 = vsub.f32 %v6885_v5, %v7038_v3 }
 0x409   : > { %v7042_v43 = vpop.xlane.xlu1 %2765 }
 0x40b   : > { %v7044_v10 = vpop.xlane.xlu0 %1092 }
 0x40d   : > { %v7050_v30 = vpop.xlane.xlu1 %2768 }
 0x40e   : > { %1372 = vrot.lane.b32.xlu0 %v7048_v35, %s6136_s27 }
 0x40f   : > { %v7054_v14 = vpop.xlane.xlu0 %1095 }
 0x411   : > { %v7057_v46 = vpop.xlane.xlu1 %2771 }
 0x413   : > { %v7059_v55 = vpop.xlane.xlu0 %1098 }
 0x415   : > { %v1126_v40 = vpop.permute.xlu1 %1125 }
 0x416   : > { %v1133_v44 = vsel %vm1131_vm4, %v1126_v40, 0 }
 0x417   : > { %v7064_v35 = vpop.xlane.xlu0 %2774  ;;  %5099 = vmatpush3.bf16.msra.mxu1 %v1133_v44  ;;  %v5693_v44 = vpop.eup %5692 }
 0x418   : > { %5110 = vmatprep.subr.bf16.mxu1 %v8163_v48 }
 0x41a   : > { %5101 = vmatmul.mubr.msk.bf16.vlgmr.msra.gmra.mrb[0].mxu1 %vm1127_vm5, %v1116_v36  ;;  %v792_v36 = vsel %vm731_vm2, %v7076_v39, 0.0 }
 0x41b   : > { %v1177_v47 = vpop.permute.xlu0 %1176  ;;  %5112 = vmatprep.mubr.msk.bf16.mxu1 %vm6138_vm3, %v8163_v48 }
 0x41c   : > { %v1182_v56 = vsel %vm1131_vm4, %v1177_v47, 0  ;;  %v1110_v47 = vmul.f32 %v5693_v44, %v6878_v58  ;;  %v2112_v58 = vmul.f32 1.442695, %v2103_v6  ;;  %v2120_v44 = vmul.f32 1.442695, %v2107_v57 }
 0x41d   : > { %5105 = vmatpush3.bf16.msra.mxu0 %v1182_v56 }
 0x41e   : > { %5116 = vmatprep.subr.bf16.mxu0 %v8163_v48  ;;  %v1118_v38 = vpack.c.bf16 %v1110_v47, %v1110_v47 }
 0x420   : > { %5107 = vmatmul.mubr.msk.bf16.vlgmr.msra.gmra.mrb[4].mxu0 %vm1127_vm5, %v1117_v50  ;;  %v5695_v50 = vpop.eup %5694 }
 0x421   : > { %5118 = vmatprep.mubr.msk.bf16.mxu0 %vm6138_vm3, %v8163_v48  ;;  %v1111_v34 = vmul.f32 %v5695_v50, %v6904_v11  ;;  %v7129_v28 = vpop.eup %5696 }
 0x422   : > { %v798_v22 = vsel %vm731_vm2, %v7129_v28, 0.0  ;;  %v7140_v52 = vpop.eup %5698 }
 0x423   : > { %v1119_v11 = vpack.c.bf16 %v1111_v34, %v1111_v34 }
 0x427   : > { %793 = vadd.xlane.f32.xlu1 %v792_v36  ;;  %v778_v36 = vmul.f32 1.442695, %v763_v42  ;;  %v2126_v42 = vsel %vm731_vm2, %v7140_v52, 0.0 }
 0x429   : > { %5700 = vpow2.f32 %v778_v36 }
 0x42a   : > { %5702 = vpow2.f32 %v2112_v58 }
 0x42b   : > { %5704 = vpow2.f32 %v2114_v15 }
 0x42c   : > { %5706 = vpow2.f32 %v2116_v2 }
 0x42d   : > { %796 = vadd.xlane.f32.xlu0 %v795_v19  ;;  %5708 = vpow2.f32 %v2118_v1 }
 0x42e   : > { %5710 = vpow2.f32 %v2120_v44 }
 0x42f   : > { %5712 = vpow2.f32 %v2122_v49  ;;  %v2792_v49 = vmul.f32 1.442695, %v2783_v32 }
 0x430   : > { %5714 = vpow2.f32 %v2124_v37  ;;  %v2784_v37 = vsub.f32 %v6915_v24, %v7042_v43 }
 0x431   : > { %5716 = vrcp.f32 %v7040_v63 }
 0x432   : > { %5718 = vrcp.f32 %v7044_v10 }
 0x433   : > { %v7142_v13 = vpop.eup %5700 }
 0x434   : > { %v7146_v47 = vpop.eup %5702  ;;  %v801_v25 = vsel %vm731_vm2, %v7142_v13, 0.0 }
 0x435   : > { %v7150_v21 = vpop.eup %5704  ;;  %v2129_v6 = vsel %vm731_vm2, %v7146_v47, 0.0 }
 0x436   : > { %v7154_v20 = vpop.eup %5706 }
 0x437   : > { %v2135_v50 = vsel %vm731_vm2, %v7154_v20, 0.0 }
 0x438   : > { %1421 = vrot.lane.b32.xlu1 %v7086_v33, %s6136_s27 }
 0x443   : > { %1470 = vrot.lane.b32.xlu0 %v7092_v9, %s6136_s27 }
 0x446   : > { %v7098_v40 = vpop.xlane.xlu1 %781 }
 0x44a   : > { %v7102_v27 = vpop.xlane.xlu1 %784 }
 0x44c   : > { %v7106_v59 = vpop.xlane.xlu0 %2777 }
 0x44e   : > { %v1226_v4 = vpop.permute.xlu1 %1225 }
 0x44f   : > { %v1231_v56 = vsel %vm1131_vm4, %v1226_v4, 0  ;;  %v2132_v4 = vsel %vm731_vm2, %v7150_v21, 0.0 }
 0x450   : > { %v7114_v41 = vpop.xlane.xlu0 %2780  ;;  %5111 = vmatpush3.bf16.msra.mxu1 %v1231_v56  ;;  %v7158_v56 = vpop.eup %5708 }
 0x451   : > { %5122 = vmatprep.subr.bf16.mxu1 %v8163_v48  ;;  %v7162_v36 = vpop.eup %5710  ;;  %v2138_v60 = vsel %vm731_vm2, %v7158_v56, 0.0 }
 0x452   : > { %v2141_v58 = vsel %vm731_vm2, %v7162_v36, 0.0 }
 0x453   : > { %5113 = vmatmul.mubr.msk.bf16.vlgmr.msra.gmra.mrb[4].mxu1 %vm1127_vm5, %v1118_v38  ;;  %v7166_v38 = vpop.eup %5712 }
 0x454   : > { %v1275_v23 = vpop.permute.xlu0 %1274  ;;  %5124 = vmatprep.mubr.msk.bf16.mxu1 %vm6138_vm3, %v8163_v48  ;;  %v7170_v61 = vpop.eup %5714  ;;  %v2144_v34 = vsel %vm731_vm2, %v7166_v38, 0.0 }
 0x455   : > { %v1280_v19 = vsel %vm1131_vm4, %v1275_v23, 0  ;;  %v2147_v15 = vsel %vm731_vm2, %v7170_v61, 0.0  ;;  %v5717_v53 = vpop.eup %5716 }
 0x456   : > { %5117 = vmatpush3.bf16.msra.mxu0 %v1280_v19  ;;  %v1112_v19 = vmul.f32 %v5717_v53, %v6910_v45 }
 0x457   : > { %5128 = vmatprep.subr.bf16.mxu0 %v8163_v48 }
 0x458   : > { %v1120_v63 = vpack.c.bf16 %v1112_v19, %v1112_v19  ;;  %v1568_v19 = vsel %vm1131_vm4, %v6958_v31, 0 }
 0x459   : > { %5119 = vmatmul.mubr.msk.bf16.vlgmr.msra.gmra.mrb[8].mxu0 %vm1127_vm5, %v1119_v11  ;;  %v5719_v11 = vpop.eup %5718 }
 0x45a   : > { %5130 = vmatprep.mubr.msk.bf16.mxu0 %vm6138_vm3, %v8163_v48  ;;  %v1113_v10 = vmul.f32 %v5719_v11, %v6917_v62  ;;  %v2782_v62 = vsub.f32 %v6840_v54, %v7030_v8 }
 0x45c   : > { %799 = vadd.xlane.f32.xlu1 %v798_v22  ;;  %v1121_v44 = vpack.c.bf16 %v1113_v10, %v1113_v10  ;;  %v2790_v22 = vmul.f32 1.442695, %v2782_v62  ;;  %v1614_v10 = vsel %vm1131_vm4, %v6988_v17, 0 }
 0x45e   : > { %5720 = vpow2.f32 %v2790_v22  ;;  %v1660_v22 = vsel %vm1131_vm4, %v6996_v7, 0 }
 0x45f   : > { %5722 = vpow2.f32 %v2792_v49 }
 0x460   : > { %2127 = vadd.xlane.f32.xlu1 %v2126_v42  ;;  %v2794_v42 = vmul.f32 1.442695, %v2784_v37 }
 0x462   : > { %802 = vadd.xlane.f32.xlu0 %v801_v25  ;;  %5724 = vpow2.f32 %v2794_v42  ;;  %v8168_v42 = vld [vmem:[#allocation30_spill] sm:$0xff] }
 0x463   : > { %5726 = vrcp.f32 %v7054_v14 }
 0x464   : > { %2130 = vadd.xlane.f32.xlu1 %v2129_v6  ;;  %5728 = vrcp.f32 %v7059_v55 }
 0x465   : > { %5730 = vrcp.f32 %v7098_v40 }
 0x466   : > { %2133 = vadd.xlane.f32.xlu0 %v2132_v4  ;;  %5732 = vrcp.f32 %v7102_v27 }
 0x468   : > { %2136 = vadd.xlane.f32.xlu1 %v2135_v50  ;;  %v7202_v25 = vpop.eup %5720 }
 0x469   : > { %v7204_v6 = vpop.eup %5722  ;;  %v2806_v54 = vsel %vm731_vm2, %v7202_v25, 0.0 }
 0x46a   : > { %2139 = vadd.xlane.f32.xlu0 %v2138_v60  ;;  %v2809_v5 = vsel %vm731_vm2, %v7204_v6, 0.0 }
 0x46c   : > { %2142 = vadd.xlane.f32.xlu1 %v2141_v58  ;;  %v7210_v8 = vpop.eup %5724 }
 0x46d   : > { %v2812_v24 = vsel %vm731_vm2, %v7210_v8, 0.0  ;;  %v5727_v3 = vpop.eup %5726 }
 0x46e   : > { %2145 = vadd.xlane.f32.xlu0 %v2144_v34  ;;  %v1114_v4 = vmul.f32 %v5727_v3, %v6926_v12  ;;  %v5729_v60 = vpop.eup %5728  ;;  %v1522_v12 = vsel %vm1131_vm4, %v6946_v26, 0 }
 0x46f   : > { %v5731_v55 = vpop.eup %5730  ;;  %v1115_v40 = vmul.f32 %v5729_v60, %v6934_v16  ;;  %v8170_v60 = vld [vmem:[#allocation25_spill] sm:$0xff] }
 0x470   : > { %2148 = vadd.xlane.f32.xlu1 %v2147_v15  ;;  %v1122_v34 = vpack.c.bf16 %v1114_v4, %v1114_v4  ;;  %v812_v15 = vmul.f32 %v5731_v55, %v6970_v29  ;;  %v1798_v55 = vsel %vm1131_vm4, %v7086_v33, 0 }
 0x471   : > { %v1123_v16 = vpack.c.bf16 %v1115_v40, %v1115_v40 }
 0x472   : > { %v820_v29 = vpack.c.bf16 %v812_v15, %v812_v15 }
 0x47f   : > { %v788_v23 = vpop.xlane.xlu1 %787 }
 0x480   : > { %5734 = vrcp.f32 %v788_v23  ;;  %v5733_v23 = vpop.eup %5732 }
 0x481   : > { %2222 = vrot.lane.b32.xlu1 %v6958_v31, %s6139_s29 }
 0x483   : > { %v1324_v2 = vpop.permute.xlu1 %1323 }
 0x484   : > { %v1329_v57 = vsel %vm1131_vm4, %v1324_v2, 0  ;;  %2174 = vrot.lane.b32.xlu0 %v6946_v26, %s6139_s29 }
 0x485   : > { %5123 = vmatpush3.bf16.msra.mxu1 %v1329_v57  ;;  %v791_v18 = vpop.xlane.xlu0 %790  ;;  %v8164_v57 = vld [vmem:[#allocation23_spill] sm:$0xff] }
 0x486   : > { %5134 = vmatprep.subr.bf16.mxu1 %v8163_v48  ;;  %5736 = vrcp.f32 %v791_v18  ;;  %v2785_v11 = vsub.f32 %v8164_v57, %v7050_v30  ;;  %v8165_v18 = vld [vmem:[#allocation26_spill] sm:$0xff] }
 0x488   : > { %5125 = vmatmul.mubr.msk.bf16.vlgmr.msra.gmra.mrb[8].mxu1 %vm1127_vm5, %v1120_v63  ;;  %2270 = vrot.lane.b32.xlu0 %v6988_v17, %s6139_s29  ;;  %v813_v63 = vmul.f32 %v5733_v23, %v8165_v18  ;;  %v2796_v30 = vmul.f32 1.442695, %v2785_v11 }
 0x489   : > { %v1373_v45 = vpop.permute.xlu0 %1372  ;;  %5136 = vmatprep.mubr.msk.bf16.mxu1 %vm6138_vm3, %v8163_v48 }
 0x48a   : > { %v1378_v1 = vsel %vm1131_vm4, %v1373_v45, 0  ;;  %v5735_v2 = vpop.eup %5734  ;;  %v8166_v45 = vld [vmem:[#allocation31_spill] sm:$0xff]  ;;  %v821_v62 = vpack.c.bf16 %v813_v63, %v813_v63 }
 0x48b   : > { %5129 = vmatpush3.bf16.msra.mxu0 %v1378_v1  ;;  %v8167_v1 = vld [vmem:[#allocation29_spill] sm:$0xff] }
 0x48c   : > { %5140 = vmatprep.subr.bf16.mxu0 %v8163_v48 }
 0x48e   : > { %5131 = vmatmul.mubr.msk.bf16.vlgmr.msra.gmra.mrb[12].mxu0 %vm1127_vm5, %v1121_v44  ;;  %v814_v44 = vmul.f32 %v5735_v2, %v8167_v1 }
 0x48f   : > { %5142 = vmatprep.mubr.msk.bf16.mxu0 %vm6138_vm3, %v8163_v48 }
 0x490   : > { %v5737_v32 = vpop.eup %5736  ;;  %v822_v49 = vpack.c.bf16 %v814_v44, %v814_v44 }
 0x4a5   : > { %2807 = vadd.xlane.f32.xlu1 %v2806_v54  ;;  %v815_v54 = vmul.f32 %v5737_v32, %v8168_v42 }
 0x4a7   : > { %2810 = vadd.xlane.f32.xlu0 %v2809_v5  ;;  %v1706_v5 = vsel %vm1131_vm4, %v7034_v51, 0  ;;  %v823_v4 = vpack.c.bf16 %v815_v54, %v815_v54 }
 0x4ab   : > { %2813 = vadd.xlane.f32.xlu0 %v2812_v24  ;;  %v8169_v24 = vld [vmem:[#allocation24_spill] sm:$0xff] }
 0x4ac   : > { %v2786_v3 = vsub.f32 %v8169_v24, %v7057_v46 }
 0x4b4   : > { %v794_v43 = vpop.xlane.xlu1 %793 }
 0x4b5   : > { %5738 = vrcp.f32 %v794_v43 }
 0x4b6   : > { %2318 = vrot.lane.b32.xlu1 %v6996_v7, %s6139_s29 }
 0x4b8   : > { %v1422_v50 = vpop.permute.xlu1 %1421 }
 0x4b9   : > { %v1427_v14 = vsel %vm1131_vm4, %v1422_v50, 0 }
 0x4ba   : > { %5135 = vmatpush3.bf16.msra.mxu1 %v1427_v14  ;;  %v797_v58 = vpop.xlane.xlu0 %796  ;;  %v2798_v14 = vmul.f32 1.442695, %v2786_v3 }
 0x4bb   : > { %5146 = vmatprep.subr.bf16.mxu1 %v8163_v48  ;;  %5740 = vrcp.f32 %v797_v58  ;;  %v2787_v58 = vsub.f32 %v8170_v60, %v7064_v35 }
 0x4bc   : > { %5742 = vpow2.f32 %v2796_v30  ;;  %v8171_v30 = vld [vmem:[#allocation27_spill] sm:$0xff] }
 0x4bd   : > { %5137 = vmatmul.mubr.msk.bf16.vlgmr.msra.gmra.mrb[12].mxu1 %vm1127_vm5, %v1122_v34  ;;  %v1752_v34 = vsel %vm1131_vm4, %v8166_v45, 0  ;;  %5744 = vpow2.f32 %v2798_v14  ;;  %v2800_v40 = vmul.f32 1.442695, %v2787_v58 }
 0x4be   : > { %5147 = vmatpush3.bf16.msra.mxu1 %v1522_v12  ;;  %v1471_v27 = vpop.permute.xlu0 %1470  ;;  %5148 = vmatprep.mubr.msk.bf16.mxu1 %vm6138_vm3, %v8163_v48 }
 0x4bf   : > { %v1476_v53 = vsel %vm1131_vm4, %v1471_v27, 0  ;;  %5158 = vmatprep.subr.bf16.mxu1 %v8163_v48  ;;  %v5739_v37 = vpop.eup %5738  ;;  %5746 = vpow2.f32 %v2800_v40  ;;  %v1844_v27 = vsel %vm1131_vm4, %v7092_v9, 0 }
 0x4c0   : > { %5141 = vmatpush3.bf16.msra.mxu0 %v1476_v53  ;;  %v816_v43 = vmul.f32 %v5739_v37, %v7076_v39 }
 0x4c1   : > { %2366 = vrot.lane.b32.xlu0 %v7034_v51, %s6139_s29  ;;  %5152 = vmatprep.subr.bf16.mxu0 %v8163_v48 }
 0x4c2   : > { %v824_v46 = vpack.c.bf16 %v816_v43, %v816_v43 }
 0x4c3   : > { %5143 = vmatmul.mubr.msk.bf16.vlgmr.msra.gmra.mrb[16].mxu0 %vm1127_vm5, %v1123_v16 }
 0x4c4   : > { %5153 = vmatpush3.bf16.msra.mxu0 %v1568_v19  ;;  %5154 = vmatprep.mubr.msk.bf16.mxu0 %vm6138_vm3, %v8163_v48 }
 0x4c5   : > { %5149 = vmatmul.mubr.msk.bf16.vlgmr.msra.gmra.mrb[0].mxu1 %vm1127_vm5, %v820_v29  ;;  %2414 = vrot.lane.b32.xlu0 %v8166_v45, %s6139_s29  ;;  %v5741_v50 = vpop.eup %5740 }
 0x4c6   : > { %5159 = vmatpush3.bf16.msra.mxu1 %v1614_v10  ;;  %5164 = vmatprep.subr.bf16.mxu0 %v8163_v48  ;;  %v817_v39 = vmul.f32 %v5741_v50, %v7080_v0  ;;  %v7281_v35 = vpop.eup %5742 }
 0x4c7   : > { %5160 = vmatprep.mubr.msk.bf16.mxu1 %vm6138_vm3, %v8163_v48  ;;  %5170 = vmatprep.subr.bf16.mxu1 %v8163_v48  ;;  %v2815_v0 = vsel %vm731_vm2, %v7281_v35, 0.0  ;;  %v7294_v15 = vpop.eup %5744 }
 0x4c8   : > { %v825_v12 = vpack.c.bf16 %v817_v39, %v817_v39  ;;  %v2818_v53 = vsel %vm731_vm2, %v7294_v15, 0.0 }
 0x4c9   : > { %v7298_v16 = vpop.eup %5746 }
 0x4ca   : > { %v2821_v23 = vsel %vm731_vm2, %v7298_v16, 0.0 }
 0x4cb   : > { %5155 = vmatmul.mubr.msk.bf16.vlgmr.msra.gmra.mrb[4].mxu0 %vm1127_vm5, %v821_v62  ;;  %v2788_v62 = vsub.f32 %v8171_v30, %v7106_v59 }
 0x4cc   : > { %5165 = vmatpush3.bf16.msra.mxu0 %v1660_v22  ;;  %5166 = vmatprep.mubr.msk.bf16.mxu0 %vm6138_vm3, %v8163_v48 }
 0x4cd   : > { %5161 = vmatmul.mubr.msk.bf16.vlgmr.msra.gmra.mrb[4].mxu1 %vm1127_vm5, %v822_v49  ;;  %5176 = vmatprep.subr.bf16.mxu0 %v8163_v48 }
 0x4ce   : > { %5171 = vmatpush3.bf16.msra.mxu1 %v1706_v5  ;;  %5172 = vmatprep.mubr.msk.bf16.mxu1 %vm6138_vm3, %v8163_v48 }
 0x4cf   : > { %5182 = vmatprep.subr.bf16.mxu1 %v8163_v48 }
 0x4d3   : > { %5167 = vmatmul.mubr.msk.bf16.vlgmr.msra.gmra.mrb[8].mxu0 %vm1127_vm5, %v823_v4 }
 0x4d4   : > { %5177 = vmatpush3.bf16.msra.mxu0 %v1752_v34  ;;  %5178 = vmatprep.mubr.msk.bf16.mxu0 %vm6138_vm3, %v8163_v48 }
 0x4d5   : > { %5173 = vmatmul.mubr.msk.bf16.vlgmr.msra.gmra.mrb[8].mxu1 %vm1127_vm5, %v824_v46  ;;  %5188 = vmatprep.subr.bf16.mxu0 %v8163_v48  ;;  %v8172_v46 = vld [vmem:[#allocation28_spill] sm:$0xff] }
 0x4d6   : > { %5183 = vmatpush3.bf16.msra.mxu1 %v1798_v55  ;;  %5184 = vmatprep.mubr.msk.bf16.mxu1 %vm6138_vm3, %v8163_v48  ;;  %v2789_v39 = vsub.f32 %v8172_v46, %v7114_v41 }
 0x4d7   : > { %5194 = vmatprep.subr.bf16.mxu1 %v8163_v48 }
 0x4da   : > { %2816 = vadd.xlane.f32.xlu1 %v2815_v0  ;;  %v2804_v0 = vmul.f32 1.442695, %v2789_v39 }
 0x4db   : > { %5179 = vmatmul.mubr.msk.bf16.vlgmr.msra.gmra.mrb[12].mxu0 %vm1127_vm5, %v825_v12 }
 0x4dc   : > { %5189 = vmatpush3.bf16.msra.mxu0 %v1844_v27  ;;  %5190 = vmatprep.mubr.msk.bf16.mxu0 %vm6138_vm3, %v8163_v48 }
 0x4dd   : > { %5200 = vmatprep.subr.bf16.mxu0 %v8163_v48 }
 0x4e4   : > { %2819 = vadd.xlane.f32.xlu0 %v2818_v53 }
 0x4e8   : > { %2822 = vadd.xlane.f32.xlu0 %v2821_v23 }
 0x4e9   : > { %v800_v19 = vpop.xlane.xlu1 %799 }
 0x4ea   : > { %5748 = vrcp.f32 %v800_v19 }
 0x4eb   : > { %2462 = vrot.lane.b32.xlu1 %v7086_v33, %s6139_s29 }
 0x4ed   : > { %v2128_v29 = vpop.xlane.xlu1 %2127 }
 0x4ef   : > { %v803_v2 = vpop.xlane.xlu0 %802 }
 0x4f0   : > { %5750 = vrcp.f32 %v803_v2 }
 0x4f1   : > { %5752 = vrcp.f32 %v2128_v29  ;;  %v2131_v57 = vpop.xlane.xlu1 %2130 }
 0x4f2   : > { %5754 = vrcp.f32 %v2131_v57 }
 0x4f3   : > { %v2134_v11 = vpop.xlane.xlu0 %2133 }
 0x4f4   : > { %v5749_v18 = vpop.eup %5748  ;;  %5756 = vrcp.f32 %v2134_v11 }
 0x4f5   : > { %v818_v63 = vmul.f32 %v5749_v18, %v7129_v28  ;;  %v2137_v10 = vpop.xlane.xlu1 %2136  ;;  %v2802_v28 = vmul.f32 1.442695, %v2788_v62 }
 0x4f7   : > { %v2140_v1 = vpop.xlane.xlu0 %2139  ;;  %v826_v44 = vpack.c.bf16 %v818_v63, %v818_v63  ;;  %5758 = vpow2.f32 %v2802_v28 }
 0x4f8   : > { %5760 = vpow2.f32 %v2804_v0 }
 0x4f9   : > { %5185 = vmatmul.mubr.msk.bf16.vlgmr.msra.gmra.mrb[12].mxu1 %vm1127_vm5, %v826_v44  ;;  %v2143_v32 = vpop.xlane.xlu1 %2142  ;;  %5762 = vrcp.f32 %v2137_v10 }
 0x4fa   : > { %v5751_v22 = vpop.eup %5750  ;;  %5196 = vmatprep.mubr.msk.bf16.mxu1 %vm6138_vm3, %v8163_v48  ;;  %5764 = vrcp.f32 %v2140_v1 }
 0x4fb   : > { %v5753_v49 = vpop.eup %5752  ;;  %v819_v37 = vmul.f32 %v5751_v22, %v7142_v13  ;;  %v7311_v42 = vpop.xlane.xlu0 %2145  ;;  %5766 = vrcp.f32 %v2143_v32 }
 0x4fc   : > { %v5755_v24 = vpop.eup %5754  ;;  %v2158_v59 = vmul.f32 %v5753_v49, %v7140_v52  ;;  %5768 = vrcp.f32 %v7311_v42  ;;  %v7391_v42 = vstv %s4945_s30 }
 0x4fd   : > { %v7313_v54 = vpop.xlane.xlu1 %2148  ;;  %v827_v5 = vpack.c.bf16 %v819_v37, %v819_v37  ;;  %v2159_v13 = vmul.f32 %v5755_v24, %v7146_v47  ;;  %v3266_v28 = vsub.s32 0, %v7391_v42  ;;  %v3259_v24 = vadd.s32 2, %v7391_v42 }
 0x4fe   : > { %2510 = vrot.lane.b32.xlu0 %v7092_v9, %s6139_s29  ;;  %v2166_v14 = vpack.c.bf16 %v2158_v59, %v2158_v59  ;;  %v5757_v52 = vpop.eup %5756  ;;  %5770 = vrcp.f32 %v7313_v54  ;;  %vm3265_vm6 = vcmp.lt.s32.totalorder %v7391_v42, 0  ;;  %v7410_v39 = vadd.s32 4, %v7391_v42 }
 0x4ff   : > { %v2175_v3 = vpop.permute.xlu0 %2174  ;;  %5191 = vmatmul.mubr.msk.bf16.vlgmr.msra.gmra.mrb[16].mxu0 %vm1127_vm5, %v827_v5  ;;  %v2167_v34 = vpack.c.bf16 %v2159_v13, %v2159_v13  ;;  %v2160_v47 = vmul.f32 %v5757_v52, %v7150_v21  ;;  %v4946_v5 = vmin.u32 %v3266_v28, %v7391_v42  ;;  %vm3279_vm9 = vcmp.lt.s32.totalorder %v3259_v24, 0 }
 0x500   : > { %v2180_v43 = vsel %vm1131_vm4, %v2175_v3, 0  ;;  %5202 = vmatprep.mubr.msk.bf16.mxu0 %vm6138_vm3, %v8163_v48 }
 0x501   : > { %v2223_v4 = vpop.permute.xlu1 %2222  ;;  %5195 = vmatpush3.bf16.msra.mxu1 %v2180_v43  ;;  %v2168_v55 = vpack.c.bf16 %v2160_v47, %v2160_v47  ;;  %v7337_v40 = vpop.eup %5758  ;;  %v3269_v13 = vand.u32 1, %v4946_v5 }
 0x502   : > { %v2228_v50 = vsel %vm1131_vm4, %v2223_v4, 0  ;;  %5206 = vmatprep.subr.bf16.mxu1 %v8163_v48  ;;  %v2824_v21 = vsel %vm731_vm2, %v7337_v40, 0.0  ;;  %v7344_v41 = vpop.eup %5760  ;;  %v3280_v4 = vsub.s32 0, %v3259_v24 }
 0x503   : > { %v2271_v60 = vpop.permute.xlu0 %2270  ;;  %5201 = vmatpush3.bf16.msra.mxu0 %v2228_v50  ;;  %v2827_v12 = vsel %vm731_vm2, %v7344_v41, 0.0  ;;  %v5763_v27 = vpop.eup %5762  ;;  %vm3293_vm2 = vcmp.lt.s32.totalorder %v7410_v39, 0 }
 0x504   : > { %v2276_v58 = vsel %vm1131_vm4, %v2271_v60, 0  ;;  %5197 = vmatmul.mubr.msk.bf16.vlgmr.msra.gmra.mrb[0].mxu1 %vm1127_vm5, %v2166_v14  ;;  %5212 = vmatprep.subr.bf16.mxu0 %v8163_v48 }
 0x505   : > { %5207 = vmatpush3.bf16.msra.mxu1 %v2276_v58  ;;  %5208 = vmatprep.mubr.msk.bf16.mxu1 %vm6138_vm3, %v8163_v48  ;;  %v3270_v58 = vsub.s32 0, %v3269_v13 }
 0x506   : > { %5218 = vmatprep.subr.bf16.mxu1 %v8163_v48 }
 0x507   : > { %5203 = vmatmul.mubr.msk.bf16.vlgmr.msra.gmra.mrb[4].mxu0 %vm1127_vm5, %v2167_v34  ;;  %v4948_v34 = vmin.u32 %v3280_v4, %v3259_v24 }
 0x508   : > { %5214 = vmatprep.mubr.msk.bf16.mxu0 %vm6138_vm3, %v8163_v48 }
 0x509   : > { %v3283_v0 = vand.u32 1, %v4948_v34 }
 0x50c   : > { %5209 = vmatmul.mubr.msk.bf16.vlgmr.msra.gmra.mrb[4].mxu1 %vm1127_vm5, %v2168_v55  ;;  %v3271_v55 = vsel %vm3265_vm6, %v3270_v58, %v3269_v13 }
 0x50d   : > { %5220 = vmatprep.mubr.msk.bf16.mxu1 %vm6138_vm3, %v8163_v48  ;;  %vm3321_vm7 = vcmp.ne.s32.totalorder %v3271_v55, 0  ;;  %vm3329_vm8 = vcmp.lt.s32.totalorder %v3271_v55, 0 }
 0x50e   : > { %vm3337_vm10 = vmand %vm3329_vm8, %vm3321_vm7 }
 0x50f   : > { %2825 = vadd.xlane.f32.xlu1 %v2824_v21 }
 0x51d   : > { %2828 = vadd.xlane.f32.xlu0 %v2827_v12 }
 0x520   : > { %2854 = vrot.lane.b32.xlu1 %v6946_v26, %s6140_s15  ;;  %v2161_v26 = vmul.f32 %v5763_v27, %v7154_v20 }
 0x522   : > { %v2169_v29 = vpack.c.bf16 %v2161_v26, %v2161_v26 }
 0x524   : > { %2950 = vrot.lane.b32.xlu1 %v6988_v17, %s6140_s15 }
 0x528   : > { %2998 = vrot.lane.b32.xlu1 %v6996_v7, %s6140_s15  ;;  %v5765_v7 = vpop.eup %5764 }
 0x52c   : > { %3046 = vrot.lane.b32.xlu1 %v7034_v51, %s6140_s15 }
 0x530   : > { %3094 = vrot.lane.b32.xlu1 %v8166_v45, %s6140_s15  ;;  %v2162_v45 = vmul.f32 %v5765_v7, %v7158_v56  ;;  %v3284_v7 = vsub.s32 0, %v3283_v0 }
 0x532   : > { %v2808_v53 = vpop.xlane.xlu1 %2807  ;;  %v2170_v2 = vpack.c.bf16 %v2162_v45, %v2162_v45 }
 0x533   : > { %2902 = vrot.lane.b32.xlu0 %v6958_v31, %s6140_s15  ;;  %v5767_v31 = vpop.eup %5766  ;;  %5772 = vrcp.f32 %v2808_v53 }
 0x534   : > { %3142 = vrot.lane.b32.xlu1 %v7086_v33, %s6140_s15  ;;  %v2811_v23 = vpop.xlane.xlu0 %2810 }
 0x536   : > { %v2319_v19 = vpop.permute.xlu1 %2318 }
 0x537   : > { %v2324_v17 = vsel %vm1131_vm4, %v2319_v19, 0  ;;  %3190 = vrot.lane.b32.xlu0 %v7092_v9, %s6140_s15  ;;  %v2163_v9 = vmul.f32 %v5767_v31, %v7162_v36  ;;  %v5769_v36 = vpop.eup %5768  ;;  %v7423_v31 = vadd.s32 3, %v7391_v42 }
 0x538   : > { %v2814_v51 = vpop.xlane.xlu0 %2813  ;;  %5213 = vmatpush3.bf16.msra.mxu0 %v2324_v17  ;;  %v2164_v63 = vmul.f32 %v5769_v36, %v7166_v38  ;;  %v5771_v62 = vpop.eup %5770 }
 0x539   : > { %5224 = vmatprep.subr.bf16.mxu0 %v8163_v48  ;;  %v2171_v56 = vpack.c.bf16 %v2163_v9, %v2163_v9  ;;  %v2165_v38 = vmul.f32 %v5771_v62, %v7170_v61  ;;  %5774 = vrcp.f32 %v2814_v51 }
 0x53a   : > { %v2172_v44 = vpack.c.bf16 %v2164_v63, %v2164_v63  ;;  %5776 = vrcp.f32 %v2811_v23 }
 0x53b   : > { %5215 = vmatmul.mubr.msk.bf16.vlgmr.msra.gmra.mrb[8].mxu0 %vm1127_vm5, %v2169_v29  ;;  %v2173_v37 = vpack.c.bf16 %v2165_v38, %v2165_v38  ;;  %v3345_v29 = vadd.s32 2, %v3271_v55 }
 0x53c   : > { %v2367_v33 = vpop.permute.xlu0 %2366  ;;  %5226 = vmatprep.mubr.msk.bf16.mxu0 %vm6138_vm3, %v8163_v48 }
 0x53d   : > { %v2372_v20 = vsel %vm1131_vm4, %v2367_v33, 0  ;;  %v5773_v61 = vpop.eup %5772 }
 0x53e   : > { %5219 = vmatpush3.bf16.msra.mxu1 %v2372_v20  ;;  %v2838_v59 = vmul.f32 %v5773_v61, %v7202_v25  ;;  %v7405_v25 = vadd.s32 1, %v7391_v42  ;;  %v7452_v61 = vadd.s32 5, %v7391_v42 }
 0x53f   : > { %5230 = vmatprep.subr.bf16.mxu1 %v8163_v48 }
 0x540   : > { %v2415_v57 = vpop.permute.xlu0 %2414  ;;  %v2846_v50 = vpack.c.bf16 %v2838_v59, %v2838_v59  ;;  %v3273_v27 = vsub.s32 0, %v7405_v25  ;;  %vm3272_vm15 = vcmp.lt.s32.totalorder %v7405_v25, 0 }
 0x541   : > { %v2420_v11 = vsel %vm1131_vm4, %v2415_v57, 0  ;;  %5221 = vmatmul.mubr.msk.bf16.vlgmr.msra.gmra.mrb[8].mxu1 %vm1127_vm5, %v2170_v2  ;;  %v7433_v2 = vadd.s32 6, %v7391_v42 }
 0x542   : > { %5225 = vmatpush3.bf16.msra.mxu0 %v2420_v11  ;;  %5232 = vmatprep.mubr.msk.bf16.mxu1 %vm6138_vm3, %v8163_v48  ;;  %v4947_v45 = vmin.u32 %v3273_v27, %v7405_v25  ;;  %v7485_v27 = vadd.s32 7, %v7391_v42 }
 0x543   : > { %5236 = vmatprep.subr.bf16.mxu0 %v8163_v48  ;;  %v5775_v14 = vpop.eup %5774  ;;  %v3308_v62 = vsub.s32 0, %v7433_v2 }
 0x544   : > { %v2840_v47 = vmul.f32 %v5775_v14, %v7210_v8  ;;  %v5777_v21 = vpop.eup %5776  ;;  %v3294_v8 = vsub.s32 0, %v7410_v39  ;;  %v3276_v36 = vand.u32 1, %v4947_v45  ;;  %v3315_v45 = vsub.s32 0, %v7485_v27 }
 0x545   : > { %5227 = vmatmul.mubr.msk.bf16.vlgmr.msra.gmra.mrb[12].mxu0 %vm1127_vm5, %v2171_v56  ;;  %v2839_v19 = vmul.f32 %v5777_v21, %v7204_v6  ;;  %v3353_v56 = vsel %vm3337_vm10, %v3345_v29, %v3271_v55  ;;  %v7462_v59 = vmin.u32 %v3308_v62, %v7433_v2  ;;  %v5837_v55 = vld [vmem:[%s6462_s12 + $0x8] sm:$0xf] }
 0x546   : > { %5238 = vmatprep.mubr.msk.bf16.mxu0 %vm6138_vm3, %v8163_v48  ;;  %v2848_v53 = vpack.c.bf16 %v2840_v47, %v2840_v47  ;;  %v4950_v9 = vmin.u32 %v3294_v8, %v7410_v39  ;;  %vm3361_vm13 = vcmp.eq.s32.totalorder %v3353_v56, 0  ;;  %vm3394_vm0 = vcmp.eq.s32.totalorder %v3353_v56, 1  ;;  %v5839_v56 = vld [vmem:[%s6462_s12 + $0x10] sm:$0xf] }
 0x547   : > { %v2847_v57 = vpack.c.bf16 %v2839_v19, %v2839_v19 }
 0x567   : > { %v2817_v18 = vpop.xlane.xlu1 %2816 }
 0x56b   : > { %v2463_v10 = vpop.permute.xlu1 %2462 }
 0x56c   : > { %v2468_v1 = vsel %vm1131_vm4, %v2463_v10, 0 }
 0x56d   : > { %5231 = vmatpush3.bf16.msra.mxu1 %v2468_v1 }
 0x56e   : > { %5242 = vmatprep.subr.bf16.mxu1 %v8163_v48 }
 0x570   : > { %5233 = vmatmul.mubr.msk.bf16.vlgmr.msra.gmra.mrb[12].mxu1 %vm1127_vm5, %v2172_v44 }
 0x571   : > { %v2820_v30 = vpop.xlane.xlu0 %2819  ;;  %5244 = vmatprep.mubr.msk.bf16.mxu1 %vm6138_vm3, %v8163_v48 }
 0x572   : > { %5778 = vrcp.f32 %v2820_v30  ;;  %v3297_v30 = vand.u32 1, %v4950_v9  ;;  %v5838_v9 = vld [vmem:[%s6462_s12 + $0x4] sm:$0xf] }
 0x573   : > { %5780 = vrcp.f32 %v2817_v18  ;;  %v3287_v18 = vsub.s32 0, %v7423_v31 }
 0x574   : > { %v3298_v24 = vsub.s32 0, %v3297_v30 }
 0x575   : > { %v7382_v32 = vpop.xlane.xlu0 %2822  ;;  %v4949_v28 = vmin.u32 %v3287_v18, %v7423_v31 }
 0x576   : > { %v3299_v47 = vsel %vm3293_vm2, %v3298_v24, %v3297_v30 }
 0x577   : > { %v3290_v14 = vand.u32 1, %v4949_v28  ;;  %vm3333_vm10 = vcmp.lt.s32.totalorder %v3299_v47, 0  ;;  %v3349_v42 = vadd.s32 2, %v3299_v47 }
 0x579   : > { %v2511_v22 = vpop.permute.xlu0 %2510  ;;  %v3291_v21 = vsub.s32 0, %v3290_v14 }
 0x57a   : > { %v2516_v49 = vsel %vm1131_vm4, %v2511_v22, 0  ;;  %v7448_v22 = vld [vmem:[#allocation8] sm:$0xf] }
 0x57b   : > { %5237 = vmatpush3.bf16.msra.mxu0 %v2516_v49 }
 0x57c   : > { %5248 = vmatprep.subr.bf16.mxu0 %v8163_v48  ;;  %v5779_v23 = vpop.eup %5778 }
 0x57d   : > { %v2842_v33 = vmul.f32 %v5779_v23, %v7294_v15  ;;  %v3285_v15 = vsel %vm3279_vm9, %v3284_v7, %v3283_v0  ;;  %v5781_v11 = vpop.eup %5780  ;;  %v397_v0 = vpack.c.bf16 %v5837_v55, %v5837_v55  ;;  %vm3325_vm9 = vcmp.ne.s32.totalorder %v3299_v47, 0 }
 0x57e   : > { %5239 = vmatmul.mubr.msk.bf16.vlgmr.msra.gmra.mrb[16].mxu0 %vm1127_vm5, %v2173_v37  ;;  %vm3323_vm11 = vcmp.ne.s32.totalorder %v3285_v15, 0  ;;  %vm3331_vm12 = vcmp.lt.s32.totalorder %v3285_v15, 0  ;;  %v3347_v49 = vadd.s32 2, %v3285_v15  ;;  %v3277_v37 = vsub.s32 0, %v3276_v36 }
 0x57f   : > { %5250 = vmatprep.mubr.msk.bf16.mxu0 %vm6138_vm3, %v8163_v48  ;;  %v2850_v10 = vpack.c.bf16 %v2842_v33, %v2842_v33  ;;  %vm3339_vm14 = vmand %vm3331_vm12, %vm3323_vm11  ;;  %vm3286_vm11 = vcmp.lt.s32.totalorder %v7423_v31, 0  ;;  %v3532_v33 = vsel %vm1131_vm4, %v397_v0, 0 }
 0x580   : > { %v3355_v4 = vsel %vm3339_vm14, %v3347_v49, %v3285_v15  ;;  %vm3307_vm14 = vcmp.lt.s32.totalorder %v7433_v2, 0  ;;  %v396_v2 = vpack.c.bf16 %v5838_v9, %v5838_v9 }
 0x581   : > { %vm3363_vm6 = vcmp.eq.s32.totalorder %v3355_v4, 0 }
 0x59c   : > { %v2826_v54 = vpop.xlane.xlu1 %2825 }
 0x59d   : > { %5782 = vrcp.f32 %v2826_v54  ;;  %v5836_v54 = vld [vmem:[%s6462_s12] sm:$0xf] }
 0x59e   : > { %5784 = vrcp.f32 %v7382_v32  ;;  %v2841_v32 = vmul.f32 %v5781_v11, %v7281_v35  ;;  %v395_v5 = vpack.c.bf16 %v5836_v54, %v5836_v54 }
 0x5a0   : > { %v2855_v3 = vpop.permute.xlu1 %2854  ;;  %v3440_v34 = vsel %vm1131_vm4, %v395_v5, 0 }
 0x5a1   : > { %v2860_v43 = vsel %vm1131_vm4, %v2855_v3, 0  ;;  %v2849_v3 = vpack.c.bf16 %v2841_v32, %v2841_v32 }
 0x5a2   : > { %5243 = vmatpush3.bf16.msra.mxu1 %v2860_v43  ;;  %v3386_v43 = vsel %vm3361_vm13, %v7448_v22, 0.0  ;;  %vm3396_vm13 = vcmp.eq.s32.totalorder %v3355_v4, 1 }
 0x5a3   : > { %5254 = vmatprep.subr.bf16.mxu1 %v8163_v48 }
 0x5a4   : > { %v2951_v52 = vpop.permute.xlu1 %2950 }
 0x5a5   : > { %v2956_v60 = vsel %vm1131_vm4, %v2951_v52, 0  ;;  %5245 = vmatmul.mubr.msk.bf16.vlgmr.msra.gmra.mrb[0].mxu1 %vm1127_vm5, %v2846_v50  ;;  %v3278_v50 = vsel %vm3272_vm15, %v3277_v37, %v3276_v36  ;;  %v3301_v52 = vsub.s32 0, %v7452_v61  ;;  %vm7494_vm15 = vmand %vm3333_vm10, %vm3325_vm9  ;;  %v399_v36 = vpack.c.bf16 %v5839_v56, %v5839_v56 }
 0x5a6   : > { %5255 = vmatpush3.bf16.msra.mxu1 %v2956_v60  ;;  %5256 = vmatprep.mubr.msk.bf16.mxu1 %vm6138_vm3, %v8163_v48  ;;  %vm3322_vm7 = vcmp.ne.s32.totalorder %v3278_v50, 0  ;;  %vm3330_vm8 = vcmp.lt.s32.totalorder %v3278_v50, 0  ;;  %v3357_v11 = vsel %vm7494_vm15, %v3349_v42, %v3299_v47  ;;  %vm3300_vm9 = vcmp.lt.s32.totalorder %v7452_v61, 0 }
 0x5a7   : > { %5266 = vmatprep.subr.bf16.mxu1 %v8163_v48  ;;  %v5783_v1 = vpop.eup %5782  ;;  %vm3338_vm12 = vmand %vm3330_vm8, %vm3322_vm7  ;;  %vm3365_vm10 = vcmp.eq.s32.totalorder %v3357_v11, 0  ;;  %v3624_v49 = vsel %vm1131_vm4, %v399_v36, 0 }
 0x5a8   : > { %v2999_v46 = vpop.permute.xlu1 %2998  ;;  %v2844_v35 = vmul.f32 %v5783_v1, %v7337_v40  ;;  %v7466_v40 = vld [vmem:[#allocation8 + $0x4] sm:$0xf]  ;;  %v5785_v13 = vpop.eup %5784  ;;  %v3486_v1 = vsel %vm1131_vm4, %v396_v2, 0  ;;  %v3390_v37 = vsel %vm3365_vm10, %v7448_v22, 0.0 }
 0x5a9   : > { %v3004_v63 = vsel %vm1131_vm4, %v2999_v46, 0  ;;  %v3420_v25 = vsel %vm3394_vm0, %v7466_v40, %v3386_v43  ;;  %v3311_v46 = vand.u32 1, %v7462_v59  ;;  %v2843_v39 = vmul.f32 %v5785_v13, %v7298_v16  ;;  %v5841_v43 = vld [vmem:[%s6462_s12 + $0x18] sm:$0xf] }
 0x5aa   : > { %v7412_v12 = vpop.xlane.xlu0 %2828  ;;  %v2852_v58 = vpack.c.bf16 %v2844_v35, %v2844_v35  ;;  %v3346_v16 = vadd.s32 2, %v3278_v50  ;;  %v3428_v23 = vpack.c.bf16 %v3420_v25, %v3420_v25  ;;  %v5840_v35 = vld [vmem:[%s6462_s12 + $0xc] sm:$0xf]  ;;  %v401_v13 = vpack.c.bf16 %v5841_v43, %v5841_v43 }
 0x5ab   : > { %5786 = vrcp.f32 %v7412_v12  ;;  %v4951_v12 = vmin.u32 %v3301_v52, %v7452_v61  ;;  %v3312_v8 = vsub.s32 0, %v3311_v46  ;;  %v2851_v19 = vpack.c.bf16 %v2843_v39, %v2843_v39 }
 0x5ac   : > { %v3047_v26 = vpop.permute.xlu1 %3046  ;;  %v398_v54 = vpack.c.bf16 %v5840_v35, %v5840_v35 }
 0x5ad   : > { %v3052_v17 = vsel %vm1131_vm4, %v3047_v26, 0  ;;  %5257 = vmatmul.mubr.msk.bf16.vlgmr.msra.gmra.mrb[4].mxu1 %vm1127_vm5, %v2848_v53  ;;  %v3388_v26 = vsel %vm3363_vm6, %v7448_v22, 0.0  ;;  %v3304_v29 = vand.u32 1, %v4951_v12 }
 0x5ae   : > { %5267 = vmatpush3.bf16.msra.mxu1 %v3052_v17  ;;  %v2903_v51 = vpop.permute.xlu0 %2902  ;;  %5268 = vmatprep.mubr.msk.bf16.mxu1 %vm6138_vm3, %v8163_v48 }
 0x5af   : > { %v2908_v6 = vsel %vm1131_vm4, %v2903_v51, 0  ;;  %5278 = vmatprep.subr.bf16.mxu1 %v8163_v48  ;;  %v3292_v51 = vsel %vm3286_vm11, %v3291_v21, %v3290_v14  ;;  %v3305_v18 = vsub.s32 0, %v3304_v29  ;;  %v3578_v14 = vsel %vm1131_vm4, %v398_v54, 0 }
 0x5b0   : > { %v3095_v20 = vpop.permute.xlu1 %3094  ;;  %5249 = vmatpush3.bf16.msra.mxu0 %v2908_v6  ;;  %v3354_v6 = vsel %vm3338_vm12, %v3346_v16, %v3278_v50  ;;  %vm3324_vm0 = vcmp.ne.s32.totalorder %v3292_v51, 0  ;;  %vm3332_vm2 = vcmp.lt.s32.totalorder %v3292_v51, 0 }
 0x5b1   : > { %5260 = vmatprep.subr.bf16.mxu0 %v8163_v48  ;;  %v3100_v60 = vsel %vm1131_vm4, %v3095_v20, 0  ;;  %v3422_v20 = vsel %vm3396_vm13, %v7466_v40, %v3388_v26  ;;  %vm3362_vm6 = vcmp.eq.s32.totalorder %v3354_v6, 0  ;;  %vm3340_vm11 = vmand %vm3332_vm2, %vm3324_vm0  ;;  %vm3395_vm12 = vcmp.eq.s32.totalorder %v3354_v6, 1  ;;  %v5843_v26 = vld [vmem:[%s6462_s12 + $0x1c] sm:$0xf] }
 0x5b2   : > { %v3191_v53 = vpop.permute.xlu0 %3190  ;;  %v3387_v30 = vsel %vm3362_vm6, %v7448_v22, 0.0  ;;  %v3306_v32 = vsel %vm3300_vm9, %v3305_v18, %v3304_v29  ;;  %vm3314_vm6 = vcmp.lt.s32.totalorder %v7485_v27, 0  ;;  %v3869_v29 = vld [vmem:[#allocation11] sm:$0xff] }
 0x5b3   : > { %5251 = vmatmul.mubr.msk.bf16.vlgmr.msra.gmra.mrb[4].mxu0 %vm1127_vm5, %v2847_v57  ;;  %v3196_v31 = vsel %vm1131_vm4, %v3191_v53, 0  ;;  %v3313_v57 = vsel %vm3307_vm14, %v3312_v8, %v3311_v46  ;;  %vm3398_vm14 = vcmp.eq.s32.totalorder %v3357_v11, 1  ;;  %v3421_v61 = vsel %vm3395_vm12, %v7466_v40, %v3387_v30  ;;  %v5842_v46 = vld [vmem:[%s6462_s12 + $0x14] sm:$0xf] }
 0x5b4   : > { %v3143_v44 = vpop.permute.xlu1 %3142  ;;  %5261 = vmatpush3.bf16.msra.mxu0 %v3004_v63  ;;  %5262 = vmatprep.mubr.msk.bf16.mxu0 %vm6138_vm3, %v8163_v48  ;;  %v4953_v63 = vmin.u32 %v3315_v45, %v7485_v27  ;;  %vm3327_vm7 = vcmp.ne.s32.totalorder %v3313_v57, 0  ;;  %vm3335_vm8 = vcmp.lt.s32.totalorder %v3313_v57, 0  ;;  %v3351_v62 = vadd.s32 2, %v3313_v57  ;;  %v3870_v45 = vld [vmem:[#allocation11 + $0x8] sm:$0xf] }
 0x5b5   : > { %v3148_v38 = vsel %vm1131_vm4, %v3143_v44, 0  ;;  %5269 = vmatmul.mubr.msk.bf16.vlgmr.msra.gmra.mrb[8].mxu1 %vm1127_vm5, %v2850_v10  ;;  %5272 = vmatprep.subr.bf16.mxu0 %v8163_v48  ;;  %v5787_v17 = vpop.eup %5786  ;;  %v3430_v10 = vpack.c.bf16 %v3422_v20, %v3422_v20  ;;  %vm3343_vm13 = vmand %vm3335_vm8, %vm3327_vm7  ;;  %vm3326_vm15 = vcmp.ne.s32.totalorder %v3306_v32, 0  ;;  %vm3334_vm0 = vcmp.lt.s32.totalorder %v3306_v32, 0 }
 0x5b6   : > { %5279 = vmatpush3.bf16.msra.mxu1 %v3148_v38  ;;  %5280 = vmatprep.mubr.msk.bf16.mxu1 %vm6138_vm3, %v8163_v48  ;;  %v2845_v15 = vmul.f32 %v5787_v17, %v7344_v41  ;;  %v3348_v41 = vadd.s32 2, %v3292_v51  ;;  %v3318_v38 = vand.u32 1, %v4953_v63  ;;  %v3359_v5 = vsel %vm3343_vm13, %v3351_v62, %v3313_v57  ;;  %vm3342_vm8 = vmand %vm3334_vm0, %vm3326_vm15 }
 0x5b7   : > { %5290 = vmatprep.subr.bf16.mxu1 %v8163_v48  ;;  %v3424_v24 = vsel %vm3398_vm14, %v7466_v40, %v3390_v37  ;;  %v3350_v4 = vadd.s32 2, %v3306_v32  ;;  %vm3367_vm7 = vcmp.eq.s32.totalorder %v3359_v5, 0  ;;  %vm3400_vm10 = vcmp.eq.s32.totalorder %v3359_v5, 1 }
 0x5b8   : > { %v2853_v44 = vpack.c.bf16 %v2845_v15, %v2845_v15  ;;  %v3356_v28 = vsel %vm3340_vm11, %v3348_v41, %v3292_v51  ;;  %v3319_v59 = vsub.s32 0, %v3318_v38  ;;  %v3432_v50 = vpack.c.bf16 %v3424_v24, %v3424_v24 }
 0x5b9   : > { %vm3364_vm2 = vcmp.eq.s32.totalorder %v3356_v28, 0  ;;  %vm3397_vm9 = vcmp.eq.s32.totalorder %v3356_v28, 1  ;;  %v3358_v25 = vsel %vm3342_vm8, %v3350_v4, %v3306_v32  ;;  %v400_v39 = vpack.c.bf16 %v5842_v46, %v5842_v46 }
 0x5ba   : > { %v3389_v52 = vsel %vm3364_vm2, %v7448_v22, 0.0  ;;  %vm3366_vm13 = vcmp.eq.s32.totalorder %v3358_v25, 0  ;;  %vm3399_vm15 = vcmp.eq.s32.totalorder %v3358_v25, 1  ;;  %v402_v8 = vpack.c.bf16 %v5843_v26, %v5843_v26 }
 0x5bb   : > { %5263 = vmatmul.mubr.msk.bf16.vlgmr.msra.gmra.mrb[8].mxu0 %vm1127_vm5, %v2849_v3  ;;  %v3429_v3 = vpack.c.bf16 %v3421_v61, %v3421_v61  ;;  %v3423_v47 = vsel %vm3397_vm9, %v7466_v40, %v3389_v52  ;;  %v3670_v27 = vsel %vm1131_vm4, %v400_v39, 0  ;;  %v3391_v16 = vsel %vm3366_vm13, %v7448_v22, 0.0 }
 0x5bc   : > { %5273 = vmatpush3.bf16.msra.mxu0 %v3100_v60  ;;  %5274 = vmatprep.mubr.msk.bf16.mxu0 %vm6138_vm3, %v8163_v48  ;;  %v3320_v60 = vsel %vm3314_vm6, %v3319_v59, %v3318_v38  ;;  %v3431_v0 = vpack.c.bf16 %v3423_v47, %v3423_v47  ;;  %v3762_v42 = vsel %vm1131_vm4, %v402_v8, 0  ;;  %vm6142_vm6 = vmmov 1  }
 0x5bd   : > { %5281 = vmatmul.mubr.msk.bf16.vlgmr.msra.gmra.mrb[12].mxu1 %vm1127_vm5, %v2852_v58  ;;  %5284 = vmatprep.subr.bf16.mxu0 %v8163_v48  ;;  %v3716_v58 = vsel %vm1131_vm4, %v401_v13, 0  ;;  %vm3328_vm11 = vcmp.ne.s32.totalorder %v3320_v60, 0  ;;  %vm3336_vm12 = vcmp.lt.s32.totalorder %v3320_v60, 0  ;;  %v3352_v21 = vadd.s32 2, %v3320_v60 }
 0x5be   : > { %5291 = vmatpush3.bf16.msra.mxu1 %v3440_v34  ;;  %5292 = vmatprep.mubr.msk.bf16.mxu1 %vm6138_vm3, %v8163_v48  ;;  %v3392_v34 = vsel %vm3367_vm7, %v7448_v22, 0.0  ;;  %vm3344_vm14 = vmand %vm3336_vm12, %vm3328_vm11  ;;  %vm3984_vm4 = vcmask 1043456   ;;  %vm680_vm8 = vcmask 1041409   ;;  %vm681_vm9 = vcmask 1042434  }
 0x5bf   : > { %5302 = vmatprep.subr.bf16.mxu1 %v8163_v48  ;;  %v3426_v55 = vsel %vm3400_vm10, %v7466_v40, %v3392_v34  ;;  %v3360_v53 = vsel %vm3344_vm14, %v3352_v21, %v3320_v60  ;;  %vm7574_vm7 = vmpackc.low %vm3984_vm4, %vm6142_vm6  ;;  %vm683_vm10 = vcmask 1043459   ;;  %vm3936_vm11 = vcmask 1044484  }
 0x5c0   : > { %v3434_v12 = vpack.c.bf16 %v3426_v55, %v3426_v55  ;;  %vm3368_vm0 = vcmp.eq.s32.totalorder %v3360_v53, 0  ;;  %vm3401_vm2 = vcmp.eq.s32.totalorder %v3360_v53, 1  ;;  %vm3939_vm12 = vcmask 1045509  }
 0x5c1   : > { %v3393_v17 = vsel %vm3368_vm0, %v7448_v22, 0.0  ;;  %v7571_v22 = vpack.c.bf16 %v3870_v45, %v3869_v29  ;;  %vm3942_vm13 = vcmask 1046534   ;;  %vm3945_vm14 = vcmask 1047559  }
 0x5c2   : > { %v3427_v7 = vsel %vm3401_vm2, %v7466_v40, %v3393_v17 }
 0x5c3   : > { %5275 = vmatmul.mubr.msk.bf16.vlgmr.msra.gmra.mrb[12].mxu0 %vm1127_vm5, %v2851_v19  ;;  %v3435_v51 = vpack.c.bf16 %v3427_v7, %v3427_v7 }
 0x5c4   : > { %5285 = vmatpush3.bf16.msra.mxu0 %v3196_v31  ;;  %5286 = vmatprep.mubr.msk.bf16.mxu0 %vm6138_vm3, %v8163_v48  ;;  %v8108_v31 = vmov 0.0|0.0  }
 0x5c5   : > { %5293 = vmatmul.mubr.msk.bf16.vlgmr.msra.gmra.mrb[16].mxu1 %vm1127_vm5, %v3428_v23  ;;  %5296 = vmatprep.subr.bf16.mxu0 %v8163_v48  ;;  %v3425_v23 = vsel %vm3399_vm15, %v7466_v40, %v3391_v16  ;;  %vm3980_vm15 = vcmask 97280  }
 0x5c6   : > { %5303 = vmatpush3.bf16.msra.mxu1 %v3532_v33  ;;  %5304 = vmatprep.mubr.msk.bf16.mxu1 %vm6138_vm3, %v8163_v48  ;;  %v3433_v19 = vpack.c.bf16 %v3425_v23, %v3425_v23  ;;  %v8175_v33 = vmov 0 }
 0x5c7   : > { %5314 = vmatprep.subr.bf16.mxu1 %v8163_v48  ;;  %v8176_v33 = vsel %vm7574_vm7, 4294967295, %v8175_v33 }
 0x5c8   : > { %8177 = vst [vmem:[#allocation23_spill] sm:$0xff] %v8176_v33 }
 0x5cb   : > { %5287 = vmatmul.mubr.msk.bf16.vlgmr.msra.gmra.mrb[16].mxu0 %vm1127_vm5, %v2853_v44 }
 0x5cc   : > { %5297 = vmatpush3.bf16.msra.mxu0 %v3486_v1  ;;  %5298 = vmatprep.mubr.msk.bf16.mxu0 %vm6138_vm3, %v8163_v48 }
 0x5cd   : > { %5305 = vmatmul.mubr.msk.bf16.vlgmr.msra.gmra.mrb[20].mxu1 %vm1127_vm5, %v3430_v10  ;;  %5308 = vmatprep.subr.bf16.mxu0 %v8163_v48 }
 0x5ce   : > { %5315 = vmatpush3.bf16.msra.mxu1 %v3624_v49  ;;  %5316 = vmatprep.mubr.msk.bf16.mxu1 %vm6138_vm3, %v8163_v48 }
 0x5cf   : > { %5326 = vmatprep.subr.bf16.mxu1 %v8163_v48 }
 0x5d3   : > { %5299 = vmatmul.mubr.msk.bf16.vlgmr.msra.gmra.mrb[20].mxu0 %vm1127_vm5, %v3429_v3 }
 0x5d4   : > { %5309 = vmatpush3.bf16.msra.mxu0 %v3578_v14  ;;  %5310 = vmatprep.mubr.msk.bf16.mxu0 %vm6138_vm3, %v8163_v48 }
 0x5d5   : > { %5317 = vmatmul.mubr.msk.bf16.vlgmr.msra.gmra.mrb[24].mxu1 %vm1127_vm5, %v3432_v50  ;;  %5320 = vmatprep.subr.bf16.mxu0 %v8163_v48 }
 0x5d6   : > { %5327 = vmatpush3.bf16.msra.mxu1 %v3716_v58  ;;  %5328 = vmatprep.mubr.msk.bf16.mxu1 %vm6138_vm3, %v8163_v48 }
 0x5d7   : > { %5366 = vmatprep.subr.bf16.mxu1 %v8108_v31 }
 0x5db   : > { %5311 = vmatmul.mubr.msk.bf16.vlgmr.msra.gmra.mrb[24].mxu0 %vm1127_vm5, %v3431_v0 }
 0x5dc   : > { %5321 = vmatpush3.bf16.msra.mxu0 %v3670_v27  ;;  %5322 = vmatprep.mubr.msk.bf16.mxu0 %vm6138_vm3, %v8163_v48 }
 0x5dd   : > { %5329 = vmatmul.mubr.msk.bf16.vlgmr.msra.gmra.mrb[28].mxu1 %vm1127_vm5, %v3434_v12  ;;  %5332 = vmatprep.subr.bf16.mxu0 %v8163_v48 }
 0x5de   : > { %5342 = vmatprep.mubr.msk.f32.mxu1 %vm6138_vm3, %v8163_v48  ;;  %5369 = vmatpush3.bf16.msk.msra.mxu1 %vm7574_vm7, %v7571_v22 }
 0x5df   : > { %5370 = vmatprep.subr.bf16.mxu1 %v8108_v31 }
 0x5e3   : > { %5323 = vmatmul.mubr.msk.bf16.vlgmr.msra.gmra.mrb[28].mxu0 %vm1127_vm5, %v3433_v19 }
 0x5e4   : > { %5333 = vmatpush3.bf16.msra.mxu0 %v3762_v42  ;;  %5334 = vmatprep.mubr.msk.bf16.mxu0 %vm6138_vm3, %v8163_v48 }
 0x5e5   : > { %5374 = vmatprep.subr.bf16.mxu0 %v8108_v31 }
 0x5eb   : > { %5335 = vmatmul.mubr.msk.bf16.vlgmr.msra.gmra.mrb[32].mxu0 %vm1127_vm5, %v3435_v51  ;;  %vm3860_vm5 = vcmask 44032  }
 0x5ec   : > { %5356 = vmatprep.mubr.msk.f32.mxu0 %vm6138_vm3, %v8163_v48  ;;  %5377 = vmatpush3.bf16.msk.msra.mxu0 %vm7574_vm7, %v7571_v22 }
 0x678   : > { %v7585_v40 = vpop.f32.mrb[0].mxu1 }
 0x679   : > { %v5246_v6 = vpop.f32.mrb[1].mxu1 }
 0x67a   : > { %v2899_v20 = vpop.f32.mrb[2].mxu1 }
 0x67b   : > { %v5247_v9 = vpop.f32.mrb[3].mxu1  ;;  %v3246_v20 = vmul.f32 0.25, %v7585_v40 }
 0x680   : > { %v7587_v2 = vpop.f32.mrb[4].mxu1 }
 0x681   : > { %v5258_v57 = vpop.f32.mrb[5].mxu1 }
 0x682   : > { %v2995_v15 = vpop.f32.mrb[6].mxu1 }
 0x683   : > { %v5259_v11 = vpop.f32.mrb[7].mxu1 }
 0x686   : > { %v7589_v56 = vpop.f32.mrb[4].mxu0 }
 0x687   : > { %v5252_v36 = vpop.f32.mrb[5].mxu0 }
 0x688   : > { %v2947_v18 = vpop.f32.mrb[6].mxu0  ;;  %v7591_v63 = vpop.f32.mrb[8].mxu1 }
 0x689   : > { %v5253_v41 = vpop.f32.mrb[7].mxu0  ;;  %v5270_v10 = vpop.f32.mrb[9].mxu1 }
 0x68a   : > { %v3091_v1 = vpop.f32.mrb[10].mxu1 }
 0x68b   : > { %v5271_v44 = vpop.f32.mrb[11].mxu1 }
 0x68e   : > { %v7593_v30 = vpop.f32.mrb[8].mxu0 }
 0x68f   : > { %v5264_v62 = vpop.f32.mrb[9].mxu0 }
 0x690   : > { %v3043_v32 = vpop.f32.mrb[10].mxu0  ;;  %v7595_v38 = vpop.f32.mrb[12].mxu1 }
 0x691   : > { %v5265_v49 = vpop.f32.mrb[11].mxu0  ;;  %v5282_v37 = vpop.f32.mrb[13].mxu1 }
 0x692   : > { %v3187_v28 = vpop.f32.mrb[14].mxu1 }
 0x693   : > { %v5283_v61 = vpop.f32.mrb[15].mxu1  ;;  %v3248_v28 = vmul.f32 0.25, %v7587_v2  ;;  %v3250_v2 = vmul.f32 0.25, %v7591_v63 }
 0x696   : > { %v7597_v35 = vpop.f32.mrb[12].mxu0 }
 0x697   : > { %v5276_v54 = vpop.f32.mrb[13].mxu0 }
 0x698   : > { %v3139_v5 = vpop.f32.mrb[14].mxu0  ;;  %v3476_v24 = vpop.f32.mrb[16].mxu1 }
 0x699   : > { %v4962_v59 = vmul.f32 -1.442695, %v3476_v24  ;;  %v5277_v3 = vpop.f32.mrb[15].mxu0  ;;  %v5294_v43 = vpop.f32.mrb[17].mxu1 }
 0x69a   : > { %v3479_v13 = vpop.f32.mrb[18].mxu1 }
 0x69b   : > { %5788 = vpow2.f32 %v4962_v59  ;;  %v5295_v4 = vpop.f32.mrb[19].mxu1 }
 0x69c   : > { %v3247_v4 = vmul.f32 0.25, %v7589_v56  ;;  %v3249_v56 = vmul.f32 0.25, %v7593_v30  ;;  %v7620_v30 = vld [vmem:[%s6462_s12 + $0x4] sm:$0x1] }
 0x69e   : > { %v7599_v50 = vpop.f32.mrb[16].mxu0 }
 0x69f   : > { %v5288_v14 = vpop.f32.mrb[17].mxu0 }
 0x6a0   : > { %v3235_v52 = vpop.f32.mrb[18].mxu0  ;;  %v3568_v60 = vpop.f32.mrb[20].mxu1 }
 0x6a1   : > { %v4964_v58 = vmul.f32 -1.442695, %v3568_v60  ;;  %v5289_v34 = vpop.f32.mrb[19].mxu0  ;;  %v5306_v25 = vpop.f32.mrb[21].mxu1 }
 0x6a2   : > { %v3571_v47 = vpop.f32.mrb[22].mxu1 }
 0x6a3   : > { %5790 = vpow2.f32 %v4964_v58  ;;  %v5307_v46 = vpop.f32.mrb[23].mxu1 }
 0x6a5   : > { %v5789_v39 = vpop.eup %5788 }
 0x6a6   : > { %v3828_v55 = vadd.f32 1.0, %v5789_v39  ;;  %v3522_v0 = vpop.f32.mrb[20].mxu0 }
 0x6a7   : > { %v4963_v21 = vmul.f32 -1.442695, %v3522_v0  ;;  %v5300_v12 = vpop.f32.mrb[21].mxu0  ;;  %v3252_v0 = vmul.f32 0.25, %v7595_v38  ;;  %v7623_v38 = vld [vmem:[%s6462_s12 + $0x8] sm:$0x1] }
 0x6a8   : > { %5792 = vrcp.f32 %v3828_v55  ;;  %v3660_v27 = vpop.f32.mrb[24].mxu1  ;;  %v3525_v16 = vpop.f32.mrb[22].mxu0 }
 0x6a9   : > { %5794 = vpow2.f32 %v4963_v21  ;;  %v4966_v53 = vmul.f32 -1.442695, %v3660_v27  ;;  %v5301_v23 = vpop.f32.mrb[23].mxu0  ;;  %v5318_v26 = vpop.f32.mrb[25].mxu1 }
 0x6aa   : > { %v3663_v8 = vpop.f32.mrb[26].mxu1  ;;  %v7614_v23 = vld [vmem:[%s6462_s12 + $0x5] sm:$0x1]  ;;  %v7617_v26 = vld [vmem:[%s6462_s12 + $0x9] sm:$0x1] }
 0x6ab   : > { %5796 = vpow2.f32 %v4966_v53  ;;  %v5319_v19 = vpop.f32.mrb[27].mxu1  ;;  %v7626_v8 = vld [vmem:[%s6462_s12 + $0xb] sm:$0x1] }
 0x6ac   : > { %v3251_v19 = vmul.f32 0.25, %v7597_v35 }
 0x6ad   : > { %v5791_v42 = vpop.eup %5790 }
 0x6ae   : > { %v3830_v17 = vadd.f32 1.0, %v5791_v42  ;;  %v3614_v7 = vpop.f32.mrb[24].mxu0 }
 0x6af   : > { %v4965_v51 = vmul.f32 -1.442695, %v3614_v7  ;;  %v5312_v29 = vpop.f32.mrb[25].mxu0 }
 0x6b0   : > { %5798 = vrcp.f32 %v3830_v17  ;;  %v3752_v45 = vpop.f32.mrb[28].mxu1  ;;  %v3617_v6 = vpop.f32.mrb[26].mxu0 }
 0x6b1   : > { %5800 = vpow2.f32 %v4965_v51  ;;  %v4968_v9 = vmul.f32 -1.442695, %v3752_v45  ;;  %v5313_v57 = vpop.f32.mrb[27].mxu0  ;;  %v5330_v15 = vpop.f32.mrb[29].mxu1  ;;  %v7630_v45 = vld [vmem:[%s6462_s12 + $0xa] sm:$0x1] }
 0x6b2   : > { %v5793_v11 = vpop.eup %5792  ;;  %v3755_v36 = vpop.f32.mrb[30].mxu1  ;;  %v7639_v57 = vld [vmem:[%s6462_s12 + $0x6] sm:$0x1]  ;;  %v7642_v15 = vld [vmem:[%s6462_s12 + $0xd] sm:$0x1] }
 0x6b3   : > { %v5795_v18 = vpop.eup %5794  ;;  %v3852_v41 = vmul.f32 %v5793_v11, %v3246_v20  ;;  %5802 = vpow2.f32 %v4968_v9  ;;  %v5331_v10 = vpop.f32.mrb[31].mxu1  ;;  %v7633_v20 = vld [vmem:[%s6462_s12 + $0x1] sm:$0x1]  ;;  %v7636_v9 = vld [vmem:[%s6462_s12 + $0x7] sm:$0x1] }
 0x6b4   : > { %v3829_v1 = vadd.f32 1.0, %v5795_v18 }
 0x6b5   : > { %v5797_v44 = vpop.eup %5796  ;;  %3861 = vst.msk [vmem:[#allocation2] sm:$0xf] %vm3860_vm5, %v3852_v41 }
 0x6b6   : > { %5804 = vrcp.f32 %v3829_v1  ;;  %v3832_v62 = vadd.f32 1.0, %v5797_v44  ;;  %v3706_v32 = vpop.f32.mrb[28].mxu0  ;;  %v7649_v44 = vld [vmem:[%s6462_s12] sm:$0x1] }
 0x6b7   : > { %v4967_v49 = vmul.f32 -1.442695, %v3706_v32  ;;  %v5324_v40 = vpop.f32.mrb[29].mxu0 }
 0x6b8   : > { %5806 = vrcp.f32 %v3832_v62  ;;  %v3709_v37 = vpop.f32.mrb[30].mxu0 }
 0x6b9   : > { %5808 = vpow2.f32 %v4967_v49  ;;  %v5325_v61 = vpop.f32.mrb[31].mxu0  ;;  %v7656_v49 = vld [vmem:[%s6462_s12 + $0x3] sm:$0x1]  ;;  %v7662_v37 = vld [vmem:[%s6462_s12 + $0x2] sm:$0x1] }
 0x6ba   : > { %v5799_v54 = vpop.eup %5798  ;;  %8178 = vst [vmem:[#allocation26_spill] sm:$0xff] %v7656_v49  ;;  %8179 = vst [vmem:[#allocation31_spill] sm:$0xff] %v7662_v37  ;;  %v3253_v61 = vmul.f32 0.25, %v7599_v50 }
 0x6bb   : > { %v5801_v5 = vpop.eup %5800  ;;  %v3854_v24 = vmul.f32 %v5799_v54, %v3248_v28  ;;  %v7667_v54 = vld [vmem:[%s6462_s12 + $0x11] sm:$0x1] }
 0x6bc   : > { %v3831_v59 = vadd.f32 1.0, %v5801_v5  ;;  %v4128_v41 = vld [vmem:[#allocation2 + $0x1] sm:$0x1]  ;;  %8180 = vst [vmem:[#allocation29_spill] sm:$0xff] %v7667_v54  ;;  %v7670_v5 = vld [vmem:[%s6462_s12 + $0xc] sm:$0x1] }
 0x6bd   : > { %v5803_v3 = vpop.eup %5802  ;;  %3863 = vst.msk [vmem:[#allocation2 + $0x8] sm:$0xf] %vm3860_vm5, %v3854_v24  ;;  %v7673_v24 = vld [vmem:[%s6462_s12 + $0x10] sm:$0x1] }
 0x6be   : > { %5810 = vrcp.f32 %v3831_v59  ;;  %v3834_v43 = vadd.f32 1.0, %v5803_v3  ;;  %v3798_v13 = vpop.f32.mrb[32].mxu0  ;;  %v3905_v59 = vld [vmem:[#allocation2] sm:$0x1] }
 0x6bf   : > { %v4969_v14 = vmul.f32 -1.442695, %v3798_v13  ;;  %v5336_v52 = vpop.f32.mrb[33].mxu0 }
 0x6c0   : > { %v5805_v60 = vpop.eup %5804  ;;  %5812 = vrcp.f32 %v3834_v43  ;;  %v3801_v58 = vpop.f32.mrb[34].mxu0  ;;  %v4546_v43 = vld [vmem:[#allocation2 + $0x3] sm:$0x1]  ;;  %v4136_v52 = vadd.f32 %v4128_v41, %v7633_v20 }
 0x6c1   : > { %v3853_v34 = vmul.f32 %v5805_v60, %v3247_v4  ;;  %5814 = vpow2.f32 %v4969_v14  ;;  %v5337_v25 = vpop.f32.mrb[35].mxu0  ;;  %v4337_v4 = vld [vmem:[#allocation2 + $0x2] sm:$0x1] }
 0x6c2   : > { %v5807_v47 = vpop.eup %5806  ;;  %v7687_v25 = vld [vmem:[%s6462_s12 + $0x13] sm:$0x1] }
 0x6c3   : > { %v5809_v46 = vpop.eup %5808  ;;  %3862 = vst.msk [vmem:[#allocation2 + $0x4] sm:$0xf] %vm3860_vm5, %v3853_v34  ;;  %v3856_v39 = vmul.f32 %v5807_v47, %v3250_v2  ;;  %v7684_v34 = vld [vmem:[%s6462_s12 + $0xf] sm:$0x1]  ;;  %v7690_v47 = vld [vmem:[%s6462_s12 + $0xe] sm:$0x1] }
 0x6c4   : > { %v3833_v55 = vadd.f32 1.0, %v5809_v46  ;;  %v4130_v17 = vld [vmem:[#allocation2 + $0x9] sm:$0x1]  ;;  %v3907_v51 = vld [vmem:[#allocation2 + $0x8] sm:$0x1]  ;;  %8181 = vst [vmem:[#allocation30_spill] sm:$0xff] %v7690_v47 }
 0x6c5   : > { %3865 = vst.msk [vmem:[#allocation2 + $0x10] sm:$0xf] %vm3860_vm5, %v3856_v39  ;;  %v4548_v29 = vld [vmem:[#allocation2 + $0xb] sm:$0x1]  ;;  %v4339_v18 = vld [vmem:[#allocation2 + $0xa] sm:$0x1]  ;;  %v7646_v1 = vadd.f32 %v4130_v17, %v7617_v26  ;;  %v7653_v32 = vadd.f32 %v3907_v51, %v7623_v38  ;;  %v4345_v17 = vadd.f32 %v4337_v4, %v7662_v37 }
 0x6c6   : > { %5816 = vrcp.f32 %v3833_v55  ;;  %v7659_v40 = vadd.f32 %v4548_v29, %v7626_v8  ;;  %v7677_v50 = vadd.f32 %v4339_v18, %v7630_v45  ;;  %v7694_v39 = vld [vmem:[%s6462_s12 + $0x15] sm:$0x1]  ;;  %v7708_v29 = vld [vmem:[%s6462_s12 + $0x14] sm:$0x1] }
 0x6c7   : > { %8182 = vst [vmem:[#allocation24_spill] sm:$0xff] %v7694_v39  ;;  %v4177_v55 = vrot.slane %v7646_v1, 6  ;;  %v7717_v1 = vld [vmem:[%s6462_s12 + $0x17] sm:$0x1] }
 0x6c8   : > { %v5811_v63 = vpop.eup %5810 }
 0x6c9   : > { %v3855_v21 = vmul.f32 %v5811_v63, %v3249_v56  ;;  %v3958_v63 = vrot.slane %v7653_v32, 6 }
 0x6ca   : > { %v5813_v12 = vpop.eup %5812  ;;  %v4129_v42 = vld [vmem:[#allocation2 + $0x5] sm:$0x1]  ;;  %v3906_v7 = vld [vmem:[#allocation2 + $0x4] sm:$0x1]  ;;  %v4547_v36 = vld [vmem:[#allocation2 + $0x7] sm:$0x1] }
 0x6cb   : > { %v5815_v27 = vpop.eup %5814  ;;  %3864 = vst.msk [vmem:[#allocation2 + $0xc] sm:$0xf] %vm3860_vm5, %v3855_v21  ;;  %v3858_v16 = vmul.f32 %v5813_v12, %v3252_v0  ;;  %v4137_v11 = vadd.f32 %v4129_v42, %v7614_v23  ;;  %v3914_v62 = vadd.f32 %v3906_v7, %v7620_v30  ;;  %v4338_v28 = vld [vmem:[#allocation2 + $0x6] sm:$0x1]  ;;  %v4555_v13 = vadd.f32 %v4547_v36, %v7636_v9  ;;  %v7700_v21 = vld [vmem:[%s6462_s12 + $0x12] sm:$0x1] }
 0x6cc   : > { %v3835_v53 = vadd.f32 1.0, %v5815_v27  ;;  %v4132_v14 = vld [vmem:[#allocation2 + $0x11] sm:$0x1]  ;;  %v3909_v2 = vld [vmem:[#allocation2 + $0x10] sm:$0x1]  ;;  %v4346_v46 = vadd.f32 %v4338_v28, %v7639_v57  ;;  %v4595_v0 = vrot.slane %v7659_v40, 6  ;;  %v3913_v12 = vadd.f32 %v3905_v59, %v7649_v44 }
 0x6cd   : > { %3867 = vst.msk [vmem:[#allocation2 + $0x18] sm:$0xf] %vm3860_vm5, %v3858_v16  ;;  %v4175_v58 = vrot.slane %v4137_v11, 7  ;;  %v3956_v56 = vrot.slane %v3914_v62, 7  ;;  %v4140_v51 = vadd.f32 %v4132_v14, %v7667_v54  ;;  %v4341_v11 = vld [vmem:[#allocation2 + $0x12] sm:$0x1] }
 0x6ce   : > { %5818 = vrcp.f32 %v3835_v53  ;;  %v4550_v53 = vld [vmem:[#allocation2 + $0x13] sm:$0x1]  ;;  %v4386_v36 = vrot.slane %v7677_v50, 6  ;;  %v7720_v62 = vld [vmem:[%s6462_s12 + $0x16] sm:$0x1]  ;;  %v4384_v32 = vrot.slane %v4346_v46, 7 }
 0x6cf   : > { %v4176_v41 = vsel %vm680_vm8, %v4175_v58, %v4136_v52  ;;  %v3957_v59 = vsel %vm680_vm8, %v3956_v56, %v3913_v12  ;;  %v7733_v58 = vld [vmem:[%s6462_s12 + $0x19] sm:$0x1]  ;;  %v4181_v46 = vrot.slane %v4140_v51, 4  ;;  %v7737_v56 = vld [vmem:[%s6462_s12 + $0x18] sm:$0x1] }
 0x6d0   : > { %v5817_v6 = vpop.eup %5816  ;;  %8183 = vst [vmem:[#allocation25_spill] sm:$0xff] %v7733_v58  ;;  %v4385_v51 = vsel %vm680_vm8, %v4384_v32, %v4345_v17  ;;  %v7760_v32 = vld [vmem:[%s6462_s12 + $0x1c] sm:$0x1] }
 0x6d1   : > { %v3857_v35 = vmul.f32 %v5817_v6, %v3251_v19  ;;  %v4554_v19 = vadd.f32 %v4546_v43, %v7656_v49  ;;  %v7711_v6 = vadd.f32 %v3909_v2, %v7673_v24  ;;  %v4178_v2 = vsel %vm681_vm9, %v4177_v55, %v4176_v41 }
 0x6d2   : > { %v4131_v10 = vld [vmem:[#allocation2 + $0xd] sm:$0x1]  ;;  %v3908_v3 = vld [vmem:[#allocation2 + $0xc] sm:$0x1]  ;;  %v4549_v16 = vld [vmem:[#allocation2 + $0xf] sm:$0x1] }
 0x6d3   : > { %3866 = vst.msk [vmem:[#allocation2 + $0x14] sm:$0xf] %vm3860_vm5, %v3857_v35  ;;  %v7681_v60 = vadd.f32 %v4131_v10, %v7642_v15  ;;  %v3916_v27 = vadd.f32 %v3908_v3, %v7670_v5  ;;  %v4340_v42 = vld [vmem:[#allocation2 + $0xe] sm:$0x1]  ;;  %v4593_v35 = vrot.slane %v4555_v13, 7  ;;  %v4557_v43 = vadd.f32 %v4549_v16, %v7684_v34 }
 0x6d4   : > { %v4348_v13 = vadd.f32 %v4340_v42, %v7690_v47  ;;  %v3962_v12 = vrot.slane %v7711_v6, 4  ;;  %v3911_v42 = vld [vmem:[#allocation2 + $0x18] sm:$0x1]  ;;  %v4552_v41 = vld [vmem:[#allocation2 + $0x1b] sm:$0x1] }
 0x6d5   : > { %v4179_v10 = vrot.slane %v7681_v60, 5  ;;  %v3960_v14 = vrot.slane %v3916_v27, 5  ;;  %v4349_v60 = vadd.f32 %v4341_v11, %v7700_v21  ;;  %v4594_v16 = vsel %vm680_vm8, %v4593_v35, %v4554_v19 }
 0x6d6   : > { %v3959_v27 = vsel %vm681_vm9, %v3958_v63, %v3957_v59  ;;  %v4597_v19 = vrot.slane %v4557_v43, 5  ;;  %v4388_v35 = vrot.slane %v4348_v13, 5  ;;  %v4596_v59 = vsel %vm681_vm9, %v4595_v0, %v4594_v16  ;;  %v7764_v43 = vld [vmem:[%s6462_s12 + $0x1f] sm:$0x1] }
 0x6d7   : > { %v3961_v63 = vsel %vm683_vm10, %v3960_v14, %v3959_v27  ;;  %v4387_v13 = vsel %vm681_vm9, %v4386_v36, %v4385_v51 }
 0x6d8   : > { %v5819_v7 = vpop.eup %5818  ;;  %v4598_v33 = vsel %vm683_vm10, %v4597_v19, %v4596_v59  ;;  %v4389_v36 = vsel %vm683_vm10, %v4388_v35, %v4387_v13 }
 0x6d9   : > { %v3859_v18 = vmul.f32 %v5819_v7, %v3253_v61  ;;  %v7725_v61 = vadd.f32 %v4550_v53, %v7687_v25  ;;  %v4134_v53 = vld [vmem:[#allocation2 + $0x19] sm:$0x1]  ;;  %v7743_v7 = vld [vmem:[%s6462_s12 + $0x1b] sm:$0x1] }
 0x6da   : > { %v4133_v40 = vld [vmem:[#allocation2 + $0x15] sm:$0x1]  ;;  %v3910_v28 = vld [vmem:[#allocation2 + $0x14] sm:$0x1]  ;;  %v4551_v3 = vld [vmem:[#allocation2 + $0x17] sm:$0x1]  ;;  %v4142_v17 = vadd.f32 %v4134_v53, %v7733_v58 }
 0x6db   : > { %3868 = vst.msk [vmem:[#allocation2 + $0x1c] sm:$0xf] %vm3860_vm5, %v3859_v18  ;;  %v4141_v4 = vadd.f32 %v4133_v40, %v7694_v39  ;;  %v3918_v50 = vadd.f32 %v3910_v28, %v7708_v29  ;;  %v4342_v52 = vld [vmem:[#allocation2 + $0x16] sm:$0x1]  ;;  %v4559_v11 = vadd.f32 %v4551_v3, %v7717_v1  ;;  %v4180_v18 = vsel %vm683_vm10, %v4179_v10, %v4178_v2  ;;  %v7750_v40 = vld [vmem:[%s6462_s12 + $0x1d] sm:$0x1] }
 0x6dc   : > { %v4350_v55 = vadd.f32 %v4342_v52, %v7720_v62  ;;  %v4599_v3 = vrot.slane %v7725_v61, 4  ;;  %v7756_v52 = vld [vmem:[%s6462_s12 + $0x1a] sm:$0x1]  ;;  %v3919_v10 = vadd.f32 %v3911_v42, %v7737_v56  ;;  %v4182_v14 = vsel %vm3936_vm11, %v4181_v46, %v4180_v18  ;;  %v7770_v2 = vld [vmem:[%s6462_s12 + $0x1e] sm:$0x1] }
 0x6dd   : > { %v4183_v6 = vrot.slane %v4141_v4, 3  ;;  %v3964_v28 = vrot.slane %v3918_v50, 3  ;;  %v4390_v4 = vrot.slane %v4349_v60, 4  ;;  %v4560_v50 = vadd.f32 %v4552_v41, %v7743_v7  ;;  %v4343_v61 = vld [vmem:[#allocation2 + $0x1a] sm:$0x1] }
 0x6de   : > { %v4601_v0 = vrot.slane %v4559_v11, 3  ;;  %v4392_v16 = vrot.slane %v4350_v55, 3  ;;  %v3963_v42 = vsel %vm3936_vm11, %v3962_v12, %v3961_v63  ;;  %v4185_v18 = vrot.slane %v4142_v17, 2 }
 0x6df   : > { %v4184_v53 = vsel %vm3939_vm12, %v4183_v6, %v4182_v14  ;;  %v3965_v11 = vsel %vm3939_vm12, %v3964_v28, %v3963_v42  ;;  %v3966_v41 = vrot.slane %v3919_v10, 2  ;;  %v4351_v6 = vadd.f32 %v4343_v61, %v7756_v52  ;;  %v7810_v42 = vld [vmem:[%s6470_s13 + $0x8] sm:$0xff] }
 0x6e0   : > { %v4600_v19 = vsel %vm3936_vm11, %v4599_v3, %v4598_v33  ;;  %v4391_v35 = vsel %vm3936_vm11, %v4390_v4, %v4389_v36  ;;  %v4186_v59 = vsel %vm3942_vm13, %v4185_v18, %v4184_v53  ;;  %v4603_v3 = vrot.slane %v4560_v50, 2  ;;  %v7807_v53 = vld [vmem:[%s6470_s13] sm:$0xff] }
 0x6e1   : > { %v4602_v28 = vsel %vm3939_vm12, %v4601_v0, %v4600_v19  ;;  %v4394_v4 = vrot.slane %v4351_v6, 2  ;;  %v3882_v50 = vrot.slane %v7807_v53, 1  ;;  %v4105_v36 = vrot.slane %v7810_v42, 1 }
 0x6e2   : > { %v4135_v27 = vld [vmem:[#allocation2 + $0x1d] sm:$0x1]  ;;  %v3912_v31 = vld [vmem:[#allocation2 + $0x1c] sm:$0x1]  ;;  %v4553_v48 = vld [vmem:[#allocation2 + $0x1f] sm:$0x1]  ;;  %v4604_v0 = vsel %vm3942_vm13, %v4603_v3, %v4602_v28  ;;  %v4120_v28 = vadd.f32 %v7810_v42, %v7633_v20  ;;  %v3897_v3 = vadd.f32 %v7807_v53, %v7649_v44 }
 0x6e3   : > { %v4143_v60 = vadd.f32 %v4135_v27, %v7750_v40  ;;  %v3920_v46 = vadd.f32 %v3912_v31, %v7760_v32  ;;  %v4561_v51 = vadd.f32 %v4553_v48, %v7764_v43  ;;  %v4344_v55 = vld [vmem:[#allocation2 + $0x1e] sm:$0x1]  ;;  %v3967_v31 = vsel %vm3942_vm13, %v3966_v41, %v3965_v11 }
 0x6e4   : > { %v4352_v12 = vadd.f32 %v4344_v55, %v7770_v2  ;;  %v4393_v48 = vsel %vm3939_vm12, %v4392_v16, %v4391_v35  ;;  %v4107_v11 = vrot.slane %v7810_v42, 3  ;;  %v3883_v55 = vrot.slane %v7807_v53, 2 }
 0x6e5   : > { %v4187_v63 = vrot.slane %v4143_v60, 1  ;;  %v3968_v14 = vrot.slane %v3920_v46, 1  ;;  %v4605_v13 = vrot.slane %v4561_v51, 1  ;;  %v4395_v61 = vsel %vm3942_vm13, %v4394_v4, %v4393_v48  ;;  %v7815_v60 = vld [vmem:[%s6470_s13 + $0x10] sm:$0xff] }
 0x6e6   : > { %v4396_v33 = vrot.slane %v4352_v12, 1  ;;  %v4106_v46 = vrot.slane %v7810_v42, 2  ;;  %v4108_v51 = vrot.slane %v7810_v42, 4  ;;  %v3898_v18 = vadd.f32 %v3882_v50, %v7620_v30 }
 0x6e7   : > { %v7789_v17 = vsel %vm3945_vm14, %v4187_v63, %v4186_v59  ;;  %v7792_v10 = vsel %vm3945_vm14, %v3968_v14, %v3967_v31  ;;  %v7799_v16 = vsel %vm3945_vm14, %v4605_v13, %v4604_v0  ;;  %v4314_v41 = vrot.slane %v7815_v60, 1  ;;  %v7827_v14 = vld [vmem:[%s6470_s13 + $0x18] sm:$0xff] }
 0x6e8   : > { %8184 = vst [vmem:[#allocation27_spill] sm:$0xff] %v7789_v17  ;;  %8185 = vst [vmem:[#allocation28_spill] sm:$0xff] %v7792_v10  ;;  %4189 = vrot.lane.b32.xlu0 %v7789_v17, %s6143_s19  ;;  %3970 = vrot.lane.b32.xlu1 %v7792_v10, %s6143_s19  ;;  %v7802_v27 = vsel %vm3945_vm14, %v4396_v33, %v4395_v61  ;;  %v4109_v6 = vrot.slane %v7810_v42, 5  ;;  %v4110_v12 = vrot.slane %v7810_v42, 6  ;;  %v3884_v31 = vrot.slane %v7807_v53, 3 }
 0x6e9   : > { %8186 = vst [vmem:[#allocation32_spill] sm:$0xff] %v7799_v16  ;;  %8187 = vst [vmem:[#allocation33_spill] sm:$0xff] %v7802_v27  ;;  %v4121_v63 = vadd.f32 %v4105_v36, %v7614_v23  ;;  %v4122_v35 = vadd.f32 %v4106_v46, %v7617_v26  ;;  %v4123_v59 = vadd.f32 %v4107_v11, %v7642_v15  ;;  %v4315_v33 = vrot.slane %v7815_v60, 2 }
 0x6ea   : > { %v7836_v48 = vadd.f32 %v4108_v51, %v7667_v54  ;;  %v3899_v13 = vadd.f32 %v3883_v55, %v7623_v38  ;;  %v3929_v4 = vrot.slane %v3898_v18, 7  ;;  %v4523_v0 = vrot.slane %v7827_v14, 1 }
 0x6eb   : > { %v4330_v61 = vadd.f32 %v4314_v41, %v7639_v57  ;;  %v7845_v50 = vadd.f32 %v4109_v6, %v7694_v39  ;;  %v7848_v36 = vadd.f32 %v4110_v12, %v7733_v58  ;;  %v4152_v46 = vrot.slane %v4121_v63, 7 }
 0x6ec   : > { %4607 = vrot.lane.b32.xlu0 %v7799_v16, %s6143_s19  ;;  %4398 = vrot.lane.b32.xlu1 %v7802_v27, %s6143_s19  ;;  %v3885_v11 = vrot.slane %v7807_v53, 4  ;;  %v4154_v51 = vrot.slane %v4122_v35, 6  ;;  %v4156_v55 = vrot.slane %v4123_v59, 5  ;;  %v3900_v19 = vadd.f32 %v3884_v31, %v7670_v5 }
 0x6ed   : > { %v4316_v16 = vrot.slane %v7815_v60, 3  ;;  %v3931_v18 = vrot.slane %v3899_v13, 6  ;;  %v4524_v27 = vrot.slane %v7827_v14, 2  ;;  %v4329_v41 = vadd.f32 %v7815_v60, %v7662_v37 }
 0x6ee   : > { %v4331_v6 = vadd.f32 %v4315_v33, %v7630_v45  ;;  %v3886_v12 = vrot.slane %v7807_v53, 5  ;;  %v3930_v63 = vsel %vm680_vm8, %v3929_v4, %v3897_v3  ;;  %v4539_v17 = vadd.f32 %v4523_v0, %v7636_v9 }
 0x6ef   : > { %v4361_v35 = vrot.slane %v4330_v61, 7  ;;  %v4153_v59 = vsel %vm680_vm8, %v4152_v46, %v4120_v28  ;;  %v4158_v31 = vrot.slane %v7836_v48, 4  ;;  %v3901_v13 = vadd.f32 %v3885_v11, %v7673_v24 }
 0x6f0   : > { %v4317_v10 = vrot.slane %v7815_v60, 4  ;;  %v3933_v58 = vrot.slane %v3900_v19, 5  ;;  %v4525_v39 = vrot.slane %v7827_v14, 3  ;;  %v4538_v33 = vadd.f32 %v7827_v14, %v7656_v49 }
 0x6f1   : > { %v4332_v54 = vadd.f32 %v4316_v16, %v7690_v47  ;;  %v3887_v3 = vrot.slane %v7807_v53, 6  ;;  %v3932_v4 = vsel %vm681_vm9, %v3931_v18, %v3930_v63  ;;  %v4540_v28 = vadd.f32 %v4524_v27, %v7626_v8 }
 0x6f2   : > { %v4363_v0 = vrot.slane %v4331_v6, 6  ;;  %v3902_v48 = vadd.f32 %v3886_v12, %v7708_v29  ;;  %v4570_v61 = vrot.slane %v4539_v17, 7  ;;  %v4318_v46 = vrot.slane %v7815_v60, 5 }
 0x6f3   : > { %v4362_v19 = vsel %vm680_vm8, %v4361_v35, %v4329_v41  ;;  %v4155_v11 = vsel %vm681_vm9, %v4154_v51, %v4153_v59  ;;  %v3935_v37 = vrot.slane %v3901_v13, 4  ;;  %v4526_v49 = vrot.slane %v7827_v14, 4 }
 0x6f4   : > { %v4333_v16 = vadd.f32 %v4317_v10, %v7700_v21  ;;  %v3888_v47 = vrot.slane %v7807_v53, 7  ;;  %v3934_v18 = vsel %vm683_vm10, %v3933_v58, %v3932_v4  ;;  %v4541_v27 = vadd.f32 %v4525_v39, %v7684_v34 }
 0x6f5   : > { %v4365_v6 = vrot.slane %v4332_v54, 5  ;;  %v3903_v17 = vadd.f32 %v3887_v3, %v7737_v56  ;;  %v4572_v12 = vrot.slane %v4540_v28, 6  ;;  %v4319_v63 = vrot.slane %v7815_v60, 6 }
 0x6f6   : > { %v4364_v41 = vsel %vm681_vm9, %v4363_v0, %v4362_v19  ;;  %v3938_v51 = vrot.slane %v3902_v48, 3  ;;  %v4527_v35 = vrot.slane %v7827_v14, 5  ;;  %v4571_v59 = vsel %vm680_vm8, %v4570_v61, %v4538_v33 }
 0x6f7   : > { %v4334_v10 = vadd.f32 %v4318_v46, %v7720_v62  ;;  %v4157_v53 = vsel %vm683_vm10, %v4156_v55, %v4155_v11  ;;  %v3937_v58 = vsel %vm3936_vm11, %v3935_v37, %v3934_v18  ;;  %v4542_v54 = vadd.f32 %v4526_v49, %v7687_v25 }
 0x6f8   : > { %v4367_v39 = vrot.slane %v4333_v16, 4  ;;  %v3904_v13 = vadd.f32 %v3888_v47, %v7760_v32  ;;  %v4574_v3 = vrot.slane %v4541_v27, 5  ;;  %v4320_v4 = vrot.slane %v7815_v60, 7 }
 0x6f9   : > { %v4366_v28 = vsel %vm683_vm10, %v4365_v6, %v4364_v41  ;;  %v3941_v0 = vrot.slane %v3903_v17, 2  ;;  %v4528_v48 = vrot.slane %v7827_v14, 6  ;;  %v4573_v33 = vsel %vm681_vm9, %v4572_v12, %v4571_v59 }
 0x6fa   : > { %v4335_v61 = vadd.f32 %v4319_v63, %v7756_v52  ;;  %v4160_v55 = vrot.slane %v7845_v50, 3  ;;  %v3940_v37 = vsel %vm3939_vm12, %v3938_v51, %v3937_v58  ;;  %v4543_v49 = vadd.f32 %v4527_v35, %v7717_v1 }
 0x6fb   : > { %v4369_v46 = vrot.slane %v4334_v10, 3  ;;  %v8188_v47 = vrot.slane %v7810_v42, 7  ;;  %v4159_v19 = vsel %vm3936_vm11, %v4158_v31, %v4157_v53  ;;  %v4576_v11 = vrot.slane %v4542_v54, 4 }
 0x6fc   : > { %v4368_v16 = vsel %vm3936_vm11, %v4367_v39, %v4366_v28  ;;  %v3944_v18 = vrot.slane %v3904_v13, 1  ;;  %v4529_v27 = vrot.slane %v7827_v14, 7  ;;  %v4575_v6 = vsel %vm683_vm10, %v4574_v3, %v4573_v33 }
 0x6fd   : > { %v4127_v60 = vadd.f32 %v8188_v47, %v7750_v40  ;;  %v4336_v50 = vadd.f32 %v4320_v4, %v7770_v2  ;;  %v4162_v17 = vrot.slane %v7848_v36, 2  ;;  %v3943_v12 = vsel %vm3942_vm13, %v3941_v0, %v3940_v37 }
 0x6fe   : > { %v4544_v63 = vadd.f32 %v4528_v48, %v7743_v7  ;;  %v4371_v42 = vrot.slane %v4335_v61, 2  ;;  %v4161_v41 = vsel %vm3939_vm12, %v4160_v55, %v4159_v19  ;;  %v4578_v31 = vrot.slane %v4543_v49, 3 }
 0x6ff   : > { %v4370_v51 = vsel %vm3939_vm12, %v4369_v46, %v4368_v16  ;;  %v4577_v35 = vsel %vm3936_vm11, %v4576_v11, %v4575_v6  ;;  %v4164_v59 = vrot.slane %v4127_v60, 1  ;;  %v7913_v14 = vsel %vm3945_vm14, %v3944_v18, %v3943_v12  ;;  %v4970_v16 = vld [vmem:[#allocation12] ss:$0 sm:$0xff] }
 0x700   : > { %v4545_v10 = vadd.f32 %v4529_v27, %v7764_v43  ;;  %v4373_v53 = vrot.slane %v4336_v50, 1  ;;  %v4163_v36 = vsel %vm3942_vm13, %v4162_v17, %v4161_v41  ;;  %v4580_v58 = vrot.slane %v4544_v63, 2 }
 0x701   : > { %v4372_v54 = vsel %vm3942_vm13, %v4371_v42, %v4370_v51  ;;  %v4579_v3 = vsel %vm3939_vm12, %v4578_v31, %v4577_v35  ;;  %v7922_v28 = vsel %vm3945_vm14, %v4164_v59, %v4163_v36  ;;  %v8190_v55 = vmov 0.0  }
 0x702   : > { %v4582_v0 = vrot.slane %v4545_v10, 1  ;;  %v7926_v48 = vsel %vm3945_vm14, %v4373_v53, %v4372_v54  ;;  %v4581_v61 = vsel %vm3942_vm13, %v4580_v58, %v4579_v3  ;;  %v8191_v49 = vmov 0.0|0.0  }
 0x703   : > { %v4077_v53 = vrot.slane %v7620_v30, 7  ;;  %v4285_v58 = vrot.slane %v7614_v23, 7  ;;  %v4079_v54 = vrot.slane %v7623_v38, 6  ;;  %v4494_v3 = vrot.slane %v7639_v57, 7 }
 0x704   : > { %v7940_v60 = vsel %vm3945_vm14, %v4582_v0, %v4581_v61  ;;  %v4081_v0 = vrot.slane %v7670_v5, 5  ;;  %v4703_v23 = vrot.slane %v7636_v9, 7  ;;  %v4496_v38 = vrot.slane %v7630_v45, 6  ;;  %v8194_v45 = vld [vmem:[#allocation30_spill] sm:$0xff] }
 0x705   : > { %v4286_v30 = vsel %vm680_vm8, %v4285_v58, %v7633_v20  ;;  %v4083_v57 = vrot.slane %v7673_v24, 4  ;;  %v4705_v9 = vrot.slane %v7626_v8, 6  ;;  %v4500_v8 = vrot.slane %v7700_v21, 4  ;;  %v8197_v21 = vld [vmem:[#allocation25_spill] sm:$0xff] }
 0x75a   : > { %v4190_v39 = vpop.permute.xlu0 %4189  ;;  %v3971_v13 = vpop.permute.xlu1 %3970 }
 0x75b   : > { %v3973_v4 = vsel %vm446_vm1, %v7913_v14, %v3971_v13  ;;  %v4192_v46 = vsel %vm446_vm1, %v7922_v28, %v4190_v39  ;;  %v4078_v39 = vsel %vm680_vm8, %v4077_v53, %v7649_v44  ;;  %v4289_v44 = vrot.slane %v7642_v15, 5 }
 0x75c   : > { %5343 = vmatmul.mubr.msk.f32.vlgmr.msra.gmra.mrb[32].mxu1 %vm3980_vm15, %v3973_v4  ;;  %v4287_v4 = vrot.slane %v7617_v26, 6  ;;  %v4080_v61 = vsel %vm681_vm9, %v4079_v54, %v4078_v39  ;;  %v4085_v15 = vrot.slane %v7708_v29, 3  ;;  %v4087_v29 = vrot.slane %v7737_v56, 2 }
 0x75d   : > { %5373 = vmatpush3.bf16.msk.msra.mxu1 %vm7574_vm7, %v7571_v22  ;;  %5349 = vmatprep.mubr.msk.f32.mxu1 %vm6138_vm3, %v8190_v55  ;;  %v4082_v20 = vsel %vm683_vm10, %v4081_v0, %v4080_v61  ;;  %v4295_v53 = vrot.slane %v8197_v21, 2 }
 0x75e   : > { %v4399_v37 = vpop.permute.xlu1 %4398  ;;  %5378 = vmatprep.subr.bf16.mxu1 %v8191_v49  ;;  %v4608_v19 = vpop.permute.xlu0 %4607  ;;  %v4288_v49 = vsel %vm681_vm9, %v4287_v4, %v4286_v30 }
 0x75f   : > { %v4401_v47 = vsel %vm446_vm1, %v7926_v48, %v4399_v37  ;;  %v4610_v11 = vsel %vm446_vm1, %v7940_v60, %v4608_v19  ;;  %v8192_v37 = vld [vmem:[#allocation31_spill] sm:$0xff] }
 0x760   : > { %5350 = vmatmul.mubr.msk.f32.vlgmr.msra.gmra.mrb[34].mxu1 %vm3980_vm15, %v4192_v46  ;;  %5357 = vmatmul.mubr.msk.f32.vlgmr.msra.gmra.mrb[36].mxu0 %vm3980_vm15, %v4401_v47  ;;  %v4495_v26 = vsel %vm680_vm8, %v4494_v3, %v8192_v37  ;;  %v8193_v47 = vld [vmem:[#allocation29_spill] sm:$0xff]  ;;  %v4711_v3 = vrot.slane %v7717_v1, 3  ;;  %v4713_v1 = vrot.slane %v7743_v7, 2  ;;  %v4715_v7 = vrot.slane %v7764_v43, 1 }
 0x761   : > { %5381 = vmatpush3.bf16.msk.msra.mxu1 %vm7574_vm7, %v7571_v22  ;;  %5363 = vmatprep.mubr.msk.f32.mxu1 %vm6138_vm3, %v8190_v55  ;;  %v4291_v19 = vrot.slane %v8193_v47, 4 }
 0x764   : > { %5364 = vmatmul.mubr.msk.f32.vlgmr.msra.gmra.mrb[36].mxu1 %vm3980_vm15, %v4610_v11  ;;  %v4498_v11 = vrot.slane %v8194_v45, 5 }
 0x82f   : > { %v4054_v18 = vpop.f32.mrb[32].mxu1 }
 0x830   : > { %v4055_v27 = vadd.f32 %v4970_v16, %v4054_v18  ;;  %v5344_v6 = vpop.f32.mrb[33].mxu1  ;;  %v8195_v18 = vld [vmem:[#allocation26_spill] sm:$0xff] }
 0x831   : > { %v4704_v24 = vsel %vm680_vm8, %v4703_v23, %v8195_v18  ;;  %v4297_v23 = vrot.slane %v7750_v40, 1 }
 0x832   : > { %v4973_v50 = vmul.f32 -1.442695, %v4055_v27  ;;  %v4497_v27 = vsel %vm681_vm9, %v4496_v38, %v4495_v26 }
 0x833   : > { %v4262_v17 = vpop.f32.mrb[34].mxu1  ;;  %v4471_v12 = vpop.f32.mrb[36].mxu0 }
 0x834   : > { %5820 = vpow2.f32 %v4973_v50  ;;  %v4263_v63 = vadd.f32 %v4970_v16, %v4262_v17  ;;  %v4472_v42 = vadd.f32 %v4970_v16, %v4471_v12  ;;  %v5351_v41 = vpop.f32.mrb[35].mxu1  ;;  %v5358_v22 = vpop.f32.mrb[37].mxu0  ;;  %v4290_v50 = vsel %vm683_vm10, %v4289_v44, %v4288_v49 }
 0x835   : > { %v4084_v17 = vsel %vm3936_vm11, %v4083_v57, %v4082_v20  ;;  %v4707_v12 = vrot.slane %v7684_v34, 5  ;;  %v4706_v22 = vsel %vm681_vm9, %v4705_v9, %v4704_v24  ;;  %v4502_v34 = vrot.slane %v7720_v62, 3  ;;  %v8199_v20 = vld [vmem:[#allocation27_spill] sm:$0xff] }
 0x836   : > { %v4977_v31 = vmul.f32 -1.442695, %v4263_v63  ;;  %v4982_v51 = vmul.f32 -1.442695, %v4472_v42  ;;  %v8196_v42 = vld [vmem:[#allocation24_spill] sm:$0xff] }
 0x837   : > { %v4680_v35 = vpop.f32.mrb[36].mxu1  ;;  %v4293_v41 = vrot.slane %v8196_v42, 3  ;;  %v4708_v56 = vsel %vm683_vm10, %v4707_v12, %v4706_v22 }
 0x838   : > { %5822 = vpow2.f32 %v4977_v31  ;;  %v4681_v59 = vadd.f32 %v4970_v16, %v4680_v35  ;;  %v5365_v10 = vpop.f32.mrb[37].mxu1  ;;  %v4499_v31 = vsel %vm683_vm10, %v4498_v11, %v4497_v27  ;;  %v4086_v35 = vsel %vm3939_vm12, %v4085_v15, %v4084_v17  ;;  %v8201_v27 = vld [vmem:[#allocation32_spill] sm:$0xff] }
 0x839   : > { %5824 = vpow2.f32 %v4982_v51  ;;  %v4292_v51 = vsel %vm3936_vm11, %v4291_v19, %v4290_v50  ;;  %v4501_v58 = vsel %vm3936_vm11, %v4500_v8, %v4499_v31  ;;  %v4088_v39 = vsel %vm3942_vm13, %v4087_v29, %v4086_v35  ;;  %v8200_v19 = vld [vmem:[#allocation33_spill] sm:$0xff] }
 0x83a   : > { %v4987_v36 = vmul.f32 -1.442695, %v4681_v59  ;;  %v4709_v59 = vrot.slane %v7687_v25, 4  ;;  %v4294_v54 = vsel %vm3939_vm12, %v4293_v41, %v4292_v51  ;;  %v4504_v25 = vrot.slane %v7756_v52, 2 }
 0x83b   : > { %v4503_v4 = vsel %vm3939_vm12, %v4502_v34, %v4501_v58  ;;  %v4296_v61 = vsel %vm3942_vm13, %v4295_v53, %v4294_v54  ;;  %v4506_v52 = vrot.slane %v7770_v2, 1 }
 0x83c   : > { %5826 = vpow2.f32 %v4987_v36  ;;  %v4089_v36 = vrot.slane %v7760_v32, 1  ;;  %v4710_v62 = vsel %vm3936_vm11, %v4709_v59, %v4708_v56  ;;  %v8198_v32 = vld [vmem:[#allocation28_spill] sm:$0xff]  ;;  %v4298_v47 = vsel %vm3945_vm14, %v4297_v23, %v4296_v61 }
 0x83d   : > { %v4712_v37 = vsel %vm3939_vm12, %v4711_v3, %v4710_v62 }
 0x83e   : > { %v5821_v13 = vpop.eup %5820  ;;  %v4090_v38 = vsel %vm3945_vm14, %v4089_v36, %v4088_v39  ;;  %v4714_v45 = vsel %vm3942_vm13, %v4713_v1, %v4712_v37 }
 0x83f   : > { %v4061_v33 = vadd.f32 1.0, %v5821_v13 }
 0x841   : > { %5828 = vrcp.f32 %v4061_v33 }
 0x842   : > { %v5823_v55 = vpop.eup %5822 }
 0x843   : > { %v5825_v5 = vpop.eup %5824  ;;  %v4269_v46 = vadd.f32 1.0, %v5823_v55 }
 0x844   : > { %v4478_v16 = vadd.f32 1.0, %v5825_v5 }
 0x845   : > { %5830 = vrcp.f32 %v4269_v46 }
 0x846   : > { %v5827_v6 = vpop.eup %5826  ;;  %5832 = vrcp.f32 %v4478_v16 }
 0x847   : > { %v4687_v63 = vadd.f32 1.0, %v5827_v6 }
 0x849   : > { %5834 = vrcp.f32 %v4687_v63 }
 0x84b   : > { %v5829_v10 = vpop.eup %5828 }
 0x84c   : > { %v4065_v13 = vsub.f32 1.0, %v5829_v10  ;;  %v4064_v0 = vmul.f32 %v5829_v10, %v7913_v14  ;;  %v4505_v14 = vsel %vm3942_vm13, %v4504_v25, %v4503_v4 }
 0x84d   : > { %v4507_v11 = vsel %vm3945_vm14, %v4506_v52, %v4505_v14 }
 0x84e   : > { %v4067_v33 = vmul.f32 %v4065_v13, %v8198_v32 }
 0x84f   : > { %v5831_v30 = vpop.eup %5830 }
 0x850   : > { %v5833_v55 = vpop.eup %5832  ;;  %v4068_v44 = vadd.f32 %v4067_v33, %v4064_v0  ;;  %v4273_v57 = vsub.f32 1.0, %v5831_v30  ;;  %v4272_v49 = vmul.f32 %v5831_v30, %v7922_v28 }
 0x851   : > { %v4482_v26 = vsub.f32 1.0, %v5833_v55  ;;  %v4481_v2 = vmul.f32 %v5833_v55, %v7926_v48  ;;  %v4716_v48 = vsel %vm3945_vm14, %v4715_v7, %v4714_v45 }
 0x852   : > { %v4092_v5 = vadd.f32 %v4090_v38, %v4068_v44  ;;  %v4275_v40 = vmul.f32 %v4273_v57, %v8199_v20 }
 0x853   : > { %v5835_v46 = vpop.eup %5834  ;;  %v4484_v9 = vmul.f32 %v4482_v26, %v8200_v19 }
 0x854   : > { %v4276_v16 = vadd.f32 %v4275_v40, %v4272_v49  ;;  %v4691_v15 = vsub.f32 1.0, %v5835_v46  ;;  %4093 = vst.msk [vmem:[%s384_s21] sm:$0xff] %vm446_vm1, %v4092_v5  ;;  %v4690_v24 = vmul.f32 %v5835_v46, %v7940_v60 }
 0x855   : > { %v4485_v28 = vadd.f32 %v4484_v9, %v4481_v2 }
 0x856   : > { %v4300_v18 = vadd.f32 %v4298_v47, %v4276_v16  ;;  %v4693_v43 = vmul.f32 %v4691_v15, %v8201_v27 }
 0x857   : > { %v4509_v6 = vadd.f32 %v4507_v11, %v4485_v28 }
 0x858   : > { %v4694_v50 = vadd.f32 %v4693_v43, %v4690_v24  ;;  %4978 = vst.msk [vmem:[%s384_s21 + $0x8] sm:$0xff] %vm446_vm1, %v4300_v18 }
 0x859   : > { %4983 = vst.msk [vmem:[%s384_s21 + $0x10] sm:$0xff] %vm446_vm1, %v4509_v6 }
 0x85a   : > { %v4718_v60 = vadd.f32 %v4716_v48, %v4694_v50 }
 0x85c   : > { %4988 = vst.msk [vmem:[%s384_s21 + $0x18] sm:$0xff] %vm446_vm1, %v4718_v60 }
 0x85d   : > { %6029 = shalt.err (!%p6026_p6)
}
 0x85e   : > { %s6030_s17 = scalar_lea.hbm %s8028_s16, 512  ;;  %s6034_s11 = scalar_lea.hbm %s8086_s6, 1024 }
 0x85f   : > { %p6031_p11 = scmp.ne.s32.totalorder %s8028_s16, %s6030_s17  ;;  %p6035_p2 = scmp.lt.u32.totalorder %s8028_s16, %s8086_s6 }
 0x860   : > { %p6036_p13 = scmp.lt.u32.totalorder %s6034_s11, %s6030_s17  ;;  %p6038_p1 = scmp.lt.u32.totalorder %s6030_s17, %s8028_s16 }
 0x861   : > { %p6032_p9 = pnand %p6031_p11, %p6356_p5 }
 0x862   : > { %p6037_p4 = por %p6036_p13, %p6035_p2 }
 0x863   : > { %p6033_p0 = pneg %p6032_p9 }
 0x864   : > { %p6039_p8 = por %p6038_p1, %p6037_p4 }
 0x866   : > { %p6040_p10 = pnand %p6039_p8, %p6033_p0 }
 0x868   : > { %6043 = shalt.err (!%p6040_p10)
}
 0x869   : > { %s6145_s29 = smov 128   ;;  %s6146_s15 = smov 8  }
 0x86a   : > { %5499 = dma.vmem_to_hbm [thread:$0]  (%p6356_p5), %s8030_s3, 512, %s8028_s16, %s4722_s24, %s6145_s29, %s6145_s29, %s6146_s15  }
 0x86b PF: > { %s8202_s30 = sld [smem:[#allocation21_spill]]  ;;  %s8203_s19 = sld [smem:[#allocation22_spill]] }
 0x86c   : > { %p8205_p7 = scmp.ge.s32.totalorder %s6114_s26, 2 }
 0x871   : > { %s4751_s21 = sand.u32 1, %s8202_s30   ;;  %p8204_p3 = scmp.ne.s32.totalorder %s8203_s19, 0 }
 0x872   : > { %s4752_s28 = scalar_lea.sflag [#allocation5], %s4751_s21 }
 0x873   : > { %p5522_p12 = pnand %p8205_p7, %p8204_p3 }
 0x875   : > { %6089 = dma.done.wait (!%p5522_p12), %s4752_s28, 512  }
 0x876   : > { %6091 = vsyncadd (!%p5522_p12), %s4752_s28, 4294966784  ;;  %s27_s26 = sadd.s32 1, %s6114_s26   ;;  %s8206_s21 = smov %s6098_s22 }
 0x877   : > { %p24_p6 = scmp.ge.s32.totalorder %s27_s26, 4   ;;  %s8207_s22 = smov %s6102_s23 }
 0x878   : > { %s8208_s23 = smov %s6367_s8  ;;  %s8209_s24 = smov %s6110_s25 }
 0x879   : > { %s8210_s25 = smov %s8212_s20  ;;  %26 = sbr.rel (!%p24_p6) target bundleno = 16 (0x10), region = 125 }
 0x880   :  { %4757 = vsyncpa [#allocation4], 1 }
 0x881   :  { %4759 = vsyncpa [#allocation4 + $0x1], 1 }
 0x882   :  { %4760 = vsyncpa [#allocation7], 1 }
 0x883   :  { %4762 = vsyncpa [#allocation7 + $0x1], 1 }
 0x884   :  { %4763 = vsyncpa [#allocation10], 1 }
 0x885   :  { %4764 = vsyncpa [#allocation13], 1 }
 0x886   :  { %4765 = vsyncpa [#allocation5], 1 }
 0x887   :  { %4767 = vsyncpa [#allocation5 + $0x1], 1 }

</bundles_post_ra>
